<compile_context>
chip_gen: v5e
topology: v5e:2x2
jax: 0.10.0
libtpu: 0.0.40
codegen_flags: <defaults>
</compile_context>

<pallas_src>
import functools

import jax
import jax.numpy as jnp
import numpy as np
from jax.experimental import pallas as pl
from jax.experimental.pallas import tpu as pltpu


_EPS2 = 1e-16   # clamp(|X|, 1e-8)  ==  sqrt(max(|X|^2, 1e-16))   (sqrt is monotone)


def _round_up(x, m):
    return ((x + m - 1) // m) * m


# ---------------------------------------------------------------------------
# Fused kernel: windowed rDFT (single MXU matmul) + clamped magnitudes + the
# three global loss reductions, per block of stacked [pred ; target] frames.
#   fr_ref : (2*TM, n_fft)  stacked frames  (rows 0..TM-1 pred, TM..2TM-1 target)
#   cb_ref : (n_fft, n_fft) merged window-folded DFT basis (see header)
#   outputs: (1, 1, 1)      per-block partial sums
# ---------------------------------------------------------------------------
def _stft_loss_kernel(fr_ref, cb_ref, d_ref, y_ref, l_ref, *, tm, n_rows, n_blocks):
    i = pl.program_id(0)
    hf = cb_ref.shape[1] // 2            # n_fft // 2  (= 512)

    # Single MXU pass per grid step: bf16 x bf16 -> f32 accumulate.
    z = jnp.dot(fr_ref[...], cb_ref[...], preferred_element_type=jnp.float32)

    zx = z[:tm, :]                       # pred rows
    zy = z[tm:, :]                       # target rows
    ax, bx = zx[:, :hf], zx[:, hf:]      # ax: re(k=0..hf-1) ; bx: [re(hf), im(1..hf-1)]
    ay, by = zy[:, :hf], zy[:, hf:]

    # Lane 0 of the second half holds the Nyquist REAL part, not an imaginary part.
    lane = jax.lax.broadcasted_iota(jnp.int32, (tm, hf), 1)
    is_imag = lane > 0

    x2 = jnp.maximum(ax * ax + jnp.where(is_imag, bx * bx, 0.0), _EPS2)   # bins 0..hf-1
    y2 = jnp.maximum(ay * ay + jnp.where(is_imag, by * by, 0.0), _EPS2)
    xn = bx[:, :1]
    yn = by[:, :1]
    x2n = jnp.maximum(xn * xn, _EPS2)                                     # bin hf (Nyquist)
    y2n = jnp.maximum(yn * yn, _EPS2)

    d = jnp.sqrt(y2) - jnp.sqrt(x2)
    dn = jnp.sqrt(y2n) - jnp.sqrt(x2n)
    ld = 0.5 * (jnp.log(y2) - jnp.log(x2))          # log|Y| - log|X|
    ldn = 0.5 * (jnp.log(y2n) - jnp.log(x2n))

    # Zero-padded frame rows give x2 == y2 == EPS2 exactly -> they contribute
    # nothing to the diff / log sums; only the ||y||^2 sum needs masking (below).
    d_ref[...] = (jnp.sum(d * d, keepdims=True)
                  + jnp.sum(dn * dn, keepdims=True)).reshape(1, 1, 1)
    l_ref[...] = (jnp.sum(jnp.abs(ld), keepdims=True)
                  + jnp.sum(jnp.abs(ldn), keepdims=True)).reshape(1, 1, 1)

    n_pad = n_blocks * tm - n_rows       # static
    if n_pad == 0:
        y_ref[...] = (jnp.sum(y2, keepdims=True)
                      + jnp.sum(y2n, keepdims=True)).reshape(1, 1, 1)
    else:
        # Only the tail block carries padded rows -> mask only there (pl.when-gated).
        @pl.when(i != n_blocks - 1)
        def _():
            y_ref[...] = (jnp.sum(y2, keepdims=True)
                          + jnp.sum(y2n, keepdims=True)).reshape(1, 1, 1)

        @pl.when(i == n_blocks - 1)
        def _():
            n_valid = n_rows - (n_blocks - 1) * tm   # static
            rows = jax.lax.broadcasted_iota(jnp.int32, (tm, hf), 0)
            rows1 = jax.lax.broadcasted_iota(jnp.int32, (tm, 1), 0)
            y_ref[...] = (
                jnp.sum(jnp.where(rows < n_valid, y2, 0.0), keepdims=True)
                + jnp.sum(jnp.where(rows1 < n_valid, y2n, 0.0), keepdims=True)
            ).reshape(1, 1, 1)


# ---------------------------------------------------------------------------
# Merged window-folded real-DFT basis (built in float64, constant-folded).
# ---------------------------------------------------------------------------
def _dft_basis(n_fft, win_len, dtype):
    hf = n_fft // 2
    nwin = np.arange(win_len, dtype=np.float64)
    win = 0.5 * (1.0 - np.cos(2.0 * np.pi * nwin / win_len))   # periodic hann
    wpad = np.zeros(n_fft, dtype=np.float64)
    off = (n_fft - win_len) // 2                               # torch centers the window
    wpad[off:off + win_len] = win

    n = np.arange(n_fft, dtype=np.int64)
    k = np.arange(hf, dtype=np.int64)
    ang = 2.0 * np.pi * ((n[:, None] * k[None, :]) % n_fft) / n_fft
    cos_b = wpad[:, None] * np.cos(ang)                        # re(k=0..hf-1)
    sin_b = -wpad[:, None] * np.sin(ang)                       # im(k=0..hf-1); col 0 dead
    sin_b[:, 0] = wpad * np.where(n % 2 == 0, 1.0, -1.0)       # Nyquist re in the dead slot
    return jnp.asarray(np.concatenate([cos_b, sin_b], axis=1), dtype=dtype)


# ---------------------------------------------------------------------------
# Forward pass equivalent to STFTLoss.forward (n_fft=1024, hop=120, win=600,
# periodic hann; torch.stft center=True / reflect / onesided / unnormalized).
# ---------------------------------------------------------------------------
def stft_loss_forward(x, y, *, n_fft=1024, hop_len=120, win_len=600,
                      compute_dtype=jnp.bfloat16):
    B, L = x.shape
    F = n_fft // 2 + 1
    pad = n_fft // 2
    T_f = 1 + L // hop_len               # torch.stft(center=True) frame count

    x = x.astype(jnp.float32)
    y = y.astype(jnp.float32)

    # ---- framing (torch.stft center=True, reflect pad) -- wrapper glue -----
    # TODO(synk): frame in-kernel from a VMEM-resident padded-signal window for long audio.
    xp = jnp.pad(x, ((0, 0), (pad, pad)), mode="reflect").astype(compute_dtype)
    yp = jnp.pad(y, ((0, 0), (pad, pad)), mode="reflect").astype(compute_dtype)
    idx = (jnp.arange(T_f) * hop_len)[:, None] + jnp.arange(n_fft)[None, :]
    fx = jnp.take(xp, idx, axis=1).reshape(B * T_f, n_fft)
    fy = jnp.take(yp, idx, axis=1).reshape(B * T_f, n_fft)

    cb = _dft_basis(n_fft, win_len, compute_dtype)             # (n_fft, n_fft)

    # ---- row blocking: fill the MXU M dimension, keep >= 2 parallel steps ---
    NR = B * T_f
    if NR >= 512:
        TM = 256                          # stacked M = 512 rows per matmul
    else:
        TM = max(8, _round_up((NR + 1) // 2, 8))   # aim for 2 blocks (v7x megacore)
    NR_pad = _round_up(NR, TM)
    nblk = NR_pad // TM
    if NR_pad != NR:
        zp = ((0, NR_pad - NR), (0, 0))
        fx = jnp.pad(fx, zp)
        fy = jnp.pad(fy, zp)
    # Per-block [pred ; target] stacking -> one (2*TM, n_fft) LHS per grid step.
    frames = jnp.concatenate(
        [fx.reshape(nblk, TM, n_fft), fy.reshape(nblk, TM, n_fft)], axis=1
    ).reshape(nblk * 2 * TM, n_fft)

    kernel = functools.partial(_stft_loss_kernel, tm=TM, n_rows=NR, n_blocks=nblk)
    part_shape = jax.ShapeDtypeStruct((nblk, 1, 1), jnp.float32)
    part_spec = pl.BlockSpec((1, 1, 1), lambda i: (i, 0, 0))

    d_p, y_p, l_p = pl.pallas_call(
        kernel,
        out_shape=(part_shape, part_shape, part_shape),
        grid_spec=pltpu.PrefetchScalarGridSpec(
            num_scalar_prefetch=0,
            grid=(nblk,),
            in_specs=[
                pl.BlockSpec((2 * TM, n_fft), lambda i: (i, 0)),
                # constant index_map -> Pallas skips re-DMA of the basis after step 0
                pl.BlockSpec((n_fft, n_fft), lambda i: (0, 0)),
            ],
            out_specs=[part_spec, part_spec, part_spec],
        ),
        compiler_params=pltpu.CompilerParams(
            dimension_semantics=("parallel",),
            vmem_limit_bytes=40 * 1024 * 1024,
        ),
    )(frames, cb)

    sse_diff = jnp.sum(d_p)
    sse_y = jnp.sum(y_p)
    sae_log = jnp.sum(l_p)

    sc_loss = jnp.sqrt(sse_diff) / jnp.sqrt(sse_y)              # ||y-x||_F / ||y||_F
    mag_loss = sae_log / jnp.float32(NR * F)                    # mean L1 of log-mags
    return sc_loss + mag_loss


# ---------------------------------------------------------------------------
# Pure-JAX f32 reference (mirrors torch.stft + STFTLoss) for a sanity check.
# ---------------------------------------------------------------------------
def _reference_loss(x, y, n_fft=1024, hop_len=120, win_len=600):
    pad = n_fft // 2
    nwin = jnp.arange(win_len, dtype=jnp.float32)
    win = 0.5 * (1.0 - jnp.cos(2.0 * jnp.pi * nwin / win_len))
    off = (n_fft - win_len) // 2
    w = jnp.zeros((n_fft,), jnp.float32).at[off:off + win_len].set(win)

    def mags(s):
        sp = jnp.pad(s.astype(jnp.float32), ((0, 0), (pad, pad)), mode="reflect")
        T_f = 1 + s.shape[1] // hop_len
        idx = (jnp.arange(T_f) * hop_len)[:, None] + jnp.arange(n_fft)[None, :]
        fr = jnp.take(sp, idx, axis=1) * w
        spec = jnp.fft.rfft(fr, axis=-1)
        return jnp.maximum(jnp.abs(spec), 1e-8)

    xm, ym = mags(x), mags(y)
    sc = jnp.linalg.norm(ym - xm) / jnp.linalg.norm(ym)
    mag = jnp.mean(jnp.abs(jnp.log(ym) - jnp.log(xm)))
    return sc + mag


if __name__ == "__main__":
    # Module defaults (n_fft=1024, hop=120, win=600); small batch / short audio.
    B, L = 2, 4800
    key = jax.random.PRNGKey(0)
    k1, k2 = jax.random.split(key)
    x = jax.random.normal(k1, (B, L), dtype=jnp.float32)
    y = jax.random.normal(k2, (B, L), dtype=jnp.float32)

    loss_fn = jax.jit(stft_loss_forward)
    loss = jax.block_until_ready(loss_fn(x, y))
    assert bool(jnp.isfinite(loss)), "loss is not finite"

    ref = jax.block_until_ready(_reference_loss(x, y))
    rel = abs(float(loss) - float(ref)) / max(abs(float(ref)), 1e-12)
    assert rel < 5e-2, f"kernel loss {float(loss)} vs reference {float(ref)} (rel err {rel})"

    print("KERNEL_OK")
</pallas_src>

<mosaic_0001>
module attributes {stable_mosaic.version = 11 : i64} {
  func.func @_stft_loss_kernel(%arg0: i32, %arg1: memref<96x1024xbf16, #tpu.memory_space<vmem>>, %arg2: memref<1024x1024xbf16, #tpu.memory_space<vmem>>, %arg3: memref<1x1x1xf32, #tpu.memory_space<vmem>>, %arg4: memref<1x1x1xf32, #tpu.memory_space<vmem>>, %arg5: memref<1x1x1xf32, #tpu.memory_space<vmem>>) attributes {dimension_semantics = [#tpu.dimension_semantics<parallel>], iteration_bounds = array<i64: 2>, scalar_prefetch = 0 : i64, scratch_operands = 0 : i64, tpu.core_type = #tpu.core_type<tc>, window_params = [{transform_indices = @transform_0, window_bounds = array<i64: 96, 1024>}, {pipeline_mode = #tpu.pipeline_mode<synchronous>, transform_indices = @transform_1, window_bounds = array<i64: 1024, 1024>}, {transform_indices = @transform_2, window_bounds = array<i64: 1, 1, 1>}, {transform_indices = @transform_3, window_bounds = array<i64: 1, 1, 1>}, {transform_indices = @transform_4, window_bounds = array<i64: 1, 1, 1>}]} {
    %c0 = arith.constant 0 : index
    %c0_0 = arith.constant 0 : index
    %0 = vector.load %arg1[%c0, %c0_0] : memref<96x1024xbf16, #tpu.memory_space<vmem>>, vector<96x1024xbf16>
    %c0_1 = arith.constant 0 : index
    %c0_2 = arith.constant 0 : index
    %1 = vector.load %arg2[%c0_1, %c0_2] : memref<1024x1024xbf16, #tpu.memory_space<vmem>>, vector<1024x1024xbf16>
    %cst = arith.constant dense<0.000000e+00> : vector<96x1024xf32>
    %2 = tpu.matmul %0, %1, %cst {dimension_numbers = #tpu.dot_dimension_numbers<[1], [0], [0], [1], [0, 0, 1, 1], [], []>} : vector<96x1024xbf16>, vector<1024x1024xbf16>, vector<96x1024xf32> -> vector<96x1024xf32>
    %3 = vector.extract_strided_slice %2 {offsets = [0, 0], sizes = [48, 1024], strides = [1, 1]} : vector<96x1024xf32> to vector<48x1024xf32>
    %4 = vector.extract_strided_slice %2 {offsets = [48, 0], sizes = [48, 1024], strides = [1, 1]} : vector<96x1024xf32> to vector<48x1024xf32>
    %5 = vector.extract_strided_slice %3 {offsets = [0, 0], sizes = [48, 512], strides = [1, 1]} : vector<48x1024xf32> to vector<48x512xf32>
    %6 = vector.extract_strided_slice %3 {offsets = [0, 512], sizes = [48, 512], strides = [1, 1]} : vector<48x1024xf32> to vector<48x512xf32>
    %7 = vector.extract_strided_slice %4 {offsets = [0, 0], sizes = [48, 512], strides = [1, 1]} : vector<48x1024xf32> to vector<48x512xf32>
    %8 = vector.extract_strided_slice %4 {offsets = [0, 512], sizes = [48, 512], strides = [1, 1]} : vector<48x1024xf32> to vector<48x512xf32>
    %9 = tpu.iota {dimensions = array<i32: 1>} : vector<48x512xi32>
    %c0_i32 = arith.constant 0 : i32
    %10 = vector.broadcast %c0_i32 : i32 to vector<48x512xi32>
    %11 = arith.cmpi sgt, %9, %10 : vector<48x512xi32>
    %12 = arith.mulf %5, %5 : vector<48x512xf32>
    %13 = arith.mulf %6, %6 : vector<48x512xf32>
    %cst_3 = arith.constant 0.000000e+00 : f32
    %14 = vector.broadcast %cst_3 : f32 to vector<48x512xf32>
    %15 = arith.select %11, %13, %14 : vector<48x512xi1>, vector<48x512xf32>
    %16 = arith.addf %12, %15 : vector<48x512xf32>
    %cst_4 = arith.constant 1.000000e-16 : f32
    %17 = vector.broadcast %cst_4 : f32 to vector<48x512xf32>
    %18 = arith.maximumf %16, %17 : vector<48x512xf32>
    %19 = arith.mulf %7, %7 : vector<48x512xf32>
    %20 = arith.mulf %8, %8 : vector<48x512xf32>
    %cst_5 = arith.constant 0.000000e+00 : f32
    %21 = vector.broadcast %cst_5 : f32 to vector<48x512xf32>
    %22 = arith.select %11, %20, %21 : vector<48x512xi1>, vector<48x512xf32>
    %23 = arith.addf %19, %22 : vector<48x512xf32>
    %cst_6 = arith.constant 1.000000e-16 : f32
    %24 = vector.broadcast %cst_6 : f32 to vector<48x512xf32>
    %25 = arith.maximumf %23, %24 : vector<48x512xf32>
    %26 = vector.extract_strided_slice %6 {offsets = [0, 0], sizes = [48, 1], strides = [1, 1]} : vector<48x512xf32> to vector<48x1xf32>
    %27 = vector.extract_strided_slice %8 {offsets = [0, 0], sizes = [48, 1], strides = [1, 1]} : vector<48x512xf32> to vector<48x1xf32>
    %28 = arith.mulf %26, %26 : vector<48x1xf32>
    %cst_7 = arith.constant 1.000000e-16 : f32
    %29 = vector.broadcast %cst_7 : f32 to vector<48x1xf32>
    %30 = arith.maximumf %28, %29 : vector<48x1xf32>
    %31 = arith.mulf %27, %27 : vector<48x1xf32>
    %cst_8 = arith.constant 1.000000e-16 : f32
    %32 = vector.broadcast %cst_8 : f32 to vector<48x1xf32>
    %33 = arith.maximumf %31, %32 : vector<48x1xf32>
    %34 = math.sqrt %25 : vector<48x512xf32>
    %35 = math.sqrt %18 : vector<48x512xf32>
    %36 = arith.subf %34, %35 : vector<48x512xf32>
    %37 = math.sqrt %33 : vector<48x1xf32>
    %38 = math.sqrt %30 : vector<48x1xf32>
    %39 = arith.subf %37, %38 : vector<48x1xf32>
    %40 = math.log %25 : vector<48x512xf32>
    %41 = math.log %18 : vector<48x512xf32>
    %42 = arith.subf %40, %41 : vector<48x512xf32>
    %cst_9 = arith.constant 5.000000e-01 : f32
    %43 = vector.broadcast %cst_9 : f32 to vector<48x512xf32>
    %44 = arith.mulf %43, %42 : vector<48x512xf32>
    %45 = math.log %33 : vector<48x1xf32>
    %46 = math.log %30 : vector<48x1xf32>
    %47 = arith.subf %45, %46 : vector<48x1xf32>
    %cst_10 = arith.constant 5.000000e-01 : f32
    %48 = vector.broadcast %cst_10 : f32 to vector<48x1xf32>
    %49 = arith.mulf %48, %47 : vector<48x1xf32>
    %50 = arith.mulf %36, %36 : vector<48x512xf32>
    %51 = vector.shape_cast %50 : vector<48x512xf32> to vector<1x48x512xf32>
    %cst_11 = arith.constant dense<0.000000e+00> : vector<1xf32>
    %52 = vector.multi_reduction <add>, %51, %cst_11 [1, 2] : vector<1x48x512xf32> to vector<1xf32>
    %53 = vector.shape_cast %52 : vector<1xf32> to vector<1x1x1xf32>
    %54 = vector.extract %53[0, 0, 0] : f32 from vector<1x1x1xf32>
    %55 = vector.broadcast %54 : f32 to vector<1x1xf32>
    %56 = arith.mulf %39, %39 : vector<48x1xf32>
    %57 = vector.shape_cast %56 : vector<48x1xf32> to vector<1x48x1xf32>
    %cst_12 = arith.constant dense<0.000000e+00> : vector<1xf32>
    %58 = vector.multi_reduction <add>, %57, %cst_12 [1, 2] : vector<1x48x1xf32> to vector<1xf32>
    %59 = vector.shape_cast %58 : vector<1xf32> to vector<1x1x1xf32>
    %60 = vector.extract %59[0, 0, 0] : f32 from vector<1x1x1xf32>
    %61 = vector.broadcast %60 : f32 to vector<1x1xf32>
    %62 = arith.addf %55, %61 : vector<1x1xf32>
    %63 = vector.shape_cast %62 : vector<1x1xf32> to vector<1x1x1xf32>
    %c0_13 = arith.constant 0 : index
    %c0_14 = arith.constant 0 : index
    %c0_15 = arith.constant 0 : index
    %64 = vector.load %arg3[%c0_13, %c0_14, %c0_15] : memref<1x1x1xf32, #tpu.memory_space<vmem>>, vector<1x1x1xf32>
    tpu.vector_store %arg3[%c0_13, %c0_14, %c0_15], %63 {strides = array<i32>} : memref<1x1x1xf32, #tpu.memory_space<vmem>>, vector<1x1x1xf32>,
    %65 = math.absf %44 : vector<48x512xf32>
    %66 = vector.shape_cast %65 : vector<48x512xf32> to vector<1x48x512xf32>
    %cst_16 = arith.constant dense<0.000000e+00> : vector<1xf32>
    %67 = vector.multi_reduction <add>, %66, %cst_16 [1, 2] : vector<1x48x512xf32> to vector<1xf32>
    %68 = vector.shape_cast %67 : vector<1xf32> to vector<1x1x1xf32>
    %69 = vector.extract %68[0, 0, 0] : f32 from vector<1x1x1xf32>
    %70 = vector.broadcast %69 : f32 to vector<1x1xf32>
    %71 = math.absf %49 : vector<48x1xf32>
    %72 = vector.shape_cast %71 : vector<48x1xf32> to vector<1x48x1xf32>
    %cst_17 = arith.constant dense<0.000000e+00> : vector<1xf32>
    %73 = vector.multi_reduction <add>, %72, %cst_17 [1, 2] : vector<1x48x1xf32> to vector<1xf32>
    %74 = vector.shape_cast %73 : vector<1xf32> to vector<1x1x1xf32>
    %75 = vector.extract %74[0, 0, 0] : f32 from vector<1x1x1xf32>
    %76 = vector.broadcast %75 : f32 to vector<1x1xf32>
    %77 = arith.addf %70, %76 : vector<1x1xf32>
    %78 = vector.shape_cast %77 : vector<1x1xf32> to vector<1x1x1xf32>
    %c0_18 = arith.constant 0 : index
    %c0_19 = arith.constant 0 : index
    %c0_20 = arith.constant 0 : index
    %79 = vector.load %arg5[%c0_18, %c0_19, %c0_20] : memref<1x1x1xf32, #tpu.memory_space<vmem>>, vector<1x1x1xf32>
    tpu.vector_store %arg5[%c0_18, %c0_19, %c0_20], %78 {strides = array<i32>} : memref<1x1x1xf32, #tpu.memory_space<vmem>>, vector<1x1x1xf32>,
    %c1_i32 = arith.constant 1 : i32
    %80 = arith.cmpi ne, %arg0, %c1_i32 : i32
    %81 = arith.extui %80 : i1 to i32
    %c0_i32_21 = arith.constant 0 : i32
    %82 = arith.cmpi ne, %81, %c0_i32_21 : i32
    scf.if %82 {
      %86 = vector.shape_cast %25 : vector<48x512xf32> to vector<1x48x512xf32>
      %cst_24 = arith.constant dense<0.000000e+00> : vector<1xf32>
      %87 = vector.multi_reduction <add>, %86, %cst_24 [1, 2] : vector<1x48x512xf32> to vector<1xf32>
      %88 = vector.shape_cast %87 : vector<1xf32> to vector<1x1x1xf32>
      %89 = vector.extract %88[0, 0, 0] : f32 from vector<1x1x1xf32>
      %90 = vector.broadcast %89 : f32 to vector<1x1xf32>
      %91 = vector.shape_cast %33 : vector<48x1xf32> to vector<1x48x1xf32>
      %cst_25 = arith.constant dense<0.000000e+00> : vector<1xf32>
      %92 = vector.multi_reduction <add>, %91, %cst_25 [1, 2] : vector<1x48x1xf32> to vector<1xf32>
      %93 = vector.shape_cast %92 : vector<1xf32> to vector<1x1x1xf32>
      %94 = vector.extract %93[0, 0, 0] : f32 from vector<1x1x1xf32>
      %95 = vector.broadcast %94 : f32 to vector<1x1xf32>
      %96 = arith.addf %90, %95 : vector<1x1xf32>
      %97 = vector.shape_cast %96 : vector<1x1xf32> to vector<1x1x1xf32>
      %c0_26 = arith.constant 0 : index
      %c0_27 = arith.constant 0 : index
      %c0_28 = arith.constant 0 : index
      %98 = vector.load %arg4[%c0_26, %c0_27, %c0_28] : memref<1x1x1xf32, #tpu.memory_space<vmem>>, vector<1x1x1xf32>
      tpu.vector_store %arg4[%c0_26, %c0_27, %c0_28], %97 {strides = array<i32>} : memref<1x1x1xf32, #tpu.memory_space<vmem>>, vector<1x1x1xf32>,
    } else {
    }
    %c1_i32_22 = arith.constant 1 : i32
    %83 = arith.cmpi eq, %arg0, %c1_i32_22 : i32
    %84 = arith.extui %83 : i1 to i32
    %c0_i32_23 = arith.constant 0 : i32
    %85 = arith.cmpi ne, %84, %c0_i32_23 : i32
    scf.if %85 {
      %86 = tpu.iota {dimensions = array<i32: 0>} : vector<48x512xi32>
      %87 = tpu.iota {dimensions = array<i32: 0>} : vector<48x1xi32>
      %c34_i32 = arith.constant 34 : i32
      %88 = vector.broadcast %c34_i32 : i32 to vector<48x512xi32>
      %89 = arith.cmpi slt, %86, %88 : vector<48x512xi32>
      %cst_24 = arith.constant 0.000000e+00 : f32
      %90 = vector.broadcast %cst_24 : f32 to vector<48x512xf32>
      %91 = arith.select %89, %25, %90 : vector<48x512xi1>, vector<48x512xf32>
      %92 = vector.shape_cast %91 : vector<48x512xf32> to vector<1x48x512xf32>
      %cst_25 = arith.constant dense<0.000000e+00> : vector<1xf32>
      %93 = vector.multi_reduction <add>, %92, %cst_25 [1, 2] : vector<1x48x512xf32> to vector<1xf32>
      %94 = vector.shape_cast %93 : vector<1xf32> to vector<1x1x1xf32>
      %95 = vector.extract %94[0, 0, 0] : f32 from vector<1x1x1xf32>
      %96 = vector.broadcast %95 : f32 to vector<1x1xf32>
      %c34_i32_26 = arith.constant 34 : i32
      %97 = vector.broadcast %c34_i32_26 : i32 to vector<48x1xi32>
      %98 = arith.cmpi slt, %87, %97 : vector<48x1xi32>
      %cst_27 = arith.constant 0.000000e+00 : f32
      %99 = vector.broadcast %cst_27 : f32 to vector<48x1xf32>
      %100 = arith.select %98, %33, %99 : vector<48x1xi1>, vector<48x1xf32>
      %101 = vector.shape_cast %100 : vector<48x1xf32> to vector<1x48x1xf32>
      %cst_28 = arith.constant dense<0.000000e+00> : vector<1xf32>
      %102 = vector.multi_reduction <add>, %101, %cst_28 [1, 2] : vector<1x48x1xf32> to vector<1xf32>
      %103 = vector.shape_cast %102 : vector<1xf32> to vector<1x1x1xf32>
      %104 = vector.extract %103[0, 0, 0] : f32 from vector<1x1x1xf32>
      %105 = vector.broadcast %104 : f32 to vector<1x1xf32>
      %106 = arith.addf %96, %105 : vector<1x1xf32>
      %107 = vector.shape_cast %106 : vector<1x1xf32> to vector<1x1x1xf32>
      %c0_29 = arith.constant 0 : index
      %c0_30 = arith.constant 0 : index
      %c0_31 = arith.constant 0 : index
      %108 = vector.load %arg4[%c0_29, %c0_30, %c0_31] : memref<1x1x1xf32, #tpu.memory_space<vmem>>, vector<1x1x1xf32>
      tpu.vector_store %arg4[%c0_29, %c0_30, %c0_31], %107 {strides = array<i32>} : memref<1x1x1xf32, #tpu.memory_space<vmem>>, vector<1x1x1xf32>,
    } else {
    }
    return
  }
  func.func @transform_0(%arg0: i32) -> (i32, i32) {
    %c0_i32 = arith.constant 0 : i32
    %c0_i32_0 = arith.constant 0 : i32
    return %arg0, %c0_i32 : i32, i32
  }
  func.func @transform_1(%arg0: i32) -> (i32, i32) {
    %c0_i32 = arith.constant 0 : i32
    %c0_i32_0 = arith.constant 0 : i32
    %c0_i32_1 = arith.constant 0 : i32
    return %c0_i32, %c0_i32_0 : i32, i32
  }
  func.func @transform_2(%arg0: i32) -> (i32, i32, i32) {
    %c0_i32 = arith.constant 0 : i32
    %c0_i32_0 = arith.constant 0 : i32
    %c0_i32_1 = arith.constant 0 : i32
    return %arg0, %c0_i32, %c0_i32_0 : i32, i32, i32
  }
  func.func @transform_3(%arg0: i32) -> (i32, i32, i32) {
    %c0_i32 = arith.constant 0 : i32
    %c0_i32_0 = arith.constant 0 : i32
    %c0_i32_1 = arith.constant 0 : i32
    return %arg0, %c0_i32, %c0_i32_0 : i32, i32, i32
  }
  func.func @transform_4(%arg0: i32) -> (i32, i32, i32) {
    %c0_i32 = arith.constant 0 : i32
    %c0_i32_0 = arith.constant 0 : i32
    %c0_i32_1 = arith.constant 0 : i32
    return %arg0, %c0_i32, %c0_i32_0 : i32, i32, i32
  }
}

</mosaic_0001>

<bundles_post_ra>
// kernel: stft_loss_forward.1
= control target key start
LH: loop header
LB: loop body
LE: loop exit
PB: predicated region body
PF: predicated region fallthrough
CT: control target
= control target key end

     0   :  { %s10806_s15 = smov 0   ;;  %s16538_s0 = inlined_call_operand.vmem [shape: bf16[192,1024], index: 0, kind: input, shape index: {}]   ;;  %s16539_s1 = inlined_call_operand.vmem [shape: bf16[1024,1024], index: 1, kind: input, shape index: {}]   ;;  %s16540_s2 = inlined_call_operand.vmem [shape: f32[2,1,1], index: 2, kind: output, shape index: {0}]   ;;  %s16541_s3 = inlined_call_operand.vmem [shape: f32[2,1,1], index: 3, kind: output, shape index: {1}]   ;;  %s16542_s4 = inlined_call_operand.vmem [shape: f32[2,1,1], index: 4, kind: output, shape index: {2}]  }
   0x1 LB: > { %s10812_s16 = sadd.s32 4294967295, %s10779_s15   ;;  %p7701_p0 = scmp.ge.s32.totalorder %s10779_s15, 1  ;;  %s10779_s15 = sphi %s10806_s15, %s15_s15  }
   0x2   : > { %p169_p1 = scmp.lt.s32.totalorder %s10779_s15, 3 }
   0x4   : > { %p170_p2 = pnand %p7701_p0, %p169_p1 }
   0x6   : > { %173 = sbr.rel (%p170_p2) target bundleno = 2490 (0x9ba), region = 28 }
   0xb   : > { %v8122_v0 = vld [vmem:[%s16539_s1 + $0x1c0] sm:$0xf]  ;;  %s200_s29 = smul.u32 12, %s10812_s16  ;;  %vm7326_vm5 = vcmask 7168   ;;  %p207_p4 = scmp.lt.s32.totalorder %s10812_s16, 1 }
   0xc   : > { %v10057_v1 = vld [vmem:[%s16539_s1 + $0x1dc] sm:$0xf0]  ;;  %p9944_p5 = scmp.eq.s32.totalorder %s10812_s16, 1 }
   0xd   : > { %v8378_v2 = vld [vmem:[%s16539_s1 + $0x3c0] sm:$0xf]  ;;  %v8123_v3 = vor.u32 %v10057_v1, %v8122_v0  ;;  %p201_p3 = scmp.lt.s32.totalorder %s200_s29, 23 }
   0xe   : > { %v10121_v4 = vld [vmem:[%s16539_s1 + $0x3dc] sm:$0xf0]  ;;  %s16439_s14 = scalar_select %p207_p4, %s10812_s16, 1 }
   0xf   : > { %v8634_v5 = vld [vmem:[%s16539_s1 + $0x5c0] sm:$0xf]  ;;  %v8379_v7 = vor.u32 %v10121_v4, %v8378_v2  ;;  %3576 = vmatpush.bf16.msra.mxu0 %v8123_v3  ;;  %s17122_s29 = smov (!%p201_p3, %s200_s29), 23 }
  0x10   : > { %v10185_v6 = vld [vmem:[%s16539_s1 + $0x5dc] sm:$0xf0]  ;;  %s9948_s5 = sshll.u32 %s17122_s29, 5  ;;  %s16445_s20 = scalar_lea.vmem %s16541_s3, %s16439_s14 }
  0x11   : > { %v8635_v8 = vor.u32 %v10185_v6, %v8634_v5  ;;  %v8890_v9 = vld [vmem:[%s16539_s1 + $0x7c0] sm:$0xf]  ;;  %3615 = vmatpush.bf16.msra.mxu1 %v8379_v7  ;;  %s11030_s17 = scalar_lea.vmem %s16538_s0, %s9948_s5  ;;  %s209_s25 = scalar_lea.vmem %s16540_s2, %s16439_s14 }
  0x12   : > { %v10249_v10 = vld [vmem:[%s16539_s1 + $0x7dc] sm:$0xf0]  ;;  %s215_s30 = scalar_lea.vmem %s16542_s4, %s16439_s14 }
  0x13   : > { %v8090_v11 = vld [vmem:[%s16539_s1 + $0x180] sm:$0xf]  ;;  %v8891_v12 = vor.u32 %v10249_v10, %v8890_v9  ;;  %3654 = vmatpush.bf16.msra.mxu2 %v8635_v8 }
  0x14   : > { %v10049_v13 = vld [vmem:[%s16539_s1 + $0x19c] sm:$0xf0] }
  0x15   : > { %v8346_v14 = vld [vmem:[%s16539_s1 + $0x380] sm:$0xf]  ;;  %v8091_v16 = vor.u32 %v10049_v13, %v8090_v11  ;;  %3693 = vmatpush.bf16.msra.mxu3 %v8891_v12 }
  0x16   : > { %v10113_v15 = vld [vmem:[%s16539_s1 + $0x39c] sm:$0xf0] }
  0x17   : > { %v8347_v17 = vor.u32 %v10113_v15, %v8346_v14  ;;  %v8602_v18 = vld [vmem:[%s16539_s1 + $0x580] sm:$0xf]  ;;  %3577 = vmatpush.bf16.msra.mxu0 %v8091_v16 }
  0x18   : > { %v10177_v19 = vld [vmem:[%s16539_s1 + $0x59c] sm:$0xf0] }
  0x19   : > { %v8858_v20 = vld [vmem:[%s16539_s1 + $0x780] sm:$0xf]  ;;  %v8603_v21 = vor.u32 %v10177_v19, %v8602_v18  ;;  %3616 = vmatpush.bf16.msra.mxu1 %v8347_v17 }
  0x1a   : > { %v10241_v22 = vld [vmem:[%s16539_s1 + $0x79c] sm:$0xf0] }
  0x1b   : > { %v8058_v23 = vld [vmem:[%s16539_s1 + $0x140] sm:$0xf]  ;;  %v8859_v25 = vor.u32 %v10241_v22, %v8858_v20  ;;  %3655 = vmatpush.bf16.msra.mxu2 %v8603_v21 }
  0x1c   : > { %v10041_v24 = vld [vmem:[%s16539_s1 + $0x15c] sm:$0xf0] }
  0x1d   : > { %v8314_v26 = vld [vmem:[%s16539_s1 + $0x340] sm:$0xf]  ;;  %v8059_v29 = vor.u32 %v10041_v24, %v8058_v23  ;;  %3694 = vmatpush.bf16.msra.mxu3 %v8859_v25 }
  0x1e   : > { %v10105_v27 = vld [vmem:[%s16539_s1 + $0x35c] sm:$0xf0] }
  0x1f   : > { %v8570_v28 = vld [vmem:[%s16539_s1 + $0x540] sm:$0xf]  ;;  %v8315_v33 = vor.u32 %v10105_v27, %v8314_v26  ;;  %3578 = vmatpush.bf16.msra.mxu0 %v8059_v29 }
  0x20   : > { %v10169_v30 = vld [vmem:[%s16539_s1 + $0x55c] sm:$0xf0] }
  0x21   : > { %v8826_v31 = vld [vmem:[%s16539_s1 + $0x740] sm:$0xf]  ;;  %v8571_v34 = vor.u32 %v10169_v30, %v8570_v28  ;;  %3617 = vmatpush.bf16.msra.mxu1 %v8315_v33 }
  0x22   : > { %v10233_v32 = vld [vmem:[%s16539_s1 + $0x75c] sm:$0xf0] }
  0x23   : > { %v8026_v35 = vld [vmem:[%s16539_s1 + $0x100] sm:$0xf]  ;;  %v8827_v38 = vor.u32 %v10233_v32, %v8826_v31  ;;  %3656 = vmatpush.bf16.msra.mxu2 %v8571_v34 }
  0x24   : > { %v10033_v36 = vld [vmem:[%s16539_s1 + $0x11c] sm:$0xf0] }
  0x25   : > { %v8282_v37 = vld [vmem:[%s16539_s1 + $0x300] sm:$0xf]  ;;  %v8027_v44 = vor.u32 %v10033_v36, %v8026_v35  ;;  %3695 = vmatpush.bf16.msra.mxu3 %v8827_v38 }
  0x26   : > { %v10097_v39 = vld [vmem:[%s16539_s1 + $0x31c] sm:$0xf0] }
  0x27   : > { %v8538_v40 = vld [vmem:[%s16539_s1 + $0x500] sm:$0xf]  ;;  %v8283_v45 = vor.u32 %v10097_v39, %v8282_v37  ;;  %3579 = vmatpush.bf16.msra.mxu0 %v8027_v44  ;;  %v9949_v44 = vld [vmem:[%s11030_s17 + $0x4] sm:$0xf] }
  0x28   : > { %v10161_v41 = vld [vmem:[%s16539_s1 + $0x51c] sm:$0xf0] }
  0x29   : > { %v8794_v42 = vld [vmem:[%s16539_s1 + $0x700] sm:$0xf]  ;;  %v8539_v46 = vor.u32 %v10161_v41, %v8538_v40  ;;  %3618 = vmatpush.bf16.msra.mxu1 %v8283_v45 }
  0x2a   : > { %v10225_v43 = vld [vmem:[%s16539_s1 + $0x71c] sm:$0xf0] }
  0x2b   : > { %v7994_v47 = vld [vmem:[%s16539_s1 + $0xc0] sm:$0xf]  ;;  %v8795_v50 = vor.u32 %v10225_v43, %v8794_v42  ;;  %3657 = vmatpush.bf16.msra.mxu2 %v8539_v46 }
  0x2c   : > { %v10025_v48 = vld [vmem:[%s16539_s1 + $0xdc] sm:$0xf0] }
  0x2d   : > { %v8250_v49 = vld [vmem:[%s16539_s1 + $0x2c0] sm:$0xf]  ;;  %v7995_v56 = vor.u32 %v10025_v48, %v7994_v47  ;;  %3696 = vmatpush.bf16.msra.mxu3 %v8795_v50  ;;  %v7708_v48 = vld [vmem:[%s11030_s17 + $0x20] sm:$0xf0]  ;;  %v9954_v50 = vld [vmem:[%s11030_s17 + $0x24] sm:$0xf0] }
  0x2e   : > { %v10089_v51 = vld [vmem:[%s16539_s1 + $0x2dc] sm:$0xf0] }
  0x2f   : > { %v8506_v52 = vld [vmem:[%s16539_s1 + $0x4c0] sm:$0xf]  ;;  %v8251_v57 = vor.u32 %v10089_v51, %v8250_v49  ;;  %3580 = vmatpush.bf16.msra.mxu0 %v7995_v56  ;;  %v7714_v49 = vld [vmem:[%s11030_s17 + $0x8] sm:$0xf] }
  0x30   : > { %v10153_v53 = vld [vmem:[%s16539_s1 + $0x4dc] sm:$0xf0] }
  0x31   : > { %v8762_v54 = vld [vmem:[%s16539_s1 + $0x6c0] sm:$0xf]  ;;  %v8507_v58 = vor.u32 %v10153_v53, %v8506_v52  ;;  %3619 = vmatpush.bf16.msra.mxu1 %v8251_v57  ;;  %v11055_v52 = vor.u32 %v9949_v44, %v7708_v48  ;;  %v11057_v53 = vor.u32 %v9954_v50, %v7714_v49 }
  0x32   : > { %v10217_v55 = vld [vmem:[%s16539_s1 + $0x6dc] sm:$0xf0] }
  0x33   : > { %v7962_v59 = vld [vmem:[%s16539_s1 + $0x80] sm:$0xf]  ;;  %v8763_v62 = vor.u32 %v10217_v55, %v8762_v54  ;;  %3658 = vmatpush.bf16.msra.mxu2 %v8507_v58  ;;  %16689 = vst [vmem:[#allocation3_spill] sm:$0xff] %v11055_v52  ;;  %v9950_v54 = vld [vmem:[%s11030_s17 + $0xc] sm:$0xf] }
  0x34   : > { %v10017_v60 = vld [vmem:[%s16539_s1 + $0x9c] sm:$0xf0]  ;;  %16690 = vst [vmem:[#allocation4_spill] sm:$0xff] %v11057_v53  ;;  %v7716_v55 = vld [vmem:[%s11030_s17 + $0x28] sm:$0xf0] }
  0x35   : > { %v8218_v61 = vld [vmem:[%s16539_s1 + $0x280] sm:$0xf]  ;;  %v7963_v4 = vor.u32 %v10017_v60, %v7962_v59  ;;  %3697 = vmatpush.bf16.msra.mxu3 %v8763_v62  ;;  %v11064_v57 = vor.u32 %v9950_v54, %v7716_v55 }
  0x36   : > { %v10081_v63 = vld [vmem:[%s16539_s1 + $0x29c] sm:$0xf0] }
  0x37   : > { %v8474_v0 = vld [vmem:[%s16539_s1 + $0x480] sm:$0xf]  ;;  %v8219_v6 = vor.u32 %v10081_v63, %v8218_v61  ;;  %3581 = vmatpush.bf16.msra.mxu0 %v7963_v4  ;;  %16691 = vst [vmem:[#allocation5_spill] sm:$0xff] %v11064_v57 }
  0x38   : > { %v10145_v1 = vld [vmem:[%s16539_s1 + $0x49c] sm:$0xf0] }
  0x39   : > { %v8730_v2 = vld [vmem:[%s16539_s1 + $0x680] sm:$0xf]  ;;  %v8475_v7 = vor.u32 %v10145_v1, %v8474_v0  ;;  %3620 = vmatpush.bf16.msra.mxu1 %v8219_v6 }
  0x3a   : > { %v10209_v3 = vld [vmem:[%s16539_s1 + $0x69c] sm:$0xf0] }
  0x3b   : > { %v7930_v5 = vld [vmem:[%s16539_s1 + $0x40] sm:$0xf]  ;;  %v8731_v11 = vor.u32 %v10209_v3, %v8730_v2  ;;  %3659 = vmatpush.bf16.msra.mxu2 %v8475_v7 }
  0x3c   : > { %v10009_v8 = vld [vmem:[%s16539_s1 + $0x5c] sm:$0xf0] }
  0x3d   : > { %v8186_v9 = vld [vmem:[%s16539_s1 + $0x240] sm:$0xf]  ;;  %v7931_v16 = vor.u32 %v10009_v8, %v7930_v5  ;;  %3698 = vmatpush.bf16.msra.mxu3 %v8731_v11 }
  0x3e   : > { %v10073_v10 = vld [vmem:[%s16539_s1 + $0x25c] sm:$0xf0] }
  0x3f   : > { %v8442_v12 = vld [vmem:[%s16539_s1 + $0x440] sm:$0xf]  ;;  %v8187_v19 = vor.u32 %v10073_v10, %v8186_v9  ;;  %3582 = vmatpush.bf16.msra.mxu0 %v7931_v16 }
  0x40   : > { %v10137_v13 = vld [vmem:[%s16539_s1 + $0x45c] sm:$0xf0] }
  0x41   : > { %v8698_v14 = vld [vmem:[%s16539_s1 + $0x640] sm:$0xf]  ;;  %v8443_v20 = vor.u32 %v10137_v13, %v8442_v12  ;;  %3621 = vmatpush.bf16.msra.mxu1 %v8187_v19 }
  0x42   : > { %v10201_v15 = vld [vmem:[%s16539_s1 + $0x65c] sm:$0xf0] }
  0x43   : > { %v7898_v17 = vld [vmem:[%s16539_s1] sm:$0xf]  ;;  %v8699_v24 = vor.u32 %v10201_v15, %v8698_v14  ;;  %3660 = vmatpush.bf16.msra.mxu2 %v8443_v20 }
  0x44   : > { %v10001_v18 = vld [vmem:[%s16539_s1 + $0x1c] sm:$0xf0] }
  0x45   : > { %v8154_v21 = vld [vmem:[%s16539_s1 + $0x200] sm:$0xf]  ;;  %v7899_v30 = vor.u32 %v10001_v18, %v7898_v17  ;;  %3699 = vmatpush.bf16.msra.mxu3 %v8699_v24 }
  0x46   : > { %v10065_v22 = vld [vmem:[%s16539_s1 + $0x21c] sm:$0xf0] }
  0x47   : > { %v8410_v23 = vld [vmem:[%s16539_s1 + $0x400] sm:$0xf]  ;;  %v8155_v35 = vor.u32 %v10065_v22, %v8154_v21  ;;  %3583 = vmatpush.bf16.msra.mxu0 %v7899_v30  ;;  %v7746_v30 = vld [vmem:[%s11030_s17 + $0x48] sm:$0xf] }
  0x48   : > { %v10129_v25 = vld [vmem:[%s16539_s1 + $0x41c] sm:$0xf0] }
  0x49   : > { %v8666_v26 = vld [vmem:[%s16539_s1 + $0x600] sm:$0xf]  ;;  %v8411_v36 = vor.u32 %v10129_v25, %v8410_v23  ;;  %3622 = vmatpush.bf16.msra.mxu1 %v8155_v35 }
  0x4a   : > { %v10193_v27 = vld [vmem:[%s16539_s1 + $0x61c] sm:$0xf0] }
  0x4b   : > { %v9658_v28 = vld [vmem:[%s16539_s1 + $0xdc0] sm:$0xf]  ;;  %v8667_v41 = vor.u32 %v10193_v27, %v8666_v26  ;;  %3661 = vmatpush.bf16.msra.mxu2 %v8411_v36 }
  0x4c   : > { %v10441_v29 = vld [vmem:[%s16539_s1 + $0xddc] sm:$0xf0]  ;;  %3623 = vmatmul.bf16.vlgmr.msra.gmra.mxu1 %v11055_v52 }
  0x4d   : > { %v9146_v31 = vld [vmem:[%s16539_s1 + $0x9c0] sm:$0xf]  ;;  %v9659_v45 = vor.u32 %v10441_v29, %v9658_v28  ;;  %3700 = vmatpush.bf16.msra.mxu3 %v8667_v41  ;;  %v9957_v28 = vld [vmem:[%s11030_s17 + $0x44] sm:$0xf] }
  0x4e   : > { %v10313_v32 = vld [vmem:[%s16539_s1 + $0x9dc] sm:$0xf0]  ;;  %3662 = vmatmul.bf16.vlgmr.msra.gmra.mxu2 %v11057_v53  ;;  %v7740_v29 = vld [vmem:[%s11030_s17 + $0x60] sm:$0xf0] }
  0x4f   : > { %v9914_v33 = vld [vmem:[%s16539_s1 + $0xfc0] sm:$0xf]  ;;  %v9147_v58 = vor.u32 %v10313_v32, %v9146_v31  ;;  %3810 = vmatpush.bf16.msrb.mxu2 %v9659_v45  ;;  %v9962_v31 = vld [vmem:[%s11030_s17 + $0x64] sm:$0xf0] }
  0x50   : > { %v10505_v34 = vld [vmem:[%s16539_s1 + $0xfdc] sm:$0xf0]  ;;  %3701 = vmatmul.bf16.vlgmr.msra.gmra.mxu3 %v11064_v57 }
  0x51   : > { %v9402_v37 = vld [vmem:[%s16539_s1 + $0xbc0] sm:$0xf]  ;;  %v9915_v51 = vor.u32 %v10505_v34, %v9914_v33  ;;  %3732 = vmatpush.bf16.msrb.mxu0 %v9147_v58  ;;  %v9958_v33 = vld [vmem:[%s11030_s17 + $0x4c] sm:$0xf] }
  0x52   : > { %v10377_v38 = vld [vmem:[%s16539_s1 + $0xbdc] sm:$0xf0]  ;;  %v7748_v34 = vld [vmem:[%s11030_s17 + $0x68] sm:$0xf0] }
  0x53   : > { %v9626_v39 = vld [vmem:[%s16539_s1 + $0xd80] sm:$0xf]  ;;  %v9403_v59 = vor.u32 %v10377_v38, %v9402_v37  ;;  %3849 = vmatpush.bf16.msrb.mxu3 %v9915_v51  ;;  %v11140_v37 = vor.u32 %v9957_v28, %v7740_v29  ;;  %v11142_v38 = vor.u32 %v9962_v31, %v7746_v30  ;;  %v9973_v30 = vld [vmem:[%s11030_s17 + $0xc4] sm:$0xf] }
  0x54   : > { %v10433_v40 = vld [vmem:[%s16539_s1 + $0xd9c] sm:$0xf0]  ;;  %v7804_v31 = vld [vmem:[%s11030_s17 + $0xe0] sm:$0xf0] }
  0x55   : > { %v7706_v42 = vld [vmem:[%s11030_s17] sm:$0xf]  ;;  %v9627_v60 = vor.u32 %v10433_v40, %v9626_v39  ;;  %3771 = vmatpush.bf16.msrb.mxu1 %v9403_v59  ;;  %16693 = vst [vmem:[#allocation7_spill] sm:$0xff] %v11140_v37  ;;  %v11144_v39 = vor.u32 %v9958_v33, %v7748_v34  ;;  %v9978_v33 = vld [vmem:[%s11030_s17 + $0xe4] sm:$0xf0] }
  0x56   : > { %v9953_v43 = vld [vmem:[%s11030_s17 + $0x1c] sm:$0xf0]  ;;  %16694 = vst [vmem:[#allocation8_spill] sm:$0xff] %v11142_v38  ;;  %v9974_v34 = vld [vmem:[%s11030_s17 + $0xcc] sm:$0xf] }
  0x57   : > { %v9882_v46 = vld [vmem:[%s16539_s1 + $0xf80] sm:$0xf]  ;;  %v11050_v47 = vor.u32 %v9953_v43, %v7706_v42  ;;  %3811 = vmatpush.bf16.msrb.mxu2 %v9627_v60  ;;  %16695 = vst [vmem:[#allocation9_spill] sm:$0xff] %v11144_v39 }
  0x58   : > { %v10497_v56 = vld [vmem:[%s16539_s1 + $0xf9c] sm:$0xf0] }
  0x59   : > { %16688 = vst [vmem:[#allocation2_spill] sm:$0xff] %v11050_v47  ;;  %v9114_v61 = vld [vmem:[%s16539_s1 + $0x980] sm:$0xf]  ;;  %3584 = vmatmul.bf16.vlgmr.msra.gmra.mxu0 %v11050_v47  ;;  %v9883_v0 = vor.u32 %v10497_v56, %v9882_v46 }
  0x5a   : > { %v10305_v62 = vld [vmem:[%s16539_s1 + $0x99c] sm:$0xf0] }
  0x5b   : > { %v9370_v63 = vld [vmem:[%s16539_s1 + $0xb80] sm:$0xf]  ;;  %v9115_v6 = vor.u32 %v10305_v62, %v9114_v61  ;;  %3850 = vmatpush.bf16.msrb.mxu3 %v9883_v0 }
  0x5c   : > { %v10369_v1 = vld [vmem:[%s16539_s1 + $0xb9c] sm:$0xf0]  ;;  %3628 = vmatmul.bf16.gmra.mxu1 %v11140_v37 }
  0x5d   : > { %v9594_v2 = vld [vmem:[%s16539_s1 + $0xd40] sm:$0xf]  ;;  %v9371_v7 = vor.u32 %v10369_v1, %v9370_v63  ;;  %3733 = vmatpush.bf16.msrb.mxu0 %v9115_v6  ;;  %v9970_v6 = vld [vmem:[%s11030_s17 + $0xa4] sm:$0xf0] }
  0x5e   : > { %v10425_v3 = vld [vmem:[%s16539_s1 + $0xd5c] sm:$0xf0]  ;;  %3667 = vmatmul.bf16.gmra.mxu2 %v11142_v38 }
  0x5f   : > { %v9850_v4 = vld [vmem:[%s16539_s1 + $0xf40] sm:$0xf]  ;;  %v9595_v8 = vor.u32 %v10425_v3, %v9594_v2  ;;  %3772 = vmatpush.bf16.msrb.mxu1 %v9371_v7  ;;  %v9965_v3 = vld [vmem:[%s11030_s17 + $0x84] sm:$0xf]  ;;  %v9966_v7 = vld [vmem:[%s11030_s17 + $0x8c] sm:$0xf] }
  0x60   : > { %v10489_v5 = vld [vmem:[%s16539_s1 + $0xf5c] sm:$0xf0]  ;;  %3706 = vmatmul.bf16.gmra.mxu3 %v11144_v39 }
  0x61   : > { %v9082_v9 = vld [vmem:[%s16539_s1 + $0x940] sm:$0xf]  ;;  %v9851_v11 = vor.u32 %v10489_v5, %v9850_v4  ;;  %3812 = vmatpush.bf16.msrb.mxu2 %v9595_v8  ;;  %v7772_v4 = vld [vmem:[%s11030_s17 + $0xa0] sm:$0xf0]  ;;  %v7778_v5 = vld [vmem:[%s11030_s17 + $0x88] sm:$0xf] }
  0x62   : > { %v10297_v10 = vld [vmem:[%s16539_s1 + $0x95c] sm:$0xf0]  ;;  %v7780_v8 = vld [vmem:[%s11030_s17 + $0xa8] sm:$0xf0] }
  0x63   : > { %v9338_v12 = vld [vmem:[%s16539_s1 + $0xb40] sm:$0xf]  ;;  %v9083_v16 = vor.u32 %v10297_v10, %v9082_v9  ;;  %3851 = vmatpush.bf16.msrb.mxu3 %v9851_v11  ;;  %v11202_v10 = vor.u32 %v9965_v3, %v7772_v4  ;;  %v11204_v11 = vor.u32 %v9970_v6, %v7778_v5  ;;  %v7844_v3 = vld [vmem:[%s11030_s17 + $0x128] sm:$0xf0] }
  0x64   : > { %v10361_v13 = vld [vmem:[%s16539_s1 + $0xb5c] sm:$0xf0] }
  0x65   : > { %v9562_v14 = vld [vmem:[%s16539_s1 + $0xd00] sm:$0xf]  ;;  %v9339_v19 = vor.u32 %v10361_v13, %v9338_v12  ;;  %3734 = vmatpush.bf16.msrb.mxu0 %v9083_v16  ;;  %16697 = vst [vmem:[#allocation11_spill] sm:$0xff] %v11202_v10  ;;  %v11206_v12 = vor.u32 %v9966_v7, %v7780_v8  ;;  %v10181_v8 = vld [vmem:[%s16539_s1 + $0x5c4] sm:$0xf] }
  0x66   : > { %v10417_v15 = vld [vmem:[%s16539_s1 + $0xd1c] sm:$0xf0]  ;;  %16698 = vst [vmem:[#allocation12_spill] sm:$0xff] %v11204_v11 }
  0x67   : > { %v9818_v17 = vld [vmem:[%s16539_s1 + $0xf00] sm:$0xf]  ;;  %v9563_v20 = vor.u32 %v10417_v15, %v9562_v14  ;;  %3773 = vmatpush.bf16.msrb.mxu1 %v9339_v19  ;;  %16699 = vst [vmem:[#allocation13_spill] sm:$0xff] %v11206_v12 }
  0x68   : > { %v10481_v18 = vld [vmem:[%s16539_s1 + $0xf1c] sm:$0xf0] }
  0x69   : > { %v9050_v21 = vld [vmem:[%s16539_s1 + $0x900] sm:$0xf]  ;;  %v9819_v23 = vor.u32 %v10481_v18, %v9818_v17  ;;  %3813 = vmatpush.bf16.msrb.mxu2 %v9563_v20 }
  0x6a   : > { %v10289_v22 = vld [vmem:[%s16539_s1 + $0x91c] sm:$0xf0] }
  0x6b   : > { %v9306_v24 = vld [vmem:[%s16539_s1 + $0xb00] sm:$0xf]  ;;  %v9051_v32 = vor.u32 %v10289_v22, %v9050_v21  ;;  %3852 = vmatpush.bf16.msrb.mxu3 %v9819_v23 }
  0x6c   : > { %v10353_v25 = vld [vmem:[%s16539_s1 + $0xb1c] sm:$0xf0]  ;;  %3633 = vmatmul.bf16.gmra.mxu1 %v11202_v10 }
  0x6d   : > { %v7738_v26 = vld [vmem:[%s11030_s17 + $0x40] sm:$0xf]  ;;  %v9307_v35 = vor.u32 %v10353_v25, %v9306_v24  ;;  %3735 = vmatpush.bf16.msrb.mxu0 %v9051_v32  ;;  %v7810_v32 = vld [vmem:[%s11030_s17 + $0xc8] sm:$0xf] }
  0x6e   : > { %v9961_v27 = vld [vmem:[%s11030_s17 + $0x5c] sm:$0xf0]  ;;  %3672 = vmatmul.bf16.gmra.mxu2 %v11204_v11 }
  0x6f   : > { %v11138_v36 = vor.u32 %v9961_v27, %v7738_v26  ;;  %3774 = vmatpush.bf16.msrb.mxu1 %v9307_v35  ;;  %v9530_v40 = vld [vmem:[%s16539_s1 + $0xcc0] sm:$0xf]  ;;  %v7812_v35 = vld [vmem:[%s11030_s17 + $0xe8] sm:$0xf0] }
  0x70   : > { %v10409_v41 = vld [vmem:[%s16539_s1 + $0xcdc] sm:$0xf0]  ;;  %3711 = vmatmul.bf16.gmra.mxu3 %v11206_v12 }
  0x71   : > { %16692 = vst [vmem:[#allocation6_spill] sm:$0xff] %v11138_v36  ;;  %3589 = vmatmul.bf16.gmra.mxu0 %v11138_v36  ;;  %v9018_v42 = vld [vmem:[%s16539_s1 + $0x8c0] sm:$0xf]  ;;  %v9531_v43 = vor.u32 %v10409_v41, %v9530_v40  ;;  %v11252_v41 = vor.u32 %v9973_v30, %v7804_v31  ;;  %v10237_v30 = vld [vmem:[%s16539_s1 + $0x784] sm:$0xf] }
  0x72   : > { %v10281_v44 = vld [vmem:[%s16539_s1 + $0x8dc] sm:$0xf0]  ;;  %v8860_v31 = vld [vmem:[%s16539_s1 + $0x7a0] sm:$0xf0] }
  0x73   : > { %v9786_v45 = vld [vmem:[%s16539_s1 + $0xec0] sm:$0xf]  ;;  %v9019_v48 = vor.u32 %v10281_v44, %v9018_v42  ;;  %3814 = vmatpush.bf16.msrb.mxu2 %v9531_v43  ;;  %16701 = vst [vmem:[#allocation15_spill] sm:$0xff] %v11252_v41  ;;  %v11254_v42 = vor.u32 %v9978_v33, %v7810_v32  ;;  %v11256_v43 = vor.u32 %v9974_v34, %v7812_v35  ;;  %v9989_v35 = vld [vmem:[%s11030_s17 + $0x144] sm:$0xf] }
  0x74   : > { %v10473_v46 = vld [vmem:[%s16539_s1 + $0xedc] sm:$0xf0]  ;;  %v8863_v32 = vor.u32 %v10237_v30, %v8860_v31  ;;  %v10157_v30 = vld [vmem:[%s16539_s1 + $0x504] sm:$0xf] }
  0x75   : > { %v9787_v49 = vor.u32 %v10473_v46, %v9786_v45  ;;  %v9274_v50 = vld [vmem:[%s16539_s1 + $0xac0] sm:$0xf]  ;;  %3736 = vmatpush.bf16.msrb.mxu0 %v9019_v48  ;;  %16702 = vst [vmem:[#allocation16_spill] sm:$0xff] %v11254_v42  ;;  %v8540_v31 = vld [vmem:[%s16539_s1 + $0x520] sm:$0xf0] }
  0x76   : > { %v10345_v51 = vld [vmem:[%s16539_s1 + $0xadc] sm:$0xf0]  ;;  %16703 = vst [vmem:[#allocation17_spill] sm:$0xff] %v11256_v43 }
  0x77   : > { %v9498_v54 = vld [vmem:[%s16539_s1 + $0xc80] sm:$0xf]  ;;  %v9275_v55 = vor.u32 %v10345_v51, %v9274_v50  ;;  %3853 = vmatpush.bf16.msrb.mxu3 %v9787_v49 }
  0x78   : > { %v10401_v56 = vld [vmem:[%s16539_s1 + $0xc9c] sm:$0xf0] }
  0x79   : > { %v8986_v58 = vld [vmem:[%s16539_s1 + $0x880] sm:$0xf]  ;;  %v9499_v60 = vor.u32 %v10401_v56, %v9498_v54  ;;  %3775 = vmatpush.bf16.msrb.mxu1 %v9275_v55 }
  0x7a   : > { %v10273_v59 = vld [vmem:[%s16539_s1 + $0x89c] sm:$0xf0] }
  0x7b   : > { %v8987_v61 = vor.u32 %v10273_v59, %v8986_v58  ;;  %v9754_v62 = vld [vmem:[%s16539_s1 + $0xe80] sm:$0xf]  ;;  %3815 = vmatpush.bf16.msrb.mxu2 %v9499_v60 }
  0x7c   : > { %v10465_v63 = vld [vmem:[%s16539_s1 + $0xe9c] sm:$0xf0]  ;;  %3638 = vmatmul.bf16.gmra.mxu1 %v11252_v41 }
  0x7d   : > { %v9755_v0 = vor.u32 %v10465_v63, %v9754_v62  ;;  %v7770_v1 = vld [vmem:[%s11030_s17 + $0x80] sm:$0xf]  ;;  %3737 = vmatpush.bf16.msrb.mxu0 %v8987_v61  ;;  %v9981_v62 = vld [vmem:[%s11030_s17 + $0x104] sm:$0xf] }
  0x7e   : > { %v9969_v2 = vld [vmem:[%s11030_s17 + $0x9c] sm:$0xf0]  ;;  %3677 = vmatmul.bf16.gmra.mxu2 %v11254_v42  ;;  %v7836_v63 = vld [vmem:[%s11030_s17 + $0x120] sm:$0xf0] }
  0x7f   : > { %3854 = vmatpush.bf16.msrb.mxu3 %v9755_v0  ;;  %v11200_v9 = vor.u32 %v9969_v2, %v7770_v1  ;;  %v9242_v13 = vld [vmem:[%s16539_s1 + $0xa80] sm:$0xf]  ;;  %v7842_v0 = vld [vmem:[%s11030_s17 + $0x108] sm:$0xf]  ;;  %v9982_v2 = vld [vmem:[%s11030_s17 + $0x10c] sm:$0xf]  ;;  %v11296_v5 = vor.u32 %v9981_v62, %v7836_v63 }
  0x80   : > { %v10337_v14 = vld [vmem:[%s16539_s1 + $0xa9c] sm:$0xf0]  ;;  %3716 = vmatmul.bf16.gmra.mxu3 %v11256_v43  ;;  %v9986_v1 = vld [vmem:[%s11030_s17 + $0x124] sm:$0xf0]  ;;  %v11300_v7 = vor.u32 %v9982_v2, %v7844_v3  ;;  %v10037_v62 = vld [vmem:[%s16539_s1 + $0x144] sm:$0xf] }
  0x81   : > { %16696 = vst [vmem:[#allocation10_spill] sm:$0xff] %v11200_v9  ;;  %3594 = vmatmul.bf16.gmra.mxu0 %v11200_v9  ;;  %v9466_v15 = vld [vmem:[%s16539_s1 + $0xc40] sm:$0xf]  ;;  %v9243_v16 = vor.u32 %v10337_v14, %v9242_v13  ;;  %v11298_v6 = vor.u32 %v9986_v1, %v7842_v0  ;;  %v8636_v13 = vld [vmem:[%s16539_s1 + $0x5e0] sm:$0xf0] }
  0x82   : > { %v10393_v17 = vld [vmem:[%s16539_s1 + $0xc5c] sm:$0xf0]  ;;  %16705 = vst [vmem:[#allocation19_spill] sm:$0xff] %v11296_v5  ;;  %v10053_v14 = vld [vmem:[%s16539_s1 + $0x1c4] sm:$0xf] }
  0x83   : > { %v8954_v18 = vld [vmem:[%s16539_s1 + $0x840] sm:$0xf]  ;;  %v9467_v20 = vor.u32 %v10393_v17, %v9466_v15  ;;  %3776 = vmatpush.bf16.msrb.mxu1 %v9243_v16  ;;  %16706 = vst [vmem:[#allocation20_spill] sm:$0xff] %v11298_v6  ;;  %v8639_v15 = vor.u32 %v10181_v8, %v8636_v13  ;;  %v8124_v16 = vld [vmem:[%s16539_s1 + $0x1e0] sm:$0xf0] }
  0x84   : > { %v10265_v19 = vld [vmem:[%s16539_s1 + $0x85c] sm:$0xf0]  ;;  %16707 = vst [vmem:[#allocation21_spill] sm:$0xff] %v11300_v7  ;;  %v10245_v17 = vld [vmem:[%s16539_s1 + $0x7c4] sm:$0xf] }
  0x85   : > { %v8955_v21 = vor.u32 %v10265_v19, %v8954_v18  ;;  %v9722_v22 = vld [vmem:[%s16539_s1 + $0xe40] sm:$0xf]  ;;  %3816 = vmatpush.bf16.msrb.mxu2 %v9467_v20  ;;  %v8892_v18 = vld [vmem:[%s16539_s1 + $0x7e0] sm:$0xf0]  ;;  %v8127_v19 = vor.u32 %v10053_v14, %v8124_v16  ;;  %v7722_v16 = vld [vmem:[%s11030_s17 + $0x10] sm:$0xf] }
  0x86   : > { %v10457_v23 = vld [vmem:[%s16539_s1 + $0xe5c] sm:$0xf0]  ;;  %v8895_v20 = vor.u32 %v10245_v17, %v8892_v18  ;;  %v8060_v63 = vld [vmem:[%s16539_s1 + $0x160] sm:$0xf0]  ;;  %v9955_v17 = vld [vmem:[%s11030_s17 + $0x2c] sm:$0xf0] }
  0x87   : > { %v9210_v24 = vld [vmem:[%s16539_s1 + $0xa40] sm:$0xf]  ;;  %v9723_v25 = vor.u32 %v10457_v23, %v9722_v22  ;;  %3738 = vmatpush.bf16.msrb.mxu0 %v8955_v21  ;;  %v10117_v21 = vld [vmem:[%s16539_s1 + $0x3c4] sm:$0xf]  ;;  %v8063_v1 = vor.u32 %v10037_v62, %v8060_v63  ;;  %v9951_v18 = vld [vmem:[%s11030_s17 + $0x14] sm:$0xf] }
  0x88   : > { %v10329_v26 = vld [vmem:[%s16539_s1 + $0xa5c] sm:$0xf0]  ;;  %v8380_v22 = vld [vmem:[%s16539_s1 + $0x3e0] sm:$0xf0]  ;;  %v9960_v62 = vld [vmem:[%s11030_s17 + $0x5c] sm:$0xf] }
  0x89   : > { %v9211_v27 = vor.u32 %v10329_v26, %v9210_v24  ;;  %3855 = vmatpush.bf16.msrb.mxu3 %v9723_v25  ;;  %v7802_v28 = vld [vmem:[%s11030_s17 + $0xc0] sm:$0xf]  ;;  %v10173_v23 = vld [vmem:[%s16539_s1 + $0x584] sm:$0xf]  ;;  %v8383_v24 = vor.u32 %v10117_v21, %v8380_v22  ;;  %v9956_v21 = vld [vmem:[%s11030_s17 + $0x34] sm:$0xf0] }
  0x8a   : > { %v9977_v29 = vld [vmem:[%s11030_s17 + $0xdc] sm:$0xf0]  ;;  %v8604_v25 = vld [vmem:[%s16539_s1 + $0x5a0] sm:$0xf0]  ;;  %v9952_v22 = vld [vmem:[%s11030_s17 + $0x1c] sm:$0xf] }
  0x8b   : > { %3777 = vmatpush.bf16.msrb.mxu1 %v9211_v27  ;;  %v11250_v40 = vor.u32 %v9977_v29, %v7802_v28  ;;  %v9434_v44 = vld [vmem:[%s16539_s1 + $0xc00] sm:$0xf]  ;;  %v10045_v26 = vld [vmem:[%s16539_s1 + $0x184] sm:$0xf]  ;;  %v8607_v28 = vor.u32 %v10173_v23, %v8604_v25  ;;  %v7732_v23 = vld [vmem:[%s11030_s17 + $0x38] sm:$0xf0] }
  0x8c   : > { %v10385_v45 = vld [vmem:[%s16539_s1 + $0xc1c] sm:$0xf0]  ;;  %3643 = vmatmul.bf16.gmra.mxu1 %v11296_v5  ;;  %v8092_v27 = vld [vmem:[%s16539_s1 + $0x1a0] sm:$0xf0]  ;;  %v7764_v63 = vld [vmem:[%s11030_s17 + $0x78] sm:$0xf0] }
  0x8d   : > { %16700 = vst [vmem:[#allocation14_spill] sm:$0xff] %v11250_v40  ;;  %v8922_v46 = vld [vmem:[%s16539_s1 + $0x800] sm:$0xf]  ;;  %v9435_v48 = vor.u32 %v10385_v45, %v9434_v44  ;;  %v8095_v29 = vor.u32 %v10045_v26, %v8092_v27  ;;  %v7868_v44 = vld [vmem:[%s11030_s17 + $0x160] sm:$0xf0]  ;;  %v11412_v27 = vor.u32 %v9952_v22, %v7732_v23 }
  0x8e   : > { %v10257_v49 = vld [vmem:[%s16539_s1 + $0x81c] sm:$0xf0]  ;;  %3682 = vmatmul.bf16.gmra.mxu2 %v11298_v6  ;;  %v7874_v45 = vld [vmem:[%s11030_s17 + $0x148] sm:$0xf]  ;;  %v10229_v2 = vld [vmem:[%s16539_s1 + $0x744] sm:$0xf] }
  0x8f   : > { %v9690_v50 = vld [vmem:[%s16539_s1 + $0xe00] sm:$0xf]  ;;  %v8923_v54 = vor.u32 %v10257_v49, %v8922_v46  ;;  %3817 = vmatpush.bf16.msrb.mxu2 %v9435_v48  ;;  %v9994_v46 = vld [vmem:[%s11030_s17 + $0x164] sm:$0xf0]  ;;  %v9990_v48 = vld [vmem:[%s11030_s17 + $0x14c] sm:$0xf] }
  0x90   : > { %v10449_v51 = vld [vmem:[%s16539_s1 + $0xe1c] sm:$0xf0]  ;;  %3721 = vmatmul.bf16.gmra.mxu3 %v11300_v7  ;;  %v7876_v49 = vld [vmem:[%s11030_s17 + $0x168] sm:$0xf0]  ;;  %v8828_v3 = vld [vmem:[%s16539_s1 + $0x760] sm:$0xf0] }
  0x91   : > { %3599 = vmatmul.bf16.gmra.mxu0 %v11250_v40  ;;  %v9691_v55 = vor.u32 %v10449_v51, %v9690_v50  ;;  %v9178_v56 = vld [vmem:[%s16539_s1 + $0xa00] sm:$0xf]  ;;  %v11358_v51 = vor.u32 %v9989_v35, %v7868_v44  ;;  %v10101_v8 = vld [vmem:[%s16539_s1 + $0x344] sm:$0xf]  ;;  %v8831_v13 = vor.u32 %v10229_v2, %v8828_v3  ;;  %16715 = vst [vmem:[#allocation29_spill] sm:$0xff] %v11412_v27 }
  0x92   : > { %v10321_v58 = vld [vmem:[%s16539_s1 + $0xa1c] sm:$0xf0]  ;;  %3739 = vmatpush.bf16.msrb.mxu0 %v8923_v54  ;;  %v11360_v54 = vor.u32 %v9994_v46, %v7874_v45  ;;  %v8316_v14 = vld [vmem:[%s16539_s1 + $0x360] sm:$0xf0]  ;;  %v9959_v45 = vld [vmem:[%s11030_s17 + $0x54] sm:$0xf]  ;;  %v11456_v3 = vor.u32 %v9960_v62, %v7764_v63 }
  0x93   : > { %v9179_v59 = vor.u32 %v10321_v58, %v9178_v56  ;;  %3856 = vmatpush.bf16.msrb.mxu3 %v9691_v55  ;;  %v7834_v60 = vld [vmem:[%s11030_s17 + $0x100] sm:$0xf]  ;;  %3966 = vmatpush.bf16.msra.mxu2 %v8639_v15  ;;  %16709 = vst [vmem:[#allocation23_spill] sm:$0xff] %v11358_v51  ;;  %v11362_v55 = vor.u32 %v9990_v48, %v7876_v49  ;;  %v10109_v56 = vld [vmem:[%s16539_s1 + $0x384] sm:$0xf] }
  0x94   : > { %v9985_v61 = vld [vmem:[%s11030_s17 + $0x11c] sm:$0xf0]  ;;  %16710 = vst [vmem:[#allocation24_spill] sm:$0xff] %v11360_v54  ;;  %v8348_v58 = vld [vmem:[%s16539_s1 + $0x3a0] sm:$0xf0]  ;;  %v8319_v15 = vor.u32 %v10101_v8, %v8316_v14 }
  0x95   : > { %3778 = vmatpush.bf16.msrb.mxu1 %v9179_v59  ;;  %v11294_v4 = vor.u32 %v9985_v61, %v7834_v60  ;;  %v7866_v33 = vld [vmem:[%s11030_s17 + $0x140] sm:$0xf]  ;;  %16711 = vst [vmem:[#allocation25_spill] sm:$0xff] %v11362_v55  ;;  %v10165_v59 = vld [vmem:[%s16539_s1 + $0x544] sm:$0xf]  ;;  %v8351_v60 = vor.u32 %v10109_v56, %v8348_v58 }
  0x96   : > { %3888 = vmatpush.bf16.msra.mxu0 %v8127_v19  ;;  %v9993_v34 = vld [vmem:[%s11030_s17 + $0x15c] sm:$0xf0]  ;;  %v8572_v61 = vld [vmem:[%s16539_s1 + $0x560] sm:$0xf0]  ;;  %v7724_v19 = vld [vmem:[%s11030_s17 + $0x30] sm:$0xf0] }
  0x97   : > { %16704 = vst [vmem:[#allocation18_spill] sm:$0xff] %v11294_v4  ;;  %4005 = vmatpush.bf16.msra.mxu3 %v8895_v20  ;;  %3967 = vmatpush.bf16.msra.mxu2 %v8607_v28  ;;  %v11356_v50 = vor.u32 %v9993_v34, %v7866_v33  ;;  %v8575_v0 = vor.u32 %v10165_v59, %v8572_v61  ;;  %v7730_v20 = vld [vmem:[%s11030_s17 + $0x18] sm:$0xf]  ;;  %v7754_v28 = vld [vmem:[%s11030_s17 + $0x50] sm:$0xf] }
  0x98   : > { %v11408_v25 = vor.u32 %v9951_v18, %v7724_v19  ;;  %v11410_v26 = vor.u32 %v9956_v21, %v7730_v20  ;;  %v8543_v33 = vor.u32 %v10157_v30, %v8540_v31  ;;  %v8028_v34 = vld [vmem:[%s16539_s1 + $0x120] sm:$0xf0]  ;;  %v7756_v58 = vld [vmem:[%s11030_s17 + $0x70] sm:$0xf0]  ;;  %v7762_v59 = vld [vmem:[%s11030_s17 + $0x58] sm:$0xf] }
  0x99   : > { %3927 = vmatpush.bf16.msra.mxu1 %v8383_v24  ;;  %16708 = vst [vmem:[#allocation22_spill] sm:$0xff] %v11356_v50  ;;  %v11406_v24 = vor.u32 %v9955_v17, %v7722_v16  ;;  %v10221_v35 = vld [vmem:[%s16539_s1 + $0x704] sm:$0xf]  ;;  %v9967_v30 = vld [vmem:[%s11030_s17 + $0x94] sm:$0xf] }
  0x9a   : > { %3889 = vmatpush.bf16.msra.mxu0 %v8095_v29  ;;  %16713 = vst [vmem:[#allocation27_spill] sm:$0xff] %v11408_v25  ;;  %v9963_v29 = vld [vmem:[%s11030_s17 + $0x6c] sm:$0xf0]  ;;  %v8796_v44 = vld [vmem:[%s16539_s1 + $0x720] sm:$0xf0] }
  0x9b   : > { %4006 = vmatpush.bf16.msra.mxu3 %v8863_v32  ;;  %3968 = vmatpush.bf16.msra.mxu2 %v8575_v0  ;;  %16712 = vst [vmem:[#allocation26_spill] sm:$0xff] %v11406_v24  ;;  %v10029_v32 = vld [vmem:[%s16539_s1 + $0x104] sm:$0xf]  ;;  %v8799_v48 = vor.u32 %v10221_v35, %v8796_v44  ;;  %v11450_v0 = vor.u32 %v9963_v29, %v7754_v28  ;;  %v7786_v28 = vld [vmem:[%s11030_s17 + $0x90] sm:$0xf] }
  0x9c   : > { %3648 = vmatmul.bf16.gmra.mxu1 %v11358_v51  ;;  %16714 = vst [vmem:[#allocation28_spill] sm:$0xff] %v11410_v26  ;;  %v8031_v46 = vor.u32 %v10029_v32, %v8028_v34  ;;  %v10093_v49 = vld [vmem:[%s16539_s1 + $0x304] sm:$0xf]  ;;  %v9971_v29 = vld [vmem:[%s11030_s17 + $0xac] sm:$0xf0] }
  0x9d   : > { %3928 = vmatpush.bf16.msra.mxu1 %v8351_v60  ;;  %v8284_v56 = vld [vmem:[%s16539_s1 + $0x320] sm:$0xf0]  ;;  %v9964_v60 = vld [vmem:[%s11030_s17 + $0x74] sm:$0xf0]  ;;  %16716 = vst [vmem:[#allocation30_spill] sm:$0xff] %v11456_v3  ;;  %v11494_v44 = vor.u32 %v9971_v29, %v7786_v28 }
  0x9e   : > { %3687 = vmatmul.bf16.gmra.mxu2 %v11360_v54  ;;  %3890 = vmatpush.bf16.msra.mxu0 %v8063_v1  ;;  %v8287_v61 = vor.u32 %v10093_v49, %v8284_v56  ;;  %v11452_v1 = vor.u32 %v9959_v45, %v7756_v58  ;;  %v11454_v2 = vor.u32 %v9964_v60, %v7762_v59  ;;  %v10149_v8 = vld [vmem:[%s16539_s1 + $0x4c4] sm:$0xf]  ;;  %v7788_v31 = vld [vmem:[%s11030_s17 + $0xb0] sm:$0xf0]  ;;  %v7794_v32 = vld [vmem:[%s11030_s17 + $0x98] sm:$0xf] }
  0x9f   : > { %4007 = vmatpush.bf16.msra.mxu3 %v8831_v13  ;;  %3969 = vmatpush.bf16.msra.mxu2 %v8543_v33  ;;  %v8508_v13 = vld [vmem:[%s16539_s1 + $0x4e0] sm:$0xf0]  ;;  %v9972_v33 = vld [vmem:[%s11030_s17 + $0xb4] sm:$0xf0]  ;;  %v9968_v34 = vld [vmem:[%s11030_s17 + $0x9c] sm:$0xf] }
  0xa0   : > { %3726 = vmatmul.bf16.gmra.mxu3 %v11362_v55  ;;  %v10021_v14 = vld [vmem:[%s16539_s1 + $0xc4] sm:$0xf]  ;;  %v7796_v35 = vld [vmem:[%s11030_s17 + $0xb8] sm:$0xf0]  ;;  %16717 = vst [vmem:[#allocation31_spill] sm:$0xff] %v11494_v44 }
  0xa1   : > { %3604 = vmatmul.bf16.gmra.mxu0 %v11294_v4  ;;  %3929 = vmatpush.bf16.msra.mxu1 %v8319_v15  ;;  %v8511_v15 = vor.u32 %v10149_v8, %v8508_v13  ;;  %v7996_v16 = vld [vmem:[%s16539_s1 + $0xe0] sm:$0xf0]  ;;  %v11500_v56 = vor.u32 %v9968_v34, %v7796_v35 }
  0xa2   : > { %3891 = vmatpush.bf16.msra.mxu0 %v8031_v46  ;;  %v10213_v17 = vld [vmem:[%s16539_s1 + $0x6c4] sm:$0xf]  ;;  %v7999_v19 = vor.u32 %v10021_v14, %v7996_v16  ;;  %v11496_v46 = vor.u32 %v9967_v30, %v7788_v31 }
  0xa3   : > { %4008 = vmatpush.bf16.msra.mxu3 %v8799_v48  ;;  %v8764_v18 = vld [vmem:[%s16539_s1 + $0x6e0] sm:$0xf0]  ;;  %3970 = vmatpush.bf16.msra.mxu2 %v8511_v15  ;;  %v11498_v48 = vor.u32 %v9972_v33, %v7794_v32  ;;  %16720 = vst [vmem:[#allocation34_spill] sm:$0xff] %v11500_v56 }
  0xa4   : > { %v8767_v20 = vor.u32 %v10213_v17, %v8764_v18  ;;  %v10085_v21 = vld [vmem:[%s16539_s1 + $0x2c4] sm:$0xf]  ;;  %16718 = vst [vmem:[#allocation32_spill] sm:$0xff] %v11496_v46 }
  0xa5   : > { %3930 = vmatpush.bf16.msra.mxu1 %v8287_v61  ;;  %v8252_v22 = vld [vmem:[%s16539_s1 + $0x2e0] sm:$0xf0]  ;;  %16719 = vst [vmem:[#allocation33_spill] sm:$0xff] %v11498_v48 }
  0xa6   : > { %3892 = vmatpush.bf16.msra.mxu0 %v7999_v19  ;;  %v8255_v23 = vor.u32 %v10085_v21, %v8252_v22  ;;  %v10141_v59 = vld [vmem:[%s16539_s1 + $0x484] sm:$0xf] }
  0xa7   : > { %4009 = vmatpush.bf16.msra.mxu3 %v8767_v20  ;;  %v8476_v60 = vld [vmem:[%s16539_s1 + $0x4a0] sm:$0xf0] }
  0xa8   : > { %v10013_v61 = vld [vmem:[%s16539_s1 + $0x84] sm:$0xf]  ;;  %v8479_v62 = vor.u32 %v10141_v59, %v8476_v60  ;;  %v9975_v59 = vld [vmem:[%s11030_s17 + $0xd4] sm:$0xf] }
  0xa9   : > { %3931 = vmatpush.bf16.msra.mxu1 %v8255_v23  ;;  %v7964_v63 = vld [vmem:[%s16539_s1 + $0xa0] sm:$0xf0] }
  0xaa   : > { %v10205_v8 = vld [vmem:[%s16539_s1 + $0x684] sm:$0xf]  ;;  %v7967_v14 = vor.u32 %v10013_v61, %v7964_v63  ;;  %3971 = vmatpush.bf16.msra.mxu2 %v8479_v62  ;;  %v7820_v62 = vld [vmem:[%s11030_s17 + $0xf0] sm:$0xf0]  ;;  %v7826_v63 = vld [vmem:[%s11030_s17 + $0xd8] sm:$0xf] }
  0xab   : > { %v8732_v13 = vld [vmem:[%s16539_s1 + $0x6a0] sm:$0xf0] }
  0xac   : > { %3779 = vmatmul.bf16.vlgmr.msrb.gmra.mxu1 %v11408_v25  ;;  %v8735_v15 = vor.u32 %v10205_v8, %v8732_v13  ;;  %3893 = vmatpush.bf16.msra.mxu0 %v7967_v14  ;;  %v10077_v16 = vld [vmem:[%s16539_s1 + $0x284] sm:$0xf]  ;;  %v9980_v8 = vld [vmem:[%s11030_s17 + $0xf4] sm:$0xf0]  ;;  %v9976_v13 = vld [vmem:[%s11030_s17 + $0xdc] sm:$0xf] }
  0xad   : > { %v8220_v18 = vld [vmem:[%s16539_s1 + $0x2a0] sm:$0xf0]  ;;  %v7828_v14 = vld [vmem:[%s11030_s17 + $0xf8] sm:$0xf0] }
  0xae   : > { %3818 = vmatmul.bf16.vlgmr.msrb.gmra.mxu2 %v11410_v26  ;;  %4010 = vmatpush.bf16.msra.mxu3 %v8735_v15  ;;  %v8223_v22 = vor.u32 %v10077_v16, %v8220_v18  ;;  %v10133_v30 = vld [vmem:[%s16539_s1 + $0x444] sm:$0xf] }
  0xaf   : > { %v8444_v31 = vld [vmem:[%s16539_s1 + $0x460] sm:$0xf0] }
  0xb0   : > { %3857 = vmatmul.bf16.vlgmr.msrb.gmra.mxu3 %v11412_v27  ;;  %3932 = vmatpush.bf16.msra.mxu1 %v8223_v22  ;;  %v10005_v32 = vld [vmem:[%s16539_s1 + $0x44] sm:$0xf]  ;;  %v8447_v33 = vor.u32 %v10133_v30, %v8444_v31 }
  0xb1   : > { %3609 = vmatmul.bf16.gmra.mxu0 %v11356_v50  ;;  %v7932_v34 = vld [vmem:[%s16539_s1 + $0x60] sm:$0xf0] }
  0xb2   : > { %v10197_v35 = vld [vmem:[%s16539_s1 + $0x644] sm:$0xf]  ;;  %v7935_v60 = vor.u32 %v10005_v32, %v7932_v34  ;;  %3972 = vmatpush.bf16.msra.mxu2 %v8447_v33 }
  0xb3   : > { %v10069_v32 = vld [vmem:[%s16539_s1 + $0x244] sm:$0xf] }
  0xb4   : > { %3894 = vmatpush.bf16.msra.mxu0 %v7935_v60 }
  0xbc   : > { %3784 = vmatmul.bf16.gmra.mxu1 %v11452_v1 }
  0xbe   : > { %3823 = vmatmul.bf16.gmra.mxu2 %v11454_v2 }
  0xc0   : > { %3862 = vmatmul.bf16.gmra.mxu3 %v11456_v3 }
  0xc1   : > { %3740 = vmatmul.bf16.vlgmr.msrb.gmra.mxu0 %v11406_v24 }
  0xc9   : > { %v3624_v49 = vpop.f32.mrf.mxu1 }
  0xcc   : > { %3789 = vmatmul.bf16.gmra.mxu1 %v11496_v46 }
  0xce   : > { %3828 = vmatmul.bf16.gmra.mxu2 %v11498_v48 }
  0xd0   : > { %3867 = vmatmul.bf16.gmra.mxu3 %v11500_v56 }
  0xd1   : > { %3745 = vmatmul.bf16.gmra.mxu0 %v11450_v0  ;;  %v3663_v17 = vpop.f32.mrf.mxu2  ;;  %v3626_v23 = vpop.f32.mrf.mxu1 }
  0xd3   : > { %v3702_v20 = vpop.f32.mrf.mxu3 }
  0xd6   : > { %v3585_v45 = vpop.f32.mrf.mxu0 }
  0xd7   : > { %v3625_v58 = vadd.f32 %v3624_v49, %v3585_v45  ;;  %v8700_v45 = vld [vmem:[%s16539_s1 + $0x660] sm:$0xf0]  ;;  %v7818_v49 = vld [vmem:[%s11030_s17 + $0xd0] sm:$0xf] }
  0xd8   : > { %v8703_v61 = vor.u32 %v10197_v35, %v8700_v45 }
  0xd9   : > { %v3664_v19 = vadd.f32 %v3663_v17, %v3625_v58  ;;  %v9979_v58 = vld [vmem:[%s11030_s17 + $0xec] sm:$0xf0]  ;;  %v3665_v15 = vpop.f32.mrf.mxu2  ;;  %v3629_v22 = vpop.f32.mrf.mxu1 }
  0xda   : > { %4011 = vmatpush.bf16.msra.mxu3 %v8703_v61  ;;  %v11558_v16 = vor.u32 %v9979_v58, %v7818_v49  ;;  %v7850_v61 = vld [vmem:[%s11030_s17 + $0x110] sm:$0xf] }
  0xdb   : > { %v11530_v28 = vadd.f32 %v3702_v20, %v3664_v19  ;;  %v3704_v18 = vpop.f32.mrf.mxu3  ;;  %v11560_v20 = vor.u32 %v9975_v59, %v7820_v62  ;;  %v9987_v62 = vld [vmem:[%s11030_s17 + $0x12c] sm:$0xf0] }
  0xdc   : > { %16721 = vst [vmem:[#allocation35_spill] sm:$0xff] %v11558_v16 }
  0xdd   : > { %16722 = vst [vmem:[#allocation36_spill] sm:$0xff] %v11560_v20  ;;  %3794 = vmatmul.bf16.gmra.mxu1 %v11560_v20 }
  0xde   : > { %v3587_v21 = vpop.f32.mrf.mxu0 }
  0xdf   : > { %v3627_v29 = vadd.f32 %v3626_v23, %v3587_v21  ;;  %v11562_v21 = vor.u32 %v9980_v8, %v7826_v63  ;;  %v11564_v23 = vor.u32 %v9976_v13, %v7828_v14  ;;  %v10125_v63 = vld [vmem:[%s16539_s1 + $0x404] sm:$0xf] }
  0xe0   : > { %v8412_v8 = vld [vmem:[%s16539_s1 + $0x420] sm:$0xf0] }
  0xe1   : > { %3750 = vmatmul.bf16.gmra.mxu0 %v11494_v44  ;;  %v3666_v17 = vadd.f32 %v3665_v15, %v3627_v29  ;;  %16723 = vst [vmem:[#allocation37_spill] sm:$0xff] %v11562_v21  ;;  %v8188_v29 = vld [vmem:[%s16539_s1 + $0x260] sm:$0xf0]  ;;  %3833 = vmatmul.bf16.gmra.mxu2 %v11562_v21  ;;  %v3668_v34 = vpop.f32.mrf.mxu2  ;;  %v3631_v58 = vpop.f32.mrf.mxu1  ;;  %v8415_v14 = vor.u32 %v10125_v63, %v8412_v8 }
  0xe2   : > { %16724 = vst [vmem:[#allocation38_spill] sm:$0xff] %v11564_v23  ;;  %v8191_v33 = vor.u32 %v10069_v32, %v8188_v29  ;;  %3872 = vmatmul.bf16.gmra.mxu3 %v11564_v23  ;;  %v9997_v13 = vld [vmem:[%s16539_s1 + $0x4] sm:$0xf]  ;;  %v11612_v8 = vor.u32 %v9987_v62, %v7850_v61 }
  0xe3   : > { %v11566_v30 = vadd.f32 %v3704_v18, %v3666_v17  ;;  %v3707_v45 = vpop.f32.mrf.mxu3  ;;  %v7900_v15 = vld [vmem:[%s16539_s1 + $0x20] sm:$0xf0]  ;;  %3973 = vmatpush.bf16.msra.mxu2 %v8415_v14 }
  0xe4   : > { %3933 = vmatpush.bf16.msra.mxu1 %v8191_v33  ;;  %v10189_v17 = vld [vmem:[%s16539_s1 + $0x604] sm:$0xf]  ;;  %v7852_v33 = vld [vmem:[%s11030_s17 + $0x130] sm:$0xf0]  ;;  %16725 = vst [vmem:[#allocation39_spill] sm:$0xff] %v11612_v8 }
  0xe5   : > { %v8668_v18 = vld [vmem:[%s16539_s1 + $0x620] sm:$0xf0] }
  0xe6   : > { %v10061_v32 = vld [vmem:[%s16539_s1 + $0x204] sm:$0xf] }
  0xe7   : > { %v8156_v29 = vld [vmem:[%s16539_s1 + $0x220] sm:$0xf0] }
  0xe8   : > { %v9660_v61 = vld [vmem:[%s16539_s1 + $0xde0] sm:$0xf0] }
  0xe9   : > { %v3670_v63 = vpop.f32.mrf.mxu2  ;;  %v3634_v21 = vpop.f32.mrf.mxu1 }
  0xee   : > { %v3590_v19 = vpop.f32.mrf.mxu0 }
  0xef   : > { %v3630_v31 = vadd.f32 %v3629_v22, %v3590_v19  ;;  %v9983_v19 = vld [vmem:[%s11030_s17 + $0x114] sm:$0xf]  ;;  %v7903_v22 = vor.u32 %v9997_v13, %v7900_v15  ;;  %v3709_v15 = vpop.f32.mrf.mxu3 }
  0xf1   : > { %3755 = vmatmul.bf16.gmra.mxu0 %v11558_v16  ;;  %v3669_v35 = vadd.f32 %v3668_v34, %v3630_v31  ;;  %v8671_v31 = vor.u32 %v10189_v17, %v8668_v18  ;;  %v7858_v34 = vld [vmem:[%s11030_s17 + $0x118] sm:$0xf]  ;;  %v11614_v18 = vor.u32 %v9983_v19, %v7852_v33  ;;  %v9148_v19 = vld [vmem:[%s16539_s1 + $0x9e0] sm:$0xf0] }
  0xf2   : > { %3895 = vmatpush.bf16.msra.mxu0 %v7903_v22  ;;  %v10501_v22 = vld [vmem:[%s16539_s1 + $0xfc4] sm:$0xf] }
  0xf3   : > { %v11578_v59 = vadd.f32 %v3707_v45, %v3669_v35  ;;  %v9988_v35 = vld [vmem:[%s11030_s17 + $0x134] sm:$0xf0]  ;;  %v8159_v45 = vor.u32 %v10061_v32, %v8156_v29  ;;  %4012 = vmatpush.bf16.msra.mxu3 %v8671_v31  ;;  %16726 = vst [vmem:[#allocation40_spill] sm:$0xff] %v11614_v18  ;;  %3799 = vmatmul.bf16.gmra.mxu1 %v11614_v18  ;;  %v9916_v31 = vld [vmem:[%s16539_s1 + $0xfe0] sm:$0xf0]  ;;  %v3673_v29 = vpop.f32.mrf.mxu2 }
  0xf4   : > { %v11616_v23 = vor.u32 %v9988_v35, %v7858_v34  ;;  %v9919_v34 = vor.u32 %v10501_v22, %v9916_v31  ;;  %v9996_v22 = vld [vmem:[%s11030_s17 + $0x174] sm:$0xf0]  ;;  %v9992_v31 = vld [vmem:[%s11030_s17 + $0x15c] sm:$0xf] }
  0xf5   : > { %3934 = vmatpush.bf16.msra.mxu1 %v8159_v45 }
  0xf6   : > { %v3592_v49 = vpop.f32.mrf.mxu0  ;;  %16727 = vst [vmem:[#allocation41_spill] sm:$0xff] %v11616_v23  ;;  %3838 = vmatmul.bf16.gmra.mxu2 %v11616_v23 }
  0xf7   : > { %v3632_v60 = vadd.f32 %v3631_v58, %v3592_v49  ;;  %v9984_v49 = vld [vmem:[%s11030_s17 + $0x11c] sm:$0xf]  ;;  %v3712_v45 = vpop.f32.mrf.mxu3  ;;  %4161 = vmatpush.bf16.msrb.mxu3 %v9919_v34 }
  0xf8   : > { %v7860_v58 = vld [vmem:[%s11030_s17 + $0x138] sm:$0xf0] }
  0xf9   : > { %v3671_v13 = vadd.f32 %v3670_v63, %v3632_v60  ;;  %v11618_v20 = vor.u32 %v9984_v49, %v7860_v58  ;;  %v10437_v60 = vld [vmem:[%s16539_s1 + $0xdc4] sm:$0xf]  ;;  %v3636_v58 = vpop.f32.mrf.mxu1 }
  0xfa   : > { %v9663_v62 = vor.u32 %v10437_v60, %v9660_v61  ;;  %v7882_v60 = vld [vmem:[%s11030_s17 + $0x150] sm:$0xf] }
  0xfb   : > { %16728 = vst [vmem:[#allocation42_spill] sm:$0xff] %v11618_v20  ;;  %v11620_v14 = vadd.f32 %v3709_v15, %v3671_v13  ;;  %3877 = vmatmul.bf16.gmra.mxu3 %v11618_v20  ;;  %v10373_v15 = vld [vmem:[%s16539_s1 + $0xbc4] sm:$0xf]  ;;  %v9995_v61 = vld [vmem:[%s11030_s17 + $0x16c] sm:$0xf0] }
  0xfc   : > { %4122 = vmatpush.bf16.msrb.mxu2 %v9663_v62  ;;  %v7884_v62 = vld [vmem:[%s11030_s17 + $0x170] sm:$0xf0]  ;;  %v11660_v34 = vor.u32 %v9995_v61, %v7882_v60  ;;  %v10301_v60 = vld [vmem:[%s16539_s1 + $0x984] sm:$0xf] }
  0xfe   : > { %v3595_v17 = vpop.f32.mrf.mxu0  ;;  %16729 = vst [vmem:[#allocation43_spill] sm:$0xff] %v11660_v34 }
  0xff   : > { %v3635_v32 = vadd.f32 %v3634_v21, %v3595_v17  ;;  %v10309_v21 = vld [vmem:[%s16539_s1 + $0x9c4] sm:$0xf] }
 0x100   : > { %v9151_v33 = vor.u32 %v10309_v21, %v9148_v19  ;;  %v9404_v17 = vld [vmem:[%s16539_s1 + $0xbe0] sm:$0xf0]  ;;  %v9991_v21 = vld [vmem:[%s11030_s17 + $0x154] sm:$0xf]  ;;  %v7890_v19 = vld [vmem:[%s11030_s17 + $0x158] sm:$0xf] }
 0x101   : > { %3760 = vmatmul.bf16.gmra.mxu0 %v11612_v8  ;;  %v3674_v35 = vadd.f32 %v3673_v29, %v3635_v32  ;;  %v9407_v32 = vor.u32 %v10373_v15, %v9404_v17  ;;  %v7892_v29 = vld [vmem:[%s11030_s17 + $0x178] sm:$0xf0]  ;;  %v11664_v20 = vor.u32 %v9996_v22, %v7890_v19  ;;  %v3639_v15 = vpop.f32.mrf.mxu1  ;;  %v9884_v19 = vld [vmem:[%s16539_s1 + $0xfa0] sm:$0xf0] }
 0x102   : > { %4044 = vmatpush.bf16.msrb.mxu0 %v9151_v33  ;;  %v3675_v33 = vpop.f32.mrf.mxu2  ;;  %v11666_v17 = vor.u32 %v9992_v31, %v7892_v29  ;;  %v10365_v29 = vld [vmem:[%s16539_s1 + $0xb84] sm:$0xf] }
 0x103   : > { %v11644_v63 = vadd.f32 %v3712_v45, %v3674_v35  ;;  %4083 = vmatpush.bf16.msrb.mxu1 %v9407_v32  ;;  %v3714_v45 = vpop.f32.mrf.mxu3  ;;  %16731 = vst [vmem:[#allocation45_spill] sm:$0xff] %v11664_v20  ;;  %v10429_v32 = vld [vmem:[%s16539_s1 + $0xd84] sm:$0xf] }
 0x104   : > { %16732 = vst [vmem:[#allocation46_spill] sm:$0xff] %v11666_v17 }
 0x106   : > { %v3597_v49 = vpop.f32.mrf.mxu0  ;;  %3843 = vmatmul.bf16.gmra.mxu2 %v11664_v20 }
 0x107   : > { %v3637_v13 = vadd.f32 %v3636_v58, %v3597_v49  ;;  %v11662_v58 = vor.u32 %v9991_v21, %v7884_v62  ;;  %v9116_v21 = vld [vmem:[%s16539_s1 + $0x9a0] sm:$0xf0] }
 0x108   : > { %v10493_v62 = vld [vmem:[%s16539_s1 + $0xf84] sm:$0xf]  ;;  %v9119_v22 = vor.u32 %v10301_v60, %v9116_v21 }
 0x109   : > { %v3676_v35 = vadd.f32 %v3675_v33, %v3637_v13  ;;  %16730 = vst [vmem:[#allocation44_spill] sm:$0xff] %v11662_v58  ;;  %v9628_v13 = vld [vmem:[%s16539_s1 + $0xda0] sm:$0xf0]  ;;  %3804 = vmatmul.bf16.gmra.mxu1 %v11662_v58  ;;  %v9887_v31 = vor.u32 %v10493_v62, %v9884_v19 }
 0x10a   : > { %v9631_v61 = vor.u32 %v10429_v32, %v9628_v13  ;;  %v9372_v33 = vld [vmem:[%s16539_s1 + $0xba0] sm:$0xf0]  ;;  %4045 = vmatpush.bf16.msrb.mxu0 %v9119_v22  ;;  %v3641_v13 = vpop.f32.mrf.mxu1 }
 0x10b   : > { %v11668_v23 = vadd.f32 %v3714_v45, %v3676_v35  ;;  %3882 = vmatmul.bf16.gmra.mxu3 %v11666_v17  ;;  %v9375_v35 = vor.u32 %v10365_v29, %v9372_v33  ;;  %v3678_v45 = vpop.f32.mrf.mxu2  ;;  %v10421_v21 = vld [vmem:[%s16539_s1 + $0xd44] sm:$0xf] }
 0x10c   : > { %4123 = vmatpush.bf16.msrb.mxu2 %v9631_v61  ;;  %4162 = vmatpush.bf16.msrb.mxu3 %v9887_v31  ;;  %v9596_v62 = vld [vmem:[%s16539_s1 + $0xd60] sm:$0xf0] }
 0x10d   : > { %4084 = vmatpush.bf16.msrb.mxu1 %v9375_v35  ;;  %v10293_v19 = vld [vmem:[%s16539_s1 + $0x944] sm:$0xf] }
 0x10e   : > { %v3600_v49 = vpop.f32.mrf.mxu0  ;;  %v9084_v22 = vld [vmem:[%s16539_s1 + $0x960] sm:$0xf0] }
 0x10f   : > { %v3640_v18 = vadd.f32 %v3639_v15, %v3600_v49  ;;  %v3717_v15 = vpop.f32.mrf.mxu3  ;;  %v10485_v31 = vld [vmem:[%s16539_s1 + $0xf44] sm:$0xf]  ;;  %v9087_v33 = vor.u32 %v10293_v19, %v9084_v22 }
 0x110   : > { %v9852_v29 = vld [vmem:[%s16539_s1 + $0xf60] sm:$0xf0] }
 0x111   : > { %3765 = vmatmul.bf16.gmra.mxu0 %v11660_v34  ;;  %v3679_v49 = vadd.f32 %v3678_v45, %v3640_v18  ;;  %v9599_v18 = vor.u32 %v10421_v21, %v9596_v62  ;;  %v9855_v35 = vor.u32 %v10485_v31, %v9852_v29  ;;  %v10357_v17 = vld [vmem:[%s16539_s1 + $0xb44] sm:$0xf] }
 0x112   : > { %4046 = vmatpush.bf16.msrb.mxu0 %v9087_v33  ;;  %v9340_v19 = vld [vmem:[%s16539_s1 + $0xb60] sm:$0xf0] }
 0x113   : > { %v11698_v60 = vadd.f32 %v3717_v15, %v3679_v49  ;;  %4124 = vmatpush.bf16.msrb.mxu2 %v9599_v18  ;;  %4163 = vmatpush.bf16.msrb.mxu3 %v9855_v35  ;;  %v3680_v45 = vpop.f32.mrf.mxu2  ;;  %v9343_v18 = vor.u32 %v10357_v17, %v9340_v19  ;;  %v9564_v17 = vld [vmem:[%s16539_s1 + $0xd20] sm:$0xf0] }
 0x114   : > { %v9820_v19 = vld [vmem:[%s16539_s1 + $0xf20] sm:$0xf0] }
 0x115   : > { %4085 = vmatpush.bf16.msrb.mxu1 %v9343_v18 }
 0x116   : > { %v3602_v32 = vpop.f32.mrf.mxu0  ;;  %3974 = vmatmul.bf16.vlgmr.msra.gmra.mxu2 %v11057_v53 }
 0x117   : > { %v3642_v61 = vadd.f32 %v3641_v13, %v3602_v32  ;;  %v3719_v15 = vpop.f32.mrf.mxu3  ;;  %v3644_v13 = vpop.f32.mrf.mxu1 }
 0x119   : > { %v3681_v49 = vadd.f32 %v3680_v45, %v3642_v61  ;;  %3935 = vmatmul.bf16.vlgmr.msra.gmra.mxu1 %v11055_v52 }
 0x11b   : > { %v11718_v21 = vadd.f32 %v3719_v15, %v3681_v49  ;;  %4013 = vmatmul.bf16.vlgmr.msra.gmra.mxu3 %v11064_v57  ;;  %v3683_v61 = vpop.f32.mrf.mxu2  ;;  %v10413_v49 = vld [vmem:[%s16539_s1 + $0xd04] sm:$0xf] }
 0x11c   : > { %v10285_v15 = vld [vmem:[%s16539_s1 + $0x904] sm:$0xf] }
 0x11e   : > { %v3605_v32 = vpop.f32.mrf.mxu0 }
 0x11f   : > { %v3645_v62 = vadd.f32 %v3644_v13, %v3605_v32  ;;  %v3722_v31 = vpop.f32.mrf.mxu3  ;;  %v3646_v33 = vpop.f32.mrf.mxu1  ;;  %v9567_v32 = vor.u32 %v10413_v49, %v9564_v17  ;;  %v9052_v13 = vld [vmem:[%s16539_s1 + $0x920] sm:$0xf0] }
 0x120   : > { %v9055_v18 = vor.u32 %v10285_v15, %v9052_v13 }
 0x121   : > { %3896 = vmatmul.bf16.vlgmr.msra.gmra.mxu0 %v11050_v47  ;;  %v3684_v22 = vadd.f32 %v3683_v61, %v3645_v62  ;;  %v10477_v62 = vld [vmem:[%s16539_s1 + $0xf04] sm:$0xf]  ;;  %4125 = vmatpush.bf16.msrb.mxu2 %v9567_v32 }
 0x122   : > { %v9823_v61 = vor.u32 %v10477_v62, %v9820_v19  ;;  %4047 = vmatpush.bf16.msrb.mxu0 %v9055_v18  ;;  %v9532_v32 = vld [vmem:[%s16539_s1 + $0xce0] sm:$0xf0] }
 0x123   : > { %v11730_v35 = vadd.f32 %v3722_v31, %v3684_v22  ;;  %v10349_v22 = vld [vmem:[%s16539_s1 + $0xb04] sm:$0xf] }
 0x124   : > { %v9308_v31 = vld [vmem:[%s16539_s1 + $0xb20] sm:$0xf0]  ;;  %4164 = vmatpush.bf16.msrb.mxu3 %v9823_v61 }
 0x125   : > { %v9020_v62 = vld [vmem:[%s16539_s1 + $0x8e0] sm:$0xf0] }
 0x126   : > { %v3607_v29 = vpop.f32.mrf.mxu0  ;;  %3979 = vmatmul.bf16.gmra.mxu2 %v11142_v38  ;;  %v10469_v19 = vld [vmem:[%s16539_s1 + $0xec4] sm:$0xf] }
 0x127   : > { %v3647_v45 = vadd.f32 %v3646_v33, %v3607_v29  ;;  %v3685_v29 = vpop.f32.mrf.mxu2  ;;  %v9311_v33 = vor.u32 %v10349_v22, %v9308_v31  ;;  %v3724_v17 = vpop.f32.mrf.mxu3  ;;  %v9788_v18 = vld [vmem:[%s16539_s1 + $0xee0] sm:$0xf0] }
 0x128   : > { %v3649_v53 = vpop.f32.mrf.mxu1  ;;  %v9791_v31 = vor.u32 %v10469_v19, %v9788_v18  ;;  %v9276_v38 = vld [vmem:[%s16539_s1 + $0xae0] sm:$0xf0] }
 0x129   : > { %v3686_v49 = vadd.f32 %v3685_v29, %v3647_v45  ;;  %4086 = vmatpush.bf16.msrb.mxu1 %v9311_v33  ;;  %v10405_v45 = vld [vmem:[%s16539_s1 + $0xcc4] sm:$0xf] }
 0x12a   : > { %3940 = vmatmul.bf16.gmra.mxu1 %v11140_v37  ;;  %4165 = vmatpush.bf16.msrb.mxu3 %v9791_v31 }
 0x12b   : > { %v11756_v15 = vadd.f32 %v3724_v17, %v3686_v49  ;;  %4018 = vmatmul.bf16.gmra.mxu3 %v11144_v39  ;;  %v10341_v39 = vld [vmem:[%s16539_s1 + $0xac4] sm:$0xf] }
 0x12e   : > { %v3610_v57 = vpop.f32.mrf.mxu0 }
 0x12f   : > { %v3650_v13 = vadd.f32 %v3649_v53, %v3610_v57  ;;  %v10277_v53 = vld [vmem:[%s16539_s1 + $0x8c4] sm:$0xf]  ;;  %v9535_v57 = vor.u32 %v10405_v45, %v9532_v32  ;;  %v3688_v61 = vpop.f32.mrf.mxu2  ;;  %v3727_v33 = vpop.f32.mrf.mxu3 }
 0x130   : > { %v9023_v22 = vor.u32 %v10277_v53, %v9020_v62  ;;  %v3651_v17 = vpop.f32.mrf.mxu1  ;;  %v9279_v53 = vor.u32 %v10341_v39, %v9276_v38  ;;  %v10397_v38 = vld [vmem:[%s16539_s1 + $0xc84] sm:$0xf] }
 0x131   : > { %3901 = vmatmul.bf16.gmra.mxu0 %v11138_v36  ;;  %v3689_v29 = vadd.f32 %v3688_v61, %v3650_v13  ;;  %4126 = vmatpush.bf16.msrb.mxu2 %v9535_v57  ;;  %v9500_v39 = vld [vmem:[%s16539_s1 + $0xca0] sm:$0xf0] }
 0x132   : > { %4048 = vmatpush.bf16.msrb.mxu0 %v9023_v22  ;;  %4087 = vmatpush.bf16.msrb.mxu1 %v9279_v53 }
 0x133   : > { %v11780_v45 = vadd.f32 %v3727_v33, %v3689_v29  ;;  %v9503_v29 = vor.u32 %v10397_v38, %v9500_v39  ;;  %v8988_v33 = vld [vmem:[%s16539_s1 + $0x8a0] sm:$0xf0] }
 0x135   : > { %4127 = vmatpush.bf16.msrb.mxu2 %v9503_v29  ;;  %v9468_v29 = vld [vmem:[%s16539_s1 + $0xc60] sm:$0xf0] }
 0x136   : > { %v3612_v49 = vpop.f32.mrf.mxu0  ;;  %3984 = vmatmul.bf16.gmra.mxu2 %v11204_v11 }
 0x137   : > { %v3652_v32 = vadd.f32 %v3651_v17, %v3612_v49  ;;  %v3690_v62 = vpop.f32.mrf.mxu2  ;;  %v3729_v19 = vpop.f32.mrf.mxu3  ;;  %v10461_v49 = vld [vmem:[%s16539_s1 + $0xe84] sm:$0xf] }
 0x138   : > { %v3780_v61 = vpop.f32.mrf.mxu1  ;;  %v9756_v17 = vld [vmem:[%s16539_s1 + $0xea0] sm:$0xf0] }
 0x139   : > { %v3691_v13 = vadd.f32 %v3690_v62, %v3652_v32  ;;  %v9759_v53 = vor.u32 %v10461_v49, %v9756_v17  ;;  %v10333_v62 = vld [vmem:[%s16539_s1 + $0xa84] sm:$0xf] }
 0x13a   : > { %3945 = vmatmul.bf16.gmra.mxu1 %v11202_v10  ;;  %v10389_v17 = vld [vmem:[%s16539_s1 + $0xc44] sm:$0xf] }
 0x13b   : > { %v11789_v22 = vadd.f32 %v3729_v19, %v3691_v13  ;;  %4023 = vmatmul.bf16.gmra.mxu3 %v11206_v12  ;;  %v9244_v13 = vld [vmem:[%s16539_s1 + $0xaa0] sm:$0xf0] }
 0x13c   : > { %4166 = vmatpush.bf16.msrb.mxu3 %v9759_v53  ;;  %v10453_v53 = vld [vmem:[%s16539_s1 + $0xe44] sm:$0xf] }
 0x13e   : > { %v3741_v57 = vpop.f32.mrf.mxu0 }
 0x13f   : > { %v3742_v18 = vadd.f32 %v3741_v57, %v11530_v28  ;;  %v10269_v28 = vld [vmem:[%s16539_s1 + $0x884] sm:$0xf]  ;;  %v3819_v19 = vpop.f32.mrf.mxu2  ;;  %v9247_v57 = vor.u32 %v10333_v62, %v9244_v13 }
 0x140   : > { %v8991_v32 = vor.u32 %v10269_v28, %v8988_v33  ;;  %v3782_v28 = vpop.f32.mrf.mxu1  ;;  %v9724_v62 = vld [vmem:[%s16539_s1 + $0xe60] sm:$0xf0] }
 0x141   : > { %v3781_v31 = vadd.f32 %v3780_v61, %v3742_v18  ;;  %3906 = vmatmul.bf16.gmra.mxu0 %v11200_v9  ;;  %v3858_v61 = vpop.f32.mrf.mxu3  ;;  %4088 = vmatpush.bf16.msrb.mxu1 %v9247_v57 }
 0x142   : > { %4049 = vmatpush.bf16.msrb.mxu0 %v8991_v32  ;;  %v9471_v32 = vor.u32 %v10389_v17, %v9468_v29 }
 0x143   : > { %v3820_v18 = vadd.f32 %v3819_v19, %v3781_v31  ;;  %v10261_v31 = vld [vmem:[%s16539_s1 + $0x844] sm:$0xf]  ;;  %v9727_v19 = vor.u32 %v10453_v53, %v9724_v62 }
 0x144   : > { %4128 = vmatpush.bf16.msrb.mxu2 %v9471_v32 }
 0x145   : > { %v11820_v33 = vadd.f32 %v3858_v61, %v3820_v18  ;;  %4167 = vmatpush.bf16.msrb.mxu3 %v9727_v19 }
 0x146   : > { %v3743_v38 = vpop.f32.mrf.mxu0  ;;  %3989 = vmatmul.bf16.gmra.mxu2 %v11254_v42 }
 0x147   : > { %v3744_v39 = vadd.f32 %v3743_v38, %v11566_v30  ;;  %16733 = vst [vmem:[#allocation47_spill] sm:$0xff] %v11820_v33  ;;  %v8956_v30 = vld [vmem:[%s16539_s1 + $0x860] sm:$0xf0]  ;;  %v3821_v57 = vpop.f32.mrf.mxu2  ;;  %v10378_v33 = vld [vmem:[%s16539_s1 + $0xbe4] sm:$0xf0] }
 0x148   : > { %v8959_v13 = vor.u32 %v10261_v31, %v8956_v30  ;;  %v9212_v31 = vld [vmem:[%s16539_s1 + $0xa60] sm:$0xf0] }
 0x149   : > { %v3783_v49 = vadd.f32 %v3782_v28, %v3744_v39  ;;  %v3860_v61 = vpop.f32.mrf.mxu3  ;;  %v3785_v28 = vpop.f32.mrf.mxu1 }
 0x14a   : > { %4050 = vmatpush.bf16.msrb.mxu0 %v8959_v13  ;;  %3950 = vmatmul.bf16.gmra.mxu1 %v11252_v41 }
 0x14b   : > { %v3822_v18 = vadd.f32 %v3821_v57, %v3783_v49  ;;  %v10325_v49 = vld [vmem:[%s16539_s1 + $0xa44] sm:$0xf]  ;;  %4028 = vmatmul.bf16.gmra.mxu3 %v11256_v43 }
 0x14d   : > { %v11841_v17 = vadd.f32 %v3860_v61, %v3822_v18  ;;  %v10381_v61 = vld [vmem:[%s16539_s1 + $0xc04] sm:$0xf] }
 0x14e   : > { %v3746_v38 = vpop.f32.mrf.mxu0 }
 0x14f   : > { %v3747_v39 = vadd.f32 %v3746_v38, %v11578_v59  ;;  %16734 = vst [vmem:[#allocation48_spill] sm:$0xff] %v11841_v17  ;;  %v9215_v59 = vor.u32 %v10325_v49, %v9212_v31  ;;  %v3824_v32 = vpop.f32.mrf.mxu2  ;;  %v9436_v38 = vld [vmem:[%s16539_s1 + $0xc20] sm:$0xf0]  ;;  %v9410_v17 = vld [vmem:[%s16539_s1 + $0xbc8] sm:$0xf] }
 0x150   : > { %v9692_v49 = vld [vmem:[%s16539_s1 + $0xe20] sm:$0xf0] }
 0x151   : > { %v3786_v29 = vadd.f32 %v3785_v28, %v3747_v39  ;;  %3911 = vmatmul.bf16.gmra.mxu0 %v11250_v40  ;;  %4089 = vmatpush.bf16.msrb.mxu1 %v9215_v59  ;;  %v3863_v53 = vpop.f32.mrf.mxu3  ;;  %v3787_v19 = vpop.f32.mrf.mxu1  ;;  %v10253_v39 = vld [vmem:[%s16539_s1 + $0x804] sm:$0xf]  ;;  %v9439_v28 = vor.u32 %v10381_v61, %v9436_v38 }
 0x153   : > { %v3825_v30 = vadd.f32 %v3824_v32, %v3786_v29  ;;  %v10445_v29 = vld [vmem:[%s16539_s1 + $0xe04] sm:$0xf]  ;;  %4129 = vmatpush.bf16.msrb.mxu2 %v9439_v28  ;;  %v8130_v28 = vld [vmem:[%s16539_s1 + $0x1c8] sm:$0xf] }
 0x154   : > { %v9695_v59 = vor.u32 %v10445_v29, %v9692_v49  ;;  %v10317_v32 = vld [vmem:[%s16539_s1 + $0xa04] sm:$0xf] }
 0x155   : > { %v11854_v57 = vadd.f32 %v3863_v53, %v3825_v30  ;;  %v9180_v30 = vld [vmem:[%s16539_s1 + $0xa20] sm:$0xf0] }
 0x156   : > { %v3748_v62 = vpop.f32.mrf.mxu0  ;;  %4168 = vmatpush.bf16.msrb.mxu3 %v9695_v59  ;;  %3994 = vmatmul.bf16.gmra.mxu2 %v11298_v6  ;;  %v8898_v59 = vld [vmem:[%s16539_s1 + $0x7c8] sm:$0xf] }
 0x157   : > { %v3749_v13 = vadd.f32 %v3748_v62, %v11620_v14  ;;  %16735 = vst [vmem:[#allocation49_spill] sm:$0xff] %v11854_v57  ;;  %v8924_v14 = vld [vmem:[%s16539_s1 + $0x820] sm:$0xf0]  ;;  %v3826_v53 = vpop.f32.mrf.mxu2  ;;  %v9183_v62 = vor.u32 %v10317_v32, %v9180_v30  ;;  %v10250_v32 = vld [vmem:[%s16539_s1 + $0x7e4] sm:$0xf0] }
 0x158   : > { %v8927_v31 = vor.u32 %v10253_v39, %v8924_v14 }
 0x159   : > { %v3788_v18 = vadd.f32 %v3787_v19, %v3749_v13  ;;  %v3865_v19 = vpop.f32.mrf.mxu3  ;;  %v3790_v39 = vpop.f32.mrf.mxu1  ;;  %4090 = vmatpush.bf16.msrb.mxu1 %v9183_v62  ;;  %v8899_v62 = vor.u32 %v10250_v32, %v8898_v59 }
 0x15a   : > { %4051 = vmatpush.bf16.msrb.mxu0 %v8927_v31  ;;  %3955 = vmatmul.bf16.gmra.mxu1 %v11296_v5  ;;  %v10058_v31 = vld [vmem:[%s16539_s1 + $0x1e4] sm:$0xf0] }
 0x15b   : > { %v3827_v13 = vadd.f32 %v3826_v53, %v3788_v18  ;;  %4033 = vmatmul.bf16.gmra.mxu3 %v11300_v7  ;;  %v8642_v18 = vld [vmem:[%s16539_s1 + $0x5c8] sm:$0xf]  ;;  %v8131_v53 = vor.u32 %v10058_v31, %v8130_v28 }
 0x15c   : > { %4317 = vmatpush.bf16.msra.mxu3 %v8899_v62  ;;  %v10122_v28 = vld [vmem:[%s16539_s1 + $0x3e4] sm:$0xf0] }
 0x15d   : > { %v11881_v14 = vadd.f32 %v3865_v19, %v3827_v13 }
 0x15e   : > { %v3751_v61 = vpop.f32.mrf.mxu0  ;;  %4200 = vmatpush.bf16.msra.mxu0 %v8131_v53 }
 0x15f   : > { %v3752_v38 = vadd.f32 %v3751_v61, %v11644_v63  ;;  %16736 = vst [vmem:[#allocation50_spill] sm:$0xff] %v11881_v14  ;;  %v10186_v63 = vld [vmem:[%s16539_s1 + $0x5e4] sm:$0xf0]  ;;  %v3829_v30 = vpop.f32.mrf.mxu2 }
 0x160   : > { %v8643_v49 = vor.u32 %v10186_v63, %v8642_v18  ;;  %v8386_v14 = vld [vmem:[%s16539_s1 + $0x3c8] sm:$0xf] }
 0x161   : > { %v3791_v29 = vadd.f32 %v3790_v39, %v3752_v38  ;;  %3916 = vmatmul.bf16.gmra.mxu0 %v11294_v4  ;;  %v3868_v19 = vpop.f32.mrf.mxu3  ;;  %v3792_v39 = vpop.f32.mrf.mxu1 }
 0x162   : > { %4278 = vmatpush.bf16.msra.mxu2 %v8643_v49 }
 0x163   : > { %v3830_v13 = vadd.f32 %v3829_v30, %v3791_v29  ;;  %v8387_v29 = vor.u32 %v10122_v28, %v8386_v14  ;;  %v8610_v14 = vld [vmem:[%s16539_s1 + $0x588] sm:$0xf] }
 0x165   : > { %v11906_v18 = vadd.f32 %v3868_v19, %v3830_v13  ;;  %4239 = vmatpush.bf16.msra.mxu1 %v8387_v29  ;;  %v10178_v13 = vld [vmem:[%s16539_s1 + $0x5a4] sm:$0xf0] }
 0x166   : > { %v3753_v61 = vpop.f32.mrf.mxu0  ;;  %3999 = vmatmul.bf16.gmra.mxu2 %v11360_v54  ;;  %v8611_v19 = vor.u32 %v10178_v13, %v8610_v14  ;;  %v8354_v29 = vld [vmem:[%s16539_s1 + $0x388] sm:$0xf] }
 0x167   : > { %v3754_v38 = vadd.f32 %v3753_v61, %v11668_v23  ;;  %16737 = vst [vmem:[#allocation51_spill] sm:$0xff] %v11906_v18  ;;  %v3831_v31 = vpop.f32.mrf.mxu2  ;;  %v10050_v61 = vld [vmem:[%s16539_s1 + $0x1a4] sm:$0xf0] }
 0x168   : > { %4279 = vmatpush.bf16.msra.mxu2 %v8611_v19  ;;  %v10170_v19 = vld [vmem:[%s16539_s1 + $0x564] sm:$0xf0] }
 0x169   : > { %v3793_v63 = vadd.f32 %v3792_v39, %v3754_v38  ;;  %v3870_v59 = vpop.f32.mrf.mxu3  ;;  %v3795_v30 = vpop.f32.mrf.mxu1  ;;  %v8866_v38 = vld [vmem:[%s16539_s1 + $0x788] sm:$0xf] }
 0x16a   : > { %3960 = vmatmul.bf16.gmra.mxu1 %v11358_v51  ;;  %v10242_v39 = vld [vmem:[%s16539_s1 + $0x7a4] sm:$0xf0] }
 0x16b   : > { %v3832_v49 = vadd.f32 %v3831_v31, %v3793_v63  ;;  %4038 = vmatmul.bf16.gmra.mxu3 %v11362_v55  ;;  %v8867_v28 = vor.u32 %v10242_v39, %v8866_v38  ;;  %v10114_v31 = vld [vmem:[%s16539_s1 + $0x3a4] sm:$0xf0] }
 0x16c   : > { %v8578_v38 = vld [vmem:[%s16539_s1 + $0x548] sm:$0xf] }
 0x16d   : > { %v11915_v53 = vadd.f32 %v3870_v59, %v3832_v49  ;;  %v8355_v59 = vor.u32 %v10114_v31, %v8354_v29  ;;  %4318 = vmatpush.bf16.msra.mxu3 %v8867_v28  ;;  %v8579_v39 = vor.u32 %v10170_v19, %v8578_v38  ;;  %v10234_v28 = vld [vmem:[%s16539_s1 + $0x764] sm:$0xf0] }
 0x16e   : > { %v3756_v23 = vpop.f32.mrf.mxu0  ;;  %v10106_v19 = vld [vmem:[%s16539_s1 + $0x364] sm:$0xf0] }
 0x16f   : > { %v3757_v32 = vadd.f32 %v3756_v23, %v11698_v60  ;;  %16738 = vst [vmem:[#allocation52_spill] sm:$0xff] %v11915_v53  ;;  %v8098_v60 = vld [vmem:[%s16539_s1 + $0x188] sm:$0xf]  ;;  %v3834_v49 = vpop.f32.mrf.mxu2  ;;  %4240 = vmatpush.bf16.msra.mxu1 %v8355_v59  ;;  %4280 = vmatpush.bf16.msra.mxu2 %v8579_v39  ;;  %v16750_v53 = vld [vmem:[#allocation42_spill] sm:$0xff] }
 0x170   : > { %v8099_v63 = vor.u32 %v10050_v61, %v8098_v60 }
 0x171   : > { %v3796_v62 = vadd.f32 %v3795_v30, %v3757_v32  ;;  %3921 = vmatmul.bf16.gmra.mxu0 %v11356_v50  ;;  %v3873_v32 = vpop.f32.mrf.mxu3  ;;  %v3797_v13 = vpop.f32.mrf.mxu1 }
 0x172   : > { %4201 = vmatpush.bf16.msra.mxu0 %v8099_v63  ;;  %v8834_v63 = vld [vmem:[%s16539_s1 + $0x748] sm:$0xf] }
 0x173   : > { %v3835_v23 = vadd.f32 %v3834_v49, %v3796_v62  ;;  %v8066_v62 = vld [vmem:[%s16539_s1 + $0x148] sm:$0xf]  ;;  %v8835_v31 = vor.u32 %v10234_v28, %v8834_v63 }
 0x175   : > { %v11946_v60 = vadd.f32 %v3873_v32, %v3835_v23  ;;  %4319 = vmatpush.bf16.msra.mxu3 %v8835_v31 }
 0x176   : > { %v3758_v30 = vpop.f32.mrf.mxu0  ;;  %4130 = vmatmul.bf16.vlgmr.msrb.gmra.mxu2 %v11410_v26 }
 0x177   : > { %v3759_v14 = vadd.f32 %v3758_v30, %v11718_v21  ;;  %16739 = vst [vmem:[#allocation53_spill] sm:$0xff] %v11946_v60  ;;  %v10042_v21 = vld [vmem:[%s16539_s1 + $0x164] sm:$0xf0]  ;;  %v3836_v49 = vpop.f32.mrf.mxu2 }
 0x178   : > { %v8067_v29 = vor.u32 %v10042_v21, %v8066_v62 }
 0x179   : > { %v3798_v61 = vadd.f32 %v3797_v13, %v3759_v14  ;;  %v3875_v23 = vpop.f32.mrf.mxu3  ;;  %v3800_v14 = vpop.f32.mrf.mxu1 }
 0x17a   : > { %4202 = vmatpush.bf16.msra.mxu0 %v8067_v29  ;;  %4091 = vmatmul.bf16.vlgmr.msrb.gmra.mxu1 %v11408_v25 }
 0x17b   : > { %v3837_v59 = vadd.f32 %v3836_v49, %v3798_v61  ;;  %v8322_v61 = vld [vmem:[%s16539_s1 + $0x348] sm:$0xf]  ;;  %4169 = vmatmul.bf16.vlgmr.msrb.gmra.mxu3 %v11412_v27 }
 0x17c   : > { %v8546_v49 = vld [vmem:[%s16539_s1 + $0x508] sm:$0xf] }
 0x17d   : > { %v11967_v13 = vadd.f32 %v3875_v23, %v3837_v59  ;;  %v10162_v59 = vld [vmem:[%s16539_s1 + $0x524] sm:$0xf0] }
 0x17e   : > { %v3761_v32 = vpop.f32.mrf.mxu0  ;;  %v8034_v23 = vld [vmem:[%s16539_s1 + $0x108] sm:$0xf] }
 0x17f   : > { %v3762_v30 = vadd.f32 %v3761_v32, %v11730_v35  ;;  %16740 = vst [vmem:[#allocation54_spill] sm:$0xff] %v11967_v13  ;;  %v8323_v35 = vor.u32 %v10106_v19, %v8322_v61  ;;  %v3839_v62 = vpop.f32.mrf.mxu2 }
 0x181   : > { %v3801_v38 = vadd.f32 %v3800_v14, %v3762_v30  ;;  %4052 = vmatmul.bf16.vlgmr.msrb.gmra.mxu0 %v11406_v24  ;;  %4241 = vmatpush.bf16.msra.mxu1 %v8323_v35  ;;  %v3878_v21 = vpop.f32.mrf.mxu3  ;;  %v3802_v29 = vpop.f32.mrf.mxu1  ;;  %v8547_v30 = vor.u32 %v10162_v59, %v8546_v49  ;;  %v8802_v14 = vld [vmem:[%s16539_s1 + $0x708] sm:$0xf] }
 0x182   : > { %v8290_v35 = vld [vmem:[%s16539_s1 + $0x308] sm:$0xf] }
 0x183   : > { %v3840_v39 = vadd.f32 %v3839_v62, %v3801_v38  ;;  %v10226_v38 = vld [vmem:[%s16539_s1 + $0x724] sm:$0xf0]  ;;  %4281 = vmatpush.bf16.msra.mxu2 %v8547_v30 }
 0x184   : > { %v8803_v19 = vor.u32 %v10226_v38, %v8802_v14  ;;  %v10098_v62 = vld [vmem:[%s16539_s1 + $0x324] sm:$0xf0] }
 0x185   : > { %v11980_v31 = vadd.f32 %v3878_v21, %v3840_v39  ;;  %v8291_v39 = vor.u32 %v10098_v62, %v8290_v35  ;;  %v8002_v30 = vld [vmem:[%s16539_s1 + $0xc8] sm:$0xf] }
 0x186   : > { %v3763_v63 = vpop.f32.mrf.mxu0  ;;  %4320 = vmatpush.bf16.msra.mxu3 %v8803_v19  ;;  %4135 = vmatmul.bf16.gmra.mxu2 %v11454_v2  ;;  %v10026_v38 = vld [vmem:[%s16539_s1 + $0xe4] sm:$0xf0] }
 0x187   : > { %v3764_v28 = vadd.f32 %v3763_v63, %v11756_v15  ;;  %16741 = vst [vmem:[#allocation55_spill] sm:$0xff] %v11980_v31  ;;  %v10034_v15 = vld [vmem:[%s16539_s1 + $0x124] sm:$0xf0]  ;;  %v3841_v21 = vpop.f32.mrf.mxu2  ;;  %4242 = vmatpush.bf16.msra.mxu1 %v8291_v39  ;;  %v8003_v62 = vor.u32 %v10026_v38, %v8002_v30 }
 0x188   : > { %v8035_v61 = vor.u32 %v10034_v15, %v8034_v23  ;;  %v10218_v19 = vld [vmem:[%s16539_s1 + $0x6e4] sm:$0xf0] }
 0x189   : > { %v3803_v32 = vadd.f32 %v3802_v29, %v3764_v28  ;;  %v3880_v28 = vpop.f32.mrf.mxu3  ;;  %v3805_v59 = vpop.f32.mrf.mxu1 }
 0x18a   : > { %4203 = vmatpush.bf16.msra.mxu0 %v8035_v61  ;;  %4096 = vmatmul.bf16.gmra.mxu1 %v11452_v1  ;;  %v8770_v61 = vld [vmem:[%s16539_s1 + $0x6c8] sm:$0xf] }
 0x18b   : > { %v3842_v63 = vadd.f32 %v3841_v21, %v3803_v32  ;;  %4174 = vmatmul.bf16.gmra.mxu3 %v11456_v3  ;;  %v8514_v32 = vld [vmem:[%s16539_s1 + $0x4c8] sm:$0xf]  ;;  %v8771_v39 = vor.u32 %v10218_v19, %v8770_v61 }
 0x18d   : > { %v12007_v23 = vadd.f32 %v3880_v28, %v3842_v63  ;;  %4321 = vmatpush.bf16.msra.mxu3 %v8771_v39  ;;  %v8482_v39 = vld [vmem:[%s16539_s1 + $0x488] sm:$0xf] }
 0x18e   : > { %v3766_v29 = vpop.f32.mrf.mxu0  ;;  %4204 = vmatpush.bf16.msra.mxu0 %v8003_v62 }
 0x18f   : > { %v3767_v49 = vadd.f32 %v3766_v29, %v11780_v45  ;;  %16742 = vst [vmem:[#allocation56_spill] sm:$0xff] %v12007_v23  ;;  %v10154_v45 = vld [vmem:[%s16539_s1 + $0x4e4] sm:$0xf0]  ;;  %v3844_v35 = vpop.f32.mrf.mxu2 }
 0x190   : > { %v8515_v14 = vor.u32 %v10154_v45, %v8514_v32  ;;  %v8258_v32 = vld [vmem:[%s16539_s1 + $0x2c8] sm:$0xf] }
 0x191   : > { %v3806_v15 = vadd.f32 %v3805_v59, %v3767_v49  ;;  %4057 = vmatmul.bf16.gmra.mxu0 %v11450_v0  ;;  %v3883_v63 = vpop.f32.mrf.mxu3  ;;  %v3807_v49 = vpop.f32.mrf.mxu1  ;;  %v10090_v45 = vld [vmem:[%s16539_s1 + $0x2e4] sm:$0xf0] }
 0x192   : > { %4282 = vmatpush.bf16.msra.mxu2 %v8515_v14 }
 0x193   : > { %v3845_v21 = vadd.f32 %v3844_v35, %v3806_v15  ;;  %v8259_v15 = vor.u32 %v10090_v45, %v8258_v32  ;;  %v10210_v32 = vld [vmem:[%s16539_s1 + $0x6a4] sm:$0xf0] }
 0x195   : > { %v12032_v59 = vadd.f32 %v3883_v63, %v3845_v21  ;;  %4243 = vmatpush.bf16.msra.mxu1 %v8259_v15  ;;  %v10146_v21 = vld [vmem:[%s16539_s1 + $0x4a4] sm:$0xf0] }
 0x196   : > { %v3768_v28 = vpop.f32.mrf.mxu0  ;;  %v7970_v63 = vld [vmem:[%s16539_s1 + $0x88] sm:$0xf]  ;;  %4140 = vmatmul.bf16.gmra.mxu2 %v11498_v48 }
 0x197   : > { %v3769_v29 = vadd.f32 %v3768_v28, %v11789_v22  ;;  %16743 = vst [vmem:[#allocation57_spill] sm:$0xff] %v12032_v59  ;;  %v3846_v38 = vpop.f32.mrf.mxu2  ;;  %v8483_v28 = vor.u32 %v10146_v21, %v8482_v39  ;;  %v8226_v15 = vld [vmem:[%s16539_s1 + $0x288] sm:$0xf] }
 0x199   : > { %v3808_v30 = vadd.f32 %v3807_v49, %v3769_v29  ;;  %v3885_v61 = vpop.f32.mrf.mxu3  ;;  %v3936_v19 = vpop.f32.mrf.mxu1  ;;  %v10018_v29 = vld [vmem:[%s16539_s1 + $0xa4] sm:$0xf0]  ;;  %4283 = vmatpush.bf16.msra.mxu2 %v8483_v28 }
 0x19a   : > { %v8738_v49 = vld [vmem:[%s16539_s1 + $0x688] sm:$0xf]  ;;  %4101 = vmatmul.bf16.gmra.mxu1 %v11496_v46  ;;  %v7971_v45 = vor.u32 %v10018_v29, %v7970_v63 }
 0x19b   : > { %v3847_v14 = vadd.f32 %v3846_v38, %v3808_v30  ;;  %v8739_v30 = vor.u32 %v10210_v32, %v8738_v49  ;;  %4179 = vmatmul.bf16.gmra.mxu3 %v11500_v56  ;;  %v10082_v38 = vld [vmem:[%s16539_s1 + $0x2a4] sm:$0xf0] }
 0x19c   : > { %4205 = vmatpush.bf16.msra.mxu0 %v7971_v45  ;;  %v8450_v29 = vld [vmem:[%s16539_s1 + $0x448] sm:$0xf] }
 0x19d   : > { %v12040_v35 = vadd.f32 %v3885_v61, %v3847_v14  ;;  %4322 = vmatpush.bf16.msra.mxu3 %v8739_v30  ;;  %v8227_v14 = vor.u32 %v10082_v38, %v8226_v15  ;;  %v10138_v49 = vld [vmem:[%s16539_s1 + $0x464] sm:$0xf0] }
 0x19e   : > { %v3897_v22 = vpop.f32.mrf.mxu0  ;;  %v7938_v32 = vld [vmem:[%s16539_s1 + $0x48] sm:$0xf] }
 0x19f   : > { %16744 = vst [vmem:[#allocation58_spill] sm:$0xff] %v12040_v35  ;;  %v3937_v62 = vadd.f32 %v3936_v19, %v3897_v22  ;;  %v3975_v61 = vpop.f32.mrf.mxu2  ;;  %4244 = vmatpush.bf16.msra.mxu1 %v8227_v14  ;;  %v10010_v45 = vld [vmem:[%s16539_s1 + $0x64] sm:$0xf0] }
 0x1a0   : > { %v8706_v30 = vld [vmem:[%s16539_s1 + $0x648] sm:$0xf]  ;;  %v7939_v38 = vor.u32 %v10010_v45, %v7938_v32  ;;  %v16745_v45 = vld [vmem:[#allocation36_spill] sm:$0xff] }
 0x1a1   : > { %4062 = vmatmul.bf16.gmra.mxu0 %v11494_v44  ;;  %v3976_v22 = vadd.f32 %v3975_v61, %v3937_v62  ;;  %v4014_v19 = vpop.f32.mrf.mxu3  ;;  %v3938_v21 = vpop.f32.mrf.mxu1  ;;  %v8451_v62 = vor.u32 %v10138_v49, %v8450_v29  ;;  %v10202_v15 = vld [vmem:[%s16539_s1 + $0x664] sm:$0xf0] }
 0x1a2   : > { %v8707_v14 = vor.u32 %v10202_v15, %v8706_v30  ;;  %4206 = vmatpush.bf16.msra.mxu0 %v7939_v38  ;;  %v8194_v35 = vld [vmem:[%s16539_s1 + $0x248] sm:$0xf]  ;;  %v16747_v30 = vld [vmem:[#allocation38_spill] sm:$0xff] }
 0x1a3   : > { %v12070_v63 = vadd.f32 %v4014_v19, %v3976_v22  ;;  %4284 = vmatpush.bf16.msra.mxu2 %v8451_v62  ;;  %v10074_v32 = vld [vmem:[%s16539_s1 + $0x264] sm:$0xf0] }
 0x1a4   : > { %4323 = vmatpush.bf16.msra.mxu3 %v8707_v14  ;;  %v8195_v62 = vor.u32 %v10074_v32, %v8194_v35  ;;  %v10130_v35 = vld [vmem:[%s16539_s1 + $0x424] sm:$0xf0] }
 0x1a5   : > { %v7906_v32 = vld [vmem:[%s16539_s1 + $0x8] sm:$0xf] }
 0x1a6   : > { %v3899_v39 = vpop.f32.mrf.mxu0  ;;  %4245 = vmatpush.bf16.msra.mxu1 %v8195_v62 }
 0x1a7   : > { %v3939_v28 = vadd.f32 %v3938_v21, %v3899_v39  ;;  %v3977_v61 = vpop.f32.mrf.mxu2 }
 0x1a9   : > { %v3978_v22 = vadd.f32 %v3977_v61, %v3939_v28  ;;  %v4016_v19 = vpop.f32.mrf.mxu3  ;;  %v3941_v21 = vpop.f32.mrf.mxu1  ;;  %v16746_v28 = vld [vmem:[#allocation37_spill] sm:$0xff] }
 0x1aa   : > { %4106 = vmatmul.bf16.gmra.mxu1 %v16745_v45  ;;  %4145 = vmatmul.bf16.gmra.mxu2 %v16746_v28 }
 0x1ab   : > { %v12090_v29 = vadd.f32 %v4016_v19, %v3978_v22  ;;  %4184 = vmatmul.bf16.gmra.mxu3 %v16747_v30 }
 0x1ae   : > { %v3902_v39 = vpop.f32.mrf.mxu0 }
 0x1af   : > { %v3942_v49 = vadd.f32 %v3941_v21, %v3902_v39  ;;  %v3980_v15 = vpop.f32.mrf.mxu2  ;;  %v8418_v21 = vld [vmem:[%s16539_s1 + $0x408] sm:$0xf] }
 0x1b0   : > { %v8419_v62 = vor.u32 %v10130_v35, %v8418_v21  ;;  %v10066_v21 = vld [vmem:[%s16539_s1 + $0x224] sm:$0xf0] }
 0x1b1   : > { %4067 = vmatmul.bf16.gmra.mxu0 %v11558_v16  ;;  %v3981_v38 = vadd.f32 %v3980_v15, %v3942_v49  ;;  %v4019_v14 = vpop.f32.mrf.mxu3  ;;  %v3943_v22 = vpop.f32.mrf.mxu1  ;;  %v10002_v49 = vld [vmem:[%s16539_s1 + $0x24] sm:$0xf0] }
 0x1b2   : > { %v8674_v15 = vld [vmem:[%s16539_s1 + $0x608] sm:$0xf]  ;;  %4285 = vmatpush.bf16.msra.mxu2 %v8419_v62 }
 0x1b3   : > { %v12102_v19 = vadd.f32 %v4019_v14, %v3981_v38  ;;  %v10194_v38 = vld [vmem:[%s16539_s1 + $0x624] sm:$0xf0]  ;;  %v7907_v14 = vor.u32 %v10002_v49, %v7906_v32 }
 0x1b4   : > { %v9666_v62 = vld [vmem:[%s16539_s1 + $0xdc8] sm:$0xf] }
 0x1b5   : > { %4207 = vmatpush.bf16.msra.mxu0 %v7907_v14 }
 0x1b6   : > { %v3904_v61 = vpop.f32.mrf.mxu0 }
 0x1b7   : > { %v3944_v39 = vadd.f32 %v3943_v22, %v3904_v61  ;;  %v8675_v61 = vor.u32 %v10194_v38, %v8674_v15  ;;  %v8162_v22 = vld [vmem:[%s16539_s1 + $0x208] sm:$0xf]  ;;  %v3982_v59 = vpop.f32.mrf.mxu2  ;;  %v16748_v15 = vld [vmem:[#allocation40_spill] sm:$0xff]  ;;  %v16749_v38 = vld [vmem:[#allocation41_spill] sm:$0xff] }
 0x1b8   : > { %v8163_v35 = vor.u32 %v10066_v21, %v8162_v22 }
 0x1b9   : > { %4324 = vmatpush.bf16.msra.mxu3 %v8675_v61  ;;  %v3983_v23 = vadd.f32 %v3982_v59, %v3944_v39  ;;  %v4021_v31 = vpop.f32.mrf.mxu3  ;;  %v3946_v60 = vpop.f32.mrf.mxu1  ;;  %v10442_v59 = vld [vmem:[%s16539_s1 + $0xde4] sm:$0xf0] }
 0x1ba   : > { %4246 = vmatpush.bf16.msra.mxu1 %v8163_v35  ;;  %4150 = vmatmul.bf16.gmra.mxu2 %v16749_v38  ;;  %v10506_v39 = vld [vmem:[%s16539_s1 + $0xfe4] sm:$0xf0] }
 0x1bb   : > { %v12128_v32 = vadd.f32 %v4021_v31, %v3983_v23  ;;  %4111 = vmatmul.bf16.gmra.mxu1 %v16748_v15  ;;  %4189 = vmatmul.bf16.gmra.mxu3 %v16750_v53  ;;  %v10314_v31 = vld [vmem:[%s16539_s1 + $0x9e4] sm:$0xf0] }
 0x1bc   : > { %v9922_v23 = vld [vmem:[%s16539_s1 + $0xfc8] sm:$0xf] }
 0x1bd   : > { %v9923_v22 = vor.u32 %v10506_v39, %v9922_v23 }
 0x1be   : > { %v3907_v13 = vpop.f32.mrf.mxu0 }
 0x1bf   : > { %v3947_v49 = vadd.f32 %v3946_v60, %v3907_v13  ;;  %v9154_v60 = vld [vmem:[%s16539_s1 + $0x9c8] sm:$0xf]  ;;  %v9667_v13 = vor.u32 %v10442_v59, %v9666_v62  ;;  %v3985_v14 = vpop.f32.mrf.mxu2  ;;  %4473 = vmatpush.bf16.msrb.mxu3 %v9923_v22 }
 0x1c0   : > { %v9155_v61 = vor.u32 %v10314_v31, %v9154_v60  ;;  %v9411_v60 = vor.u32 %v10378_v33, %v9410_v17  ;;  %v10434_v22 = vld [vmem:[%s16539_s1 + $0xda4] sm:$0xf0] }
 0x1c1   : > { %4072 = vmatmul.bf16.gmra.mxu0 %v11612_v8  ;;  %v3986_v21 = vadd.f32 %v3985_v14, %v3947_v49  ;;  %v4024_v35 = vpop.f32.mrf.mxu3  ;;  %4434 = vmatpush.bf16.msrb.mxu2 %v9667_v13  ;;  %v3948_v62 = vpop.f32.mrf.mxu1  ;;  %v9122_v33 = vld [vmem:[%s16539_s1 + $0x988] sm:$0xf] }
 0x1c2   : > { %4356 = vmatpush.bf16.msrb.mxu0 %v9155_v61  ;;  %4395 = vmatpush.bf16.msrb.mxu1 %v9411_v60 }
 0x1c3   : > { %v12152_v59 = vadd.f32 %v4024_v35, %v3986_v21  ;;  %v9890_v21 = vld [vmem:[%s16539_s1 + $0xf88] sm:$0xf] }
 0x1c4   : > { %v10498_v35 = vld [vmem:[%s16539_s1 + $0xfa4] sm:$0xf0] }
 0x1c5   : > { %v9891_v60 = vor.u32 %v10498_v35, %v9890_v21  ;;  %v9602_v21 = vld [vmem:[%s16539_s1 + $0xd48] sm:$0xf] }
 0x1c6   : > { %v3909_v18 = vpop.f32.mrf.mxu0  ;;  %v10426_v35 = vld [vmem:[%s16539_s1 + $0xd64] sm:$0xf0] }
 0x1c7   : > { %v3949_v57 = vadd.f32 %v3948_v62, %v3909_v18  ;;  %v3987_v49 = vpop.f32.mrf.mxu2  ;;  %v9634_v18 = vld [vmem:[%s16539_s1 + $0xd88] sm:$0xf]  ;;  %4474 = vmatpush.bf16.msrb.mxu3 %v9891_v60 }
 0x1c8   : > { %v9635_v17 = vor.u32 %v10434_v22, %v9634_v18  ;;  %v10298_v60 = vld [vmem:[%s16539_s1 + $0x964] sm:$0xf0] }
 0x1c9   : > { %v3988_v31 = vadd.f32 %v3987_v49, %v3949_v57  ;;  %v4026_v23 = vpop.f32.mrf.mxu3  ;;  %v3951_v39 = vpop.f32.mrf.mxu1  ;;  %v10306_v57 = vld [vmem:[%s16539_s1 + $0x9a4] sm:$0xf0]  ;;  %v16751_v49 = vld [vmem:[#allocation46_spill] sm:$0xff] }
 0x1ca   : > { %4155 = vmatmul.bf16.gmra.mxu2 %v11664_v20  ;;  %v9123_v62 = vor.u32 %v10306_v57, %v9122_v33 }
 0x1cb   : > { %v12160_v14 = vadd.f32 %v4026_v23, %v3988_v31  ;;  %4116 = vmatmul.bf16.gmra.mxu1 %v11662_v58  ;;  %4194 = vmatmul.bf16.gmra.mxu3 %v16751_v49  ;;  %v9378_v31 = vld [vmem:[%s16539_s1 + $0xb88] sm:$0xf] }
 0x1cc   : > { %4435 = vmatpush.bf16.msrb.mxu2 %v9635_v17  ;;  %v10370_v23 = vld [vmem:[%s16539_s1 + $0xba4] sm:$0xf0]  ;;  %4357 = vmatpush.bf16.msrb.mxu0 %v9123_v62 }
 0x1cd   : > { %v9090_v62 = vld [vmem:[%s16539_s1 + $0x948] sm:$0xf] }
 0x1ce   : > { %v3912_v13 = vpop.f32.mrf.mxu0  ;;  %v9346_v58 = vld [vmem:[%s16539_s1 + $0xb48] sm:$0xf] }
 0x1cf   : > { %v3952_v61 = vadd.f32 %v3951_v39, %v3912_v13  ;;  %v9379_v13 = vor.u32 %v10370_v23, %v9378_v31  ;;  %v3990_v39 = vpop.f32.mrf.mxu2  ;;  %v10490_v31 = vld [vmem:[%s16539_s1 + $0xf64] sm:$0xf0]  ;;  %v9091_v23 = vor.u32 %v10298_v60, %v9090_v62  ;;  %v16753_v60 = vld [vmem:[#allocation5_spill] sm:$0xff] }
 0x1d0   : > { %v10362_v62 = vld [vmem:[%s16539_s1 + $0xb64] sm:$0xf0] }
 0x1d1   : > { %4077 = vmatmul.bf16.gmra.mxu0 %v11660_v34  ;;  %v3991_v18 = vadd.f32 %v3990_v39, %v3952_v61  ;;  %v4029_v22 = vpop.f32.mrf.mxu3  ;;  %4396 = vmatpush.bf16.msrb.mxu1 %v9379_v13  ;;  %v3953_v33 = vpop.f32.mrf.mxu1  ;;  %v9603_v61 = vor.u32 %v10426_v35, %v9602_v21 }
 0x1d2   : > { %4358 = vmatpush.bf16.msrb.mxu0 %v9091_v23 }
 0x1d3   : > { %v12190_v57 = vadd.f32 %v4029_v22, %v3991_v18  ;;  %4436 = vmatpush.bf16.msrb.mxu2 %v9603_v61  ;;  %v9347_v61 = vor.u32 %v10362_v62, %v9346_v58  ;;  %v10418_v58 = vld [vmem:[%s16539_s1 + $0xd24] sm:$0xf0] }
 0x1d5   : > { %4397 = vmatpush.bf16.msrb.mxu1 %v9347_v61  ;;  %v9826_v61 = vld [vmem:[%s16539_s1 + $0xf08] sm:$0xf] }
 0x1d6   : > { %v3914_v20 = vpop.f32.mrf.mxu0 }
 0x1d7   : > { %v3954_v17 = vadd.f32 %v3953_v33, %v3914_v20  ;;  %v9858_v20 = vld [vmem:[%s16539_s1 + $0xf48] sm:$0xf]  ;;  %v3992_v39 = vpop.f32.mrf.mxu2 }
 0x1d8   : > { %v9859_v13 = vor.u32 %v10490_v31, %v9858_v20 }
 0x1d9   : > { %v3993_v18 = vadd.f32 %v3992_v39, %v3954_v17  ;;  %v4031_v22 = vpop.f32.mrf.mxu3  ;;  %v3956_v21 = vpop.f32.mrf.mxu1  ;;  %v16752_v17 = vld [vmem:[#allocation4_spill] sm:$0xff] }
 0x1da   : > { %4475 = vmatpush.bf16.msrb.mxu3 %v9859_v13  ;;  %4286 = vmatmul.bf16.vlgmr.msra.gmra.mxu2 %v16752_v17 }
 0x1db   : > { %v12210_v35 = vadd.f32 %v4031_v22, %v3993_v18  ;;  %4247 = vmatmul.bf16.vlgmr.msra.gmra.mxu1 %v11055_v52  ;;  %4325 = vmatmul.bf16.vlgmr.msra.gmra.mxu3 %v16753_v60 }
 0x1de   : > { %v3917_v33 = vpop.f32.mrf.mxu0 }
 0x1df   : > { %v3957_v49 = vadd.f32 %v3956_v21, %v3917_v33  ;;  %v3995_v20 = vpop.f32.mrf.mxu2  ;;  %v9570_v33 = vld [vmem:[%s16539_s1 + $0xd08] sm:$0xf] }
 0x1e0   : > { %v9058_v21 = vld [vmem:[%s16539_s1 + $0x908] sm:$0xf]  ;;  %v9571_v62 = vor.u32 %v10418_v58, %v9570_v33 }
 0x1e1   : > { %4208 = vmatmul.bf16.vlgmr.msra.gmra.mxu0 %v11050_v47  ;;  %v3996_v31 = vadd.f32 %v3995_v20, %v3957_v49  ;;  %v4034_v23 = vpop.f32.mrf.mxu3  ;;  %v3958_v39 = vpop.f32.mrf.mxu1  ;;  %v10290_v49 = vld [vmem:[%s16539_s1 + $0x924] sm:$0xf0] }
 0x1e2   : > { %v10482_v20 = vld [vmem:[%s16539_s1 + $0xf24] sm:$0xf0]  ;;  %4437 = vmatpush.bf16.msrb.mxu2 %v9571_v62 }
 0x1e3   : > { %v12222_v18 = vadd.f32 %v4034_v23, %v3996_v31  ;;  %v9059_v31 = vor.u32 %v10290_v49, %v9058_v21  ;;  %v9827_v23 = vor.u32 %v10482_v20, %v9826_v61  ;;  %v16754_v61 = vld [vmem:[#allocation8_spill] sm:$0xff]  ;;  %v16755_v20 = vld [vmem:[#allocation9_spill] sm:$0xff]  ;;  %v10410_v62 = vld [vmem:[%s16539_s1 + $0xce4] sm:$0xf0] }
 0x1e5   : > { %4359 = vmatpush.bf16.msrb.mxu0 %v9059_v31  ;;  %4476 = vmatpush.bf16.msrb.mxu3 %v9827_v23  ;;  %v10474_v31 = vld [vmem:[%s16539_s1 + $0xee4] sm:$0xf0] }
 0x1e6   : > { %v3919_v13 = vpop.f32.mrf.mxu0 }
 0x1e7   : > { %v3959_v22 = vadd.f32 %v3958_v39, %v3919_v13  ;;  %v9314_v13 = vld [vmem:[%s16539_s1 + $0xb08] sm:$0xf]  ;;  %v3997_v33 = vpop.f32.mrf.mxu2 }
 0x1e8   : > { %v10354_v39 = vld [vmem:[%s16539_s1 + $0xb24] sm:$0xf0] }
 0x1e9   : > { %v9315_v58 = vor.u32 %v10354_v39, %v9314_v13  ;;  %v3998_v60 = vadd.f32 %v3997_v33, %v3959_v22  ;;  %v4036_v17 = vpop.f32.mrf.mxu3  ;;  %v3961_v47 = vpop.f32.mrf.mxu1  ;;  %v9538_v22 = vld [vmem:[%s16539_s1 + $0xcc8] sm:$0xf] }
 0x1ea   : > { %4291 = vmatmul.bf16.gmra.mxu2 %v16754_v61 }
 0x1eb   : > { %4398 = vmatpush.bf16.msrb.mxu1 %v9315_v58  ;;  %v12248_v21 = vadd.f32 %v4036_v17, %v3998_v60  ;;  %4330 = vmatmul.bf16.gmra.mxu3 %v16755_v20  ;;  %v10282_v17 = vld [vmem:[%s16539_s1 + $0x8e4] sm:$0xf0] }
 0x1ec   : > { %4252 = vmatmul.bf16.gmra.mxu1 %v11140_v37  ;;  %v9794_v60 = vld [vmem:[%s16539_s1 + $0xec8] sm:$0xf] }
 0x1ed   : > { %v9795_v39 = vor.u32 %v10474_v31, %v9794_v60  ;;  %v9282_v37 = vld [vmem:[%s16539_s1 + $0xac8] sm:$0xf] }
 0x1ee   : > { %v3922_v52 = vpop.f32.mrf.mxu0 }
 0x1ef   : > { %v3962_v49 = vadd.f32 %v3961_v47, %v3922_v52  ;;  %v9026_v47 = vld [vmem:[%s16539_s1 + $0x8c8] sm:$0xf]  ;;  %v9539_v52 = vor.u32 %v10410_v62, %v9538_v22  ;;  %v4000_v23 = vpop.f32.mrf.mxu2  ;;  %4477 = vmatpush.bf16.msrb.mxu3 %v9795_v39 }
 0x1f0   : > { %v9027_v13 = vor.u32 %v10282_v17, %v9026_v47  ;;  %v10274_v39 = vld [vmem:[%s16539_s1 + $0x8a4] sm:$0xf0] }
 0x1f1   : > { %4213 = vmatmul.bf16.gmra.mxu0 %v11138_v36  ;;  %v4001_v33 = vadd.f32 %v4000_v23, %v3962_v49  ;;  %v4039_v58 = vpop.f32.mrf.mxu3  ;;  %4438 = vmatpush.bf16.msrb.mxu2 %v9539_v52  ;;  %v3963_v22 = vpop.f32.mrf.mxu1  ;;  %v10346_v36 = vld [vmem:[%s16539_s1 + $0xae4] sm:$0xf0] }
 0x1f2   : > { %4360 = vmatpush.bf16.msrb.mxu0 %v9027_v13  ;;  %v9283_v47 = vor.u32 %v10346_v36, %v9282_v37  ;;  %v9506_v36 = vld [vmem:[%s16539_s1 + $0xc88] sm:$0xf] }
 0x1f3   : > { %v12272_v62 = vadd.f32 %v4039_v58, %v4001_v33  ;;  %v10402_v37 = vld [vmem:[%s16539_s1 + $0xca4] sm:$0xf0] }
 0x1f4   : > { %4399 = vmatpush.bf16.msrb.mxu1 %v9283_v47  ;;  %v9762_v33 = vld [vmem:[%s16539_s1 + $0xe88] sm:$0xf] }
 0x1f5   : > { %v10466_v58 = vld [vmem:[%s16539_s1 + $0xea4] sm:$0xf0] }
 0x1f6   : > { %v3924_v20 = vpop.f32.mrf.mxu0  ;;  %v9763_v47 = vor.u32 %v10466_v58, %v9762_v33  ;;  %v9474_v58 = vld [vmem:[%s16539_s1 + $0xc48] sm:$0xf] }
 0x1f7   : > { %v3964_v61 = vadd.f32 %v3963_v22, %v3924_v20  ;;  %v4002_v17 = vpop.f32.mrf.mxu2 }
 0x1f8   : > { %4478 = vmatpush.bf16.msrb.mxu3 %v9763_v47  ;;  %v9730_v47 = vld [vmem:[%s16539_s1 + $0xe48] sm:$0xf] }
 0x1f9   : > { %v4003_v49 = vadd.f32 %v4002_v17, %v3964_v61  ;;  %v4041_v60 = vpop.f32.mrf.mxu3  ;;  %v4092_v23 = vpop.f32.mrf.mxu1  ;;  %v9507_v61 = vor.u32 %v10402_v37, %v9506_v36  ;;  %v9250_v17 = vld [vmem:[%s16539_s1 + $0xa88] sm:$0xf] }
 0x1fa   : > { %4296 = vmatmul.bf16.gmra.mxu2 %v11204_v11 }
 0x1fb   : > { %v12281_v13 = vadd.f32 %v4041_v60, %v4003_v49  ;;  %4335 = vmatmul.bf16.gmra.mxu3 %v11206_v12  ;;  %v10338_v49 = vld [vmem:[%s16539_s1 + $0xaa4] sm:$0xf0]  ;;  %4439 = vmatpush.bf16.msrb.mxu2 %v9507_v61 }
 0x1fc   : > { %4257 = vmatmul.bf16.gmra.mxu1 %v11202_v10  ;;  %v10394_v61 = vld [vmem:[%s16539_s1 + $0xc64] sm:$0xf0] }
 0x1fe   : > { %v4053_v52 = vpop.f32.mrf.mxu0 }
 0x1ff   : > { %v4054_v31 = vadd.f32 %v4053_v52, %v12070_v63  ;;  %v8994_v63 = vld [vmem:[%s16539_s1 + $0x888] sm:$0xf]  ;;  %v4131_v60 = vpop.f32.mrf.mxu2  ;;  %v9251_v52 = vor.u32 %v10338_v49, %v9250_v17 }
 0x200   : > { %v8995_v22 = vor.u32 %v10274_v39, %v8994_v63  ;;  %v10458_v17 = vld [vmem:[%s16539_s1 + $0xe64] sm:$0xf0] }
 0x201   : > { %v4093_v20 = vadd.f32 %v4092_v23, %v4054_v31  ;;  %4218 = vmatmul.bf16.gmra.mxu0 %v11200_v9  ;;  %v4170_v23 = vpop.f32.mrf.mxu3  ;;  %v4094_v63 = vpop.f32.mrf.mxu1  ;;  %4400 = vmatpush.bf16.msrb.mxu1 %v9251_v52 }
 0x202   : > { %4361 = vmatpush.bf16.msrb.mxu0 %v8995_v22  ;;  %v9475_v22 = vor.u32 %v10394_v61, %v9474_v58 }
 0x203   : > { %v4132_v31 = vadd.f32 %v4131_v60, %v4093_v20  ;;  %v8962_v20 = vld [vmem:[%s16539_s1 + $0x848] sm:$0xf]  ;;  %v9731_v60 = vor.u32 %v10458_v17, %v9730_v47 }
 0x204   : > { %4440 = vmatpush.bf16.msrb.mxu2 %v9475_v22 }
 0x205   : > { %v12312_v39 = vadd.f32 %v4170_v23, %v4132_v31  ;;  %4479 = vmatpush.bf16.msrb.mxu3 %v9731_v60 }
 0x206   : > { %v4055_v36 = vpop.f32.mrf.mxu0 }
 0x207   : > { %v4056_v37 = vadd.f32 %v4055_v36, %v12090_v29  ;;  %16756 = vst [vmem:[#allocation59_spill] sm:$0xff] %v12312_v39  ;;  %v10266_v29 = vld [vmem:[%s16539_s1 + $0x864] sm:$0xf0]  ;;  %v4133_v52 = vpop.f32.mrf.mxu2  ;;  %v10414_v39 = vld [vmem:[%s16539_s1 + $0xd0c] sm:$0xf] }
 0x208   : > { %v8963_v49 = vor.u32 %v10266_v29, %v8962_v20  ;;  %v10330_v20 = vld [vmem:[%s16539_s1 + $0xa64] sm:$0xf0] }
 0x209   : > { %v4095_v33 = vadd.f32 %v4094_v63, %v4056_v37  ;;  %v4172_v23 = vpop.f32.mrf.mxu3  ;;  %v4097_v63 = vpop.f32.mrf.mxu1 }
 0x20a   : > { %4362 = vmatpush.bf16.msrb.mxu0 %v8963_v49  ;;  %4301 = vmatmul.bf16.gmra.mxu2 %v11254_v42 }
 0x20b   : > { %v4134_v31 = vadd.f32 %v4133_v52, %v4095_v33  ;;  %v9218_v33 = vld [vmem:[%s16539_s1 + $0xa48] sm:$0xf]  ;;  %4340 = vmatmul.bf16.gmra.mxu3 %v11256_v43 }
 0x20c   : > { %4262 = vmatmul.bf16.gmra.mxu1 %v11252_v41 }
 0x20d   : > { %v12333_v58 = vadd.f32 %v4172_v23, %v4134_v31  ;;  %v9442_v23 = vld [vmem:[%s16539_s1 + $0xc08] sm:$0xf] }
 0x20e   : > { %v4058_v36 = vpop.f32.mrf.mxu0 }
 0x20f   : > { %v4059_v37 = vadd.f32 %v4058_v36, %v12102_v19  ;;  %16757 = vst [vmem:[#allocation60_spill] sm:$0xff] %v12333_v58  ;;  %v9219_v19 = vor.u32 %v10330_v20, %v9218_v33  ;;  %v4136_v22 = vpop.f32.mrf.mxu2  ;;  %v10386_v36 = vld [vmem:[%s16539_s1 + $0xc24] sm:$0xf0]  ;;  %v10358_v58 = vld [vmem:[%s16539_s1 + $0xb4c] sm:$0xf] }
 0x210   : > { %v10450_v33 = vld [vmem:[%s16539_s1 + $0xe24] sm:$0xf0] }
 0x211   : > { %v4098_v61 = vadd.f32 %v4097_v63, %v4059_v37  ;;  %4223 = vmatmul.bf16.gmra.mxu0 %v11250_v40  ;;  %4401 = vmatpush.bf16.msrb.mxu1 %v9219_v19  ;;  %v4175_v47 = vpop.f32.mrf.mxu3  ;;  %v4099_v60 = vpop.f32.mrf.mxu1  ;;  %v8930_v37 = vld [vmem:[%s16539_s1 + $0x808] sm:$0xf]  ;;  %v9443_v63 = vor.u32 %v10386_v36, %v9442_v23 }
 0x213   : > { %v4137_v29 = vadd.f32 %v4136_v22, %v4098_v61  ;;  %v9698_v61 = vld [vmem:[%s16539_s1 + $0xe08] sm:$0xf]  ;;  %4441 = vmatpush.bf16.msrb.mxu2 %v9443_v63  ;;  %v10054_v63 = vld [vmem:[%s16539_s1 + $0x1cc] sm:$0xf] }
 0x214   : > { %v9699_v19 = vor.u32 %v10450_v33, %v9698_v61  ;;  %v9186_v22 = vld [vmem:[%s16539_s1 + $0xa08] sm:$0xf] }
 0x215   : > { %v12346_v52 = vadd.f32 %v4175_v47, %v4137_v29  ;;  %v10322_v29 = vld [vmem:[%s16539_s1 + $0xa24] sm:$0xf0] }
 0x216   : > { %v4060_v17 = vpop.f32.mrf.mxu0  ;;  %4480 = vmatpush.bf16.msrb.mxu3 %v9699_v19  ;;  %v10246_v19 = vld [vmem:[%s16539_s1 + $0x7cc] sm:$0xf] }
 0x217   : > { %v4061_v49 = vadd.f32 %v4060_v17, %v12128_v32  ;;  %16758 = vst [vmem:[#allocation61_spill] sm:$0xff] %v12346_v52  ;;  %v10258_v32 = vld [vmem:[%s16539_s1 + $0x824] sm:$0xf0]  ;;  %v4138_v47 = vpop.f32.mrf.mxu2  ;;  %v9187_v17 = vor.u32 %v10322_v29, %v9186_v22  ;;  %v8900_v22 = vld [vmem:[%s16539_s1 + $0x7e8] sm:$0xf0] }
 0x218   : > { %v8931_v20 = vor.u32 %v10258_v32, %v8930_v37 }
 0x219   : > { %v4100_v31 = vadd.f32 %v4099_v60, %v4061_v49  ;;  %v4177_v60 = vpop.f32.mrf.mxu3  ;;  %v4102_v37 = vpop.f32.mrf.mxu1  ;;  %4402 = vmatpush.bf16.msrb.mxu1 %v9187_v17  ;;  %v8903_v17 = vor.u32 %v10246_v19, %v8900_v22 }
 0x21a   : > { %4363 = vmatpush.bf16.msrb.mxu0 %v8931_v20  ;;  %4306 = vmatmul.bf16.gmra.mxu2 %v11298_v6  ;;  %v8132_v20 = vld [vmem:[%s16539_s1 + $0x1e8] sm:$0xf0] }
 0x21b   : > { %v4139_v49 = vadd.f32 %v4138_v47, %v4100_v31  ;;  %4345 = vmatmul.bf16.gmra.mxu3 %v11300_v7  ;;  %v10182_v31 = vld [vmem:[%s16539_s1 + $0x5cc] sm:$0xf]  ;;  %v8135_v47 = vor.u32 %v10054_v63, %v8132_v20 }
 0x21c   : > { %4267 = vmatmul.bf16.gmra.mxu1 %v11296_v5  ;;  %4629 = vmatpush.bf16.msra.mxu3 %v8903_v17  ;;  %v8388_v63 = vld [vmem:[%s16539_s1 + $0x3e8] sm:$0xf0] }
 0x21d   : > { %v12373_v32 = vadd.f32 %v4177_v60, %v4139_v49 }
 0x21e   : > { %v4063_v23 = vpop.f32.mrf.mxu0  ;;  %4512 = vmatpush.bf16.msra.mxu0 %v8135_v47 }
 0x21f   : > { %v4064_v36 = vadd.f32 %v4063_v23, %v12152_v59  ;;  %16759 = vst [vmem:[#allocation62_spill] sm:$0xff] %v12373_v32  ;;  %v8644_v59 = vld [vmem:[%s16539_s1 + $0x5e8] sm:$0xf0]  ;;  %v4141_v29 = vpop.f32.mrf.mxu2 }
 0x220   : > { %v8647_v33 = vor.u32 %v10182_v31, %v8644_v59  ;;  %v10118_v32 = vld [vmem:[%s16539_s1 + $0x3cc] sm:$0xf] }
 0x221   : > { %v4103_v61 = vadd.f32 %v4102_v37, %v4064_v36  ;;  %4228 = vmatmul.bf16.gmra.mxu0 %v11294_v4  ;;  %v4180_v60 = vpop.f32.mrf.mxu3  ;;  %v4104_v37 = vpop.f32.mrf.mxu1 }
 0x222   : > { %4590 = vmatpush.bf16.msra.mxu2 %v8647_v33 }
 0x223   : > { %v4142_v49 = vadd.f32 %v4141_v29, %v4103_v61  ;;  %v8391_v61 = vor.u32 %v10118_v32, %v8388_v63  ;;  %v10174_v32 = vld [vmem:[%s16539_s1 + $0x58c] sm:$0xf] }
 0x225   : > { %v12398_v31 = vadd.f32 %v4180_v60, %v4142_v49  ;;  %4551 = vmatpush.bf16.msra.mxu1 %v8391_v61  ;;  %v8612_v49 = vld [vmem:[%s16539_s1 + $0x5a8] sm:$0xf0] }
 0x226   : > { %v4065_v23 = vpop.f32.mrf.mxu0  ;;  %v8615_v60 = vor.u32 %v10174_v32, %v8612_v49  ;;  %v10110_v61 = vld [vmem:[%s16539_s1 + $0x38c] sm:$0xf] }
 0x227   : > { %v4066_v36 = vadd.f32 %v4065_v23, %v12160_v14  ;;  %16760 = vst [vmem:[#allocation63_spill] sm:$0xff] %v12398_v31  ;;  %v4143_v20 = vpop.f32.mrf.mxu2  ;;  %v8100_v23 = vld [vmem:[%s16539_s1 + $0x1a8] sm:$0xf0] }
 0x228   : > { %4591 = vmatpush.bf16.msra.mxu2 %v8615_v60  ;;  %v8580_v60 = vld [vmem:[%s16539_s1 + $0x568] sm:$0xf0] }
 0x229   : > { %v4105_v59 = vadd.f32 %v4104_v37, %v4066_v36  ;;  %v4182_v19 = vpop.f32.mrf.mxu3  ;;  %v4107_v29 = vpop.f32.mrf.mxu1  ;;  %v10238_v36 = vld [vmem:[%s16539_s1 + $0x78c] sm:$0xf] }
 0x22a   : > { %4311 = vmatmul.bf16.gmra.mxu2 %v11360_v54  ;;  %v8868_v37 = vld [vmem:[%s16539_s1 + $0x7a8] sm:$0xf0] }
 0x22b   : > { %v4144_v33 = vadd.f32 %v4143_v20, %v4105_v59  ;;  %4350 = vmatmul.bf16.gmra.mxu3 %v11362_v55  ;;  %v8871_v63 = vor.u32 %v10238_v36, %v8868_v37  ;;  %v8356_v20 = vld [vmem:[%s16539_s1 + $0x3a8] sm:$0xf0] }
 0x22c   : > { %4272 = vmatmul.bf16.gmra.mxu1 %v11358_v51  ;;  %v10166_v36 = vld [vmem:[%s16539_s1 + $0x54c] sm:$0xf] }
 0x22d   : > { %v12407_v47 = vadd.f32 %v4182_v19, %v4144_v33  ;;  %v8359_v19 = vor.u32 %v10110_v61, %v8356_v20  ;;  %4630 = vmatpush.bf16.msra.mxu3 %v8871_v63  ;;  %v8583_v37 = vor.u32 %v10166_v36, %v8580_v60  ;;  %v8836_v63 = vld [vmem:[%s16539_s1 + $0x768] sm:$0xf0] }
 0x22e   : > { %v4068_v14 = vpop.f32.mrf.mxu0  ;;  %v8324_v60 = vld [vmem:[%s16539_s1 + $0x368] sm:$0xf0] }
 0x22f   : > { %v4069_v22 = vadd.f32 %v4068_v14, %v12190_v57  ;;  %16761 = vst [vmem:[#allocation64_spill] sm:$0xff] %v12407_v47  ;;  %v10046_v57 = vld [vmem:[%s16539_s1 + $0x18c] sm:$0xf]  ;;  %v4146_v33 = vpop.f32.mrf.mxu2  ;;  %4552 = vmatpush.bf16.msra.mxu1 %v8359_v19  ;;  %4592 = vmatpush.bf16.msra.mxu2 %v8583_v37 }
 0x230   : > { %v8103_v59 = vor.u32 %v10046_v57, %v8100_v23 }
 0x231   : > { %v4108_v17 = vadd.f32 %v4107_v29, %v4069_v22  ;;  %4233 = vmatmul.bf16.gmra.mxu0 %v11356_v50  ;;  %v4185_v22 = vpop.f32.mrf.mxu3  ;;  %v4109_v49 = vpop.f32.mrf.mxu1 }
 0x232   : > { %4513 = vmatpush.bf16.msra.mxu0 %v8103_v59  ;;  %v10230_v59 = vld [vmem:[%s16539_s1 + $0x74c] sm:$0xf] }
 0x233   : > { %v4147_v14 = vadd.f32 %v4146_v33, %v4108_v17  ;;  %v10038_v17 = vld [vmem:[%s16539_s1 + $0x14c] sm:$0xf]  ;;  %v8839_v20 = vor.u32 %v10230_v59, %v8836_v63 }
 0x235   : > { %v12438_v57 = vadd.f32 %v4185_v22, %v4147_v14  ;;  %4631 = vmatpush.bf16.msra.mxu3 %v8839_v20 }
 0x236   : > { %v4070_v29 = vpop.f32.mrf.mxu0 }
 0x237   : > { %v4071_v32 = vadd.f32 %v4070_v29, %v12210_v35  ;;  %16762 = vst [vmem:[#allocation65_spill] sm:$0xff] %v12438_v57  ;;  %v8068_v35 = vld [vmem:[%s16539_s1 + $0x168] sm:$0xf0]  ;;  %v4148_v33 = vpop.f32.mrf.mxu2 }
 0x238   : > { %v8071_v61 = vor.u32 %v10038_v17, %v8068_v35 }
 0x239   : > { %v4110_v23 = vadd.f32 %v4109_v49, %v4071_v32  ;;  %v4187_v14 = vpop.f32.mrf.mxu3  ;;  %v4112_v32 = vpop.f32.mrf.mxu1 }
 0x23a   : > { %4514 = vmatpush.bf16.msra.mxu0 %v8071_v61  ;;  %4442 = vmatmul.bf16.vlgmr.msrb.gmra.mxu2 %v11410_v26 }
 0x23b   : > { %v4149_v19 = vadd.f32 %v4148_v33, %v4110_v23  ;;  %v10102_v23 = vld [vmem:[%s16539_s1 + $0x34c] sm:$0xf]  ;;  %4481 = vmatmul.bf16.vlgmr.msrb.gmra.mxu3 %v11412_v27 }
 0x23c   : > { %4403 = vmatmul.bf16.vlgmr.msrb.gmra.mxu1 %v11408_v25  ;;  %v10158_v33 = vld [vmem:[%s16539_s1 + $0x50c] sm:$0xf] }
 0x23d   : > { %v12459_v49 = vadd.f32 %v4187_v14, %v4149_v19  ;;  %v8548_v19 = vld [vmem:[%s16539_s1 + $0x528] sm:$0xf0] }
 0x23e   : > { %v4073_v22 = vpop.f32.mrf.mxu0  ;;  %v10030_v14 = vld [vmem:[%s16539_s1 + $0x10c] sm:$0xf] }
 0x23f   : > { %v4074_v29 = vadd.f32 %v4073_v22, %v12222_v18  ;;  %16763 = vst [vmem:[#allocation66_spill] sm:$0xff] %v12459_v49  ;;  %v8327_v18 = vor.u32 %v10102_v23, %v8324_v60  ;;  %v4151_v17 = vpop.f32.mrf.mxu2  ;;  %v9412_v49 = vld [vmem:[%s16539_s1 + $0xbe8] sm:$0xf0] }
 0x241   : > { %v4113_v36 = vadd.f32 %v4112_v32, %v4074_v29  ;;  %4364 = vmatmul.bf16.vlgmr.msrb.gmra.mxu0 %v11406_v24  ;;  %4553 = vmatpush.bf16.msra.mxu1 %v8327_v18  ;;  %v4190_v35 = vpop.f32.mrf.mxu3  ;;  %v4114_v61 = vpop.f32.mrf.mxu1  ;;  %v8551_v29 = vor.u32 %v10158_v33, %v8548_v19  ;;  %v10222_v32 = vld [vmem:[%s16539_s1 + $0x70c] sm:$0xf] }
 0x242   : > { %v10094_v18 = vld [vmem:[%s16539_s1 + $0x30c] sm:$0xf] }
 0x243   : > { %v4152_v37 = vadd.f32 %v4151_v17, %v4113_v36  ;;  %v8804_v36 = vld [vmem:[%s16539_s1 + $0x728] sm:$0xf0]  ;;  %4593 = vmatpush.bf16.msra.mxu2 %v8551_v29 }
 0x244   : > { %v8807_v60 = vor.u32 %v10222_v32, %v8804_v36  ;;  %v8292_v17 = vld [vmem:[%s16539_s1 + $0x328] sm:$0xf0] }
 0x245   : > { %v12472_v20 = vadd.f32 %v4190_v35, %v4152_v37  ;;  %v8295_v37 = vor.u32 %v10094_v18, %v8292_v17  ;;  %v10022_v29 = vld [vmem:[%s16539_s1 + $0xcc] sm:$0xf] }
 0x246   : > { %v4075_v59 = vpop.f32.mrf.mxu0  ;;  %4632 = vmatpush.bf16.msra.mxu3 %v8807_v60  ;;  %v8004_v36 = vld [vmem:[%s16539_s1 + $0xe8] sm:$0xf0] }
 0x247   : > { %v4076_v63 = vadd.f32 %v4075_v59, %v12248_v21  ;;  %16764 = vst [vmem:[#allocation67_spill] sm:$0xff] %v12472_v20  ;;  %v8036_v21 = vld [vmem:[%s16539_s1 + $0x128] sm:$0xf0]  ;;  %v4153_v35 = vpop.f32.mrf.mxu2  ;;  %4554 = vmatpush.bf16.msra.mxu1 %v8295_v37  ;;  %v8007_v17 = vor.u32 %v10022_v29, %v8004_v36 }
 0x248   : > { %v8039_v23 = vor.u32 %v10030_v14, %v8036_v21  ;;  %v8772_v60 = vld [vmem:[%s16539_s1 + $0x6e8] sm:$0xf0] }
 0x249   : > { %v4115_v22 = vadd.f32 %v4114_v61, %v4076_v63  ;;  %v4192_v63 = vpop.f32.mrf.mxu3  ;;  %v4117_v19 = vpop.f32.mrf.mxu1  ;;  %v10374_v20 = vld [vmem:[%s16539_s1 + $0xbcc] sm:$0xf] }
 0x24a   : > { %4515 = vmatpush.bf16.msra.mxu0 %v8039_v23  ;;  %4447 = vmatmul.bf16.gmra.mxu2 %v11454_v2  ;;  %v10214_v23 = vld [vmem:[%s16539_s1 + $0x6cc] sm:$0xf] }
 0x24b   : > { %v4154_v59 = vadd.f32 %v4153_v35, %v4115_v22  ;;  %4486 = vmatmul.bf16.gmra.mxu3 %v11456_v3  ;;  %v10150_v22 = vld [vmem:[%s16539_s1 + $0x4cc] sm:$0xf]  ;;  %v8775_v37 = vor.u32 %v10214_v23, %v8772_v60 }
 0x24c   : > { %4408 = vmatmul.bf16.gmra.mxu1 %v11452_v1 }
 0x24d   : > { %v12499_v14 = vadd.f32 %v4192_v63, %v4154_v59  ;;  %4633 = vmatpush.bf16.msra.mxu3 %v8775_v37  ;;  %v10142_v37 = vld [vmem:[%s16539_s1 + $0x48c] sm:$0xf] }
 0x24e   : > { %v4078_v61 = vpop.f32.mrf.mxu0  ;;  %4516 = vmatpush.bf16.msra.mxu0 %v8007_v17 }
 0x24f   : > { %v4079_v33 = vadd.f32 %v4078_v61, %v12272_v62  ;;  %16765 = vst [vmem:[#allocation68_spill] sm:$0xff] %v12499_v14  ;;  %v8516_v62 = vld [vmem:[%s16539_s1 + $0x4e8] sm:$0xf0]  ;;  %v4156_v18 = vpop.f32.mrf.mxu2 }
 0x250   : > { %v8519_v32 = vor.u32 %v10150_v22, %v8516_v62  ;;  %v10086_v22 = vld [vmem:[%s16539_s1 + $0x2cc] sm:$0xf] }
 0x251   : > { %v4118_v21 = vadd.f32 %v4117_v19, %v4079_v33  ;;  %4369 = vmatmul.bf16.gmra.mxu0 %v11450_v0  ;;  %v4195_v59 = vpop.f32.mrf.mxu3  ;;  %v4119_v33 = vpop.f32.mrf.mxu1  ;;  %v8260_v62 = vld [vmem:[%s16539_s1 + $0x2e8] sm:$0xf0] }
 0x252   : > { %4594 = vmatpush.bf16.msra.mxu2 %v8519_v32 }
 0x253   : > { %v4157_v35 = vadd.f32 %v4156_v18, %v4118_v21  ;;  %v8263_v21 = vor.u32 %v10086_v22, %v8260_v62  ;;  %v8740_v22 = vld [vmem:[%s16539_s1 + $0x6a8] sm:$0xf0] }
 0x255   : > { %v12524_v19 = vadd.f32 %v4195_v59, %v4157_v35  ;;  %4555 = vmatpush.bf16.msra.mxu1 %v8263_v21  ;;  %v8484_v35 = vld [vmem:[%s16539_s1 + $0x4a8] sm:$0xf0] }
 0x256   : > { %v4080_v63 = vpop.f32.mrf.mxu0  ;;  %v10014_v59 = vld [vmem:[%s16539_s1 + $0x8c] sm:$0xf] }
 0x257   : > { %v4081_v61 = vadd.f32 %v4080_v63, %v12281_v13  ;;  %16766 = vst [vmem:[#allocation69_spill] sm:$0xff] %v12524_v19  ;;  %v4158_v36 = vpop.f32.mrf.mxu2  ;;  %v8487_v63 = vor.u32 %v10142_v37, %v8484_v35  ;;  %v10078_v21 = vld [vmem:[%s16539_s1 + $0x28c] sm:$0xf] }
 0x259   : > { %v4120_v29 = vadd.f32 %v4119_v33, %v4081_v61  ;;  %v4197_v23 = vpop.f32.mrf.mxu3  ;;  %v4248_v60 = vpop.f32.mrf.mxu1  ;;  %v7972_v61 = vld [vmem:[%s16539_s1 + $0xa8] sm:$0xf0]  ;;  %4595 = vmatpush.bf16.msra.mxu2 %v8487_v63 }
 0x25a   : > { %v10206_v33 = vld [vmem:[%s16539_s1 + $0x68c] sm:$0xf]  ;;  %4452 = vmatmul.bf16.gmra.mxu2 %v11498_v48  ;;  %v7975_v62 = vor.u32 %v10014_v59, %v7972_v61 }
 0x25b   : > { %v4159_v32 = vadd.f32 %v4158_v36, %v4120_v29  ;;  %v8743_v29 = vor.u32 %v10206_v33, %v8740_v22  ;;  %4491 = vmatmul.bf16.gmra.mxu3 %v11500_v56  ;;  %v8228_v36 = vld [vmem:[%s16539_s1 + $0x2a8] sm:$0xf0] }
 0x25c   : > { %4413 = vmatmul.bf16.gmra.mxu1 %v11496_v46  ;;  %4517 = vmatpush.bf16.msra.mxu0 %v7975_v62  ;;  %v10134_v61 = vld [vmem:[%s16539_s1 + $0x44c] sm:$0xf] }
 0x25d   : > { %v12532_v18 = vadd.f32 %v4197_v23, %v4159_v32  ;;  %4634 = vmatpush.bf16.msra.mxu3 %v8743_v29  ;;  %v8231_v32 = vor.u32 %v10078_v21, %v8228_v36  ;;  %v8452_v33 = vld [vmem:[%s16539_s1 + $0x468] sm:$0xf0] }
 0x25e   : > { %v4209_v13 = vpop.f32.mrf.mxu0  ;;  %v10006_v22 = vld [vmem:[%s16539_s1 + $0x4c] sm:$0xf] }
 0x25f   : > { %16767 = vst [vmem:[#allocation70_spill] sm:$0xff] %v12532_v18  ;;  %v4249_v17 = vadd.f32 %v4248_v60, %v4209_v13  ;;  %v4287_v23 = vpop.f32.mrf.mxu2  ;;  %4556 = vmatpush.bf16.msra.mxu1 %v8231_v32  ;;  %v7940_v62 = vld [vmem:[%s16539_s1 + $0x68] sm:$0xf0] }
 0x260   : > { %v10198_v29 = vld [vmem:[%s16539_s1 + $0x64c] sm:$0xf]  ;;  %v7943_v36 = vor.u32 %v10006_v22, %v7940_v62 }
 0x261   : > { %4374 = vmatmul.bf16.gmra.mxu0 %v11494_v44  ;;  %v4288_v13 = vadd.f32 %v4287_v23, %v4249_v17  ;;  %v4326_v60 = vpop.f32.mrf.mxu3  ;;  %v4250_v35 = vpop.f32.mrf.mxu1  ;;  %v8455_v17 = vor.u32 %v10134_v61, %v8452_v33  ;;  %v8708_v21 = vld [vmem:[%s16539_s1 + $0x668] sm:$0xf0] }
 0x262   : > { %v8711_v32 = vor.u32 %v10198_v29, %v8708_v21  ;;  %4518 = vmatpush.bf16.msra.mxu0 %v7943_v36  ;;  %v10070_v18 = vld [vmem:[%s16539_s1 + $0x24c] sm:$0xf] }
 0x263   : > { %v12562_v59 = vadd.f32 %v4326_v60, %v4288_v13  ;;  %4596 = vmatpush.bf16.msra.mxu2 %v8455_v17  ;;  %v8196_v22 = vld [vmem:[%s16539_s1 + $0x268] sm:$0xf0] }
 0x264   : > { %4635 = vmatpush.bf16.msra.mxu3 %v8711_v32  ;;  %v8199_v17 = vor.u32 %v10070_v18, %v8196_v22  ;;  %v8420_v18 = vld [vmem:[%s16539_s1 + $0x428] sm:$0xf0] }
 0x265   : > { %v8676_v22 = vld [vmem:[%s16539_s1 + $0x628] sm:$0xf0] }
 0x266   : > { %v4211_v37 = vpop.f32.mrf.mxu0  ;;  %4557 = vmatpush.bf16.msra.mxu1 %v8199_v17 }
 0x267   : > { %v4251_v63 = vadd.f32 %v4250_v35, %v4211_v37  ;;  %v4289_v23 = vpop.f32.mrf.mxu2 }
 0x269   : > { %v4290_v13 = vadd.f32 %v4289_v23, %v4251_v63  ;;  %v4328_v60 = vpop.f32.mrf.mxu3  ;;  %v4253_v35 = vpop.f32.mrf.mxu1 }
 0x26a   : > { %4457 = vmatmul.bf16.gmra.mxu2 %v16746_v28 }
 0x26b   : > { %v12582_v61 = vadd.f32 %v4328_v60, %v4290_v13  ;;  %4496 = vmatmul.bf16.gmra.mxu3 %v16747_v30  ;;  %v10126_v13 = vld [vmem:[%s16539_s1 + $0x40c] sm:$0xf] }
 0x26c   : > { %4418 = vmatmul.bf16.gmra.mxu1 %v16745_v45  ;;  %v9998_v60 = vld [vmem:[%s16539_s1 + $0xc] sm:$0xf] }
 0x26e   : > { %v4214_v37 = vpop.f32.mrf.mxu0 }
 0x26f   : > { %v4254_v33 = vadd.f32 %v4253_v35, %v4214_v37  ;;  %v4292_v63 = vpop.f32.mrf.mxu2  ;;  %v8423_v37 = vor.u32 %v10126_v13, %v8420_v18  ;;  %v7908_v35 = vld [vmem:[%s16539_s1 + $0x28] sm:$0xf0] }
 0x270   : > { %v7911_v17 = vor.u32 %v9998_v60, %v7908_v35 }
 0x271   : > { %4379 = vmatmul.bf16.gmra.mxu0 %v11558_v16  ;;  %v4293_v62 = vadd.f32 %v4292_v63, %v4254_v33  ;;  %v4331_v29 = vpop.f32.mrf.mxu3  ;;  %v4255_v36 = vpop.f32.mrf.mxu1  ;;  %v10190_v33 = vld [vmem:[%s16539_s1 + $0x60c] sm:$0xf]  ;;  %4597 = vmatpush.bf16.msra.mxu2 %v8423_v37 }
 0x272   : > { %v8679_v63 = vor.u32 %v10190_v33, %v8676_v22  ;;  %4519 = vmatpush.bf16.msra.mxu0 %v7911_v17  ;;  %v10438_v37 = vld [vmem:[%s16539_s1 + $0xdcc] sm:$0xf] }
 0x273   : > { %v12594_v32 = vadd.f32 %v4331_v29, %v4293_v62  ;;  %v10062_v62 = vld [vmem:[%s16539_s1 + $0x20c] sm:$0xf] }
 0x274   : > { %v8164_v29 = vld [vmem:[%s16539_s1 + $0x228] sm:$0xf0]  ;;  %4636 = vmatpush.bf16.msra.mxu3 %v8679_v63 }
 0x275   : > { %v9156_v33 = vld [vmem:[%s16539_s1 + $0x9e8] sm:$0xf0] }
 0x276   : > { %v4216_v21 = vpop.f32.mrf.mxu0  ;;  %v10502_v22 = vld [vmem:[%s16539_s1 + $0xfcc] sm:$0xf] }
 0x277   : > { %v4256_v23 = vadd.f32 %v4255_v36, %v4216_v21  ;;  %v8167_v21 = vor.u32 %v10062_v62, %v8164_v29  ;;  %v4294_v36 = vpop.f32.mrf.mxu2  ;;  %v9924_v17 = vld [vmem:[%s16539_s1 + $0xfe8] sm:$0xf0] }
 0x278   : > { %v9927_v29 = vor.u32 %v10502_v22, %v9924_v17 }
 0x279   : > { %4558 = vmatpush.bf16.msra.mxu1 %v8167_v21  ;;  %v4295_v13 = vadd.f32 %v4294_v36, %v4256_v23  ;;  %v4333_v18 = vpop.f32.mrf.mxu3  ;;  %v4258_v14 = vpop.f32.mrf.mxu1  ;;  %v9668_v23 = vld [vmem:[%s16539_s1 + $0xde8] sm:$0xf0] }
 0x27a   : > { %4462 = vmatmul.bf16.gmra.mxu2 %v16749_v38  ;;  %4785 = vmatpush.bf16.msrb.mxu3 %v9927_v29  ;;  %v10430_v29 = vld [vmem:[%s16539_s1 + $0xd8c] sm:$0xf] }
 0x27b   : > { %v12620_v60 = vadd.f32 %v4333_v18, %v4295_v13  ;;  %4501 = vmatmul.bf16.gmra.mxu3 %v16750_v53 }
 0x27c   : > { %4423 = vmatmul.bf16.gmra.mxu1 %v16748_v15 }
 0x27e   : > { %v4219_v19 = vpop.f32.mrf.mxu0 }
 0x27f   : > { %v4259_v35 = vadd.f32 %v4258_v14, %v4219_v19  ;;  %v10310_v14 = vld [vmem:[%s16539_s1 + $0x9cc] sm:$0xf]  ;;  %v9671_v19 = vor.u32 %v10438_v37, %v9668_v23  ;;  %v4297_v63 = vpop.f32.mrf.mxu2 }
 0x280   : > { %v9159_v62 = vor.u32 %v10310_v14, %v9156_v33  ;;  %v9415_v14 = vor.u32 %v10374_v20, %v9412_v49  ;;  %v10302_v49 = vld [vmem:[%s16539_s1 + $0x98c] sm:$0xf] }
 0x281   : > { %4384 = vmatmul.bf16.gmra.mxu0 %v11612_v8  ;;  %v4298_v21 = vadd.f32 %v4297_v63, %v4259_v35  ;;  %v4336_v36 = vpop.f32.mrf.mxu3  ;;  %4746 = vmatpush.bf16.msrb.mxu2 %v9671_v19  ;;  %v4260_v18 = vpop.f32.mrf.mxu1 }
 0x282   : > { %4668 = vmatpush.bf16.msrb.mxu0 %v9159_v62  ;;  %4707 = vmatpush.bf16.msrb.mxu1 %v9415_v14  ;;  %v16769_v14 = vld [vmem:[#allocation45_spill] sm:$0xff] }
 0x283   : > { %v12644_v37 = vadd.f32 %v4336_v36, %v4298_v21  ;;  %v9636_v21 = vld [vmem:[%s16539_s1 + $0xda8] sm:$0xf0] }
 0x284   : > { %v9639_v20 = vor.u32 %v10430_v29, %v9636_v21  ;;  %v9124_v36 = vld [vmem:[%s16539_s1 + $0x9a8] sm:$0xf0] }
 0x286   : > { %v4221_v13 = vpop.f32.mrf.mxu0  ;;  %4747 = vmatpush.bf16.msrb.mxu2 %v9639_v20 }
 0x287   : > { %v4261_v23 = vadd.f32 %v4260_v18, %v4221_v13  ;;  %v4299_v35 = vpop.f32.mrf.mxu2  ;;  %v10494_v13 = vld [vmem:[%s16539_s1 + $0xf8c] sm:$0xf] }
 0x288   : > { %v9892_v18 = vld [vmem:[%s16539_s1 + $0xfa8] sm:$0xf0] }
 0x289   : > { %v4300_v33 = vadd.f32 %v4299_v35, %v4261_v23  ;;  %v4338_v22 = vpop.f32.mrf.mxu3  ;;  %v4263_v17 = vpop.f32.mrf.mxu1  ;;  %v16768_v23 = vld [vmem:[#allocation44_spill] sm:$0xff]  ;;  %v9127_v35 = vor.u32 %v10302_v49, %v9124_v36 }
 0x28a   : > { %4467 = vmatmul.bf16.gmra.mxu2 %v16769_v14  ;;  %v16777_v14 = vld [vmem:[#allocation8_spill] sm:$0xff] }
 0x28b   : > { %v12652_v63 = vadd.f32 %v4338_v22, %v4300_v33  ;;  %v9895_v33 = vor.u32 %v10494_v13, %v9892_v18  ;;  %v16770_v22 = vld [vmem:[#allocation46_spill] sm:$0xff]  ;;  %4669 = vmatpush.bf16.msrb.mxu0 %v9127_v35  ;;  %v10422_v13 = vld [vmem:[%s16539_s1 + $0xd4c] sm:$0xf] }
 0x28c   : > { %4428 = vmatmul.bf16.gmra.mxu1 %v16768_v23  ;;  %4506 = vmatmul.bf16.gmra.mxu3 %v16770_v22  ;;  %v9604_v18 = vld [vmem:[%s16539_s1 + $0xd68] sm:$0xf0]  ;;  %v16778_v23 = vld [vmem:[#allocation9_spill] sm:$0xff] }
 0x28d   : > { %4786 = vmatpush.bf16.msrb.mxu3 %v9895_v33  ;;  %v10294_v35 = vld [vmem:[%s16539_s1 + $0x94c] sm:$0xf] }
 0x28e   : > { %v4224_v19 = vpop.f32.mrf.mxu0  ;;  %v9092_v33 = vld [vmem:[%s16539_s1 + $0x968] sm:$0xf0] }
 0x28f   : > { %v4264_v62 = vadd.f32 %v4263_v17, %v4224_v19  ;;  %v10366_v19 = vld [vmem:[%s16539_s1 + $0xb8c] sm:$0xf]  ;;  %v4302_v21 = vpop.f32.mrf.mxu2 }
 0x290   : > { %v9380_v17 = vld [vmem:[%s16539_s1 + $0xba8] sm:$0xf0] }
 0x291   : > { %4389 = vmatmul.bf16.gmra.mxu0 %v11660_v34  ;;  %v9383_v29 = vor.u32 %v10366_v19, %v9380_v17  ;;  %v4303_v57 = vadd.f32 %v4302_v21, %v4264_v62  ;;  %v4341_v47 = vpop.f32.mrf.mxu3  ;;  %v4265_v49 = vpop.f32.mrf.mxu1  ;;  %v9607_v62 = vor.u32 %v10422_v13, %v9604_v18 }
 0x293   : > { %4708 = vmatpush.bf16.msrb.mxu1 %v9383_v29  ;;  %v12682_v36 = vadd.f32 %v4341_v47, %v4303_v57  ;;  %v9860_v47 = vld [vmem:[%s16539_s1 + $0xf68] sm:$0xf0]  ;;  %v9095_v57 = vor.u32 %v10294_v35, %v9092_v33  ;;  %4748 = vmatpush.bf16.msrb.mxu2 %v9607_v62  ;;  %v16771_v33 = vld [vmem:[#allocation2_spill] sm:$0xff] }
 0x294   : > { %v9348_v35 = vld [vmem:[%s16539_s1 + $0xb68] sm:$0xf0] }
 0x295   : > { %4670 = vmatpush.bf16.msrb.mxu0 %v9095_v57  ;;  %v9351_v62 = vor.u32 %v10358_v58, %v9348_v35  ;;  %v9572_v58 = vld [vmem:[%s16539_s1 + $0xd28] sm:$0xf0] }
 0x296   : > { %v4226_v31 = vpop.f32.mrf.mxu0  ;;  %v10286_v35 = vld [vmem:[%s16539_s1 + $0x90c] sm:$0xf] }
 0x297   : > { %v4266_v20 = vadd.f32 %v4265_v49, %v4226_v31  ;;  %v10486_v31 = vld [vmem:[%s16539_s1 + $0xf4c] sm:$0xf]  ;;  %v4304_v17 = vpop.f32.mrf.mxu2  ;;  %4709 = vmatpush.bf16.msrb.mxu1 %v9351_v62  ;;  %v9575_v62 = vor.u32 %v10414_v39, %v9572_v58 }
 0x298   : > { %v9863_v19 = vor.u32 %v10486_v31, %v9860_v47  ;;  %v16772_v31 = vld [vmem:[#allocation3_spill] sm:$0xff]  ;;  %v16774_v47 = vld [vmem:[#allocation5_spill] sm:$0xff] }
 0x299   : > { %v4305_v29 = vadd.f32 %v4304_v17, %v4266_v20  ;;  %v4343_v21 = vpop.f32.mrf.mxu3  ;;  %v4268_v13 = vpop.f32.mrf.mxu1  ;;  %v16773_v20 = vld [vmem:[#allocation4_spill] sm:$0xff]  ;;  %v9316_v39 = vld [vmem:[%s16539_s1 + $0xb28] sm:$0xf0]  ;;  %4749 = vmatpush.bf16.msrb.mxu2 %v9575_v62 }
 0x29a   : > { %4787 = vmatpush.bf16.msrb.mxu3 %v9863_v19  ;;  %4598 = vmatmul.bf16.vlgmr.msra.gmra.mxu2 %v16773_v20  ;;  %v9540_v62 = vld [vmem:[%s16539_s1 + $0xce8] sm:$0xf0] }
 0x29b   : > { %v12702_v18 = vadd.f32 %v4343_v21, %v4305_v29 }
 0x29c   : > { %4559 = vmatmul.bf16.vlgmr.msra.gmra.mxu1 %v16772_v31  ;;  %4637 = vmatmul.bf16.vlgmr.msra.gmra.mxu3 %v16774_v47 }
 0x29e   : > { %v4229_v49 = vpop.f32.mrf.mxu0 }
 0x29f   : > { %v4269_v52 = vadd.f32 %v4268_v13, %v4229_v49  ;;  %v4307_v57 = vpop.f32.mrf.mxu2 }
 0x2a1   : > { %4520 = vmatmul.bf16.vlgmr.msra.gmra.mxu0 %v16771_v33  ;;  %v4308_v19 = vadd.f32 %v4307_v57, %v4269_v52  ;;  %v4346_v17 = vpop.f32.mrf.mxu3  ;;  %v4270_v21 = vpop.f32.mrf.mxu1  ;;  %v9060_v52 = vld [vmem:[%s16539_s1 + $0x928] sm:$0xf0] }
 0x2a2   : > { %v10478_v57 = vld [vmem:[%s16539_s1 + $0xf0c] sm:$0xf] }
 0x2a3   : > { %v12714_v49 = vadd.f32 %v4346_v17, %v4308_v19  ;;  %v9828_v19 = vld [vmem:[%s16539_s1 + $0xf28] sm:$0xf0]  ;;  %v9063_v17 = vor.u32 %v10286_v35, %v9060_v52 }
 0x2a5   : > { %4671 = vmatpush.bf16.msrb.mxu0 %v9063_v17 }
 0x2a6   : > { %v4231_v29 = vpop.f32.mrf.mxu0 }
 0x2a7   : > { %v4271_v13 = vadd.f32 %v4270_v21, %v4231_v29  ;;  %v9831_v29 = vor.u32 %v10478_v57, %v9828_v19  ;;  %v10350_v21 = vld [vmem:[%s16539_s1 + $0xb0c] sm:$0xf]  ;;  %v4309_v58 = vpop.f32.mrf.mxu2  ;;  %v16775_v57 = vld [vmem:[#allocation6_spill] sm:$0xff] }
 0x2a8   : > { %v9319_v47 = vor.u32 %v10350_v21, %v9316_v39  ;;  %v16776_v19 = vld [vmem:[#allocation7_spill] sm:$0xff] }
 0x2a9   : > { %v4310_v20 = vadd.f32 %v4309_v58, %v4271_v13  ;;  %v4348_v31 = vpop.f32.mrf.mxu3  ;;  %4788 = vmatpush.bf16.msrb.mxu3 %v9831_v29  ;;  %v4273_v22 = vpop.f32.mrf.mxu1  ;;  %v10406_v13 = vld [vmem:[%s16539_s1 + $0xccc] sm:$0xf] }
 0x2aa   : > { %4710 = vmatpush.bf16.msrb.mxu1 %v9319_v47  ;;  %4603 = vmatmul.bf16.gmra.mxu2 %v16777_v14  ;;  %v9796_v47 = vld [vmem:[%s16539_s1 + $0xee8] sm:$0xf0] }
 0x2ab   : > { %v12740_v35 = vadd.f32 %v4348_v31, %v4310_v20  ;;  %v9028_v31 = vld [vmem:[%s16539_s1 + $0x8e8] sm:$0xf0] }
 0x2ac   : > { %4564 = vmatmul.bf16.gmra.mxu1 %v16776_v19  ;;  %4642 = vmatmul.bf16.gmra.mxu3 %v16778_v23  ;;  %v10470_v20 = vld [vmem:[%s16539_s1 + $0xecc] sm:$0xf] }
 0x2ad   : > { %v9799_v21 = vor.u32 %v10470_v20, %v9796_v47  ;;  %v10342_v19 = vld [vmem:[%s16539_s1 + $0xacc] sm:$0xf] }
 0x2ae   : > { %v4234_v33 = vpop.f32.mrf.mxu0 }
 0x2af   : > { %v4274_v52 = vadd.f32 %v4273_v22, %v4234_v33  ;;  %v10278_v22 = vld [vmem:[%s16539_s1 + $0x8cc] sm:$0xf]  ;;  %v9543_v33 = vor.u32 %v10406_v13, %v9540_v62  ;;  %v4312_v17 = vpop.f32.mrf.mxu2  ;;  %4789 = vmatpush.bf16.msrb.mxu3 %v9799_v21 }
 0x2b0   : > { %v9031_v29 = vor.u32 %v10278_v22, %v9028_v31  ;;  %v8996_v21 = vld [vmem:[%s16539_s1 + $0x8a8] sm:$0xf0] }
 0x2b1   : > { %4525 = vmatmul.bf16.gmra.mxu0 %v16775_v57  ;;  %v4313_v39 = vadd.f32 %v4312_v17, %v4274_v52  ;;  %v4351_v58 = vpop.f32.mrf.mxu3  ;;  %4750 = vmatpush.bf16.msrb.mxu2 %v9543_v33  ;;  %v4275_v13 = vpop.f32.mrf.mxu1  ;;  %v9284_v57 = vld [vmem:[%s16539_s1 + $0xae8] sm:$0xf0] }
 0x2b2   : > { %4672 = vmatpush.bf16.msrb.mxu0 %v9031_v29  ;;  %v9287_v22 = vor.u32 %v10342_v19, %v9284_v57  ;;  %v10398_v57 = vld [vmem:[%s16539_s1 + $0xc8c] sm:$0xf] }
 0x2b3   : > { %v12764_v62 = vadd.f32 %v4351_v58, %v4313_v39  ;;  %v10462_v39 = vld [vmem:[%s16539_s1 + $0xe8c] sm:$0xf] }
 0x2b4   : > { %4711 = vmatpush.bf16.msrb.mxu1 %v9287_v22  ;;  %v9764_v58 = vld [vmem:[%s16539_s1 + $0xea8] sm:$0xf0] }
 0x2b5   : > { %v9767_v22 = vor.u32 %v10462_v39, %v9764_v58  ;;  %v10390_v58 = vld [vmem:[%s16539_s1 + $0xc4c] sm:$0xf] }
 0x2b6   : > { %v4236_v23 = vpop.f32.mrf.mxu0 }
 0x2b7   : > { %v4276_v14 = vadd.f32 %v4275_v13, %v4236_v23  ;;  %v4314_v31 = vpop.f32.mrf.mxu2  ;;  %4790 = vmatpush.bf16.msrb.mxu3 %v9767_v22  ;;  %v10454_v22 = vld [vmem:[%s16539_s1 + $0xe4c] sm:$0xf] }
 0x2b9   : > { %v4315_v52 = vadd.f32 %v4314_v31, %v4276_v14  ;;  %v4353_v20 = vpop.f32.mrf.mxu3  ;;  %v4404_v17 = vpop.f32.mrf.mxu1  ;;  %v9508_v14 = vld [vmem:[%s16539_s1 + $0xca8] sm:$0xf0] }
 0x2ba   : > { %4608 = vmatmul.bf16.gmra.mxu2 %v11204_v11  ;;  %v9511_v19 = vor.u32 %v10398_v57, %v9508_v14  ;;  %v10334_v31 = vld [vmem:[%s16539_s1 + $0xa8c] sm:$0xf] }
 0x2bb   : > { %v12773_v29 = vadd.f32 %v4353_v20, %v4315_v52  ;;  %v9252_v52 = vld [vmem:[%s16539_s1 + $0xaa8] sm:$0xf0] }
 0x2bc   : > { %4569 = vmatmul.bf16.gmra.mxu1 %v11202_v10  ;;  %4647 = vmatmul.bf16.gmra.mxu3 %v11206_v12 }
 0x2bd   : > { %4751 = vmatpush.bf16.msrb.mxu2 %v9511_v19  ;;  %v9476_v19 = vld [vmem:[%s16539_s1 + $0xc68] sm:$0xf0] }
 0x2be   : > { %v4365_v33 = vpop.f32.mrf.mxu0 }
 0x2bf   : > { %v4366_v47 = vadd.f32 %v4365_v33, %v12562_v59  ;;  %v10270_v59 = vld [vmem:[%s16539_s1 + $0x88c] sm:$0xf]  ;;  %v4443_v20 = vpop.f32.mrf.mxu2  ;;  %v9255_v33 = vor.u32 %v10334_v31, %v9252_v52 }
 0x2c0   : > { %v8999_v13 = vor.u32 %v10270_v59, %v8996_v21  ;;  %v9732_v31 = vld [vmem:[%s16539_s1 + $0xe68] sm:$0xf0] }
 0x2c1   : > { %v4405_v23 = vadd.f32 %v4404_v17, %v4366_v47  ;;  %4530 = vmatmul.bf16.gmra.mxu0 %v11200_v9  ;;  %v4482_v17 = vpop.f32.mrf.mxu3  ;;  %v4406_v59 = vpop.f32.mrf.mxu1  ;;  %4712 = vmatpush.bf16.msrb.mxu1 %v9255_v33 }
 0x2c2   : > { %4673 = vmatpush.bf16.msrb.mxu0 %v8999_v13  ;;  %v9479_v13 = vor.u32 %v10390_v58, %v9476_v19 }
 0x2c3   : > { %v4444_v47 = vadd.f32 %v4443_v20, %v4405_v23  ;;  %v10262_v23 = vld [vmem:[%s16539_s1 + $0x84c] sm:$0xf]  ;;  %v9735_v20 = vor.u32 %v10454_v22, %v9732_v31 }
 0x2c4   : > { %4752 = vmatpush.bf16.msrb.mxu2 %v9479_v13 }
 0x2c5   : > { %v12804_v21 = vadd.f32 %v4482_v17, %v4444_v47  ;;  %4791 = vmatpush.bf16.msrb.mxu3 %v9735_v20 }
 0x2c6   : > { %v4367_v57 = vpop.f32.mrf.mxu0 }
 0x2c7   : > { %v4368_v14 = vadd.f32 %v4367_v57, %v12582_v61  ;;  %16779 = vst [vmem:[#allocation71_spill] sm:$0xff] %v12804_v21  ;;  %v8964_v61 = vld [vmem:[%s16539_s1 + $0x868] sm:$0xf0]  ;;  %v4445_v33 = vpop.f32.mrf.mxu2  ;;  %v9578_v21 = vld [vmem:[%s16539_s1 + $0xd10] sm:$0xf] }
 0x2c8   : > { %v8967_v52 = vor.u32 %v10262_v23, %v8964_v61  ;;  %v9220_v23 = vld [vmem:[%s16539_s1 + $0xa68] sm:$0xf0] }
 0x2c9   : > { %v4407_v39 = vadd.f32 %v4406_v59, %v4368_v14  ;;  %v4484_v17 = vpop.f32.mrf.mxu3  ;;  %v4409_v59 = vpop.f32.mrf.mxu1 }
 0x2ca   : > { %4674 = vmatpush.bf16.msrb.mxu0 %v8967_v52  ;;  %4613 = vmatmul.bf16.gmra.mxu2 %v11254_v42 }
 0x2cb   : > { %v4446_v47 = vadd.f32 %v4445_v33, %v4407_v39  ;;  %v10326_v39 = vld [vmem:[%s16539_s1 + $0xa4c] sm:$0xf] }
 0x2cc   : > { %4574 = vmatmul.bf16.gmra.mxu1 %v11252_v41  ;;  %4652 = vmatmul.bf16.gmra.mxu3 %v11256_v43 }
 0x2cd   : > { %v12825_v58 = vadd.f32 %v4484_v17, %v4446_v47  ;;  %v10382_v17 = vld [vmem:[%s16539_s1 + $0xc0c] sm:$0xf] }
 0x2ce   : > { %v4370_v57 = vpop.f32.mrf.mxu0 }
 0x2cf   : > { %v4371_v14 = vadd.f32 %v4370_v57, %v12594_v32  ;;  %16780 = vst [vmem:[#allocation72_spill] sm:$0xff] %v12825_v58  ;;  %v9223_v32 = vor.u32 %v10326_v39, %v9220_v23  ;;  %v4448_v13 = vpop.f32.mrf.mxu2  ;;  %v9444_v57 = vld [vmem:[%s16539_s1 + $0xc28] sm:$0xf0]  ;;  %v9354_v58 = vld [vmem:[%s16539_s1 + $0xb50] sm:$0xf] }
 0x2d0   : > { %v9700_v39 = vld [vmem:[%s16539_s1 + $0xe28] sm:$0xf0] }
 0x2d1   : > { %v4410_v19 = vadd.f32 %v4409_v59, %v4371_v14  ;;  %4535 = vmatmul.bf16.gmra.mxu0 %v11250_v40  ;;  %4713 = vmatpush.bf16.msrb.mxu1 %v9223_v32  ;;  %v4487_v22 = vpop.f32.mrf.mxu3  ;;  %v4411_v20 = vpop.f32.mrf.mxu1  ;;  %v10254_v14 = vld [vmem:[%s16539_s1 + $0x80c] sm:$0xf]  ;;  %v9447_v59 = vor.u32 %v10382_v17, %v9444_v57 }
 0x2d3   : > { %v4449_v61 = vadd.f32 %v4448_v13, %v4410_v19  ;;  %v10446_v19 = vld [vmem:[%s16539_s1 + $0xe0c] sm:$0xf]  ;;  %4753 = vmatpush.bf16.msrb.mxu2 %v9447_v59  ;;  %v8138_v59 = vld [vmem:[%s16539_s1 + $0x1d0] sm:$0xf] }
 0x2d4   : > { %v9703_v32 = vor.u32 %v10446_v19, %v9700_v39  ;;  %v10318_v13 = vld [vmem:[%s16539_s1 + $0xa0c] sm:$0xf] }
 0x2d5   : > { %v12838_v33 = vadd.f32 %v4487_v22, %v4449_v61  ;;  %v9188_v61 = vld [vmem:[%s16539_s1 + $0xa28] sm:$0xf0] }
 0x2d6   : > { %v4372_v31 = vpop.f32.mrf.mxu0  ;;  %4792 = vmatpush.bf16.msrb.mxu3 %v9703_v32  ;;  %v8906_v32 = vld [vmem:[%s16539_s1 + $0x7d0] sm:$0xf] }
 0x2d7   : > { %v4373_v52 = vadd.f32 %v4372_v31, %v12620_v60  ;;  %16781 = vst [vmem:[#allocation73_spill] sm:$0xff] %v12838_v33  ;;  %v8932_v60 = vld [vmem:[%s16539_s1 + $0x828] sm:$0xf0]  ;;  %v4450_v22 = vpop.f32.mrf.mxu2  ;;  %v9191_v31 = vor.u32 %v10318_v13, %v9188_v61  ;;  %v10251_v13 = vld [vmem:[%s16539_s1 + $0x7ec] sm:$0xf0] }
 0x2d8   : > { %v8935_v23 = vor.u32 %v10254_v14, %v8932_v60 }
 0x2d9   : > { %v4412_v47 = vadd.f32 %v4411_v20, %v4373_v52  ;;  %v4489_v20 = vpop.f32.mrf.mxu3  ;;  %v4414_v14 = vpop.f32.mrf.mxu1  ;;  %4714 = vmatpush.bf16.msrb.mxu1 %v9191_v31  ;;  %v8907_v31 = vor.u32 %v10251_v13, %v8906_v32 }
 0x2da   : > { %4675 = vmatpush.bf16.msrb.mxu0 %v8935_v23  ;;  %4618 = vmatmul.bf16.gmra.mxu2 %v11298_v6  ;;  %v10059_v23 = vld [vmem:[%s16539_s1 + $0x1ec] sm:$0xf0] }
 0x2db   : > { %v4451_v52 = vadd.f32 %v4450_v22, %v4412_v47  ;;  %v8650_v47 = vld [vmem:[%s16539_s1 + $0x5d0] sm:$0xf]  ;;  %v8139_v22 = vor.u32 %v10059_v23, %v8138_v59  ;;  %4941 = vmatpush.bf16.msra.mxu3 %v8907_v31 }
 0x2dc   : > { %4579 = vmatmul.bf16.gmra.mxu1 %v11296_v5  ;;  %4657 = vmatmul.bf16.gmra.mxu3 %v11300_v7  ;;  %v10123_v59 = vld [vmem:[%s16539_s1 + $0x3ec] sm:$0xf0] }
 0x2dd   : > { %v12865_v60 = vadd.f32 %v4489_v20, %v4451_v52 }
 0x2de   : > { %v4375_v17 = vpop.f32.mrf.mxu0  ;;  %4824 = vmatpush.bf16.msra.mxu0 %v8139_v22 }
 0x2df   : > { %v4376_v57 = vadd.f32 %v4375_v17, %v12644_v37  ;;  %16782 = vst [vmem:[#allocation74_spill] sm:$0xff] %v12865_v60  ;;  %v10187_v37 = vld [vmem:[%s16539_s1 + $0x5ec] sm:$0xf0]  ;;  %v4453_v61 = vpop.f32.mrf.mxu2 }
 0x2e0   : > { %v8651_v39 = vor.u32 %v10187_v37, %v8650_v47  ;;  %v8394_v60 = vld [vmem:[%s16539_s1 + $0x3d0] sm:$0xf] }
 0x2e1   : > { %v4415_v19 = vadd.f32 %v4414_v14, %v4376_v57  ;;  %4540 = vmatmul.bf16.gmra.mxu0 %v11294_v4  ;;  %v4492_v20 = vpop.f32.mrf.mxu3  ;;  %v4416_v14 = vpop.f32.mrf.mxu1 }
 0x2e2   : > { %4902 = vmatpush.bf16.msra.mxu2 %v8651_v39 }
 0x2e3   : > { %v4454_v52 = vadd.f32 %v4453_v61, %v4415_v19  ;;  %v8395_v19 = vor.u32 %v10123_v59, %v8394_v60  ;;  %v8618_v60 = vld [vmem:[%s16539_s1 + $0x590] sm:$0xf] }
 0x2e5   : > { %v12890_v47 = vadd.f32 %v4492_v20, %v4454_v52  ;;  %4863 = vmatpush.bf16.msra.mxu1 %v8395_v19  ;;  %v10179_v52 = vld [vmem:[%s16539_s1 + $0x5ac] sm:$0xf0] }
 0x2e6   : > { %v4377_v17 = vpop.f32.mrf.mxu0  ;;  %v8619_v20 = vor.u32 %v10179_v52, %v8618_v60  ;;  %v8362_v19 = vld [vmem:[%s16539_s1 + $0x390] sm:$0xf] }
 0x2e7   : > { %v4378_v57 = vadd.f32 %v4377_v17, %v12652_v63  ;;  %16783 = vst [vmem:[#allocation75_spill] sm:$0xff] %v12890_v47  ;;  %v4455_v23 = vpop.f32.mrf.mxu2  ;;  %v10051_v17 = vld [vmem:[%s16539_s1 + $0x1ac] sm:$0xf0] }
 0x2e8   : > { %4903 = vmatpush.bf16.msra.mxu2 %v8619_v20  ;;  %v10171_v20 = vld [vmem:[%s16539_s1 + $0x56c] sm:$0xf0] }
 0x2e9   : > { %v4417_v37 = vadd.f32 %v4416_v14, %v4378_v57  ;;  %v4494_v32 = vpop.f32.mrf.mxu3  ;;  %v4419_v61 = vpop.f32.mrf.mxu1  ;;  %v8874_v57 = vld [vmem:[%s16539_s1 + $0x790] sm:$0xf] }
 0x2ea   : > { %4623 = vmatmul.bf16.gmra.mxu2 %v11360_v54  ;;  %v10243_v14 = vld [vmem:[%s16539_s1 + $0x7ac] sm:$0xf0] }
 0x2eb   : > { %v4456_v39 = vadd.f32 %v4455_v23, %v4417_v37  ;;  %v8875_v59 = vor.u32 %v10243_v14, %v8874_v57  ;;  %v10115_v23 = vld [vmem:[%s16539_s1 + $0x3ac] sm:$0xf0] }
 0x2ec   : > { %4584 = vmatmul.bf16.gmra.mxu1 %v11358_v51  ;;  %4662 = vmatmul.bf16.gmra.mxu3 %v11362_v55  ;;  %v8586_v57 = vld [vmem:[%s16539_s1 + $0x550] sm:$0xf] }
 0x2ed   : > { %v12899_v22 = vadd.f32 %v4494_v32, %v4456_v39  ;;  %v8363_v32 = vor.u32 %v10115_v23, %v8362_v19  ;;  %4942 = vmatpush.bf16.msra.mxu3 %v8875_v59  ;;  %v8587_v14 = vor.u32 %v10171_v20, %v8586_v57  ;;  %v10235_v59 = vld [vmem:[%s16539_s1 + $0x76c] sm:$0xf0] }
 0x2ee   : > { %v4380_v63 = vpop.f32.mrf.mxu0  ;;  %v10107_v20 = vld [vmem:[%s16539_s1 + $0x36c] sm:$0xf0] }
 0x2ef   : > { %v4381_v13 = vadd.f32 %v4380_v63, %v12682_v36  ;;  %16784 = vst [vmem:[#allocation76_spill] sm:$0xff] %v12899_v22  ;;  %v8106_v36 = vld [vmem:[%s16539_s1 + $0x190] sm:$0xf]  ;;  %v4458_v39 = vpop.f32.mrf.mxu2  ;;  %4864 = vmatpush.bf16.msra.mxu1 %v8363_v32  ;;  %4904 = vmatpush.bf16.msra.mxu2 %v8587_v14 }
 0x2f0   : > { %v8107_v37 = vor.u32 %v10051_v17, %v8106_v36 }
 0x2f1   : > { %v4420_v31 = vadd.f32 %v4419_v61, %v4381_v13  ;;  %4545 = vmatmul.bf16.gmra.mxu0 %v11356_v50  ;;  %v4497_v13 = vpop.f32.mrf.mxu3  ;;  %v4421_v52 = vpop.f32.mrf.mxu1 }
 0x2f2   : > { %4825 = vmatpush.bf16.msra.mxu0 %v8107_v37  ;;  %v8842_v37 = vld [vmem:[%s16539_s1 + $0x750] sm:$0xf] }
 0x2f3   : > { %v4459_v63 = vadd.f32 %v4458_v39, %v4420_v31  ;;  %v8074_v31 = vld [vmem:[%s16539_s1 + $0x150] sm:$0xf]  ;;  %v8843_v23 = vor.u32 %v10235_v59, %v8842_v37 }
 0x2f5   : > { %v12930_v36 = vadd.f32 %v4497_v13, %v4459_v63  ;;  %4943 = vmatpush.bf16.msra.mxu3 %v8843_v23 }
 0x2f6   : > { %v4382_v61 = vpop.f32.mrf.mxu0 }
 0x2f7   : > { %v4383_v60 = vadd.f32 %v4382_v61, %v12702_v18  ;;  %16785 = vst [vmem:[#allocation77_spill] sm:$0xff] %v12930_v36  ;;  %v10043_v18 = vld [vmem:[%s16539_s1 + $0x16c] sm:$0xf0]  ;;  %v4460_v39 = vpop.f32.mrf.mxu2 }
 0x2f8   : > { %v8075_v19 = vor.u32 %v10043_v18, %v8074_v31 }
 0x2f9   : > { %v4422_v17 = vadd.f32 %v4421_v52, %v4383_v60  ;;  %v4499_v63 = vpop.f32.mrf.mxu3  ;;  %v4424_v60 = vpop.f32.mrf.mxu1 }
 0x2fa   : > { %4826 = vmatpush.bf16.msra.mxu0 %v8075_v19  ;;  %4754 = vmatmul.bf16.vlgmr.msrb.gmra.mxu2 %v11410_v26 }
 0x2fb   : > { %v4461_v32 = vadd.f32 %v4460_v39, %v4422_v17  ;;  %v8330_v17 = vld [vmem:[%s16539_s1 + $0x350] sm:$0xf] }
 0x2fc   : > { %4715 = vmatmul.bf16.vlgmr.msrb.gmra.mxu1 %v11408_v25  ;;  %4793 = vmatmul.bf16.vlgmr.msrb.gmra.mxu3 %v11412_v27  ;;  %v8554_v39 = vld [vmem:[%s16539_s1 + $0x510] sm:$0xf] }
 0x2fd   : > { %v12951_v52 = vadd.f32 %v4499_v63, %v4461_v32  ;;  %v10163_v32 = vld [vmem:[%s16539_s1 + $0x52c] sm:$0xf0] }
 0x2fe   : > { %v4385_v13 = vpop.f32.mrf.mxu0  ;;  %v8042_v63 = vld [vmem:[%s16539_s1 + $0x110] sm:$0xf] }
 0x2ff   : > { %v4386_v61 = vadd.f32 %v4385_v13, %v12714_v49  ;;  %16786 = vst [vmem:[#allocation78_spill] sm:$0xff] %v12951_v52  ;;  %v8331_v49 = vor.u32 %v10107_v20, %v8330_v17  ;;  %v4463_v31 = vpop.f32.mrf.mxu2  ;;  %v10379_v52 = vld [vmem:[%s16539_s1 + $0xbec] sm:$0xf0] }
 0x301   : > { %v4425_v57 = vadd.f32 %v4424_v60, %v4386_v61  ;;  %4676 = vmatmul.bf16.vlgmr.msrb.gmra.mxu0 %v11406_v24  ;;  %4865 = vmatpush.bf16.msra.mxu1 %v8331_v49  ;;  %v4502_v18 = vpop.f32.mrf.mxu3  ;;  %v4426_v19 = vpop.f32.mrf.mxu1  ;;  %v8555_v61 = vor.u32 %v10163_v32, %v8554_v39  ;;  %v8810_v60 = vld [vmem:[%s16539_s1 + $0x710] sm:$0xf] }
 0x302   : > { %v8298_v49 = vld [vmem:[%s16539_s1 + $0x310] sm:$0xf] }
 0x303   : > { %v4464_v14 = vadd.f32 %v4463_v31, %v4425_v57  ;;  %v10227_v57 = vld [vmem:[%s16539_s1 + $0x72c] sm:$0xf0]  ;;  %4905 = vmatpush.bf16.msra.mxu2 %v8555_v61 }
 0x304   : > { %v8811_v20 = vor.u32 %v10227_v57, %v8810_v60  ;;  %v10099_v31 = vld [vmem:[%s16539_s1 + $0x32c] sm:$0xf0] }
 0x305   : > { %v12964_v23 = vadd.f32 %v4502_v18, %v4464_v14  ;;  %v8299_v14 = vor.u32 %v10099_v31, %v8298_v49  ;;  %v8010_v61 = vld [vmem:[%s16539_s1 + $0xd0] sm:$0xf] }
 0x306   : > { %v4387_v37 = vpop.f32.mrf.mxu0  ;;  %4944 = vmatpush.bf16.msra.mxu3 %v8811_v20  ;;  %v10027_v57 = vld [vmem:[%s16539_s1 + $0xec] sm:$0xf0] }
 0x307   : > { %v4388_v59 = vadd.f32 %v4387_v37, %v12740_v35  ;;  %16787 = vst [vmem:[#allocation79_spill] sm:$0xff] %v12964_v23  ;;  %v10035_v35 = vld [vmem:[%s16539_s1 + $0x12c] sm:$0xf0]  ;;  %v4465_v18 = vpop.f32.mrf.mxu2  ;;  %4866 = vmatpush.bf16.msra.mxu1 %v8299_v14  ;;  %v8011_v31 = vor.u32 %v10027_v57, %v8010_v61 }
 0x308   : > { %v8043_v17 = vor.u32 %v10035_v35, %v8042_v63  ;;  %v10219_v20 = vld [vmem:[%s16539_s1 + $0x6ec] sm:$0xf0] }
 0x309   : > { %v4427_v13 = vadd.f32 %v4426_v19, %v4388_v59  ;;  %v4504_v59 = vpop.f32.mrf.mxu3  ;;  %v4429_v32 = vpop.f32.mrf.mxu1  ;;  %v9418_v23 = vld [vmem:[%s16539_s1 + $0xbd0] sm:$0xf] }
 0x30a   : > { %4827 = vmatpush.bf16.msra.mxu0 %v8043_v17  ;;  %4759 = vmatmul.bf16.gmra.mxu2 %v11454_v2  ;;  %v8778_v17 = vld [vmem:[%s16539_s1 + $0x6d0] sm:$0xf] }
 0x30b   : > { %v4466_v37 = vadd.f32 %v4465_v18, %v4427_v13  ;;  %v8522_v13 = vld [vmem:[%s16539_s1 + $0x4d0] sm:$0xf]  ;;  %v8779_v14 = vor.u32 %v10219_v20, %v8778_v17 }
 0x30c   : > { %4720 = vmatmul.bf16.gmra.mxu1 %v11452_v1  ;;  %4798 = vmatmul.bf16.gmra.mxu3 %v11456_v3 }
 0x30d   : > { %v12991_v63 = vadd.f32 %v4504_v59, %v4466_v37  ;;  %4945 = vmatpush.bf16.msra.mxu3 %v8779_v14  ;;  %v8490_v14 = vld [vmem:[%s16539_s1 + $0x490] sm:$0xf] }
 0x30e   : > { %v4390_v19 = vpop.f32.mrf.mxu0  ;;  %4828 = vmatpush.bf16.msra.mxu0 %v8011_v31 }
 0x30f   : > { %v4391_v39 = vadd.f32 %v4390_v19, %v12764_v62  ;;  %16788 = vst [vmem:[#allocation80_spill] sm:$0xff] %v12991_v63  ;;  %v10155_v62 = vld [vmem:[%s16539_s1 + $0x4ec] sm:$0xf0]  ;;  %v4468_v49 = vpop.f32.mrf.mxu2 }
 0x310   : > { %v8523_v60 = vor.u32 %v10155_v62, %v8522_v13  ;;  %v8266_v13 = vld [vmem:[%s16539_s1 + $0x2d0] sm:$0xf] }
 0x311   : > { %v4430_v35 = vadd.f32 %v4429_v32, %v4391_v39  ;;  %4681 = vmatmul.bf16.gmra.mxu0 %v11450_v0  ;;  %v4507_v37 = vpop.f32.mrf.mxu3  ;;  %v4431_v39 = vpop.f32.mrf.mxu1  ;;  %v10091_v62 = vld [vmem:[%s16539_s1 + $0x2ec] sm:$0xf0] }
 0x312   : > { %4906 = vmatpush.bf16.msra.mxu2 %v8523_v60 }
 0x313   : > { %v4469_v18 = vadd.f32 %v4468_v49, %v4430_v35  ;;  %v8267_v35 = vor.u32 %v10091_v62, %v8266_v13  ;;  %v10211_v13 = vld [vmem:[%s16539_s1 + $0x6ac] sm:$0xf0] }
 0x315   : > { %v13016_v32 = vadd.f32 %v4507_v37, %v4469_v18  ;;  %4867 = vmatpush.bf16.msra.mxu1 %v8267_v35  ;;  %v10147_v18 = vld [vmem:[%s16539_s1 + $0x4ac] sm:$0xf0] }
 0x316   : > { %v4392_v59 = vpop.f32.mrf.mxu0  ;;  %v7978_v37 = vld [vmem:[%s16539_s1 + $0x90] sm:$0xf] }
 0x317   : > { %v4393_v19 = vadd.f32 %v4392_v59, %v12773_v29  ;;  %16789 = vst [vmem:[#allocation81_spill] sm:$0xff] %v13016_v32  ;;  %v4470_v57 = vpop.f32.mrf.mxu2  ;;  %v8491_v59 = vor.u32 %v10147_v18, %v8490_v14  ;;  %v8234_v35 = vld [vmem:[%s16539_s1 + $0x290] sm:$0xf] }
 0x319   : > { %v4432_v61 = vadd.f32 %v4431_v39, %v4393_v19  ;;  %v4509_v17 = vpop.f32.mrf.mxu3  ;;  %v4560_v20 = vpop.f32.mrf.mxu1  ;;  %v10019_v19 = vld [vmem:[%s16539_s1 + $0xac] sm:$0xf0]  ;;  %4907 = vmatpush.bf16.msra.mxu2 %v8491_v59 }
 0x31a   : > { %v8746_v39 = vld [vmem:[%s16539_s1 + $0x690] sm:$0xf]  ;;  %4764 = vmatmul.bf16.gmra.mxu2 %v11498_v48  ;;  %v7979_v62 = vor.u32 %v10019_v19, %v7978_v37 }
 0x31b   : > { %v4471_v60 = vadd.f32 %v4470_v57, %v4432_v61  ;;  %v8747_v61 = vor.u32 %v10211_v13, %v8746_v39  ;;  %v10083_v57 = vld [vmem:[%s16539_s1 + $0x2ac] sm:$0xf0] }
 0x31c   : > { %4725 = vmatmul.bf16.gmra.mxu1 %v11496_v46  ;;  %4803 = vmatmul.bf16.gmra.mxu3 %v11500_v56  ;;  %v8458_v19 = vld [vmem:[%s16539_s1 + $0x450] sm:$0xf] }
 0x31d   : > { %v13024_v49 = vadd.f32 %v4509_v17, %v4471_v60  ;;  %4829 = vmatpush.bf16.msra.mxu0 %v7979_v62  ;;  %4946 = vmatpush.bf16.msra.mxu3 %v8747_v61  ;;  %v8235_v60 = vor.u32 %v10083_v57, %v8234_v35  ;;  %v10139_v39 = vld [vmem:[%s16539_s1 + $0x46c] sm:$0xf0] }
 0x31e   : > { %v4521_v29 = vpop.f32.mrf.mxu0  ;;  %v7946_v13 = vld [vmem:[%s16539_s1 + $0x50] sm:$0xf] }
 0x31f   : > { %16790 = vst [vmem:[#allocation82_spill] sm:$0xff] %v13024_v49  ;;  %v4561_v31 = vadd.f32 %v4560_v20, %v4521_v29  ;;  %v4599_v17 = vpop.f32.mrf.mxu2  ;;  %4868 = vmatpush.bf16.msra.mxu1 %v8235_v60  ;;  %v10011_v62 = vld [vmem:[%s16539_s1 + $0x6c] sm:$0xf0] }
 0x320   : > { %v8714_v61 = vld [vmem:[%s16539_s1 + $0x650] sm:$0xf]  ;;  %v7947_v57 = vor.u32 %v10011_v62, %v7946_v13 }
 0x321   : > { %4686 = vmatmul.bf16.gmra.mxu0 %v11494_v44  ;;  %v4600_v29 = vadd.f32 %v4599_v17, %v4561_v31  ;;  %v4638_v20 = vpop.f32.mrf.mxu3  ;;  %v4562_v18 = vpop.f32.mrf.mxu1  ;;  %v8459_v31 = vor.u32 %v10139_v39, %v8458_v19  ;;  %v10203_v35 = vld [vmem:[%s16539_s1 + $0x66c] sm:$0xf0] }
 0x322   : > { %v8715_v60 = vor.u32 %v10203_v35, %v8714_v61  ;;  %4830 = vmatpush.bf16.msra.mxu0 %v7947_v57  ;;  %v8202_v49 = vld [vmem:[%s16539_s1 + $0x250] sm:$0xf] }
 0x323   : > { %v13054_v37 = vadd.f32 %v4638_v20, %v4600_v29  ;;  %4908 = vmatpush.bf16.msra.mxu2 %v8459_v31  ;;  %v10075_v13 = vld [vmem:[%s16539_s1 + $0x26c] sm:$0xf0] }
 0x324   : > { %4947 = vmatpush.bf16.msra.mxu3 %v8715_v60  ;;  %v8203_v31 = vor.u32 %v10075_v13, %v8202_v49  ;;  %v10131_v49 = vld [vmem:[%s16539_s1 + $0x42c] sm:$0xf0] }
 0x325   : > { %v10195_v13 = vld [vmem:[%s16539_s1 + $0x62c] sm:$0xf0] }
 0x326   : > { %v4523_v14 = vpop.f32.mrf.mxu0  ;;  %4869 = vmatpush.bf16.msra.mxu1 %v8203_v31 }
 0x327   : > { %v4563_v59 = vadd.f32 %v4562_v18, %v4523_v14  ;;  %v4601_v17 = vpop.f32.mrf.mxu2 }
 0x329   : > { %v4602_v29 = vadd.f32 %v4601_v17, %v4563_v59  ;;  %v4640_v20 = vpop.f32.mrf.mxu3  ;;  %v4565_v18 = vpop.f32.mrf.mxu1 }
 0x32a   : > { %4769 = vmatmul.bf16.gmra.mxu2 %v16746_v28 }
 0x32b   : > { %v13074_v19 = vadd.f32 %v4640_v20, %v4602_v29  ;;  %v8426_v29 = vld [vmem:[%s16539_s1 + $0x410] sm:$0xf] }
 0x32c   : > { %4730 = vmatmul.bf16.gmra.mxu1 %v16745_v45  ;;  %4808 = vmatmul.bf16.gmra.mxu3 %v16747_v30  ;;  %v7914_v20 = vld [vmem:[%s16539_s1 + $0x10] sm:$0xf] }
 0x32e   : > { %v4526_v14 = vpop.f32.mrf.mxu0 }
 0x32f   : > { %v4566_v39 = vadd.f32 %v4565_v18, %v4526_v14  ;;  %v4604_v59 = vpop.f32.mrf.mxu2  ;;  %v8427_v14 = vor.u32 %v10131_v49, %v8426_v29  ;;  %v10003_v18 = vld [vmem:[%s16539_s1 + $0x2c] sm:$0xf0] }
 0x330   : > { %v7915_v31 = vor.u32 %v10003_v18, %v7914_v20 }
 0x331   : > { %4691 = vmatmul.bf16.gmra.mxu0 %v11558_v16  ;;  %v4605_v62 = vadd.f32 %v4604_v59, %v4566_v39  ;;  %v4643_v61 = vpop.f32.mrf.mxu3  ;;  %v4567_v57 = vpop.f32.mrf.mxu1  ;;  %v8682_v39 = vld [vmem:[%s16539_s1 + $0x610] sm:$0xf]  ;;  %4909 = vmatpush.bf16.msra.mxu2 %v8427_v14 }
 0x332   : > { %v8683_v59 = vor.u32 %v10195_v13, %v8682_v39  ;;  %4831 = vmatpush.bf16.msra.mxu0 %v7915_v31  ;;  %v9674_v14 = vld [vmem:[%s16539_s1 + $0xdd0] sm:$0xf] }
 0x333   : > { %v13086_v60 = vadd.f32 %v4643_v61, %v4605_v62  ;;  %v8170_v62 = vld [vmem:[%s16539_s1 + $0x210] sm:$0xf] }
 0x334   : > { %v10067_v61 = vld [vmem:[%s16539_s1 + $0x22c] sm:$0xf0]  ;;  %4948 = vmatpush.bf16.msra.mxu3 %v8683_v59 }
 0x335   : > { %v10315_v39 = vld [vmem:[%s16539_s1 + $0x9ec] sm:$0xf0] }
 0x336   : > { %v4528_v35 = vpop.f32.mrf.mxu0  ;;  %v9930_v13 = vld [vmem:[%s16539_s1 + $0xfd0] sm:$0xf] }
 0x337   : > { %v4568_v17 = vadd.f32 %v4567_v57, %v4528_v35  ;;  %v8171_v35 = vor.u32 %v10067_v61, %v8170_v62  ;;  %v4606_v57 = vpop.f32.mrf.mxu2  ;;  %v10507_v31 = vld [vmem:[%s16539_s1 + $0xfec] sm:$0xf0] }
 0x338   : > { %v9931_v61 = vor.u32 %v10507_v31, %v9930_v13 }
 0x339   : > { %4870 = vmatpush.bf16.msra.mxu1 %v8171_v35  ;;  %v4607_v29 = vadd.f32 %v4606_v57, %v4568_v17  ;;  %v4645_v49 = vpop.f32.mrf.mxu3  ;;  %v4570_v63 = vpop.f32.mrf.mxu1  ;;  %v10443_v17 = vld [vmem:[%s16539_s1 + $0xdec] sm:$0xf0] }
 0x33a   : > { %4774 = vmatmul.bf16.gmra.mxu2 %v16749_v38  ;;  %5097 = vmatpush.bf16.msrb.mxu3 %v9931_v61  ;;  %v9642_v61 = vld [vmem:[%s16539_s1 + $0xd90] sm:$0xf] }
 0x33b   : > { %v13112_v20 = vadd.f32 %v4645_v49, %v4607_v29 }
 0x33c   : > { %4735 = vmatmul.bf16.gmra.mxu1 %v16748_v15  ;;  %4813 = vmatmul.bf16.gmra.mxu3 %v16750_v53 }
 0x33e   : > { %v4531_v32 = vpop.f32.mrf.mxu0 }
 0x33f   : > { %v4571_v18 = vadd.f32 %v4570_v63, %v4531_v32  ;;  %v9162_v63 = vld [vmem:[%s16539_s1 + $0x9d0] sm:$0xf]  ;;  %v9675_v32 = vor.u32 %v10443_v17, %v9674_v14  ;;  %v4609_v59 = vpop.f32.mrf.mxu2 }
 0x340   : > { %v9163_v62 = vor.u32 %v10315_v39, %v9162_v63  ;;  %v9419_v63 = vor.u32 %v10379_v52, %v9418_v23  ;;  %v9130_v52 = vld [vmem:[%s16539_s1 + $0x990] sm:$0xf] }
 0x341   : > { %4696 = vmatmul.bf16.gmra.mxu0 %v11612_v8  ;;  %v4610_v35 = vadd.f32 %v4609_v59, %v4571_v18  ;;  %v4648_v57 = vpop.f32.mrf.mxu3  ;;  %5058 = vmatpush.bf16.msrb.mxu2 %v9675_v32  ;;  %v4572_v49 = vpop.f32.mrf.mxu1 }
 0x342   : > { %4980 = vmatpush.bf16.msrb.mxu0 %v9163_v62  ;;  %5019 = vmatpush.bf16.msrb.mxu1 %v9419_v63  ;;  %v16792_v63 = vld [vmem:[#allocation45_spill] sm:$0xff] }
 0x343   : > { %v13136_v14 = vadd.f32 %v4648_v57, %v4610_v35  ;;  %v10435_v35 = vld [vmem:[%s16539_s1 + $0xdac] sm:$0xf0] }
 0x344   : > { %v9643_v23 = vor.u32 %v10435_v35, %v9642_v61  ;;  %v10307_v57 = vld [vmem:[%s16539_s1 + $0x9ac] sm:$0xf0] }
 0x346   : > { %v4533_v29 = vpop.f32.mrf.mxu0  ;;  %5059 = vmatpush.bf16.msrb.mxu2 %v9643_v23 }
 0x347   : > { %v4573_v17 = vadd.f32 %v4572_v49, %v4533_v29  ;;  %v4611_v18 = vpop.f32.mrf.mxu2  ;;  %v9898_v29 = vld [vmem:[%s16539_s1 + $0xf90] sm:$0xf] }
 0x348   : > { %v10499_v49 = vld [vmem:[%s16539_s1 + $0xfac] sm:$0xf0] }
 0x349   : > { %v4612_v39 = vadd.f32 %v4611_v18, %v4573_v17  ;;  %v4650_v13 = vpop.f32.mrf.mxu3  ;;  %v4575_v31 = vpop.f32.mrf.mxu1  ;;  %v16791_v17 = vld [vmem:[#allocation44_spill] sm:$0xff]  ;;  %v9131_v18 = vor.u32 %v10307_v57, %v9130_v52 }
 0x34a   : > { %4779 = vmatmul.bf16.gmra.mxu2 %v16792_v63  ;;  %v16800_v63 = vld [vmem:[#allocation8_spill] sm:$0xff] }
 0x34b   : > { %v13144_v59 = vadd.f32 %v4650_v13, %v4612_v39  ;;  %v9899_v39 = vor.u32 %v10499_v49, %v9898_v29  ;;  %v16793_v13 = vld [vmem:[#allocation46_spill] sm:$0xff]  ;;  %4981 = vmatpush.bf16.msrb.mxu0 %v9131_v18  ;;  %v9610_v29 = vld [vmem:[%s16539_s1 + $0xd50] sm:$0xf] }
 0x34c   : > { %4740 = vmatmul.bf16.gmra.mxu1 %v16791_v17  ;;  %4818 = vmatmul.bf16.gmra.mxu3 %v16793_v13  ;;  %v10427_v49 = vld [vmem:[%s16539_s1 + $0xd6c] sm:$0xf0]  ;;  %v16801_v17 = vld [vmem:[#allocation9_spill] sm:$0xff] }
 0x34d   : > { %5098 = vmatpush.bf16.msrb.mxu3 %v9899_v39  ;;  %v9098_v18 = vld [vmem:[%s16539_s1 + $0x950] sm:$0xf] }
 0x34e   : > { %v4536_v32 = vpop.f32.mrf.mxu0  ;;  %v10299_v39 = vld [vmem:[%s16539_s1 + $0x96c] sm:$0xf0] }
 0x34f   : > { %v4576_v62 = vadd.f32 %v4575_v31, %v4536_v32  ;;  %v9386_v32 = vld [vmem:[%s16539_s1 + $0xb90] sm:$0xf]  ;;  %v4614_v35 = vpop.f32.mrf.mxu2 }
 0x350   : > { %v10371_v31 = vld [vmem:[%s16539_s1 + $0xbac] sm:$0xf0] }
 0x351   : > { %4701 = vmatmul.bf16.gmra.mxu0 %v11660_v34  ;;  %v9387_v61 = vor.u32 %v10371_v31, %v9386_v32  ;;  %v4615_v36 = vadd.f32 %v4614_v35, %v4576_v62  ;;  %v4653_v22 = vpop.f32.mrf.mxu3  ;;  %v4577_v52 = vpop.f32.mrf.mxu1  ;;  %v9611_v62 = vor.u32 %v10427_v49, %v9610_v29 }
 0x353   : > { %5020 = vmatpush.bf16.msrb.mxu1 %v9387_v61  ;;  %v13174_v57 = vadd.f32 %v4653_v22, %v4615_v36  ;;  %v10491_v22 = vld [vmem:[%s16539_s1 + $0xf6c] sm:$0xf0]  ;;  %v9099_v36 = vor.u32 %v10299_v39, %v9098_v18  ;;  %5060 = vmatpush.bf16.msrb.mxu2 %v9611_v62  ;;  %v16794_v39 = vld [vmem:[#allocation2_spill] sm:$0xff] }
 0x354   : > { %v10363_v18 = vld [vmem:[%s16539_s1 + $0xb6c] sm:$0xf0] }
 0x355   : > { %4982 = vmatpush.bf16.msrb.mxu0 %v9099_v36  ;;  %v9355_v62 = vor.u32 %v10363_v18, %v9354_v58  ;;  %v10419_v58 = vld [vmem:[%s16539_s1 + $0xd2c] sm:$0xf0] }
 0x356   : > { %v4538_v47 = vpop.f32.mrf.mxu0  ;;  %v9066_v18 = vld [vmem:[%s16539_s1 + $0x910] sm:$0xf] }
 0x357   : > { %v4578_v23 = vadd.f32 %v4577_v52, %v4538_v47  ;;  %v9866_v47 = vld [vmem:[%s16539_s1 + $0xf50] sm:$0xf]  ;;  %v4616_v31 = vpop.f32.mrf.mxu2  ;;  %5021 = vmatpush.bf16.msrb.mxu1 %v9355_v62  ;;  %v9579_v62 = vor.u32 %v10419_v58, %v9578_v21 }
 0x358   : > { %v9867_v32 = vor.u32 %v10491_v22, %v9866_v47  ;;  %v16795_v47 = vld [vmem:[#allocation3_spill] sm:$0xff]  ;;  %v16797_v22 = vld [vmem:[#allocation5_spill] sm:$0xff]  ;;  %v10355_v21 = vld [vmem:[%s16539_s1 + $0xb2c] sm:$0xf0] }
 0x359   : > { %v4617_v61 = vadd.f32 %v4616_v31, %v4578_v23  ;;  %v4655_v35 = vpop.f32.mrf.mxu3  ;;  %v4580_v29 = vpop.f32.mrf.mxu1  ;;  %v16796_v23 = vld [vmem:[#allocation4_spill] sm:$0xff]  ;;  %5061 = vmatpush.bf16.msrb.mxu2 %v9579_v62 }
 0x35a   : > { %5099 = vmatpush.bf16.msrb.mxu3 %v9867_v32  ;;  %4910 = vmatmul.bf16.vlgmr.msra.gmra.mxu2 %v16796_v23  ;;  %v10411_v62 = vld [vmem:[%s16539_s1 + $0xcec] sm:$0xf0] }
 0x35b   : > { %v13194_v49 = vadd.f32 %v4655_v35, %v4617_v61 }
 0x35c   : > { %4871 = vmatmul.bf16.vlgmr.msra.gmra.mxu1 %v16795_v47  ;;  %4949 = vmatmul.bf16.vlgmr.msra.gmra.mxu3 %v16797_v22 }
 0x35e   : > { %v4541_v52 = vpop.f32.mrf.mxu0 }
 0x35f   : > { %v4581_v33 = vadd.f32 %v4580_v29, %v4541_v52  ;;  %v4619_v36 = vpop.f32.mrf.mxu2 }
 0x361   : > { %4832 = vmatmul.bf16.vlgmr.msra.gmra.mxu0 %v16794_v39  ;;  %v4620_v32 = vadd.f32 %v4619_v36, %v4581_v33  ;;  %v4658_v31 = vpop.f32.mrf.mxu3  ;;  %v4582_v35 = vpop.f32.mrf.mxu1  ;;  %v10291_v33 = vld [vmem:[%s16539_s1 + $0x92c] sm:$0xf0] }
 0x362   : > { %v9834_v36 = vld [vmem:[%s16539_s1 + $0xf10] sm:$0xf] }
 0x363   : > { %v13206_v52 = vadd.f32 %v4658_v31, %v4620_v32  ;;  %v10483_v32 = vld [vmem:[%s16539_s1 + $0xf2c] sm:$0xf0]  ;;  %v9067_v31 = vor.u32 %v10291_v33, %v9066_v18 }
 0x365   : > { %4983 = vmatpush.bf16.msrb.mxu0 %v9067_v31 }
 0x366   : > { %v4543_v61 = vpop.f32.mrf.mxu0 }
 0x367   : > { %v4583_v29 = vadd.f32 %v4582_v35, %v4543_v61  ;;  %v9835_v61 = vor.u32 %v10483_v32, %v9834_v36  ;;  %v9322_v35 = vld [vmem:[%s16539_s1 + $0xb10] sm:$0xf]  ;;  %v4621_v58 = vpop.f32.mrf.mxu2  ;;  %v16798_v36 = vld [vmem:[#allocation6_spill] sm:$0xff]  ;;  %v16799_v32 = vld [vmem:[#allocation7_spill] sm:$0xff] }
 0x368   : > { %v9323_v22 = vor.u32 %v10355_v21, %v9322_v35 }
 0x369   : > { %v4622_v23 = vadd.f32 %v4621_v58, %v4583_v29  ;;  %v4660_v47 = vpop.f32.mrf.mxu3  ;;  %5100 = vmatpush.bf16.msrb.mxu3 %v9835_v61  ;;  %v4585_v13 = vpop.f32.mrf.mxu1  ;;  %v9546_v29 = vld [vmem:[%s16539_s1 + $0xcd0] sm:$0xf] }
 0x36a   : > { %5022 = vmatpush.bf16.msrb.mxu1 %v9323_v22  ;;  %4915 = vmatmul.bf16.gmra.mxu2 %v16800_v63  ;;  %v10475_v22 = vld [vmem:[%s16539_s1 + $0xeec] sm:$0xf0] }
 0x36b   : > { %v13232_v18 = vadd.f32 %v4660_v47, %v4622_v23  ;;  %v10283_v47 = vld [vmem:[%s16539_s1 + $0x8ec] sm:$0xf0] }
 0x36c   : > { %4876 = vmatmul.bf16.gmra.mxu1 %v16799_v32  ;;  %4954 = vmatmul.bf16.gmra.mxu3 %v16801_v17  ;;  %v9802_v23 = vld [vmem:[%s16539_s1 + $0xed0] sm:$0xf] }
 0x36d   : > { %v9803_v35 = vor.u32 %v10475_v22, %v9802_v23  ;;  %v9290_v32 = vld [vmem:[%s16539_s1 + $0xad0] sm:$0xf] }
 0x36e   : > { %v4546_v39 = vpop.f32.mrf.mxu0 }
 0x36f   : > { %v4586_v33 = vadd.f32 %v4585_v13, %v4546_v39  ;;  %v9034_v13 = vld [vmem:[%s16539_s1 + $0x8d0] sm:$0xf]  ;;  %v9547_v39 = vor.u32 %v10411_v62, %v9546_v29  ;;  %v4624_v31 = vpop.f32.mrf.mxu2  ;;  %5101 = vmatpush.bf16.msrb.mxu3 %v9803_v35 }
 0x370   : > { %v9035_v61 = vor.u32 %v10283_v47, %v9034_v13  ;;  %v10275_v35 = vld [vmem:[%s16539_s1 + $0x8ac] sm:$0xf0] }
 0x371   : > { %4837 = vmatmul.bf16.gmra.mxu0 %v16798_v36  ;;  %v4625_v21 = vadd.f32 %v4624_v31, %v4586_v33  ;;  %v4663_v58 = vpop.f32.mrf.mxu3  ;;  %5062 = vmatpush.bf16.msrb.mxu2 %v9547_v39  ;;  %v4587_v29 = vpop.f32.mrf.mxu1  ;;  %v10347_v36 = vld [vmem:[%s16539_s1 + $0xaec] sm:$0xf0] }
 0x372   : > { %4984 = vmatpush.bf16.msrb.mxu0 %v9035_v61  ;;  %v9291_v13 = vor.u32 %v10347_v36, %v9290_v32  ;;  %v9514_v36 = vld [vmem:[%s16539_s1 + $0xc90] sm:$0xf] }
 0x373   : > { %v13256_v62 = vadd.f32 %v4663_v58, %v4625_v21  ;;  %v9770_v21 = vld [vmem:[%s16539_s1 + $0xe90] sm:$0xf] }
 0x374   : > { %5023 = vmatpush.bf16.msrb.mxu1 %v9291_v13  ;;  %v10467_v58 = vld [vmem:[%s16539_s1 + $0xeac] sm:$0xf0] }
 0x375   : > { %v9771_v13 = vor.u32 %v10467_v58, %v9770_v21  ;;  %v9482_v58 = vld [vmem:[%s16539_s1 + $0xc50] sm:$0xf] }
 0x376   : > { %v4548_v17 = vpop.f32.mrf.mxu0 }
 0x377   : > { %v4588_v63 = vadd.f32 %v4587_v29, %v4548_v17  ;;  %v4626_v47 = vpop.f32.mrf.mxu2  ;;  %5102 = vmatpush.bf16.msrb.mxu3 %v9771_v13  ;;  %v9738_v13 = vld [vmem:[%s16539_s1 + $0xe50] sm:$0xf] }
 0x379   : > { %v4627_v33 = vadd.f32 %v4626_v47, %v4588_v63  ;;  %v4665_v23 = vpop.f32.mrf.mxu3  ;;  %v4716_v31 = vpop.f32.mrf.mxu1  ;;  %v10403_v63 = vld [vmem:[%s16539_s1 + $0xcac] sm:$0xf0] }
 0x37a   : > { %4920 = vmatmul.bf16.gmra.mxu2 %v11204_v11  ;;  %v9515_v32 = vor.u32 %v10403_v63, %v9514_v36  ;;  %v9258_v47 = vld [vmem:[%s16539_s1 + $0xa90] sm:$0xf] }
 0x37b   : > { %v13265_v61 = vadd.f32 %v4665_v23, %v4627_v33  ;;  %v10339_v33 = vld [vmem:[%s16539_s1 + $0xaac] sm:$0xf0] }
 0x37c   : > { %4881 = vmatmul.bf16.gmra.mxu1 %v11202_v10  ;;  %4959 = vmatmul.bf16.gmra.mxu3 %v11206_v12 }
 0x37d   : > { %5063 = vmatpush.bf16.msrb.mxu2 %v9515_v32  ;;  %v10395_v32 = vld [vmem:[%s16539_s1 + $0xc6c] sm:$0xf0] }
 0x37e   : > { %v4677_v39 = vpop.f32.mrf.mxu0 }
 0x37f   : > { %v4678_v22 = vadd.f32 %v4677_v39, %v13054_v37  ;;  %v9002_v37 = vld [vmem:[%s16539_s1 + $0x890] sm:$0xf]  ;;  %v4755_v23 = vpop.f32.mrf.mxu2  ;;  %v9259_v39 = vor.u32 %v10339_v33, %v9258_v47 }
 0x380   : > { %v9003_v29 = vor.u32 %v10275_v35, %v9002_v37  ;;  %v10459_v47 = vld [vmem:[%s16539_s1 + $0xe6c] sm:$0xf0] }
 0x381   : > { %v4717_v17 = vadd.f32 %v4716_v31, %v4678_v22  ;;  %4842 = vmatmul.bf16.gmra.mxu0 %v11200_v9  ;;  %v4794_v31 = vpop.f32.mrf.mxu3  ;;  %v4718_v37 = vpop.f32.mrf.mxu1  ;;  %5024 = vmatpush.bf16.msrb.mxu1 %v9259_v39 }
 0x382   : > { %4985 = vmatpush.bf16.msrb.mxu0 %v9003_v29  ;;  %v9483_v29 = vor.u32 %v10395_v32, %v9482_v58 }
 0x383   : > { %v4756_v22 = vadd.f32 %v4755_v23, %v4717_v17  ;;  %v8970_v17 = vld [vmem:[%s16539_s1 + $0x850] sm:$0xf]  ;;  %v9739_v23 = vor.u32 %v10459_v47, %v9738_v13 }
 0x384   : > { %5064 = vmatpush.bf16.msrb.mxu2 %v9483_v29 }
 0x385   : > { %v13296_v35 = vadd.f32 %v4794_v31, %v4756_v22  ;;  %5103 = vmatpush.bf16.msrb.mxu3 %v9739_v23 }
 0x386   : > { %v4679_v36 = vpop.f32.mrf.mxu0 }
 0x387   : > { %v4680_v63 = vadd.f32 %v4679_v36, %v13074_v19  ;;  %16802 = vst [vmem:[#allocation83_spill] sm:$0xff] %v13296_v35  ;;  %v10267_v19 = vld [vmem:[%s16539_s1 + $0x86c] sm:$0xf0]  ;;  %v4757_v39 = vpop.f32.mrf.mxu2 }
 0x388   : > { %v8971_v33 = vor.u32 %v10267_v19, %v8970_v17  ;;  %v10331_v17 = vld [vmem:[%s16539_s1 + $0xa6c] sm:$0xf0] }
 0x389   : > { %v4719_v21 = vadd.f32 %v4718_v37, %v4680_v63  ;;  %v4796_v31 = vpop.f32.mrf.mxu3  ;;  %v4721_v37 = vpop.f32.mrf.mxu1 }
 0x38a   : > { %4986 = vmatpush.bf16.msrb.mxu0 %v8971_v33  ;;  %4925 = vmatmul.bf16.gmra.mxu2 %v11254_v42 }
 0x38b   : > { %v4758_v22 = vadd.f32 %v4757_v39, %v4719_v21  ;;  %v9226_v21 = vld [vmem:[%s16539_s1 + $0xa50] sm:$0xf] }
 0x38c   : > { %4886 = vmatmul.bf16.gmra.mxu1 %v11252_v41  ;;  %4964 = vmatmul.bf16.gmra.mxu3 %v11256_v43 }
 0x38d   : > { %v13317_v58 = vadd.f32 %v4796_v31, %v4758_v22  ;;  %v9450_v31 = vld [vmem:[%s16539_s1 + $0xc10] sm:$0xf] }
 0x38e   : > { %v4682_v36 = vpop.f32.mrf.mxu0 }
 0x38f   : > { %v4683_v63 = vadd.f32 %v4682_v36, %v13086_v60  ;;  %16803 = vst [vmem:[#allocation84_spill] sm:$0xff] %v13317_v58  ;;  %v9227_v60 = vor.u32 %v10331_v17, %v9226_v21  ;;  %v4760_v29 = vpop.f32.mrf.mxu2  ;;  %v10387_v36 = vld [vmem:[%s16539_s1 + $0xc2c] sm:$0xf0]  ;;  %v10359_v58 = vld [vmem:[%s16539_s1 + $0xb54] sm:$0xf] }
 0x390   : > { %v10451_v21 = vld [vmem:[%s16539_s1 + $0xe2c] sm:$0xf0] }
 0x391   : > { %v4722_v32 = vadd.f32 %v4721_v37, %v4683_v63  ;;  %4847 = vmatmul.bf16.gmra.mxu0 %v11250_v40  ;;  %5025 = vmatpush.bf16.msrb.mxu1 %v9227_v60  ;;  %v4799_v13 = vpop.f32.mrf.mxu3  ;;  %v4723_v23 = vpop.f32.mrf.mxu1  ;;  %v8938_v63 = vld [vmem:[%s16539_s1 + $0x810] sm:$0xf]  ;;  %v9451_v37 = vor.u32 %v10387_v36, %v9450_v31 }
 0x393   : > { %v4761_v19 = vadd.f32 %v4760_v29, %v4722_v32  ;;  %v9706_v32 = vld [vmem:[%s16539_s1 + $0xe10] sm:$0xf]  ;;  %5065 = vmatpush.bf16.msrb.mxu2 %v9451_v37  ;;  %v10055_v37 = vld [vmem:[%s16539_s1 + $0x1d4] sm:$0xf] }
 0x394   : > { %v9707_v60 = vor.u32 %v10451_v21, %v9706_v32  ;;  %v9194_v29 = vld [vmem:[%s16539_s1 + $0xa10] sm:$0xf] }
 0x395   : > { %v13330_v39 = vadd.f32 %v4799_v13, %v4761_v19  ;;  %v10323_v19 = vld [vmem:[%s16539_s1 + $0xa2c] sm:$0xf0] }
 0x396   : > { %v4684_v47 = vpop.f32.mrf.mxu0  ;;  %5104 = vmatpush.bf16.msrb.mxu3 %v9707_v60  ;;  %v10247_v60 = vld [vmem:[%s16539_s1 + $0x7d4] sm:$0xf] }
 0x397   : > { %v4685_v33 = vadd.f32 %v4684_v47, %v13112_v20  ;;  %16804 = vst [vmem:[#allocation85_spill] sm:$0xff] %v13330_v39  ;;  %v10259_v20 = vld [vmem:[%s16539_s1 + $0x82c] sm:$0xf0]  ;;  %v4762_v13 = vpop.f32.mrf.mxu2  ;;  %v9195_v47 = vor.u32 %v10323_v19, %v9194_v29  ;;  %v8908_v29 = vld [vmem:[%s16539_s1 + $0x7f0] sm:$0xf0] }
 0x398   : > { %v8939_v17 = vor.u32 %v10259_v20, %v8938_v63 }
 0x399   : > { %v4724_v22 = vadd.f32 %v4723_v23, %v4685_v33  ;;  %v4801_v23 = vpop.f32.mrf.mxu3  ;;  %v4726_v63 = vpop.f32.mrf.mxu1  ;;  %5026 = vmatpush.bf16.msrb.mxu1 %v9195_v47  ;;  %v8911_v47 = vor.u32 %v10247_v60, %v8908_v29 }
 0x39a   : > { %4987 = vmatpush.bf16.msrb.mxu0 %v8939_v17  ;;  %4930 = vmatmul.bf16.gmra.mxu2 %v11298_v6  ;;  %v8140_v17 = vld [vmem:[%s16539_s1 + $0x1f0] sm:$0xf0] }
 0x39b   : > { %v4763_v33 = vadd.f32 %v4762_v13, %v4724_v22  ;;  %v10183_v22 = vld [vmem:[%s16539_s1 + $0x5d4] sm:$0xf]  ;;  %v8143_v13 = vor.u32 %v10055_v37, %v8140_v17  ;;  %5253 = vmatpush.bf16.msra.mxu3 %v8911_v47 }
 0x39c   : > { %4891 = vmatmul.bf16.gmra.mxu1 %v11296_v5  ;;  %4969 = vmatmul.bf16.gmra.mxu3 %v11300_v7  ;;  %v8396_v37 = vld [vmem:[%s16539_s1 + $0x3f0] sm:$0xf0] }
 0x39d   : > { %v13357_v20 = vadd.f32 %v4801_v23, %v4763_v33 }
 0x39e   : > { %v4687_v31 = vpop.f32.mrf.mxu0  ;;  %5136 = vmatpush.bf16.msra.mxu0 %v8143_v13 }
 0x39f   : > { %v4688_v36 = vadd.f32 %v4687_v31, %v13136_v14  ;;  %16805 = vst [vmem:[#allocation86_spill] sm:$0xff] %v13357_v20  ;;  %v8652_v14 = vld [vmem:[%s16539_s1 + $0x5f0] sm:$0xf0]  ;;  %v4765_v19 = vpop.f32.mrf.mxu2 }
 0x3a0   : > { %v8655_v21 = vor.u32 %v10183_v22, %v8652_v14  ;;  %v10119_v20 = vld [vmem:[%s16539_s1 + $0x3d4] sm:$0xf] }
 0x3a1   : > { %v4727_v32 = vadd.f32 %v4726_v63, %v4688_v36  ;;  %4852 = vmatmul.bf16.gmra.mxu0 %v11294_v4  ;;  %v4804_v23 = vpop.f32.mrf.mxu3  ;;  %v4728_v63 = vpop.f32.mrf.mxu1 }
 0x3a2   : > { %5214 = vmatpush.bf16.msra.mxu2 %v8655_v21 }
 0x3a3   : > { %v4766_v33 = vadd.f32 %v4765_v19, %v4727_v32  ;;  %v8399_v32 = vor.u32 %v10119_v20, %v8396_v37  ;;  %v10175_v20 = vld [vmem:[%s16539_s1 + $0x594] sm:$0xf] }
 0x3a5   : > { %v13382_v22 = vadd.f32 %v4804_v23, %v4766_v33  ;;  %5175 = vmatpush.bf16.msra.mxu1 %v8399_v32  ;;  %v8620_v33 = vld [vmem:[%s16539_s1 + $0x5b0] sm:$0xf0] }
 0x3a6   : > { %v4689_v31 = vpop.f32.mrf.mxu0  ;;  %v8623_v23 = vor.u32 %v10175_v20, %v8620_v33  ;;  %v10111_v32 = vld [vmem:[%s16539_s1 + $0x394] sm:$0xf] }
 0x3a7   : > { %v4690_v36 = vadd.f32 %v4689_v31, %v13144_v59  ;;  %16806 = vst [vmem:[#allocation87_spill] sm:$0xff] %v13382_v22  ;;  %v4767_v17 = vpop.f32.mrf.mxu2  ;;  %v8108_v31 = vld [vmem:[%s16539_s1 + $0x1b0] sm:$0xf0] }
 0x3a8   : > { %5215 = vmatpush.bf16.msra.mxu2 %v8623_v23  ;;  %v8588_v23 = vld [vmem:[%s16539_s1 + $0x570] sm:$0xf0] }
 0x3a9   : > { %v4729_v14 = vadd.f32 %v4728_v63, %v4690_v36  ;;  %v4806_v60 = vpop.f32.mrf.mxu3  ;;  %v4731_v19 = vpop.f32.mrf.mxu1  ;;  %v10239_v36 = vld [vmem:[%s16539_s1 + $0x794] sm:$0xf] }
 0x3aa   : > { %4935 = vmatmul.bf16.gmra.mxu2 %v11360_v54  ;;  %v8876_v63 = vld [vmem:[%s16539_s1 + $0x7b0] sm:$0xf0] }
 0x3ab   : > { %v4768_v21 = vadd.f32 %v4767_v17, %v4729_v14  ;;  %v8879_v37 = vor.u32 %v10239_v36, %v8876_v63  ;;  %v8364_v17 = vld [vmem:[%s16539_s1 + $0x3b0] sm:$0xf0] }
 0x3ac   : > { %4896 = vmatmul.bf16.gmra.mxu1 %v11358_v51  ;;  %4974 = vmatmul.bf16.gmra.mxu3 %v11362_v55  ;;  %v10167_v36 = vld [vmem:[%s16539_s1 + $0x554] sm:$0xf] }
 0x3ad   : > { %v13391_v13 = vadd.f32 %v4806_v60, %v4768_v21  ;;  %v8367_v60 = vor.u32 %v10111_v32, %v8364_v17  ;;  %5254 = vmatpush.bf16.msra.mxu3 %v8879_v37  ;;  %v8591_v63 = vor.u32 %v10167_v36, %v8588_v23  ;;  %v8844_v37 = vld [vmem:[%s16539_s1 + $0x770] sm:$0xf0] }
 0x3ae   : > { %v4692_v59 = vpop.f32.mrf.mxu0  ;;  %v8332_v23 = vld [vmem:[%s16539_s1 + $0x370] sm:$0xf0] }
 0x3af   : > { %v4693_v29 = vadd.f32 %v4692_v59, %v13174_v57  ;;  %16807 = vst [vmem:[#allocation88_spill] sm:$0xff] %v13391_v13  ;;  %v10047_v57 = vld [vmem:[%s16539_s1 + $0x194] sm:$0xf]  ;;  %v4770_v21 = vpop.f32.mrf.mxu2  ;;  %5176 = vmatpush.bf16.msra.mxu1 %v8367_v60  ;;  %5216 = vmatpush.bf16.msra.mxu2 %v8591_v63 }
 0x3b0   : > { %v8111_v14 = vor.u32 %v10047_v57, %v8108_v31 }
 0x3b1   : > { %v4732_v47 = vadd.f32 %v4731_v19, %v4693_v29  ;;  %4857 = vmatmul.bf16.gmra.mxu0 %v11356_v50  ;;  %v4809_v29 = vpop.f32.mrf.mxu3  ;;  %v4733_v33 = vpop.f32.mrf.mxu1 }
 0x3b2   : > { %5137 = vmatpush.bf16.msra.mxu0 %v8111_v14  ;;  %v10231_v14 = vld [vmem:[%s16539_s1 + $0x754] sm:$0xf] }
 0x3b3   : > { %v4771_v59 = vadd.f32 %v4770_v21, %v4732_v47  ;;  %v10039_v47 = vld [vmem:[%s16539_s1 + $0x154] sm:$0xf]  ;;  %v8847_v17 = vor.u32 %v10231_v14, %v8844_v37 }
 0x3b5   : > { %v13422_v57 = vadd.f32 %v4809_v29, %v4771_v59  ;;  %5255 = vmatpush.bf16.msra.mxu3 %v8847_v17 }
 0x3b6   : > { %v4694_v19 = vpop.f32.mrf.mxu0 }
 0x3b7   : > { %v4695_v20 = vadd.f32 %v4694_v19, %v13194_v49  ;;  %16808 = vst [vmem:[#allocation89_spill] sm:$0xff] %v13422_v57  ;;  %v8076_v49 = vld [vmem:[%s16539_s1 + $0x170] sm:$0xf0]  ;;  %v4772_v21 = vpop.f32.mrf.mxu2 }
 0x3b8   : > { %v8079_v32 = vor.u32 %v10039_v47, %v8076_v49 }
 0x3b9   : > { %v4734_v31 = vadd.f32 %v4733_v33, %v4695_v20  ;;  %v4811_v59 = vpop.f32.mrf.mxu3  ;;  %v4736_v20 = vpop.f32.mrf.mxu1 }
 0x3ba   : > { %5138 = vmatpush.bf16.msra.mxu0 %v8079_v32  ;;  %5066 = vmatmul.bf16.vlgmr.msrb.gmra.mxu2 %v11410_v26 }
 0x3bb   : > { %v4773_v60 = vadd.f32 %v4772_v21, %v4734_v31  ;;  %v10103_v31 = vld [vmem:[%s16539_s1 + $0x354] sm:$0xf] }
 0x3bc   : > { %5027 = vmatmul.bf16.vlgmr.msrb.gmra.mxu1 %v11408_v25  ;;  %5105 = vmatmul.bf16.vlgmr.msrb.gmra.mxu3 %v11412_v27  ;;  %v10159_v21 = vld [vmem:[%s16539_s1 + $0x514] sm:$0xf] }
 0x3bd   : > { %v13443_v33 = vadd.f32 %v4811_v59, %v4773_v60  ;;  %v8556_v60 = vld [vmem:[%s16539_s1 + $0x530] sm:$0xf0] }
 0x3be   : > { %v4697_v29 = vpop.f32.mrf.mxu0  ;;  %v10031_v59 = vld [vmem:[%s16539_s1 + $0x114] sm:$0xf] }
 0x3bf   : > { %v4698_v19 = vadd.f32 %v4697_v29, %v13206_v52  ;;  %16809 = vst [vmem:[#allocation90_spill] sm:$0xff] %v13443_v33  ;;  %v8335_v52 = vor.u32 %v10103_v31, %v8332_v23  ;;  %v4775_v47 = vpop.f32.mrf.mxu2  ;;  %v9420_v33 = vld [vmem:[%s16539_s1 + $0xbf0] sm:$0xf0] }
 0x3c1   : > { %v4737_v36 = vadd.f32 %v4736_v20, %v4698_v19  ;;  %4988 = vmatmul.bf16.vlgmr.msrb.gmra.mxu0 %v11406_v24  ;;  %5177 = vmatpush.bf16.msra.mxu1 %v8335_v52  ;;  %v4814_v49 = vpop.f32.mrf.mxu3  ;;  %v4738_v32 = vpop.f32.mrf.mxu1  ;;  %v8559_v19 = vor.u32 %v10159_v21, %v8556_v60  ;;  %v10223_v20 = vld [vmem:[%s16539_s1 + $0x714] sm:$0xf] }
 0x3c2   : > { %v10095_v52 = vld [vmem:[%s16539_s1 + $0x314] sm:$0xf] }
 0x3c3   : > { %v4776_v63 = vadd.f32 %v4775_v47, %v4737_v36  ;;  %v8812_v36 = vld [vmem:[%s16539_s1 + $0x730] sm:$0xf0]  ;;  %5217 = vmatpush.bf16.msra.mxu2 %v8559_v19 }
 0x3c4   : > { %v8815_v23 = vor.u32 %v10223_v20, %v8812_v36  ;;  %v8300_v47 = vld [vmem:[%s16539_s1 + $0x330] sm:$0xf0] }
 0x3c5   : > { %v13456_v17 = vadd.f32 %v4814_v49, %v4776_v63  ;;  %v8303_v63 = vor.u32 %v10095_v52, %v8300_v47  ;;  %v10023_v19 = vld [vmem:[%s16539_s1 + $0xd4] sm:$0xf] }
 0x3c6   : > { %v4699_v14 = vpop.f32.mrf.mxu0  ;;  %5256 = vmatpush.bf16.msra.mxu3 %v8815_v23  ;;  %v8012_v36 = vld [vmem:[%s16539_s1 + $0xf0] sm:$0xf0] }
 0x3c7   : > { %v4700_v37 = vadd.f32 %v4699_v14, %v13232_v18  ;;  %16810 = vst [vmem:[#allocation91_spill] sm:$0xff] %v13456_v17  ;;  %v8044_v18 = vld [vmem:[%s16539_s1 + $0x130] sm:$0xf0]  ;;  %v4777_v49 = vpop.f32.mrf.mxu2  ;;  %5178 = vmatpush.bf16.msra.mxu1 %v8303_v63  ;;  %v8015_v47 = vor.u32 %v10023_v19, %v8012_v36 }
 0x3c8   : > { %v8047_v31 = vor.u32 %v10031_v59, %v8044_v18  ;;  %v8780_v23 = vld [vmem:[%s16539_s1 + $0x6f0] sm:$0xf0] }
 0x3c9   : > { %v4739_v29 = vadd.f32 %v4738_v32, %v4700_v37  ;;  %v4816_v37 = vpop.f32.mrf.mxu3  ;;  %v4741_v60 = vpop.f32.mrf.mxu1  ;;  %v10375_v17 = vld [vmem:[%s16539_s1 + $0xbd4] sm:$0xf] }
 0x3ca   : > { %5139 = vmatpush.bf16.msra.mxu0 %v8047_v31  ;;  %5071 = vmatmul.bf16.gmra.mxu2 %v11454_v2  ;;  %v10215_v31 = vld [vmem:[%s16539_s1 + $0x6d4] sm:$0xf] }
 0x3cb   : > { %v4778_v14 = vadd.f32 %v4777_v49, %v4739_v29  ;;  %v10151_v29 = vld [vmem:[%s16539_s1 + $0x4d4] sm:$0xf]  ;;  %v8783_v63 = vor.u32 %v10215_v31, %v8780_v23 }
 0x3cc   : > { %5032 = vmatmul.bf16.gmra.mxu1 %v11452_v1  ;;  %5110 = vmatmul.bf16.gmra.mxu3 %v11456_v3 }
 0x3cd   : > { %v13483_v59 = vadd.f32 %v4816_v37, %v4778_v14  ;;  %5257 = vmatpush.bf16.msra.mxu3 %v8783_v63  ;;  %v10143_v63 = vld [vmem:[%s16539_s1 + $0x494] sm:$0xf] }
 0x3ce   : > { %v4702_v32 = vpop.f32.mrf.mxu0  ;;  %5140 = vmatpush.bf16.msra.mxu0 %v8015_v47 }
 0x3cf   : > { %v4703_v21 = vadd.f32 %v4702_v32, %v13256_v62  ;;  %16811 = vst [vmem:[#allocation92_spill] sm:$0xff] %v13483_v59  ;;  %v8524_v62 = vld [vmem:[%s16539_s1 + $0x4f0] sm:$0xf0]  ;;  %v4780_v52 = vpop.f32.mrf.mxu2 }
 0x3d0   : > { %v8527_v20 = vor.u32 %v10151_v29, %v8524_v62  ;;  %v10087_v29 = vld [vmem:[%s16539_s1 + $0x2d4] sm:$0xf] }
 0x3d1   : > { %v4742_v18 = vadd.f32 %v4741_v60, %v4703_v21  ;;  %4993 = vmatmul.bf16.gmra.mxu0 %v11450_v0  ;;  %v4819_v14 = vpop.f32.mrf.mxu3  ;;  %v4743_v21 = vpop.f32.mrf.mxu1  ;;  %v8268_v62 = vld [vmem:[%s16539_s1 + $0x2f0] sm:$0xf0] }
 0x3d2   : > { %5218 = vmatpush.bf16.msra.mxu2 %v8527_v20 }
 0x3d3   : > { %v4781_v49 = vadd.f32 %v4780_v52, %v4742_v18  ;;  %v8271_v18 = vor.u32 %v10087_v29, %v8268_v62  ;;  %v8748_v29 = vld [vmem:[%s16539_s1 + $0x6b0] sm:$0xf0] }
 0x3d5   : > { %v13508_v60 = vadd.f32 %v4819_v14, %v4781_v49  ;;  %5179 = vmatpush.bf16.msra.mxu1 %v8271_v18  ;;  %v8492_v49 = vld [vmem:[%s16539_s1 + $0x4b0] sm:$0xf0] }
 0x3d6   : > { %v4704_v37 = vpop.f32.mrf.mxu0  ;;  %v10015_v14 = vld [vmem:[%s16539_s1 + $0x94] sm:$0xf] }
 0x3d7   : > { %v4705_v32 = vadd.f32 %v4704_v37, %v13265_v61  ;;  %16812 = vst [vmem:[#allocation93_spill] sm:$0xff] %v13508_v60  ;;  %v4782_v36 = vpop.f32.mrf.mxu2  ;;  %v8495_v37 = vor.u32 %v10143_v63, %v8492_v49  ;;  %v10079_v18 = vld [vmem:[%s16539_s1 + $0x294] sm:$0xf] }
 0x3d9   : > { %v4744_v19 = vadd.f32 %v4743_v21, %v4705_v32  ;;  %v4821_v31 = vpop.f32.mrf.mxu3  ;;  %v4872_v23 = vpop.f32.mrf.mxu1  ;;  %v7980_v32 = vld [vmem:[%s16539_s1 + $0xb0] sm:$0xf0]  ;;  %5219 = vmatpush.bf16.msra.mxu2 %v8495_v37 }
 0x3da   : > { %v10207_v21 = vld [vmem:[%s16539_s1 + $0x694] sm:$0xf]  ;;  %5076 = vmatmul.bf16.gmra.mxu2 %v11498_v48  ;;  %v7983_v62 = vor.u32 %v10015_v14, %v7980_v32 }
 0x3db   : > { %v4783_v20 = vadd.f32 %v4782_v36, %v4744_v19  ;;  %v8751_v19 = vor.u32 %v10207_v21, %v8748_v29  ;;  %v8236_v36 = vld [vmem:[%s16539_s1 + $0x2b0] sm:$0xf0] }
 0x3dc   : > { %5037 = vmatmul.bf16.gmra.mxu1 %v11496_v46  ;;  %5115 = vmatmul.bf16.gmra.mxu3 %v11500_v56  ;;  %v10135_v32 = vld [vmem:[%s16539_s1 + $0x454] sm:$0xf] }
 0x3dd   : > { %v13516_v52 = vadd.f32 %v4821_v31, %v4783_v20  ;;  %5141 = vmatpush.bf16.msra.mxu0 %v7983_v62  ;;  %5258 = vmatpush.bf16.msra.mxu3 %v8751_v19  ;;  %v8239_v20 = vor.u32 %v10079_v18, %v8236_v36  ;;  %v8460_v21 = vld [vmem:[%s16539_s1 + $0x470] sm:$0xf0] }
 0x3de   : > { %v4833_v61 = vpop.f32.mrf.mxu0  ;;  %v10007_v29 = vld [vmem:[%s16539_s1 + $0x54] sm:$0xf] }
 0x3df   : > { %16813 = vst [vmem:[#allocation94_spill] sm:$0xff] %v13516_v52  ;;  %v4873_v47 = vadd.f32 %v4872_v23, %v4833_v61  ;;  %v4911_v31 = vpop.f32.mrf.mxu2  ;;  %5180 = vmatpush.bf16.msra.mxu1 %v8239_v20  ;;  %v7948_v62 = vld [vmem:[%s16539_s1 + $0x70] sm:$0xf0] }
 0x3e0   : > { %v10199_v19 = vld [vmem:[%s16539_s1 + $0x654] sm:$0xf]  ;;  %v7951_v36 = vor.u32 %v10007_v29, %v7948_v62 }
 0x3e1   : > { %4998 = vmatmul.bf16.gmra.mxu0 %v11494_v44  ;;  %v4912_v61 = vadd.f32 %v4911_v31, %v4873_v47  ;;  %v4950_v23 = vpop.f32.mrf.mxu3  ;;  %v4874_v49 = vpop.f32.mrf.mxu1  ;;  %v8463_v47 = vor.u32 %v10135_v32, %v8460_v21  ;;  %v8716_v18 = vld [vmem:[%s16539_s1 + $0x670] sm:$0xf0] }
 0x3e2   : > { %v8719_v20 = vor.u32 %v10199_v19, %v8716_v18  ;;  %5142 = vmatpush.bf16.msra.mxu0 %v7951_v36  ;;  %v10071_v52 = vld [vmem:[%s16539_s1 + $0x254] sm:$0xf] }
 0x3e3   : > { %v13546_v14 = vadd.f32 %v4950_v23, %v4912_v61  ;;  %5220 = vmatpush.bf16.msra.mxu2 %v8463_v47  ;;  %v8204_v29 = vld [vmem:[%s16539_s1 + $0x270] sm:$0xf0] }
 0x3e4   : > { %5259 = vmatpush.bf16.msra.mxu3 %v8719_v20  ;;  %v8207_v47 = vor.u32 %v10071_v52, %v8204_v29  ;;  %v8428_v52 = vld [vmem:[%s16539_s1 + $0x430] sm:$0xf0] }
 0x3e5   : > { %v8684_v29 = vld [vmem:[%s16539_s1 + $0x630] sm:$0xf0] }
 0x3e6   : > { %v4835_v63 = vpop.f32.mrf.mxu0  ;;  %5181 = vmatpush.bf16.msra.mxu1 %v8207_v47 }
 0x3e7   : > { %v4875_v37 = vadd.f32 %v4874_v49, %v4835_v63  ;;  %v4913_v31 = vpop.f32.mrf.mxu2 }
 0x3e9   : > { %v4914_v61 = vadd.f32 %v4913_v31, %v4875_v37  ;;  %v4952_v23 = vpop.f32.mrf.mxu3  ;;  %v4877_v49 = vpop.f32.mrf.mxu1 }
 0x3ea   : > { %5081 = vmatmul.bf16.gmra.mxu2 %v16746_v28 }
 0x3eb   : > { %v13566_v32 = vadd.f32 %v4952_v23, %v4914_v61  ;;  %v10127_v61 = vld [vmem:[%s16539_s1 + $0x414] sm:$0xf] }
 0x3ec   : > { %5042 = vmatmul.bf16.gmra.mxu1 %v16745_v45  ;;  %5120 = vmatmul.bf16.gmra.mxu3 %v16747_v30  ;;  %v9999_v23 = vld [vmem:[%s16539_s1 + $0x14] sm:$0xf] }
 0x3ee   : > { %v4838_v63 = vpop.f32.mrf.mxu0 }
 0x3ef   : > { %v4878_v21 = vadd.f32 %v4877_v49, %v4838_v63  ;;  %v4916_v37 = vpop.f32.mrf.mxu2  ;;  %v8431_v63 = vor.u32 %v10127_v61, %v8428_v52  ;;  %v7916_v49 = vld [vmem:[%s16539_s1 + $0x30] sm:$0xf0] }
 0x3f0   : > { %v7919_v47 = vor.u32 %v9999_v23, %v7916_v49 }
 0x3f1   : > { %5003 = vmatmul.bf16.gmra.mxu0 %v11558_v16  ;;  %v4917_v62 = vadd.f32 %v4916_v37, %v4878_v21  ;;  %v4955_v19 = vpop.f32.mrf.mxu3  ;;  %v4879_v36 = vpop.f32.mrf.mxu1  ;;  %v10191_v21 = vld [vmem:[%s16539_s1 + $0x614] sm:$0xf]  ;;  %5221 = vmatpush.bf16.msra.mxu2 %v8431_v63 }
 0x3f2   : > { %v8687_v37 = vor.u32 %v10191_v21, %v8684_v29  ;;  %5143 = vmatpush.bf16.msra.mxu0 %v7919_v47  ;;  %v10439_v63 = vld [vmem:[%s16539_s1 + $0xdd4] sm:$0xf] }
 0x3f3   : > { %v13578_v20 = vadd.f32 %v4955_v19, %v4917_v62  ;;  %v10063_v62 = vld [vmem:[%s16539_s1 + $0x214] sm:$0xf] }
 0x3f4   : > { %v8172_v19 = vld [vmem:[%s16539_s1 + $0x230] sm:$0xf0]  ;;  %5260 = vmatpush.bf16.msra.mxu3 %v8687_v37 }
 0x3f5   : > { %v9164_v21 = vld [vmem:[%s16539_s1 + $0x9f0] sm:$0xf0] }
 0x3f6   : > { %v4840_v18 = vpop.f32.mrf.mxu0  ;;  %v10503_v29 = vld [vmem:[%s16539_s1 + $0xfd4] sm:$0xf] }
 0x3f7   : > { %v4880_v31 = vadd.f32 %v4879_v36, %v4840_v18  ;;  %v8175_v18 = vor.u32 %v10063_v62, %v8172_v19  ;;  %v4918_v36 = vpop.f32.mrf.mxu2  ;;  %v9932_v47 = vld [vmem:[%s16539_s1 + $0xff0] sm:$0xf0] }
 0x3f8   : > { %v9935_v19 = vor.u32 %v10503_v29, %v9932_v47 }
 0x3f9   : > { %5182 = vmatpush.bf16.msra.mxu1 %v8175_v18  ;;  %v4919_v61 = vadd.f32 %v4918_v36, %v4880_v31  ;;  %v4957_v52 = vpop.f32.mrf.mxu3  ;;  %v4882_v59 = vpop.f32.mrf.mxu1  ;;  %v9676_v31 = vld [vmem:[%s16539_s1 + $0xdf0] sm:$0xf0] }
 0x3fa   : > { %5086 = vmatmul.bf16.gmra.mxu2 %v16749_v38  ;;  %5409 = vmatpush.bf16.msrb.mxu3 %v9935_v19  ;;  %v10431_v19 = vld [vmem:[%s16539_s1 + $0xd94] sm:$0xf] }
 0x3fb   : > { %v13604_v23 = vadd.f32 %v4957_v52, %v4919_v61 }
 0x3fc   : > { %5047 = vmatmul.bf16.gmra.mxu1 %v16748_v15  ;;  %5125 = vmatmul.bf16.gmra.mxu3 %v16750_v53 }
 0x3fe   : > { %v4843_v60 = vpop.f32.mrf.mxu0 }
 0x3ff   : > { %v4883_v49 = vadd.f32 %v4882_v59, %v4843_v60  ;;  %v10311_v59 = vld [vmem:[%s16539_s1 + $0x9d4] sm:$0xf]  ;;  %v9679_v60 = vor.u32 %v10439_v63, %v9676_v31  ;;  %v4921_v37 = vpop.f32.mrf.mxu2 }
 0x400   : > { %v9167_v62 = vor.u32 %v10311_v59, %v9164_v21  ;;  %v9423_v59 = vor.u32 %v10375_v17, %v9420_v33  ;;  %v10303_v33 = vld [vmem:[%s16539_s1 + $0x994] sm:$0xf] }
 0x401   : > { %5008 = vmatmul.bf16.gmra.mxu0 %v11612_v8  ;;  %v4922_v18 = vadd.f32 %v4921_v37, %v4883_v49  ;;  %v4960_v36 = vpop.f32.mrf.mxu3  ;;  %5370 = vmatpush.bf16.msrb.mxu2 %v9679_v60  ;;  %v4884_v52 = vpop.f32.mrf.mxu1 }
 0x402   : > { %5292 = vmatpush.bf16.msrb.mxu0 %v9167_v62  ;;  %5331 = vmatpush.bf16.msrb.mxu1 %v9423_v59  ;;  %v16815_v59 = vld [vmem:[#allocation45_spill] sm:$0xff] }
 0x403   : > { %v13628_v63 = vadd.f32 %v4960_v36, %v4922_v18  ;;  %v9644_v18 = vld [vmem:[%s16539_s1 + $0xdb0] sm:$0xf0] }
 0x404   : > { %v9647_v17 = vor.u32 %v10431_v19, %v9644_v18  ;;  %v9132_v36 = vld [vmem:[%s16539_s1 + $0x9b0] sm:$0xf0] }
 0x406   : > { %v4845_v61 = vpop.f32.mrf.mxu0  ;;  %5371 = vmatpush.bf16.msrb.mxu2 %v9647_v17 }
 0x407   : > { %v4885_v31 = vadd.f32 %v4884_v52, %v4845_v61  ;;  %v4923_v49 = vpop.f32.mrf.mxu2  ;;  %v10495_v61 = vld [vmem:[%s16539_s1 + $0xf94] sm:$0xf] }
 0x408   : > { %v9900_v52 = vld [vmem:[%s16539_s1 + $0xfb0] sm:$0xf0] }
 0x409   : > { %v4924_v21 = vadd.f32 %v4923_v49, %v4885_v31  ;;  %v4962_v29 = vpop.f32.mrf.mxu3  ;;  %v4887_v47 = vpop.f32.mrf.mxu1  ;;  %v16814_v31 = vld [vmem:[#allocation44_spill] sm:$0xff]  ;;  %v9135_v49 = vor.u32 %v10303_v33, %v9132_v36 }
 0x40a   : > { %5091 = vmatmul.bf16.gmra.mxu2 %v16815_v59 }
 0x40b   : > { %v13636_v37 = vadd.f32 %v4962_v29, %v4924_v21  ;;  %v9903_v21 = vor.u32 %v10495_v61, %v9900_v52  ;;  %v16816_v29 = vld [vmem:[#allocation46_spill] sm:$0xff]  ;;  %5293 = vmatpush.bf16.msrb.mxu0 %v9135_v49  ;;  %v10423_v61 = vld [vmem:[%s16539_s1 + $0xd54] sm:$0xf] }
 0x40c   : > { %5052 = vmatmul.bf16.gmra.mxu1 %v16814_v31  ;;  %5130 = vmatmul.bf16.gmra.mxu3 %v16816_v29  ;;  %v9612_v52 = vld [vmem:[%s16539_s1 + $0xd70] sm:$0xf0] }
 0x40d   : > { %5410 = vmatpush.bf16.msrb.mxu3 %v9903_v21  ;;  %v10295_v49 = vld [vmem:[%s16539_s1 + $0x954] sm:$0xf] }
 0x40e   : > { %v4848_v60 = vpop.f32.mrf.mxu0  ;;  %v9100_v21 = vld [vmem:[%s16539_s1 + $0x970] sm:$0xf0] }
 0x40f   : > { %v4888_v62 = vadd.f32 %v4887_v47, %v4848_v60  ;;  %v10367_v60 = vld [vmem:[%s16539_s1 + $0xb94] sm:$0xf]  ;;  %v4926_v18 = vpop.f32.mrf.mxu2 }
 0x410   : > { %v9388_v47 = vld [vmem:[%s16539_s1 + $0xbb0] sm:$0xf0] }
 0x411   : > { %5013 = vmatmul.bf16.gmra.mxu0 %v11660_v34  ;;  %v9391_v19 = vor.u32 %v10367_v60, %v9388_v47  ;;  %v4927_v57 = vadd.f32 %v4926_v18, %v4888_v62  ;;  %v4965_v13 = vpop.f32.mrf.mxu3  ;;  %v4889_v33 = vpop.f32.mrf.mxu1  ;;  %v9615_v62 = vor.u32 %v10423_v61, %v9612_v52 }
 0x413   : > { %5332 = vmatpush.bf16.msrb.mxu1 %v9391_v19  ;;  %v13666_v36 = vadd.f32 %v4965_v13, %v4927_v57  ;;  %v9868_v13 = vld [vmem:[%s16539_s1 + $0xf70] sm:$0xf0]  ;;  %v9103_v57 = vor.u32 %v10295_v49, %v9100_v21  ;;  %5372 = vmatpush.bf16.msrb.mxu2 %v9615_v62  ;;  %v16817_v21 = vld [vmem:[#allocation2_spill] sm:$0xff] }
 0x414   : > { %v9356_v49 = vld [vmem:[%s16539_s1 + $0xb70] sm:$0xf0] }
 0x415   : > { %5294 = vmatpush.bf16.msrb.mxu0 %v9103_v57  ;;  %v9359_v62 = vor.u32 %v10359_v58, %v9356_v49 }
 0x416   : > { %v4850_v22 = vpop.f32.mrf.mxu0 }
 0x417   : > { %v4890_v17 = vadd.f32 %v4889_v33, %v4850_v22  ;;  %v10487_v22 = vld [vmem:[%s16539_s1 + $0xf54] sm:$0xf]  ;;  %v4928_v47 = vpop.f32.mrf.mxu2  ;;  %5333 = vmatpush.bf16.msrb.mxu1 %v9359_v62 }
 0x418   : > { %v9871_v60 = vor.u32 %v10487_v22, %v9868_v13  ;;  %v16818_v22 = vld [vmem:[#allocation3_spill] sm:$0xff]  ;;  %v16820_v13 = vld [vmem:[#allocation5_spill] sm:$0xff]  ;;  %v16823_v62 = vld [vmem:[#allocation8_spill] sm:$0xff] }
 0x419   : > { %v4929_v19 = vadd.f32 %v4928_v47, %v4890_v17  ;;  %v4967_v18 = vpop.f32.mrf.mxu3  ;;  %v4892_v61 = vpop.f32.mrf.mxu1  ;;  %v16819_v17 = vld [vmem:[#allocation4_spill] sm:$0xff] }
 0x41a   : > { %5411 = vmatpush.bf16.msrb.mxu3 %v9871_v60  ;;  %5222 = vmatmul.bf16.vlgmr.msra.gmra.mxu2 %v16819_v17  ;;  %v16821_v17 = vld [vmem:[#allocation6_spill] sm:$0xff] }
 0x41b   : > { %v13686_v52 = vadd.f32 %v4967_v18, %v4929_v19 }
 0x41c   : > { %5183 = vmatmul.bf16.vlgmr.msra.gmra.mxu1 %v16818_v22  ;;  %5261 = vmatmul.bf16.vlgmr.msra.gmra.mxu3 %v16820_v13  ;;  %v16822_v13 = vld [vmem:[#allocation7_spill] sm:$0xff] }
 0x41e   : > { %v4853_v33 = vpop.f32.mrf.mxu0 }
 0x41f   : > { %v4893_v39 = vadd.f32 %v4892_v61, %v4853_v33  ;;  %v4931_v57 = vpop.f32.mrf.mxu2 }
 0x421   : > { %5144 = vmatmul.bf16.vlgmr.msra.gmra.mxu0 %v16817_v21  ;;  %v4932_v60 = vadd.f32 %v4931_v57, %v4893_v39  ;;  %v4970_v47 = vpop.f32.mrf.mxu3  ;;  %v4894_v18 = vpop.f32.mrf.mxu1  ;;  %v16824_v39 = vld [vmem:[#allocation9_spill] sm:$0xff] }
 0x423   : > { %v13698_v33 = vadd.f32 %v4970_v47, %v4932_v60 }
 0x426   : > { %v4855_v19 = vpop.f32.mrf.mxu0 }
 0x427   : > { %v4895_v61 = vadd.f32 %v4894_v18, %v4855_v19  ;;  %v4933_v35 = vpop.f32.mrf.mxu2 }
 0x429   : > { %v4934_v29 = vadd.f32 %v4933_v35, %v4895_v61  ;;  %v4972_v59 = vpop.f32.mrf.mxu3  ;;  %v4897_v58 = vpop.f32.mrf.mxu1 }
 0x42a   : > { %5227 = vmatmul.bf16.gmra.mxu2 %v16823_v62  ;;  %v16579_v62 = vlaneseq }
 0x42b   : > { %v13700_v49 = vadd.f32 %v4972_v59, %v4934_v29 }
 0x42c   : > { %5188 = vmatmul.bf16.gmra.mxu1 %v16822_v13  ;;  %5266 = vmatmul.bf16.gmra.mxu3 %v16824_v39 }
 0x42e   : > { %v4858_v21 = vpop.f32.mrf.mxu0 }
 0x42f   : > { %v4898_v22 = vadd.f32 %v4897_v58, %v4858_v21  ;;  %v4936_v57 = vpop.f32.mrf.mxu2 }
 0x431   : > { %5149 = vmatmul.bf16.gmra.mxu0 %v16821_v17  ;;  %v4937_v60 = vadd.f32 %v4936_v57, %v4898_v22  ;;  %v4975_v47 = vpop.f32.mrf.mxu3  ;;  %v4899_v18 = vpop.f32.mrf.mxu1  ;;  %v13716_v22 = vand.u32 127, %v16579_v62  ;;  %v10287_v57 = vld [vmem:[%s16539_s1 + $0x914] sm:$0xf] }
 0x433   : > { %v13706_v35 = vadd.f32 %v4975_v47, %v4937_v60  ;;  %vm6077_vm0 = vcmp.gt.s32.totalorder %v13716_v22, 0 }
 0x436   : > { %v4860_v19 = vpop.f32.mrf.mxu0 }
 0x437   : > { %v4900_v61 = vadd.f32 %v4899_v18, %v4860_v19  ;;  %v4938_v31 = vpop.f32.mrf.mxu2 }
 0x439   : > { %v4939_v59 = vadd.f32 %v4938_v31, %v4900_v61  ;;  %v4977_v29 = vpop.f32.mrf.mxu3  ;;  %v5028_v17 = vpop.f32.mrf.mxu1  ;;  %v9068_v61 = vld [vmem:[%s16539_s1 + $0x930] sm:$0xf0] }
 0x43a   : > { %5232 = vmatmul.bf16.gmra.mxu2 %v11204_v11  ;;  %v9071_v62 = vor.u32 %v10287_v57, %v9068_v61  ;;  %v16825_v57 = vld [vmem:[#allocation47_spill] sm:$0xff] }
 0x43b   : > { %v13709_v13 = vadd.f32 %v4977_v29, %v4939_v59  ;;  %v10479_v59 = vld [vmem:[%s16539_s1 + $0xf14] sm:$0xf] }
 0x43c   : > { %5193 = vmatmul.bf16.gmra.mxu1 %v11202_v10  ;;  %5271 = vmatmul.bf16.gmra.mxu3 %v11206_v12  ;;  %v9836_v29 = vld [vmem:[%s16539_s1 + $0xf30] sm:$0xf0] }
 0x43d   : > { %5295 = vmatpush.bf16.msrb.mxu0 %v9071_v62  ;;  %v9548_v62 = vld [vmem:[%s16539_s1 + $0xcf0] sm:$0xf0] }
 0x43e   : > { %v4989_v21 = vpop.f32.mrf.mxu0 }
 0x43f   : > { %v4990_v58 = vadd.f32 %v4989_v21, %v13546_v14  ;;  %v5067_v31 = vpop.f32.mrf.mxu2  ;;  %v10415_v14 = vld [vmem:[%s16539_s1 + $0xd14] sm:$0xf] }
 0x441   : > { %v5029_v34 = vadd.f32 %v5028_v17, %v4990_v58  ;;  %5154 = vmatmul.bf16.gmra.mxu0 %v11200_v9  ;;  %v9580_v17 = vld [vmem:[%s16539_s1 + $0xd30] sm:$0xf0]  ;;  %v5106_v47 = vpop.f32.mrf.mxu3  ;;  %v5030_v58 = vpop.f32.mrf.mxu1  ;;  %v10228_v9 = vld [vmem:[%s16539_s1 + $0x734] sm:$0xf0] }
 0x442   : > { %v9583_v19 = vor.u32 %v10415_v14, %v9580_v17  ;;  %v9324_v14 = vld [vmem:[%s16539_s1 + $0xb30] sm:$0xf0] }
 0x443   : > { %v5068_v60 = vadd.f32 %v5067_v31, %v5029_v34  ;;  %v9839_v34 = vor.u32 %v10479_v59, %v9836_v29  ;;  %v10351_v31 = vld [vmem:[%s16539_s1 + $0xb14] sm:$0xf] }
 0x444   : > { %5373 = vmatpush.bf16.msrb.mxu2 %v9583_v19  ;;  %v9327_v12 = vor.u32 %v10351_v31, %v9324_v14  ;;  %v10471_v31 = vld [vmem:[%s16539_s1 + $0xed4] sm:$0xf] }
 0x445   : > { %v5107_v17 = vadd.f32 %v5106_v47, %v5068_v60  ;;  %5412 = vmatpush.bf16.msrb.mxu3 %v9839_v34  ;;  %v10407_v47 = vld [vmem:[%s16539_s1 + $0xcd4] sm:$0xf] }
 0x446   : > { %v4991_v18 = vpop.f32.mrf.mxu0  ;;  %5334 = vmatpush.bf16.msrb.mxu1 %v9327_v12  ;;  %v10279_v12 = vld [vmem:[%s16539_s1 + $0x8d4] sm:$0xf] }
 0x447   : > { %v4992_v21 = vadd.f32 %v4991_v18, %v13566_v32  ;;  %v13744_v32 = vmul.f32 %v5107_v17, %v5107_v17  ;;  %v6081_v18 = vmul.f32 %v16825_v57, %v16825_v57  ;;  %v5069_v60 = vpop.f32.mrf.mxu2  ;;  %v9036_v34 = vld [vmem:[%s16539_s1 + $0x8f0] sm:$0xf0] }
 0x448   : > { %v9804_v14 = vld [vmem:[%s16539_s1 + $0xef0] sm:$0xf0] }
 0x449   : > { %v5031_v11 = vadd.f32 %v5030_v58, %v4992_v21  ;;  %v6129_v61 = vsel %vm6077_vm0, %v13744_v32, 0.0  ;;  %v5108_v29 = vpop.f32.mrf.mxu3  ;;  %v9551_v58 = vor.u32 %v10407_v47, %v9548_v62  ;;  %v5033_v57 = vpop.f32.mrf.mxu1 }
 0x44a   : > { %v13751_v59 = vadd.f32 %v6129_v61, %v6081_v18  ;;  %v9039_v18 = vor.u32 %v10279_v12, %v9036_v34  ;;  %5237 = vmatmul.bf16.gmra.mxu2 %v11254_v42  ;;  %v10399_v12 = vld [vmem:[%s16539_s1 + $0xc94] sm:$0xf] }
 0x44b   : > { %v5070_v19 = vadd.f32 %v5069_v60, %v5031_v11  ;;  %v9807_v11 = vor.u32 %v10471_v31, %v9804_v14  ;;  %5374 = vmatpush.bf16.msrb.mxu2 %v9551_v58  ;;  %v10343_v60 = vld [vmem:[%s16539_s1 + $0xad4] sm:$0xf] }
 0x44c   : > { %5198 = vmatmul.bf16.gmra.mxu1 %v11252_v41  ;;  %5276 = vmatmul.bf16.gmra.mxu3 %v11256_v43  ;;  %v10271_v31 = vld [vmem:[%s16539_s1 + $0x894] sm:$0xf] }
 0x44d   : > { %v5109_v61 = vadd.f32 %v5108_v29, %v5070_v19  ;;  %5413 = vmatpush.bf16.msrb.mxu3 %v9807_v11  ;;  %v9516_v19 = vld [vmem:[%s16539_s1 + $0xcb0] sm:$0xf0]  ;;  %5296 = vmatpush.bf16.msrb.mxu0 %v9039_v18 }
 0x44e   : > { %v4994_v21 = vpop.f32.mrf.mxu0  ;;  %v16826_v29 = vld [vmem:[#allocation48_spill] sm:$0xff]  ;;  %v9519_v34 = vor.u32 %v10399_v12, %v9516_v19 }
 0x44f   : > { %v4995_v17 = vadd.f32 %v4994_v21, %v13578_v20  ;;  %v13776_v47 = vmul.f32 %v5109_v61, %v5109_v61  ;;  %v9292_v20 = vld [vmem:[%s16539_s1 + $0xaf0] sm:$0xf0]  ;;  %v6085_v21 = vmul.f32 %v16826_v29, %v16826_v29 }
 0x450   : > { %v9295_v58 = vor.u32 %v10343_v60, %v9292_v20  ;;  %v9004_v14 = vld [vmem:[%s16539_s1 + $0x8b0] sm:$0xf0]  ;;  %v5072_v60 = vpop.f32.mrf.mxu2  ;;  %5375 = vmatpush.bf16.msrb.mxu2 %v9519_v34 }
 0x451   : > { %5159 = vmatmul.bf16.gmra.mxu0 %v11250_v40  ;;  %v5034_v62 = vadd.f32 %v5033_v57, %v4995_v17  ;;  %v10463_v17 = vld [vmem:[%s16539_s1 + $0xe94] sm:$0xf]  ;;  %v6133_v57 = vsel %vm6077_vm0, %v13776_v47, 0.0  ;;  %v9007_v11 = vor.u32 %v10271_v31, %v9004_v14  ;;  %v5111_v14 = vpop.f32.mrf.mxu3  ;;  %v5035_v43 = vpop.f32.mrf.mxu1 }
 0x452   : > { %v9772_v18 = vld [vmem:[%s16539_s1 + $0xeb0] sm:$0xf0]  ;;  %v13807_v61 = vadd.f32 %v6133_v57, %v6085_v21  ;;  %5335 = vmatpush.bf16.msrb.mxu1 %v9295_v58 }
 0x453   : > { %v9775_v20 = vor.u32 %v10463_v17, %v9772_v18  ;;  %v10335_v12 = vld [vmem:[%s16539_s1 + $0xa94] sm:$0xf]  ;;  %v5073_v31 = vadd.f32 %v5072_v60, %v5034_v62  ;;  %5297 = vmatpush.bf16.msrb.mxu0 %v9007_v11 }
 0x454   : > { %v9260_v19 = vld [vmem:[%s16539_s1 + $0xab0] sm:$0xf0] }
 0x455   : > { %v10391_v29 = vld [vmem:[%s16539_s1 + $0xc54] sm:$0xf]  ;;  %v9263_v57 = vor.u32 %v10335_v12, %v9260_v19  ;;  %5414 = vmatpush.bf16.msrb.mxu3 %v9775_v20  ;;  %v5112_v42 = vadd.f32 %v5111_v14, %v5073_v31  ;;  %v16827_v20 = vld [vmem:[#allocation49_spill] sm:$0xff] }
 0x456   : > { %v4996_v21 = vpop.f32.mrf.mxu0  ;;  %v9484_v58 = vld [vmem:[%s16539_s1 + $0xc70] sm:$0xf0] }
 0x457   : > { %v10263_v34 = vld [vmem:[%s16539_s1 + $0x854] sm:$0xf]  ;;  %v4997_v18 = vadd.f32 %v4996_v21, %v13604_v23  ;;  %v9487_v62 = vor.u32 %v10391_v29, %v9484_v58  ;;  %5336 = vmatpush.bf16.msrb.mxu1 %v9263_v57  ;;  %v13840_v11 = vmul.f32 %v5112_v42, %v5112_v42  ;;  %v6089_v29 = vmul.f32 %v16827_v20, %v16827_v20 }
 0x458   : > { %v8972_v17 = vld [vmem:[%s16539_s1 + $0x870] sm:$0xf0] }
 0x459   : > { %v8975_v60 = vor.u32 %v10263_v34, %v8972_v17  ;;  %v10455_v12 = vld [vmem:[%s16539_s1 + $0xe54] sm:$0xf]  ;;  %5376 = vmatpush.bf16.msrb.mxu2 %v9487_v62  ;;  %v5036_v21 = vadd.f32 %v5035_v43, %v4997_v18  ;;  %v6137_v14 = vsel %vm6077_vm0, %v13840_v11, 0.0  ;;  %v5074_v34 = vpop.f32.mrf.mxu2  ;;  %v5113_v43 = vpop.f32.mrf.mxu3 }
 0x45a   : > { %v9740_v19 = vld [vmem:[%s16539_s1 + $0xe70] sm:$0xf0]  ;;  %v13847_v58 = vadd.f32 %v6137_v14, %v6089_v29  ;;  %5242 = vmatmul.bf16.gmra.mxu2 %v11298_v6 }
 0x45b   : > { %v9743_v41 = vor.u32 %v10455_v12, %v9740_v19  ;;  %v10327_v40 = vld [vmem:[%s16539_s1 + $0xa54] sm:$0xf]  ;;  %5298 = vmatpush.bf16.msrb.mxu0 %v8975_v60  ;;  %v5038_v19 = vpop.f32.mrf.mxu1 }
 0x45c   : > { %v9228_v23 = vld [vmem:[%s16539_s1 + $0xa70] sm:$0xf0]  ;;  %5203 = vmatmul.bf16.gmra.mxu1 %v11296_v5  ;;  %5281 = vmatmul.bf16.gmra.mxu3 %v11300_v7 }
 0x45d   : > { %5415 = vmatpush.bf16.msrb.mxu3 %v9743_v41  ;;  %v9231_v31 = vor.u32 %v10327_v40, %v9228_v23  ;;  %v10383_v42 = vld [vmem:[%s16539_s1 + $0xc14] sm:$0xf]  ;;  %v5075_v41 = vadd.f32 %v5074_v34, %v5036_v21  ;;  %v16828_v34 = vld [vmem:[#allocation50_spill] sm:$0xff] }
 0x45e   : > { %v9452_v57 = vld [vmem:[%s16539_s1 + $0xc30] sm:$0xf0]  ;;  %v4999_v17 = vpop.f32.mrf.mxu0 }
 0x45f   : > { %5337 = vmatpush.bf16.msrb.mxu1 %v9231_v31  ;;  %v10255_v40 = vld [vmem:[%s16539_s1 + $0x814] sm:$0xf]  ;;  %v9455_v18 = vor.u32 %v10383_v42, %v9452_v57  ;;  %v5000_v12 = vadd.f32 %v4999_v17, %v13628_v63  ;;  %v5114_v29 = vadd.f32 %v5113_v43, %v5075_v41  ;;  %v6093_v42 = vmul.f32 %v16828_v34, %v16828_v34 }
 0x460   : > { %v8940_v62 = vld [vmem:[%s16539_s1 + $0x830] sm:$0xf0]  ;;  %v13882_v57 = vmax.f32 %v13751_v59, 1e-16 }
 0x461   : > { %v10447_v60 = vld [vmem:[%s16539_s1 + $0xe14] sm:$0xf]  ;;  %v8943_v23 = vor.u32 %v10255_v40, %v8940_v62  ;;  %5377 = vmatpush.bf16.msrb.mxu2 %v9455_v18  ;;  %5164 = vmatmul.bf16.gmra.mxu0 %v11294_v4  ;;  %v13875_v63 = vmul.f32 %v5114_v29, %v5114_v29  ;;  %v5039_v40 = vadd.f32 %v5038_v19, %v5000_v12  ;;  %v5077_v18 = vpop.f32.mrf.mxu2  ;;  %v13970_v4 = vmax.f32 %v13847_v58, 1e-16  ;;  %v8402_v58 = vld [vmem:[%s16539_s1 + $0x3d8] sm:$0xf] }
 0x462   : > { %v9708_v20 = vld [vmem:[%s16539_s1 + $0xe30] sm:$0xf0]  ;;  %10533 = vrsqrt.f32 %v13882_v57  ;;  %vm6628_vm1 = vcmp.eq.f32.partialorder %v13882_v57, inf  ;;  %vm6630_vm2 = vcmp.eq.f32.partialorder %v13882_v57, 0.0 }
 0x463   : > { %v9711_v21 = vor.u32 %v10447_v60, %v9708_v20  ;;  %v10319_v31 = vld [vmem:[%s16539_s1 + $0xa14] sm:$0xf]  ;;  %5299 = vmatpush.bf16.msrb.mxu0 %v8943_v23  ;;  %v6141_v43 = vsel %vm6077_vm0, %v13875_v63, 0.0  ;;  %v5078_v62 = vadd.f32 %v5077_v18, %v5039_v40  ;;  %v5116_v60 = vpop.f32.mrf.mxu3  ;;  %v5040_v12 = vpop.f32.mrf.mxu1  ;;  %v13904_v18 = vmax.f32 %v13744_v32, 1e-16 }
 0x464   : > { %v9196_v14 = vld [vmem:[%s16539_s1 + $0xa30] sm:$0xf0]  ;;  %v13888_v17 = vadd.f32 %v6141_v43, %v6093_v42  ;;  %vm6724_vm10 = vcmp.eq.f32.partialorder %v13970_v4, inf  ;;  %vm6726_vm13 = vcmp.eq.f32.partialorder %v13970_v4, 0.0 }
 0x465   : > { %v9199_v41 = vor.u32 %v10319_v31, %v9196_v14  ;;  %5416 = vmatpush.bf16.msrb.mxu3 %v9711_v21  ;;  %v5117_v19 = vadd.f32 %v5116_v60, %v5078_v62  ;;  %v16829_v31 = vld [vmem:[#allocation51_spill] sm:$0xff]  ;;  %10535 = vlog2.f32 %v13904_v18 }
 0x466   : > { %v5001_v20 = vpop.f32.mrf.mxu0  ;;  %v6097_v14 = vmul.f32 %v16829_v31, %v16829_v31  ;;  %10537 = vlog2.f32 %v13882_v57 }
 0x467   : > { %5338 = vmatpush.bf16.msrb.mxu1 %v9199_v41  ;;  %v5002_v59 = vadd.f32 %v5001_v20, %v13636_v37  ;;  %v13892_v29 = vmul.f32 %v5117_v19, %v5117_v19 }
 0x468   : > { %v13899_v34 = vpop.eup %10533 }
 0x469   : > { %v5041_v23 = vadd.f32 %v5040_v12, %v5002_v59  ;;  %v6145_v21 = vsel %vm6077_vm0, %v13892_v29, 0.0  ;;  %v5079_v40 = vpop.f32.mrf.mxu2  ;;  %v6622_v20 = vmul.f32 %v13899_v34, %v13882_v57 }
 0x46a   : > { %v13901_v42 = vadd.f32 %v6145_v21, %v6097_v14  ;;  %5247 = vmatmul.bf16.gmra.mxu2 %v11360_v54 }
 0x46b   : > { %v5080_v41 = vadd.f32 %v5079_v40, %v5041_v23  ;;  %v5118_v43 = vpop.f32.mrf.mxu3  ;;  %v5043_v60 = vpop.f32.mrf.mxu1  ;;  %v16830_v23 = vld [vmem:[#allocation52_spill] sm:$0xff] }
 0x46c   : > { %5208 = vmatmul.bf16.gmra.mxu1 %v11358_v51  ;;  %v6101_v32 = vmul.f32 %v16830_v23, %v16830_v23  ;;  %5286 = vmatmul.bf16.gmra.mxu3 %v11362_v55  ;;  %v10536_v23 = vpop.eup %10535  ;;  %v16831_v51 = vld [vmem:[#allocation53_spill] sm:$0xff] }
 0x46d   : > { %v5119_v59 = vadd.f32 %v5118_v43, %v5080_v41 }
 0x46e   : > { %v5004_v37 = vpop.f32.mrf.mxu0 }
 0x46f   : > { %v5005_v62 = vadd.f32 %v5004_v37, %v13666_v36  ;;  %v13910_v19 = vmul.f32 %v5119_v59, %v5119_v59  ;;  %v6623_v36 = vmul.f32 %v13899_v34, %v6622_v20  ;;  %v13926_v37 = vmax.f32 %v13807_v61, 1e-16 }
 0x470   : > { %v13938_v61 = vmul.f32 0.6931472, %v10536_v23  ;;  %v10060_v23 = vld [vmem:[%s16539_s1 + $0x1f4] sm:$0xf0] }
 0x471   : > { %v5044_v12 = vadd.f32 %v5043_v60, %v5005_v62  ;;  %5169 = vmatmul.bf16.gmra.mxu0 %v11356_v50  ;;  %v6149_v31 = vsel %vm6077_vm0, %v13910_v19, 0.0  ;;  %v5082_v21 = vpop.f32.mrf.mxu2  ;;  %v6624_v59 = vmul.f32 0.5, %v6623_v36  ;;  %10539 = vlog2.f32 %v13926_v37  ;;  %v10538_v36 = vpop.eup %10537 }
 0x472   : > { %v13922_v14 = vadd.f32 %v6149_v31, %v6101_v32  ;;  %v6201_v32 = vmul.f32 %v16831_v51, %v16831_v51  ;;  %v8658_v51 = vld [vmem:[%s16539_s1 + $0x5d8] sm:$0xf]  ;;  %vm6676_vm6 = vcmp.eq.f32.partialorder %v13926_v37, inf  ;;  %vm6678_vm7 = vcmp.eq.f32.partialorder %v13926_v37, 0.0 }
 0x473   : > { %v5083_v40 = vadd.f32 %v5082_v21, %v5044_v12  ;;  %v5121_v41 = vpop.f32.mrf.mxu3  ;;  %v5045_v60 = vpop.f32.mrf.mxu1  ;;  %v6625_v31 = vsub.f32 1.5, %v6624_v59  ;;  %v13934_v21 = vmax.f32 %v13776_v47, 1e-16  ;;  %v8146_v47 = vld [vmem:[%s16539_s1 + $0x1d8] sm:$0xf] }
 0x475   : > { %v5122_v20 = vadd.f32 %v5121_v41, %v5083_v40  ;;  %16832 = vst [vmem:[#allocation47_spill] sm:$0xff] %v13934_v21  ;;  %10541 = vlog2.f32 %v13934_v21 }
 0x476   : > { %v5006_v43 = vpop.f32.mrf.mxu0 }
 0x477   : > { %v5007_v62 = vadd.f32 %v5006_v43, %v13686_v52  ;;  %v6225_v54 = vmul.f32 %v5122_v20, %v5122_v20  ;;  %v10188_v43 = vld [vmem:[%s16539_s1 + $0x5f4] sm:$0xf0]  ;;  %v10540_v5 = vpop.eup %10539 }
 0x478   : > { %v8659_v20 = vor.u32 %v10188_v43, %v8658_v51  ;;  %v13962_v51 = vmul.f32 0.6931472, %v10538_v36  ;;  %v13965_v43 = vmax.f32 %v13840_v11, 1e-16 }
 0x479   : > { %v5046_v55 = vadd.f32 %v5045_v60, %v5007_v62  ;;  %v6249_v52 = vsel %vm6077_vm0, %v6225_v54, 0.0  ;;  %v5084_v41 = vpop.f32.mrf.mxu2 }
 0x47a   : > { %v6273_v40 = vadd.f32 %v6249_v52, %v6201_v32  ;;  %v8914_v32 = vld [vmem:[%s16539_s1 + $0x7d8] sm:$0xf]  ;;  %16834 = vst [vmem:[#allocation49_spill] sm:$0xff] %v13962_v51  ;;  %5526 = vmatpush.bf16.msra.mxu2 %v8659_v20 }
 0x47b   : > { %v5085_v62 = vadd.f32 %v5084_v41, %v5046_v55  ;;  %v5123_v60 = vpop.f32.mrf.mxu3  ;;  %v10252_v52 = vld [vmem:[%s16539_s1 + $0x7f4] sm:$0xf0]  ;;  %v5048_v55 = vpop.f32.mrf.mxu1  ;;  %v8147_v41 = vor.u32 %v10060_v23, %v8146_v47  ;;  %16835 = vst [vmem:[#allocation50_spill] sm:$0xff] %v13965_v43  ;;  %5378 = vmatmul.bf16.vlgmr.msrb.gmra.mxu2 %v11410_v26 }
 0x47c   : > { %v13958_v12 = vmax.f32 %v6273_v40, 1e-16  ;;  %v8915_v7 = vor.u32 %v10252_v52, %v8914_v32  ;;  %v6626_v40 = vmul.f32 %v13899_v34, %v6625_v31  ;;  %5339 = vmatmul.bf16.vlgmr.msrb.gmra.mxu1 %v11408_v25  ;;  %v16837_v34 = vld [vmem:[#allocation54_spill] sm:$0xff]  ;;  %5417 = vmatmul.bf16.vlgmr.msrb.gmra.mxu3 %v11412_v27  ;;  %v10180_v31 = vld [vmem:[%s16539_s1 + $0x5b4] sm:$0xf0]  ;;  %v16839_v52 = vld [vmem:[#allocation55_spill] sm:$0xff] }
 0x47d   : > { %v5124_v6 = vadd.f32 %v5123_v60, %v5085_v62  ;;  %5448 = vmatpush.bf16.msra.mxu0 %v8147_v41  ;;  %v8114_v47 = vld [vmem:[%s16539_s1 + $0x198] sm:$0xf]  ;;  %v14002_v60 = vmul.f32 0.6931472, %v10540_v5 }
 0x47e   : > { %v5009_v59 = vpop.f32.mrf.mxu0  ;;  %16833 = vst [vmem:[#allocation48_spill] sm:$0xff] %v13958_v12  ;;  %10543 = vrsqrt.f32 %v13958_v12  ;;  %5565 = vmatpush.bf16.msra.mxu3 %v8915_v7  ;;  %v8626_v7 = vld [vmem:[%s16539_s1 + $0x598] sm:$0xf]  ;;  %v6627_v41 = vmul.f32 %v6626_v40, %v13882_v57  ;;  %vm6340_vm3 = vcmp.eq.f32.partialorder %v13958_v12, inf  ;;  %vm6342_vm4 = vcmp.eq.f32.partialorder %v13958_v12, 0.0 }
 0x47f   : > { %v5010_v50 = vadd.f32 %v5009_v59, %v13698_v33  ;;  %v13972_v33 = vmax.f32 %v6225_v54, 1e-16  ;;  %10545 = vlog2.f32 %v13958_v12  ;;  %v13977_v11 = vmul.f32 %v5124_v6, %v5124_v6  ;;  %v10124_v54 = vld [vmem:[%s16539_s1 + $0x3f4] sm:$0xf0]  ;;  %16838 = vst [vmem:[#allocation52_spill] sm:$0xff] %v14002_v60 }
 0x480   : > { %v6205_v6 = vmul.f32 %v16837_v34, %v16837_v34  ;;  %v10052_v62 = vld [vmem:[%s16539_s1 + $0x1b4] sm:$0xf0]  ;;  %v8627_v20 = vor.u32 %v10180_v31, %v8626_v7  ;;  %v10542_v31 = vpop.eup %10541 }
 0x481   : > { %16836 = vst [vmem:[#allocation51_spill] sm:$0xff] %v13972_v33  ;;  %5300 = vmatmul.bf16.vlgmr.msrb.gmra.mxu0 %v11406_v24  ;;  %v5049_v36 = vadd.f32 %v5048_v55, %v5010_v50  ;;  %v8403_v50 = vor.u32 %v10124_v54, %v8402_v58  ;;  %v6253_v59 = vsel %vm6077_vm0, %v13977_v11, 0.0  ;;  %v8115_v23 = vor.u32 %v10052_v62, %v8114_v47  ;;  %v8882_v32 = vld [vmem:[%s16539_s1 + $0x798] sm:$0xf]  ;;  %v5087_v54 = vpop.f32.mrf.mxu2 }
 0x482   : > { %v14012_v55 = vmul.f32 %v16839_v52, %v16839_v52  ;;  %v6277_v58 = vadd.f32 %v6253_v59, %v6205_v6  ;;  %v10244_v5 = vld [vmem:[%s16539_s1 + $0x7b4] sm:$0xf0]  ;;  %5527 = vmatpush.bf16.msra.mxu2 %v8627_v20  ;;  %10547 = vlog2.f32 %v13972_v33 }
 0x483   : > { %5487 = vmatpush.bf16.msra.mxu1 %v8403_v50  ;;  %v8370_v7 = vld [vmem:[%s16539_s1 + $0x398] sm:$0xf]  ;;  %v5088_v47 = vadd.f32 %v5087_v54, %v5049_v36  ;;  %v5126_v62 = vpop.f32.mrf.mxu3  ;;  %v8883_v40 = vor.u32 %v10244_v5, %v8882_v32  ;;  %v16840_v54 = vld [vmem:[#allocation56_spill] sm:$0xff]  ;;  %5449 = vmatpush.bf16.msra.mxu0 %v8115_v23  ;;  %10549 = vlog2.f32 %v13965_v43  ;;  %v14096_v43 = vmax.f32 %v13875_v63, 1e-16 }
 0x484   : > { %v10116_v34 = vld [vmem:[%s16539_s1 + $0x3b4] sm:$0xf0]  ;;  %v14034_v36 = vpop.eup %10543  ;;  %v14038_v20 = vmul.f32 %v16840_v54, %v16840_v54  ;;  %v14041_v32 = vmax.f32 %v6277_v58, 1e-16  ;;  %10551 = vlog2.f32 %v13970_v4 }
 0x485   : > { %v8371_v6 = vor.u32 %v10116_v34, %v8370_v7  ;;  %v8594_v50 = vld [vmem:[%s16539_s1 + $0x558] sm:$0xf]  ;;  %v5050_v7 = vpop.f32.mrf.mxu1  ;;  %v10546_v24 = vpop.eup %10545  ;;  %v6334_v54 = vmul.f32 %v14034_v36, %v13958_v12  ;;  %v5127_v10 = vadd.f32 %v5126_v62, %v5088_v47  ;;  %5566 = vmatpush.bf16.msra.mxu3 %v8883_v40  ;;  %v6629_v47 = vsel %vm6628_vm1, %v13882_v57, %v6627_v41 }
 0x486   : > { %v5011_v52 = vpop.f32.mrf.mxu0  ;;  %v10172_v59 = vld [vmem:[%s16539_s1 + $0x574] sm:$0xf0]  ;;  %16841 = vst [vmem:[#allocation53_spill] sm:$0xff] %v14041_v32  ;;  %v14071_v62 = vmul.f32 0.6931472, %v10542_v31  ;;  %10553 = vlog2.f32 %v14041_v32  ;;  %vm6388_vm8 = vcmp.eq.f32.partialorder %v14041_v32, inf }
 0x487   : > { %v8082_v27 = vld [vmem:[%s16539_s1 + $0x158] sm:$0xf]  ;;  %v5012_v5 = vadd.f32 %v5011_v52, %v13700_v49  ;;  %v8595_v34 = vor.u32 %v10172_v59, %v8594_v50  ;;  %5488 = vmatpush.bf16.msra.mxu1 %v8371_v6  ;;  %v6335_v40 = vmul.f32 %v14034_v36, %v6334_v54  ;;  %v14075_v50 = vmax.f32 %v13977_v11, 1e-16 }
 0x488   : > { %v10044_v26 = vld [vmem:[%s16539_s1 + $0x174] sm:$0xf0]  ;;  %v6233_v59 = vmul.f32 %v5127_v10, %v5127_v10  ;;  %v10548_v39 = vpop.eup %10547  ;;  %vm6390_vm9 = vcmp.eq.f32.partialorder %v14041_v32, 0.0 }
 0x489   : > { %v8850_v25 = vld [vmem:[%s16539_s1 + $0x758] sm:$0xf]  ;;  %v8083_v58 = vor.u32 %v10044_v26, %v8082_v27  ;;  %v14066_v26 = vmul.f32 0.6931472, %v10546_v24  ;;  %16843 = vst [vmem:[#allocation55_spill] sm:$0xff] %v14075_v50  ;;  %5528 = vmatpush.bf16.msra.mxu2 %v8595_v34  ;;  %v5051_v6 = vadd.f32 %v5050_v7, %v5012_v5  ;;  %v6336_v5 = vmul.f32 0.5, %v6335_v40  ;;  %v14110_v51 = vpop.eup %10549 }
 0x48a   : > { %v10236_v49 = vld [vmem:[%s16539_s1 + $0x774] sm:$0xf0]  ;;  %10555 = vlog2.f32 %v14075_v50 }
 0x48b   : > { %v8338_v23 = vld [vmem:[%s16539_s1 + $0x358] sm:$0xf]  ;;  %16842 = vst [vmem:[#allocation54_spill] sm:$0xff] %v14066_v26  ;;  %5450 = vmatpush.bf16.msra.mxu0 %v8083_v58  ;;  %v8851_v54 = vor.u32 %v10236_v49, %v8850_v25  ;;  %v6257_v25 = vsel %vm6077_vm0, %v6233_v59, 0.0  ;;  %v14104_v49 = vmax.f32 %v13888_v17, 1e-16  ;;  %v5128_v21 = vpop.f32.mrf.mxu3  ;;  %10557 = vlog2.f32 %v14096_v43  ;;  %5383 = vmatmul.bf16.gmra.mxu2 %v11454_v2 }
 0x48c   : > { %v10108_v52 = vld [vmem:[%s16539_s1 + $0x374] sm:$0xf0]  ;;  %5344 = vmatmul.bf16.gmra.mxu1 %v11452_v1  ;;  %5422 = vmatmul.bf16.gmra.mxu3 %v11456_v3 }
 0x48d   : > { %v8562_v27 = vld [vmem:[%s16539_s1 + $0x518] sm:$0xf]  ;;  %v8339_v11 = vor.u32 %v10108_v52, %v8338_v23  ;;  %v6281_v23 = vadd.f32 %v6257_v25, %v14012_v55  ;;  %v5089_v52 = vpop.f32.mrf.mxu2  ;;  %5567 = vmatpush.bf16.msra.mxu3 %v8851_v54  ;;  %v14115_v55 = vpop.eup %10551  ;;  %10559 = vlog2.f32 %v14104_v49  ;;  %vm6772_vm14 = vcmp.eq.f32.partialorder %v14104_v49, inf }
 0x48e   : > { %v10164_v24 = vld [vmem:[%s16539_s1 + $0x534] sm:$0xf0]  ;;  %v5090_v26 = vadd.f32 %v5089_v52, %v5051_v6  ;;  %v5014_v17 = vpop.f32.mrf.mxu0  ;;  %vm6774_vm1 = vcmp.eq.f32.partialorder %v14104_v49, 0.0 }
 0x48f   : > { %v8050_v41 = vld [vmem:[%s16539_s1 + $0x118] sm:$0xf]  ;;  %v8563_v7 = vor.u32 %v10164_v24, %v8562_v27  ;;  %5489 = vmatpush.bf16.msra.mxu1 %v8339_v11  ;;  %v6337_v27 = vsub.f32 1.5, %v6336_v5  ;;  %v14112_v24 = vmax.f32 %v6233_v59, 1e-16  ;;  %v16846_v59 = vand.u32 2147483648, %v13882_v57 }
 0x490   : > { %v10036_v10 = vld [vmem:[%s16539_s1 + $0x134] sm:$0xf0]  ;;  %v14117_v54 = vmax.f32 %v6281_v23, 1e-16  ;;  %v5129_v25 = vadd.f32 %v5128_v21, %v5090_v26  ;;  %v6343_v57 = vand.u32 2147483648, %v13958_v12 }
 0x491   : > { %v8818_v34 = vld [vmem:[%s16539_s1 + $0x718] sm:$0xf]  ;;  %v8051_v31 = vor.u32 %v10036_v10, %v8050_v41  ;;  %16844 = vst [vmem:[#allocation56_spill] sm:$0xff] %v14112_v24  ;;  %5529 = vmatpush.bf16.msra.mxu2 %v8563_v7  ;;  %v5053_v41 = vpop.f32.mrf.mxu1  ;;  %v14120_v10 = vmul.f32 0.6931472, %v10548_v39  ;;  %v6632_v6 = vsel %vm6630_vm2, %v16846_v59, %v6629_v47  ;;  %v6338_v5 = vmul.f32 %v14034_v36, %v6337_v27 }
 0x492   : > { %v8306_v58 = vld [vmem:[%s16539_s1 + $0x318] sm:$0xf]  ;;  %v8819_v63 = vor.u32 %v10228_v9, %v8818_v34  ;;  %16845 = vst [vmem:[#allocation95_spill] sm:$0xff] %v14117_v54  ;;  %v5015_v9 = vadd.f32 %v5014_v17, %v13706_v35  ;;  %v10554_v34 = vpop.eup %10553  ;;  %v14129_v7 = vmax.f32 %v13892_v29, 1e-16  ;;  %5305 = vmatmul.bf16.gmra.mxu0 %v11450_v0  ;;  %10561 = vlog2.f32 %v14117_v54 }
 0x493   : > { %v10100_v40 = vld [vmem:[%s16539_s1 + $0x334] sm:$0xf0]  ;;  %5451 = vmatpush.bf16.msra.mxu0 %v8051_v31  ;;  %v14132_v35 = vmul.f32 0.6931472, %v10554_v34  ;;  %v6339_v39 = vmul.f32 %v6338_v5, %v13958_v12  ;;  %v6237_v21 = vmul.f32 %v5129_v25, %v5129_v25  ;;  %10563 = vlog2.f32 %v14112_v24  ;;  %v10556_v23 = vpop.eup %10555  ;;  %v5131_v31 = vpop.f32.mrf.mxu3 }
 0x494   : > { %v8307_v11 = vor.u32 %v10100_v40, %v8306_v58  ;;  %5568 = vmatpush.bf16.msra.mxu3 %v8819_v63  ;;  %v5054_v29 = vadd.f32 %v5053_v41, %v5015_v9  ;;  %v8530_v36 = vld [vmem:[%s16539_s1 + $0x4d8] sm:$0xf]  ;;  %v10558_v25 = vpop.eup %10557  ;;  %10565 = vlog2.f32 %v14129_v7  ;;  %vm6436_vm11 = vcmp.eq.f32.partialorder %v14117_v54, inf }
 0x495   : > { %16847 = vst [vmem:[#allocation96_spill] sm:$0xff] %v14132_v35  ;;  %v10156_v47 = vld [vmem:[%s16539_s1 + $0x4f4] sm:$0xf0]  ;;  %v6341_v52 = vsel %vm6340_vm3, %v13958_v12, %v6339_v39  ;;  %v6261_v63 = vsel %vm6077_vm0, %v6237_v21, 0.0  ;;  %v14162_v40 = vmax.f32 %v6237_v21, 1e-16  ;;  %v5092_v41 = vpop.f32.mrf.mxu2 }
 0x496   : > { %5490 = vmatpush.bf16.msra.mxu1 %v8307_v11  ;;  %v8018_v26 = vld [vmem:[%s16539_s1 + $0xd8] sm:$0xf]  ;;  %v6344_v17 = vsel %vm6342_vm4, %v6343_v57, %v6341_v52  ;;  %v6285_v9 = vadd.f32 %v6261_v63, %v14038_v20  ;;  %v8531_v11 = vor.u32 %v10156_v47, %v8530_v36  ;;  %v5093_v21 = vadd.f32 %v5092_v41, %v5054_v29  ;;  %v5016_v58 = vpop.f32.mrf.mxu0  ;;  %v10560_v20 = vpop.eup %10559 }
 0x497   : > { %16848 = vst [vmem:[#allocation97_spill] sm:$0xff] %v14162_v40  ;;  %v10028_v27 = vld [vmem:[%s16539_s1 + $0xf4] sm:$0xf0]  ;;  %v14174_v39 = vsub.f32 %v6344_v17, %v6632_v6  ;;  %v5017_v47 = vadd.f32 %v5016_v58, %v13709_v13  ;;  %v14180_v52 = vmul.f32 0.6931472, %v10556_v23  ;;  %10567 = vlog2.f32 %v14162_v40 }
 0x498   : > { %v8019_v34 = vor.u32 %v10028_v27, %v8018_v26  ;;  %v8786_v59 = vld [vmem:[%s16539_s1 + $0x6d8] sm:$0xf]  ;;  %v14177_v36 = vmax.f32 %v6285_v9, 1e-16  ;;  %5530 = vmatpush.bf16.msra.mxu2 %v8531_v11  ;;  %v10562_v6 = vpop.eup %10561  ;;  %10569 = vrsqrt.f32 %v13926_v37  ;;  %v5132_v29 = vadd.f32 %v5131_v31, %v5093_v21 }
 0x499   : > { %v10220_v5 = vld [vmem:[%s16539_s1 + $0x6f4] sm:$0xf0]  ;;  %16849 = vst [vmem:[#allocation98_spill] sm:$0xff] %v14174_v39  ;;  %v5055_v26 = vpop.f32.mrf.mxu1  ;;  %v14191_v58 = vmul.f32 0.6931472, %v14115_v55  ;;  %v10564_v23 = vpop.eup %10563  ;;  %v7252_v21 = vsub.f32 %v14180_v52, %v14071_v62  ;;  %vm6438_vm12 = vcmp.eq.f32.partialorder %v14117_v54, 0.0 }
 0x49a   : > { %v8787_v57 = vor.u32 %v10220_v5, %v8786_v59  ;;  %16850 = vst [vmem:[#allocation99_spill] sm:$0xff] %v14177_v36  ;;  %5452 = vmatpush.bf16.msra.mxu0 %v8019_v34  ;;  %v8274_v63 = vld [vmem:[%s16539_s1 + $0x2d8] sm:$0xf]  ;;  %v14194_v27 = vmax.f32 %v13901_v42, 1e-16  ;;  %v5056_v17 = vadd.f32 %v5055_v26, %v5017_v47  ;;  %v6241_v34 = vmul.f32 %v5132_v29, %v5132_v29 }
 0x49b   : > { %v10092_v13 = vld [vmem:[%s16539_s1 + $0x2f4] sm:$0xf0]  ;;  %16851 = vst [vmem:[#allocation100_spill] sm:$0xff] %v14191_v58  ;;  %v14196_v41 = vmul.f32 0.6931472, %v10562_v6  ;;  %10571 = vlog2.f32 %v14177_v36  ;;  %v5133_v52 = vpop.f32.mrf.mxu3  ;;  %5388 = vmatmul.bf16.gmra.mxu2 %v11498_v48  ;;  %vm6484_vm15 = vcmp.eq.f32.partialorder %v14177_v36, inf }
 0x49c   : > { %5569 = vmatpush.bf16.msra.mxu3 %v8787_v57  ;;  %v8275_v9 = vor.u32 %v10092_v13, %v8274_v63  ;;  %v16853_v31 = vld [vmem:[#allocation57_spill] sm:$0xff]  ;;  %v7244_v59 = vmul.f32 0.6931472, %v14110_v51  ;;  %v14203_v5 = vmax.f32 %v13910_v19, 1e-16  ;;  %v10566_v57 = vpop.eup %10565  ;;  %10573 = vrsqrt.f32 %v13970_v4  ;;  %5349 = vmatmul.bf16.gmra.mxu1 %v11496_v46 }
 0x49d   : > { %16852 = vst [vmem:[#allocation101_spill] sm:$0xff] %v14196_v41  ;;  %v6217_v11 = vmul.f32 %v16853_v31, %v16853_v31  ;;  %v7232_v55 = vmul.f32 0.6931472, %v10564_v23  ;;  %v6265_v47 = vsel %vm6077_vm0, %v6241_v34, 0.0  ;;  %v14212_v26 = vmax.f32 %v6241_v34, 1e-16  ;;  %v10568_v6 = vpop.eup %10567  ;;  %v5094_v63 = vpop.f32.mrf.mxu2  ;;  %5427 = vmatmul.bf16.gmra.mxu3 %v11500_v56 }
 0x49e   : > { %5491 = vmatpush.bf16.msra.mxu1 %v8275_v9  ;;  %v7246_v51 = vmul.f32 0.6931472, %v10558_v25  ;;  %v14215_v19 = vmax.f32 %v13922_v14, 1e-16  ;;  %10575 = vlog2.f32 %v14194_v27  ;;  %v14218_v23 = vpop.eup %10569  ;;  %v5095_v62 = vadd.f32 %v5094_v63, %v5056_v17  ;;  %v5145_v9 = vpop.f32.mrf.mxu0  ;;  %v10020_v63 = vld [vmem:[%s16539_s1 + $0xb4] sm:$0xf0] }
 0x49f   : > { %16854 = vst [vmem:[#allocation57_spill] sm:$0xff] %v14212_v26  ;;  %v6289_v29 = vadd.f32 %v6265_v47, %v6217_v11  ;;  %v7253_v13 = vsub.f32 %v7232_v55, %v7244_v59  ;;  %v14220_v31 = vmul.f32 0.6931472, %v10560_v20  ;;  %v7234_v42 = vmul.f32 0.6931472, %v10568_v6 }
 0x4a0   : > { %10577 = vlog2.f32 %v14212_v26  ;;  %v14225_v14 = vmul.f32 0.6931472, %v10566_v57  ;;  %v16857_v11 = vsub.f32 %v14120_v10, %v13938_v61  ;;  %v5134_v20 = vadd.f32 %v5133_v52, %v5095_v62  ;;  %v8498_v47 = vld [vmem:[%s16539_s1 + $0x498] sm:$0xf]  ;;  %v16858_v61 = vld [vmem:[#allocation58_spill] sm:$0xff] }
 0x4a1   : > { %16855 = vst [vmem:[#allocation102_spill] sm:$0xff] %v14220_v31  ;;  %v14223_v25 = vmax.f32 %v6289_v29, 1e-16  ;;  %v5184_v34 = vpop.f32.mrf.mxu1  ;;  %10579 = vlog2.f32 %v14203_v5  ;;  %v10572_v17 = vpop.eup %10571  ;;  %v10148_v57 = vld [vmem:[%s16539_s1 + $0x4b4] sm:$0xf0]  ;;  %v6221_v10 = vmul.f32 %v16858_v61, %v16858_v61  ;;  %v7258_v61 = vmul.f32 0.5, %v7252_v21 }
 0x4a2   : > { %v14231_v59 = vmul.f32 0.5, %v16857_v11  ;;  %10581 = vrsqrt.f32 %v14041_v32  ;;  %v5185_v55 = vadd.f32 %v5184_v34, %v5145_v9  ;;  %v7986_v6 = vld [vmem:[%s16539_s1 + $0x98] sm:$0xf]  ;;  %5310 = vmatmul.bf16.gmra.mxu0 %v11494_v44  ;;  %v8499_v29 = vor.u32 %v10148_v57, %v8498_v47  ;;  %v14256_v34 = vpop.eup %10573 }
 0x4a3   : > { %16856 = vst [vmem:[#allocation103_spill] sm:$0xff] %v14223_v25  ;;  %v8754_v62 = vld [vmem:[%s16539_s1 + $0x698] sm:$0xf]  ;;  %10583 = vlog2.f32 %v14215_v19  ;;  %v7254_v9 = vsub.f32 %v7234_v42, %v7246_v51  ;;  %v6245_v11 = vmul.f32 %v5134_v20, %v5134_v20  ;;  %v7987_v47 = vor.u32 %v10020_v63, %v7986_v6  ;;  %v5262_v22 = vpop.f32.mrf.mxu3 }
 0x4a4   : > { %v10212_v52 = vld [vmem:[%s16539_s1 + $0x6b4] sm:$0xf0]  ;;  %v14260_v57 = vmul.f32 0.6931472, %v10572_v17  ;;  %v10576_v12 = vpop.eup %10575  ;;  %5531 = vmatpush.bf16.msra.mxu2 %v8499_v29  ;;  %10585 = vlog2.f32 %v14223_v25  ;;  %v7259_v20 = vmul.f32 0.5, %v7253_v13  ;;  %vm6532_vm2 = vcmp.eq.f32.partialorder %v14223_v25, inf }
 0x4a5   : > { %v8755_v58 = vor.u32 %v10212_v52, %v8754_v62  ;;  %v8242_v42 = vld [vmem:[%s16539_s1 + $0x298] sm:$0xf]  ;;  %v14270_v6 = vmul.f32 0.5, %v7254_v9  ;;  %v6269_v21 = vsel %vm6077_vm0, %v6245_v11, 0.0  ;;  %v14274_v63 = vmax.f32 %v6245_v11, 1e-16  ;;  %5453 = vmatpush.bf16.msra.mxu0 %v7987_v47  ;;  %v5223_v60 = vpop.f32.mrf.mxu2 }
 0x4a6   : > { %16859 = vst [vmem:[#allocation58_spill] sm:$0xff] %v14260_v57  ;;  %v10084_v51 = vld [vmem:[%s16539_s1 + $0x2b4] sm:$0xf0]  ;;  %v10578_v17 = vpop.eup %10577  ;;  %10587 = vrsqrt.f32 %v14117_v54  ;;  %v6293_v41 = vadd.f32 %v6269_v21, %v6221_v10  ;;  %v5224_v35 = vadd.f32 %v5223_v60, %v5185_v55  ;;  %v5147_v56 = vpop.f32.mrf.mxu0  ;;  %v7408_v11 = vand.u32 2147483647, %v14231_v59 }
 0x4a7   : > { %16860 = vst [vmem:[#allocation104_spill] sm:$0xff] %v14274_v63  ;;  %v8243_v29 = vor.u32 %v10084_v51, %v8242_v42  ;;  %v10580_v52 = vpop.eup %10579  ;;  %5570 = vmatpush.bf16.msra.mxu3 %v8755_v58  ;;  %v7236_v13 = vmul.f32 0.6931472, %v10578_v17  ;;  %10589 = vlog2.f32 %v14274_v63  ;;  %v7409_v47 = vand.u32 2147483647, %v7258_v61 }
 0x4a8   : > { %v14279_v9 = vpop.eup %10581  ;;  %v14283_v51 = vmax.f32 %v6293_v41, 1e-16  ;;  %v7410_v58 = vand.u32 2147483647, %v7259_v20  ;;  %v7411_v17 = vand.u32 2147483647, %v14270_v6  ;;  %v6670_v60 = vmul.f32 %v14218_v23, %v13926_v37 }
 0x4a9   : > { %5492 = vmatpush.bf16.msra.mxu1 %v8243_v29  ;;  %v10584_v42 = vpop.eup %10583  ;;  %v5186_v62 = vpop.f32.mrf.mxu1  ;;  %v7255_v10 = vsub.f32 %v7236_v13, %v14225_v14  ;;  %v14289_v55 = vadd.f32 %v5262_v22, %v5224_v35  ;;  %v8466_v59 = vld [vmem:[%s16539_s1 + $0x458] sm:$0xf]  ;;  %v6382_v20 = vmul.f32 %v14279_v9, %v14041_v32  ;;  %v14314_v31 = vmul.f32 0.6931472, %v10576_v12 }
 0x4aa   : > { %16861 = vst [vmem:[#allocation105_spill] sm:$0xff] %v14283_v51  ;;  %v5187_v21 = vadd.f32 %v5186_v62, %v5147_v56  ;;  %v10140_v41 = vld [vmem:[%s16539_s1 + $0x474] sm:$0xf0]  ;;  %v10586_v61 = vpop.eup %10585  ;;  %10591 = vlog2.f32 %v14283_v51  ;;  %v7414_v57 = vsel %vm7326_vm5, %v7408_v11, 0.0  ;;  %v7415_v48 = vsel %vm7326_vm5, %v7409_v47, 0.0 }
 0x4ab   : > { %v7954_v14 = vld [vmem:[%s16539_s1 + $0x58] sm:$0xf]  ;;  %v8467_v6 = vor.u32 %v10140_v41, %v8466_v59  ;;  %v14312_v22 = vmul.f32 0.6931472, %v10586_v61  ;;  %16863 = vst [vmem:[#allocation107_spill] sm:$0xff] %v14314_v31  ;;  %v7261_v41 = vmul.f32 0.5, %v7255_v10  ;;  %v6671_v39 = vmul.f32 %v14218_v23, %v6670_v60  ;;  %5393 = vmatmul.bf16.gmra.mxu2 %v16746_v28 }
 0x4ac   : > { %v10012_v56 = vld [vmem:[%s16539_s1 + $0x74] sm:$0xf0]  ;;  %v14316_v59 = vpop.eup %10587  ;;  %v7417_v46 = vsel %vm7326_vm5, %v7410_v58, 0.0  ;;  %v7250_v12 = vmul.f32 0.6931472, %v10580_v52  ;;  %v7416_v61 = vadd.f32 %v7415_v48, %v7414_v57  ;;  %v7419_v11 = vsel %vm7326_vm5, %v7411_v17, 0.0  ;;  %5354 = vmatmul.bf16.gmra.mxu1 %v16745_v45 }
 0x4ad   : > { %v8722_v35 = vld [vmem:[%s16539_s1 + $0x658] sm:$0xf]  ;;  %v7955_v62 = vor.u32 %v10012_v56, %v7954_v14  ;;  %16862 = vst [vmem:[#allocation106_spill] sm:$0xff] %v14312_v22  ;;  %5532 = vmatpush.bf16.msra.mxu2 %v8467_v6  ;;  %v10590_v44 = vpop.eup %10589  ;;  %v6383_v56 = vmul.f32 %v14279_v9, %v6382_v20  ;;  %v5225_v6 = vpop.f32.mrf.mxu2  ;;  %v6718_v47 = vmul.f32 %v14256_v34, %v13970_v4  ;;  %10593 = vrsqrt.f32 %v14177_v36 }
 0x4ae   : > { %v10204_v29 = vld [vmem:[%s16539_s1 + $0x674] sm:$0xf0]  ;;  %v7238_v10 = vmul.f32 0.6931472, %v10590_v44  ;;  %v5226_v58 = vadd.f32 %v5225_v6, %v5187_v21  ;;  %v5150_v60 = vpop.f32.mrf.mxu0  ;;  %v6430_v48 = vmul.f32 %v14316_v59, %v14117_v54  ;;  %10595 = vrsqrt.f32 %v14104_v49  ;;  %5432 = vmatmul.bf16.gmra.mxu3 %v16747_v30 }
 0x4af   : > { %v8723_v13 = vor.u32 %v10204_v29, %v8722_v35  ;;  %5454 = vmatpush.bf16.msra.mxu0 %v7955_v62  ;;  %v7412_v35 = vand.u32 2147483647, %v7261_v41  ;;  %v5264_v29 = vpop.f32.mrf.mxu3  ;;  %v14328_v62 = vmul.f32 0.6931472, %v10584_v42  ;;  %v8210_v21 = vld [vmem:[%s16539_s1 + $0x258] sm:$0xf]  ;;  %10597 = vrsqrt.f32 %v14223_v25 }
 0x4b0   : > { %v10592_v3 = vpop.eup %10591  ;;  %v7256_v44 = vsub.f32 %v7238_v10, %v7250_v12  ;;  %v14334_v17 = vadd.f32 %v5264_v29, %v5226_v58  ;;  %v6672_v58 = vmul.f32 0.5, %v6671_v39  ;;  %10599 = vrsqrt.f32 %v14194_v27 }
 0x4b1   : > { %5571 = vmatpush.bf16.msra.mxu3 %v8723_v13  ;;  %16864 = vst [vmem:[#allocation108_spill] sm:$0xff] %v14328_v62  ;;  %v7418_v13 = vadd.f32 %v7417_v46, %v7416_v61  ;;  %v5189_v57 = vpop.f32.mrf.mxu1  ;;  %v7421_v52 = vsel %vm7326_vm5, %v7412_v35, 0.0  ;;  %v10076_v46 = vld [vmem:[%s16539_s1 + $0x274] sm:$0xf0]  ;;  %v14342_v42 = vmul.f32 0.6931472, %v10592_v3  ;;  %v6719_v3 = vmul.f32 %v14256_v34, %v6718_v47 }
 0x4b2   : > { %v5190_v20 = vadd.f32 %v5189_v57, %v5150_v60  ;;  %v6384_v61 = vmul.f32 0.5, %v6383_v56  ;;  %5315 = vmatmul.bf16.gmra.mxu0 %v11558_v16  ;;  %v8211_v12 = vor.u32 %v10076_v46, %v8210_v21  ;;  %v7262_v6 = vmul.f32 0.5, %v7256_v44 }
 0x4b3   : > { %16865 = vst [vmem:[#allocation109_spill] sm:$0xff] %v14342_v42  ;;  %v7420_v41 = vadd.f32 %v7419_v11, %v7418_v13  ;;  %v6431_v11 = vmul.f32 %v14316_v59, %v6430_v48  ;;  %v14353_v29 = vpop.eup %10593  ;;  %v6673_v47 = vsub.f32 1.5, %v6672_v58  ;;  %10601 = vrsqrt.f32 %v14283_v51 }
 0x4b4   : > { %5493 = vmatpush.bf16.msra.mxu1 %v8211_v12  ;;  %v7413_v56 = vand.u32 2147483647, %v7262_v6  ;;  %v6385_v60 = vsub.f32 1.5, %v6384_v61  ;;  %v14358_v39 = vpop.eup %10595  ;;  %v8434_v61 = vld [vmem:[%s16539_s1 + $0x418] sm:$0xf]  ;;  %10603 = vrsqrt.f32 %v14215_v19  ;;  %vm6486_vm0 = vcmp.eq.f32.partialorder %v14177_v36, 0.0 }
 0x4b5   : > { %v7422_v35 = vadd.f32 %v7421_v52, %v7420_v41  ;;  %v5228_v13 = vpop.f32.mrf.mxu2  ;;  %v6720_v52 = vmul.f32 0.5, %v6719_v3  ;;  %v6432_v48 = vmul.f32 0.5, %v6431_v11  ;;  %v6478_v3 = vmul.f32 %v14353_v29, %v14177_v36 }
 0x4b6   : > { %v7423_v57 = vsel %vm7326_vm5, %v7413_v56, 0.0  ;;  %v5229_v44 = vadd.f32 %v5228_v13, %v5190_v20  ;;  %v5152_v46 = vpop.f32.mrf.mxu0  ;;  %v10132_v20 = vld [vmem:[%s16539_s1 + $0x434] sm:$0xf0]  ;;  %v6386_v58 = vmul.f32 %v14279_v9, %v6385_v60  ;;  %10605 = vrsqrt.f32 %v13972_v33 }
 0x4b7   : > { %v5267_v21 = vpop.f32.mrf.mxu3  ;;  %v14356_v10 = vadd.f32 %v7423_v57, %v7422_v35  ;;  %v7922_v35 = vld [vmem:[%s16539_s1 + $0x18] sm:$0xf]  ;;  %v8435_v11 = vor.u32 %v10132_v20, %v8434_v61  ;;  %v6433_v20 = vsub.f32 1.5, %v6432_v48  ;;  %v6721_v14 = vsub.f32 1.5, %v6720_v52 }
 0x4b8   : > { %v14361_v12 = vadd.f32 %v5267_v21, %v5229_v44  ;;  %v10004_v56 = vld [vmem:[%s16539_s1 + $0x34] sm:$0xf0]  ;;  %v6766_v44 = vmul.f32 %v14358_v39, %v14104_v49  ;;  %v6679_v52 = vand.u32 2147483648, %v13926_v37  ;;  %10607 = vrsqrt.f32 %v13904_v18 }
 0x4b9   : > { %16866 = vst [vmem:[#allocation110_spill] sm:$0xff] %v14356_v10  ;;  %v5191_v41 = vpop.f32.mrf.mxu1  ;;  %v8690_v13 = vld [vmem:[%s16539_s1 + $0x618] sm:$0xf]  ;;  %v7923_v9 = vor.u32 %v10004_v56, %v7922_v35  ;;  %5533 = vmatpush.bf16.msra.mxu2 %v8435_v11  ;;  %v6387_v10 = vmul.f32 %v6386_v58, %v14041_v32  ;;  %v6479_v56 = vmul.f32 %v14353_v29, %v6478_v3  ;;  %10609 = vrsqrt.f32 %v14075_v50 }
 0x4ba   : > { %v5192_v6 = vadd.f32 %v5191_v41, %v5152_v46  ;;  %v10196_v57 = vld [vmem:[%s16539_s1 + $0x634] sm:$0xf0]  ;;  %v6674_v41 = vmul.f32 %v14218_v23, %v6673_v47  ;;  %v6767_v23 = vmul.f32 %v14358_v39, %v6766_v44  ;;  %v6722_v44 = vmul.f32 %v14256_v34, %v6721_v14 }
 0x4bb   : > { %v8691_v60 = vor.u32 %v10196_v57, %v8690_v13  ;;  %v8178_v21 = vld [vmem:[%s16539_s1 + $0x218] sm:$0xf]  ;;  %5455 = vmatpush.bf16.msra.mxu0 %v7923_v9  ;;  %v14396_v13 = vpop.eup %10597  ;;  %v6389_v9 = vsel %vm6388_vm8, %v14041_v32, %v6387_v10  ;;  %5398 = vmatmul.bf16.gmra.mxu2 %v16749_v38  ;;  %vm6820_vm3 = vcmp.eq.f32.partialorder %v14194_v27, inf  ;;  %vm6534_vm4 = vcmp.eq.f32.partialorder %v14223_v25, 0.0 }
 0x4bc   : > { %v10068_v46 = vld [vmem:[%s16539_s1 + $0x234] sm:$0xf0]  ;;  %v6675_v47 = vmul.f32 %v6674_v41, %v13926_v37  ;;  %v14404_v58 = vpop.eup %10599  ;;  %5359 = vmatmul.bf16.gmra.mxu1 %v16748_v15  ;;  %10611 = vrsqrt.f32 %v14112_v24  ;;  %vm6868_vm8 = vcmp.eq.f32.partialorder %v14215_v19, inf }
 0x4bd   : > { %v8179_v61 = vor.u32 %v10068_v46, %v8178_v21  ;;  %5572 = vmatpush.bf16.msra.mxu3 %v8691_v60  ;;  %v5230_v35 = vpop.f32.mrf.mxu2  ;;  %v6480_v60 = vmul.f32 0.5, %v6479_v56  ;;  %v6526_v21 = vmul.f32 %v14396_v13, %v14223_v25  ;;  %v6391_v46 = vand.u32 2147483648, %v14041_v32  ;;  %v9682_v14 = vld [vmem:[%s16539_s1 + $0xdd8] sm:$0xf]  ;;  %v14435_v41 = vpop.eup %10601 }
 0x4be   : > { %v5231_v57 = vadd.f32 %v5230_v35, %v5192_v6  ;;  %v5155_v42 = vpop.f32.mrf.mxu0  ;;  %v6434_v6 = vmul.f32 %v14316_v59, %v6433_v20  ;;  %v6768_v59 = vmul.f32 0.5, %v6767_v23  ;;  %v6677_v34 = vsel %vm6676_vm6, %v13926_v37, %v6675_v47  ;;  %5437 = vmatmul.bf16.gmra.mxu3 %v16750_v53  ;;  %v10316_v56 = vld [vmem:[%s16539_s1 + $0x9f4] sm:$0xf0] }
 0x4bf   : > { %5494 = vmatpush.bf16.msra.mxu1 %v8179_v61  ;;  %v5269_v62 = vpop.f32.mrf.mxu3  ;;  %v6814_v10 = vmul.f32 %v14404_v58, %v14194_v27  ;;  %v6392_v61 = vsel %vm6390_vm9, %v6391_v46, %v6389_v9  ;;  %v10508_v23 = vld [vmem:[%s16539_s1 + $0xff4] sm:$0xf0]  ;;  %v6481_v31 = vsub.f32 1.5, %v6480_v60  ;;  %v6527_v9 = vmul.f32 %v14396_v13, %v6526_v21  ;;  %v14456_v21 = vpop.eup %10603 }
 0x4c0   : > { %v14408_v3 = vadd.f32 %v5269_v62, %v5231_v57  ;;  %v10444_v62 = vld [vmem:[%s16539_s1 + $0xdf4] sm:$0xf0]  ;;  %v6435_v20 = vmul.f32 %v6434_v6, %v14117_v54  ;;  %v6680_v6 = vsel %vm6678_vm7, %v6679_v52, %v6677_v34  ;;  %v6723_v46 = vmul.f32 %v6722_v44, %v13970_v4 }
 0x4c1   : > { %v5194_v48 = vpop.f32.mrf.mxu1  ;;  %v9683_v35 = vor.u32 %v10444_v62, %v9682_v14  ;;  %v9938_v57 = vld [vmem:[%s16539_s1 + $0xfd8] sm:$0xf]  ;;  %v6769_v53 = vsub.f32 1.5, %v6768_v59  ;;  %v6815_v60 = vmul.f32 %v14404_v58, %v6814_v10  ;;  %v6482_v34 = vmul.f32 %v14353_v29, %v6481_v31 }
 0x4c2   : > { %v5195_v11 = vadd.f32 %v5194_v48, %v5155_v42  ;;  %5320 = vmatmul.bf16.gmra.mxu0 %v11612_v8  ;;  %v9170_v42 = vld [vmem:[%s16539_s1 + $0x9d8] sm:$0xf]  ;;  %v9939_v32 = vor.u32 %v10508_v23, %v9938_v57  ;;  %v6437_v59 = vsel %vm6436_vm11, %v14117_v54, %v6435_v20  ;;  %v6528_v10 = vmul.f32 0.5, %v6527_v9 }
 0x4c3   : > { %v9171_v48 = vor.u32 %v10316_v56, %v9170_v42  ;;  %5682 = vmatpush.bf16.msrb.mxu2 %v9683_v35  ;;  %v6574_v42 = vmul.f32 %v14435_v41, %v14283_v51  ;;  %v14454_v56 = vsub.f32 %v6392_v61, %v6680_v6  ;;  %v6439_v61 = vand.u32 2147483648, %v14117_v54 }
 0x4c4   : > { %5721 = vmatpush.bf16.msrb.mxu3 %v9939_v32  ;;  %v9426_v32 = vld [vmem:[%s16539_s1 + $0xbd8] sm:$0xf]  ;;  %v6725_v35 = vsel %vm6724_vm10, %v13970_v4, %v6723_v46  ;;  %v6816_v57 = vmul.f32 0.5, %v6815_v60  ;;  %v6862_v23 = vmul.f32 %v14456_v21, %v14215_v19  ;;  %v6727_v20 = vand.u32 2147483648, %v13970_v4 }
 0x4c5   : > { %v5233_v47 = vpop.f32.mrf.mxu2  ;;  %5604 = vmatpush.bf16.msrb.mxu0 %v9171_v48  ;;  %16867 = vst [vmem:[#allocation111_spill] sm:$0xff] %v14454_v56  ;;  %v6483_v29 = vmul.f32 %v6482_v34, %v14177_v36  ;;  %v6529_v48 = vsub.f32 1.5, %v6528_v10  ;;  %v16869_v34 = vld [vmem:[#allocation43_spill] sm:$0xff]  ;;  %vm6822_vm6 = vcmp.eq.f32.partialorder %v14194_v27, 0.0  ;;  %vm6580_vm7 = vcmp.eq.f32.partialorder %v14283_v51, inf }
 0x4c6   : > { %v5234_v14 = vadd.f32 %v5233_v47, %v5195_v11  ;;  %v5157_v22 = vpop.f32.mrf.mxu0  ;;  %v10380_v11 = vld [vmem:[%s16539_s1 + $0xbf4] sm:$0xf0]  ;;  %v6440_v47 = vsel %vm6438_vm12, %v6439_v61, %v6437_v59  ;;  %v6728_v6 = vsel %vm6726_vm13, %v6727_v20, %v6725_v35  ;;  %v6863_v60 = vmul.f32 %v14456_v21, %v6862_v23  ;;  %v16870_v23 = vld [vmem:[#allocation44_spill] sm:$0xff] }
 0x4c7   : > { %v5272_v62 = vpop.f32.mrf.mxu3  ;;  %v9427_v44 = vor.u32 %v10380_v11, %v9426_v32  ;;  %v14486_v32 = vsub.f32 %v6440_v47, %v6728_v6  ;;  %v9138_v59 = vld [vmem:[%s16539_s1 + $0x998] sm:$0xf]  ;;  %vm6582_vm9 = vcmp.eq.f32.partialorder %v14283_v51, 0.0  ;;  %vm6870_vm10 = vcmp.eq.f32.partialorder %v14215_v19, 0.0 }
 0x4c8   : > { %v14460_v37 = vadd.f32 %v5272_v62, %v5234_v14  ;;  %v10308_v61 = vld [vmem:[%s16539_s1 + $0x9b4] sm:$0xf0]  ;;  %v6864_v6 = vmul.f32 0.5, %v6863_v60  ;;  %vm6940_vm11 = vcmp.eq.f32.partialorder %v13972_v33, inf  ;;  %vm6942_vm12 = vcmp.eq.f32.partialorder %v13972_v33, 0.0 }
 0x4c9   : > { %v5196_v38 = vpop.f32.mrf.mxu1  ;;  %5643 = vmatpush.bf16.msrb.mxu1 %v9427_v44  ;;  %16868 = vst [vmem:[#allocation112_spill] sm:$0xff] %v14486_v32  ;;  %v10436_v44 = vld [vmem:[%s16539_s1 + $0xdb4] sm:$0xf0]  ;;  %v9139_v47 = vor.u32 %v10308_v61, %v9138_v59  ;;  %vm7012_vm13 = vcmp.eq.f32.partialorder %v13904_v18, inf }
 0x4ca   : > { %v5197_v52 = vadd.f32 %v5196_v38, %v5157_v22  ;;  %v6770_v38 = vmul.f32 %v14358_v39, %v6769_v53  ;;  %v6575_v22 = vmul.f32 %v14435_v41, %v6574_v42  ;;  %v6817_v42 = vsub.f32 1.5, %v6816_v57  ;;  %v9906_v35 = vld [vmem:[%s16539_s1 + $0xf98] sm:$0xf] }
 0x4cb   : > { %v6530_v57 = vmul.f32 %v14396_v13, %v6529_v48  ;;  %v16871_v20 = vld [vmem:[#allocation45_spill] sm:$0xff]  ;;  %5605 = vmatpush.bf16.msrb.mxu0 %v9139_v47 }
 0x4cc   : > { %v6771_v46 = vmul.f32 %v6770_v38, %v14104_v49  ;;  %v14483_v62 = vmul.f32 0.5, %v6575_v22  ;;  %v10500_v38 = vld [vmem:[%s16539_s1 + $0xfb4] sm:$0xf0]  ;;  %v6485_v22 = vsel %vm6484_vm15, %v14177_v36, %v6483_v29  ;;  %5364 = vmatmul.bf16.gmra.mxu1 %v16870_v23  ;;  %5403 = vmatmul.bf16.gmra.mxu2 %v16871_v20  ;;  %v6818_v48 = vmul.f32 %v14404_v58, %v6817_v42 }
 0x4cd   : > { %v5235_v31 = vpop.f32.mrf.mxu2  ;;  %v9394_v13 = vld [vmem:[%s16539_s1 + $0xb98] sm:$0xf]  ;;  %v6531_v59 = vmul.f32 %v6530_v57, %v14223_v25  ;;  %vm7014_vm15 = vcmp.eq.f32.partialorder %v13904_v18, 0.0 }
 0x4ce   : > { %v5236_v53 = vadd.f32 %v5235_v31, %v5197_v52  ;;  %v5160_v9 = vpop.f32.mrf.mxu0  ;;  %v9650_v52 = vld [vmem:[%s16539_s1 + $0xd98] sm:$0xf]  ;;  %v9907_v31 = vor.u32 %v10500_v38, %v9906_v35  ;;  %v6819_v60 = vmul.f32 %v6818_v48, %v14194_v27 }
 0x4cf   : > { %v5274_v39 = vpop.f32.mrf.mxu3  ;;  %v9651_v10 = vor.u32 %v10436_v44, %v9650_v52  ;;  %v10372_v29 = vld [vmem:[%s16539_s1 + $0xbb4] sm:$0xf0]  ;;  %v6775_v52 = vand.u32 2147483648, %v14104_v49 }
 0x4d0   : > { %v14488_v11 = vadd.f32 %v5274_v39, %v5236_v53  ;;  %v6487_v53 = vand.u32 2147483648, %v14177_v36  ;;  %v6773_v39 = vsel %vm6772_vm14, %v14104_v49, %v6771_v46  ;;  %5722 = vmatpush.bf16.msrb.mxu3 %v9907_v31  ;;  %v9395_v46 = vor.u32 %v10372_v29, %v9394_v13  ;;  %v9618_v49 = vld [vmem:[%s16539_s1 + $0xd58] sm:$0xf] }
 0x4d1   : > { %v5199_v14 = vpop.f32.mrf.mxu1  ;;  %5683 = vmatpush.bf16.msrb.mxu2 %v9651_v10  ;;  %v6577_v10 = vsub.f32 1.5, %v14483_v62  ;;  %v6776_v58 = vsel %vm6774_vm1, %v6775_v52, %v6773_v39  ;;  %v9106_v31 = vld [vmem:[%s16539_s1 + $0x958] sm:$0xf]  ;;  %vm6952_vm14 = vcmp.eq.f32.partialorder %v14075_v50, inf  ;;  %vm6964_vm1 = vcmp.eq.f32.partialorder %v14112_v24, inf }
 0x4d2   : > { %v5200_v4 = vadd.f32 %v5199_v14, %v5160_v9  ;;  %5325 = vmatmul.bf16.gmra.mxu0 %v16869_v34  ;;  %v16872_v9 = vld [vmem:[#allocation46_spill] sm:$0xff]  ;;  %v6488_v14 = vsel %vm6486_vm0, %v6487_v53, %v6485_v22  ;;  %5644 = vmatpush.bf16.msrb.mxu1 %v9395_v46  ;;  %v6865_v22 = vsub.f32 1.5, %v6864_v6  ;;  %v14550_v53 = vpop.eup %10605  ;;  %v10300_v13 = vld [vmem:[%s16539_s1 + $0x974] sm:$0xf0]  ;;  %v6533_v6 = vsel %vm6532_vm2, %v14223_v25, %v6531_v59 }
 0x4d3   : > { %5442 = vmatmul.bf16.gmra.mxu3 %v16872_v9  ;;  %v14536_v47 = vsub.f32 %v6488_v14, %v6776_v58  ;;  %v9874_v29 = vld [vmem:[%s16539_s1 + $0xf58] sm:$0xf]  ;;  %v6578_v46 = vmul.f32 %v14435_v41, %v6577_v10  ;;  %v9107_v14 = vor.u32 %v10300_v13, %v9106_v31  ;;  %v6823_v59 = vand.u32 2147483648, %v14194_v27  ;;  %v16874_v58 = vld [vmem:[#allocation47_spill] sm:$0xff] }
 0x4d4   : > { %v10492_v48 = vld [vmem:[%s16539_s1 + $0xf74] sm:$0xf0]  ;;  %v6934_v10 = vmul.f32 %v14550_v53, %v13972_v33  ;;  %10613 = vrsqrt.f32 %v16874_v58  ;;  %vm6954_vm0 = vcmp.eq.f32.partialorder %v14075_v50, 0.0  ;;  %vm7024_vm2 = vcmp.eq.f32.partialorder %v16874_v58, inf }
 0x4d5   : > { %v5238_v44 = vpop.f32.mrf.mxu2  ;;  %16873 = vst [vmem:[#allocation43_spill] sm:$0xff] %v14536_v47  ;;  %v9875_v52 = vor.u32 %v10492_v48, %v9874_v29  ;;  %5606 = vmatpush.bf16.msrb.mxu0 %v9107_v14 }
 0x4d6   : > { %v5239_v61 = vadd.f32 %v5238_v44, %v5200_v4  ;;  %v5162_v38 = vpop.f32.mrf.mxu0  ;;  %v10428_v4 = vld [vmem:[%s16539_s1 + $0xd74] sm:$0xf0]  ;;  %v6535_v44 = vand.u32 2147483648, %v14223_v25 }
 0x4d7   : > { %v5277_v35 = vpop.f32.mrf.mxu3  ;;  %v9619_v39 = vor.u32 %v10428_v4, %v9618_v49  ;;  %5723 = vmatpush.bf16.msrb.mxu3 %v9875_v52  ;;  %v6579_v49 = vmul.f32 %v6578_v46, %v14283_v51  ;;  %v6935_v46 = vmul.f32 %v14550_v53, %v6934_v10  ;;  %v16876_v52 = vld [vmem:[#allocation2_spill] sm:$0xff] }
 0x4d8   : > { %v14539_v57 = vadd.f32 %v5277_v35, %v5239_v61  ;;  %v14565_v61 = vpop.eup %10607  ;;  %v6821_v35 = vsel %vm6820_vm3, %v14194_v27, %v6819_v60  ;;  %v6536_v41 = vsel %vm6534_vm4, %v6535_v44, %v6533_v6  ;;  %v9362_v27 = vld [vmem:[%s16539_s1 + $0xb58] sm:$0xf]  ;;  %vm7026_vm3 = vcmp.eq.f32.partialorder %v16874_v58, 0.0 }
 0x4d9   : > { %v5201_v42 = vpop.f32.mrf.mxu1  ;;  %5684 = vmatpush.bf16.msrb.mxu2 %v9619_v39  ;;  %v14577_v60 = vpop.eup %10609  ;;  %v6824_v31 = vsel %vm6822_vm6, %v6823_v59, %v6821_v35  ;;  %v7006_v39 = vmul.f32 %v14565_v61, %v13904_v18  ;;  %v6581_v35 = vsel %vm6580_vm7, %v14283_v51, %v6579_v49  ;;  %v16877_v59 = vld [vmem:[#allocation3_spill] sm:$0xff]  ;;  %vm6966_vm4 = vcmp.eq.f32.partialorder %v14112_v24, 0.0 }
 0x4da   : > { %v5202_v62 = vadd.f32 %v5201_v42, %v5162_v38  ;;  %v6866_v38 = vmul.f32 %v14456_v21, %v6865_v22  ;;  %v14582_v48 = vsub.f32 %v6536_v41, %v6824_v31  ;;  %v14598_v41 = vpop.eup %10611  ;;  %v16880_v31 = vld [vmem:[#allocation50_spill] sm:$0xff]  ;;  %vm6976_vm6 = vcmp.eq.f32.partialorder %v14162_v40, inf }
 0x4db   : > { %v7007_v10 = vmul.f32 %v14565_v61, %v7006_v39  ;;  %10615 = vrsqrt.f32 %v16880_v31  ;;  %v6958_v36 = vmul.f32 %v14598_v41, %v14112_v24  ;;  %vm7036_vm7 = vcmp.eq.f32.partialorder %v16880_v31, inf }
 0x4dc   : > { %v6867_v29 = vmul.f32 %v6866_v38, %v14215_v19  ;;  %16875 = vst [vmem:[#allocation44_spill] sm:$0xff] %v14582_v48  ;;  %v6946_v38 = vmul.f32 %v14577_v60, %v14075_v50  ;;  %5495 = vmatmul.bf16.vlgmr.msra.gmra.mxu1 %v16877_v59  ;;  %10617 = vrsqrt.f32 %v14162_v40 }
 0x4dd   : > { %v5240_v42 = vpop.f32.mrf.mxu2  ;;  %v7008_v48 = vmul.f32 0.5, %v7007_v10  ;;  %10619 = vrsqrt.f32 %v14212_v26 }
 0x4de   : > { %v5241_v21 = vadd.f32 %v5240_v42, %v5202_v62  ;;  %v5165_v4 = vpop.f32.mrf.mxu0  ;;  %v10364_v62 = vld [vmem:[%s16539_s1 + $0xb74] sm:$0xf0]  ;;  %v16878_v42 = vld [vmem:[#allocation4_spill] sm:$0xff]  ;;  %v6869_v49 = vsel %vm6868_vm8, %v14215_v19, %v6867_v29  ;;  %v6947_v39 = vmul.f32 %v14577_v60, %v6946_v38  ;;  %10621 = vrsqrt.f32 %v14096_v43 }
 0x4df   : > { %v5279_v22 = vpop.f32.mrf.mxu3  ;;  %v9363_v44 = vor.u32 %v10364_v62, %v9362_v27  ;;  %5534 = vmatmul.bf16.vlgmr.msra.gmra.mxu2 %v16878_v42  ;;  %v6871_v27 = vand.u32 2147483648, %v14215_v19  ;;  %v6936_v62 = vmul.f32 0.5, %v6935_v46  ;;  %10623 = vrsqrt.f32 %v14274_v63 }
 0x4e0   : > { %v14584_v6 = vadd.f32 %v5279_v22, %v5241_v21  ;;  %v6583_v21 = vand.u32 2147483648, %v14283_v51  ;;  %v14605_v22 = vpop.eup %10613  ;;  %v6948_v32 = vmul.f32 0.5, %v6947_v39  ;;  %10625 = vrsqrt.f32 %v14129_v7 }
 0x4e1   : > { %v5204_v13 = vpop.f32.mrf.mxu1  ;;  %5645 = vmatpush.bf16.msrb.mxu1 %v9363_v44  ;;  %v6872_v29 = vsel %vm6870_vm10, %v6871_v27, %v6869_v49  ;;  %v6937_v38 = vsub.f32 1.5, %v6936_v62  ;;  %v14623_v56 = vpop.eup %10615  ;;  %10627 = vrsqrt.f32 %v14203_v5  ;;  %vm6978_vm8 = vcmp.eq.f32.partialorder %v14162_v40, 0.0 }
 0x4e2   : > { %v5205_v14 = vadd.f32 %v5204_v13, %v5165_v4  ;;  %5456 = vmatmul.bf16.vlgmr.msra.gmra.mxu0 %v16876_v52  ;;  %v16879_v4 = vld [vmem:[#allocation5_spill] sm:$0xff]  ;;  %v6584_v13 = vsel %vm6582_vm9, %v6583_v21, %v6581_v35  ;;  %v7018_v35 = vmul.f32 %v14605_v22, %v16874_v58  ;;  %v14627_v49 = vpop.eup %10617  ;;  %v7015_v52 = vand.u32 2147483648, %v13904_v18 }
 0x4e3   : > { %5573 = vmatmul.bf16.vlgmr.msra.gmra.mxu3 %v16879_v4  ;;  %v14619_v46 = vsub.f32 %v6584_v13, %v6872_v29  ;;  %v6959_v4 = vmul.f32 %v14598_v41, %v6958_v36  ;;  %v6938_v10 = vmul.f32 %v14550_v53, %v6937_v38  ;;  %v6949_v13 = vsub.f32 1.5, %v6948_v32  ;;  %v14640_v32 = vpop.eup %10619 }
 0x4e4   : > { %vm7038_vm9 = vcmp.eq.f32.partialorder %v16880_v31, 0.0  ;;  %vm6988_vm10 = vcmp.eq.f32.partialorder %v14212_v26, inf }
 0x4e5   : > { %v5243_v25 = vpop.f32.mrf.mxu2  ;;  %16881 = vst [vmem:[#allocation47_spill] sm:$0xff] %v14619_v46  ;;  %v6960_v36 = vmul.f32 0.5, %v6959_v4  ;;  %v6939_v38 = vmul.f32 %v6938_v10, %v13972_v33  ;;  %v16882_v46 = vld [vmem:[#allocation6_spill] sm:$0xff]  ;;  %v14646_v4 = vpop.eup %10621 }
 0x4e6   : > { %v5244_v44 = vadd.f32 %v5243_v25, %v5205_v14  ;;  %v5167_v54 = vpop.f32.mrf.mxu0  ;;  %v7009_v25 = vsub.f32 1.5, %v7008_v48  ;;  %v7019_v14 = vmul.f32 %v14605_v22, %v7018_v35  ;;  %v6970_v35 = vmul.f32 %v14627_v49, %v14162_v40  ;;  %v14667_v42 = vpop.eup %10623 }
 0x4e7   : > { %v5282_v51 = vpop.f32.mrf.mxu3 }
 0x4e8   : > { %v14621_v47 = vadd.f32 %v5282_v51, %v5244_v44  ;;  %v7010_v48 = vmul.f32 %v14565_v61, %v7009_v25  ;;  %v7020_v44 = vmul.f32 0.5, %v7019_v14  ;;  %v16883_v25 = vld [vmem:[#allocation7_spill] sm:$0xff]  ;;  %v16884_v14 = vld [vmem:[#allocation8_spill] sm:$0xff] }
 0x4e9   : > { %v5206_v21 = vpop.f32.mrf.mxu1 }
 0x4ea   : > { %v5207_v19 = vadd.f32 %v5206_v21, %v5167_v54  ;;  %v7030_v54 = vmul.f32 %v14623_v56, %v16880_v31  ;;  %v7021_v10 = vsub.f32 1.5, %v7020_v44 }
 0x4ec   : > { %v7031_v61 = vmul.f32 %v14623_v56, %v7030_v54  ;;  %5500 = vmatmul.bf16.gmra.mxu1 %v16883_v25  ;;  %v6943_v54 = vand.u32 2147483648, %v13972_v33 }
 0x4ed   : > { %v5245_v51 = vpop.f32.mrf.mxu2 }
 0x4ee   : > { %v5246_v27 = vadd.f32 %v5245_v51, %v5207_v19  ;;  %v5170_v39 = vpop.f32.mrf.mxu0  ;;  %v6950_v19 = vmul.f32 %v14577_v60, %v6949_v13  ;;  %v6961_v51 = vsub.f32 1.5, %v6960_v36  ;;  %v6971_v60 = vmul.f32 %v14627_v49, %v6970_v35 }
 0x4ef   : > { %v5284_v62 = vpop.f32.mrf.mxu3  ;;  %5539 = vmatmul.bf16.gmra.mxu2 %v16884_v14  ;;  %v6941_v13 = vsel %vm6940_vm11, %v13972_v33, %v6939_v38  ;;  %v7032_v44 = vmul.f32 0.5, %v7031_v61  ;;  %vm7048_vm11 = vcmp.eq.f32.partialorder %v14096_v43, inf }
 0x4f0   : > { %v14637_v21 = vadd.f32 %v5284_v62, %v5246_v27  ;;  %v7011_v27 = vmul.f32 %v7010_v48, %v13904_v18  ;;  %v16885_v62 = vld [vmem:[#allocation9_spill] sm:$0xff]  ;;  %v6951_v48 = vmul.f32 %v6950_v19, %v14075_v50  ;;  %v6962_v38 = vmul.f32 %v14598_v41, %v6961_v51 }
 0x4f1   : > { %v5209_v29 = vpop.f32.mrf.mxu1  ;;  %v6944_v19 = vsel %vm6942_vm12, %v6943_v54, %v6941_v13  ;;  %v6972_v61 = vmul.f32 0.5, %v6971_v60  ;;  %v6994_v60 = vmul.f32 %v14667_v42, %v14274_v63  ;;  %vm6990_vm12 = vcmp.eq.f32.partialorder %v14212_v26, 0.0 }
 0x4f2   : > { %v5210_v53 = vadd.f32 %v5209_v29, %v5170_v39  ;;  %5461 = vmatmul.bf16.gmra.mxu0 %v16882_v46  ;;  %v6982_v39 = vmul.f32 %v14640_v32, %v14212_v26  ;;  %v7042_v29 = vmul.f32 %v14646_v4, %v14096_v43  ;;  %v7013_v25 = vsel %vm7012_vm13, %v13904_v18, %v7011_v27 }
 0x4f3   : > { %5578 = vmatmul.bf16.gmra.mxu3 %v16885_v62  ;;  %v7022_v46 = vmul.f32 %v14605_v22, %v7021_v10  ;;  %v6953_v22 = vsel %vm6952_vm14, %v14075_v50, %v6951_v48  ;;  %v7016_v27 = vsel %vm7014_vm15, %v7015_v52, %v7013_v25  ;;  %v7033_v10 = vsub.f32 1.5, %v7032_v44 }
 0x4f4   : > { %v6983_v51 = vmul.f32 %v14640_v32, %v6982_v39  ;;  %v7043_v13 = vmul.f32 %v14646_v4, %v7042_v29  ;;  %v6963_v54 = vmul.f32 %v6962_v38, %v14112_v24  ;;  %v6955_v18 = vand.u32 2147483648, %v14075_v50 }
 0x4f5   : > { %v5248_v36 = vpop.f32.mrf.mxu2  ;;  %v7023_v33 = vmul.f32 %v7022_v46, %v16874_v58  ;;  %v6973_v25 = vsub.f32 1.5, %v6972_v61  ;;  %v7034_v48 = vmul.f32 %v14623_v56, %v7033_v10  ;;  %vm7050_vm13 = vcmp.eq.f32.partialorder %v14096_v43, 0.0 }
 0x4f6   : > { %v5249_v62 = vadd.f32 %v5248_v36, %v5210_v53  ;;  %v5172_v14 = vpop.f32.mrf.mxu0  ;;  %v14673_v53 = vpop.eup %10625  ;;  %v6956_v46 = vsel %vm6954_vm0, %v6955_v18, %v6953_v22  ;;  %v7044_v44 = vmul.f32 0.5, %v7043_v13  ;;  %vm7060_vm14 = vcmp.eq.f32.partialorder %v14129_v7, inf }
 0x4f7   : > { %v5287_v35 = vpop.f32.mrf.mxu3  ;;  %v7054_v52 = vmul.f32 %v14673_v53, %v14129_v7  ;;  %v7025_v50 = vsel %vm7024_vm2, %v16874_v58, %v7023_v33  ;;  %v6974_v56 = vmul.f32 %v14627_v49, %v6973_v25  ;;  %v14707_v10 = vpop.eup %10627  ;;  %v6967_v49 = vand.u32 2147483648, %v14112_v24 }
 0x4f8   : > { %v14675_v36 = vadd.f32 %v5287_v35, %v5249_v62  ;;  %v7077_v62 = vsub.f32 %v6944_v19, %v7016_v27  ;;  %v16886_v35 = vld [vmem:[#allocation59_spill] sm:$0xff]  ;;  %v6965_v27 = vsel %vm6964_vm1, %v14112_v24, %v6963_v54  ;;  %v16887_v54 = vld [vmem:[#allocation10_spill] sm:$0xff]  ;;  %vm7062_vm15 = vcmp.eq.f32.partialorder %v14129_v7, 0.0 }
 0x4f9   : > { %v5211_v59 = vpop.f32.mrf.mxu1  ;;  %v7055_v22 = vmul.f32 %v14673_v53, %v7054_v52  ;;  %v16889_v52 = vld [vmem:[#allocation12_spill] sm:$0xff]  ;;  %vm7000_vm0 = vcmp.eq.f32.partialorder %v14274_v63, inf  ;;  %vm7072_vm1 = vcmp.eq.f32.partialorder %v14203_v5, inf  ;;  %vm7002_vm2 = vcmp.eq.f32.partialorder %v14274_v63, 0.0 }
 0x4fa   : > { %v5212_v41 = vadd.f32 %v5211_v59, %v5172_v14  ;;  %v14687_v59 = vmul.f32 %v16886_v35, %v16886_v35  ;;  %v6984_v14 = vmul.f32 0.5, %v6983_v51  ;;  %v6995_v35 = vmul.f32 %v14667_v42, %v6994_v60 }
 0x4fb   : > { %v7027_v51 = vand.u32 2147483648, %v16874_v58  ;;  %v7320_v18 = vmul.f32 %v7077_v62, %v7077_v62  ;;  %v7045_v60 = vsub.f32 1.5, %v7044_v44  ;;  %v16890_v62 = vld [vmem:[#allocation13_spill] sm:$0xff]  ;;  %v6968_v44 = vsel %vm6966_vm4, %v6967_v49, %v6965_v27 }
 0x4fc   : > { %v10484_v27 = vld [vmem:[%s16539_s1 + $0xf34] sm:$0xf0] }
 0x4fd   : > { %v5250_v39 = vpop.f32.mrf.mxu2  ;;  %v7028_v33 = vsel %vm7026_vm3, %v7027_v51, %v7025_v50  ;;  %v14720_v50 = vmul.f32 0.5, %v7055_v22  ;;  %v7327_v25 = vsel %vm7326_vm5, %v7320_v18, 0.0  ;;  %v10292_v51 = vld [vmem:[%s16539_s1 + $0x934] sm:$0xf0]  ;;  %vm7074_vm3 = vcmp.eq.f32.partialorder %v14203_v5, 0.0 }
 0x4fe   : > { %v5251_v29 = vadd.f32 %v5250_v39, %v5212_v41  ;;  %v5301_v19 = vpop.f32.mrf.mxu0  ;;  %v6985_v41 = vsub.f32 1.5, %v6984_v14  ;;  %v16888_v39 = vld [vmem:[#allocation11_spill] sm:$0xff]  ;;  %v7078_v58 = vsub.f32 %v6956_v46, %v7028_v33  ;;  %v9586_v14 = vld [vmem:[%s16539_s1 + $0xd18] sm:$0xf]  ;;  %v7046_v33 = vmul.f32 %v14646_v4, %v7045_v60 }
 0x4ff   : > { %v5289_v38 = vpop.f32.mrf.mxu3  ;;  %v5302_v9 = vadd.f32 %v5301_v19, %v14289_v55  ;;  %v7035_v55 = vmul.f32 %v7034_v48, %v16880_v31  ;;  %5505 = vmatmul.bf16.gmra.mxu1 %v16888_v39  ;;  %5544 = vmatmul.bf16.gmra.mxu2 %v16889_v52  ;;  %v10420_v48 = vld [vmem:[%s16539_s1 + $0xd34] sm:$0xf0] }
 0x500   : > { %v14703_v20 = vadd.f32 %v5289_v38, %v5251_v29  ;;  %v9074_v46 = vld [vmem:[%s16539_s1 + $0x918] sm:$0xf]  ;;  %v6975_v29 = vmul.f32 %v6974_v56, %v14162_v40  ;;  %v7066_v38 = vmul.f32 %v14707_v10, %v14203_v5  ;;  %v7321_v19 = vmul.f32 %v7078_v58, %v7078_v58 }
 0x501   : > { %v5340_v61 = vpop.f32.mrf.mxu1  ;;  %v9842_v22 = vld [vmem:[%s16539_s1 + $0xf18] sm:$0xf]  ;;  %v6986_v18 = vmul.f32 %v14640_v32, %v6985_v41  ;;  %v7037_v56 = vsel %vm7036_vm7, %v16880_v31, %v7035_v55 }
 0x502   : > { %v5341_v13 = vadd.f32 %v5340_v61, %v5302_v9  ;;  %5466 = vmatmul.bf16.gmra.mxu0 %v16887_v54  ;;  %v14717_v9 = vmul.f32 0.5, %v6995_v35  ;;  %v9587_v61 = vor.u32 %v10420_v48, %v9586_v14  ;;  %v9075_v48 = vor.u32 %v10292_v51, %v9074_v46  ;;  %v10356_v52 = vld [vmem:[%s16539_s1 + $0xb34] sm:$0xf0] }
 0x503   : > { %5583 = vmatmul.bf16.gmra.mxu3 %v16890_v62  ;;  %v9843_v24 = vor.u32 %v10484_v27, %v9842_v22  ;;  %v9330_v62 = vld [vmem:[%s16539_s1 + $0xb18] sm:$0xf]  ;;  %v7328_v32 = vsel %vm7326_vm5, %v7321_v19, 0.0  ;;  %v6979_v22 = vand.u32 2147483648, %v14162_v40 }
 0x504   : > { %5685 = vmatpush.bf16.msrb.mxu2 %v9587_v61  ;;  %v9331_v4 = vor.u32 %v10356_v52, %v9330_v62  ;;  %v14758_v60 = vadd.f32 %v7328_v32, %v7327_v25  ;;  %5607 = vmatpush.bf16.msrb.mxu0 %v9075_v48  ;;  %v7057_v52 = vsub.f32 1.5, %v14720_v50  ;;  %v6977_v25 = vsel %vm6976_vm6, %v14162_v40, %v6975_v29  ;;  %v16891_v29 = vld [vmem:[#allocation60_spill] sm:$0xff] }
 0x505   : > { %v5379_v35 = vpop.f32.mrf.mxu2  ;;  %5724 = vmatpush.bf16.msrb.mxu3 %v9843_v24  ;;  %v6987_v24 = vmul.f32 %v6986_v18, %v14212_v26  ;;  %v6086_v18 = vmul.f32 %v16891_v29, %v16891_v29  ;;  %v16892_v29 = vld [vmem:[#allocation14_spill] sm:$0xff] }
 0x506   : > { %v5380_v49 = vadd.f32 %v5379_v35, %v5341_v13  ;;  %v5303_v14 = vpop.f32.mrf.mxu0  ;;  %v7039_v13 = vand.u32 2147483648, %v16880_v31  ;;  %v7067_v35 = vmul.f32 %v14707_v10, %v7066_v38  ;;  %5646 = vmatpush.bf16.msrb.mxu1 %v9331_v4  ;;  %v6991_v31 = vand.u32 2147483648, %v14212_v26 }
 0x507   : > { %v5418_v58 = vpop.f32.mrf.mxu3  ;;  %v5304_v41 = vadd.f32 %v5303_v14, %v14334_v17  ;;  %v7047_v17 = vmul.f32 %v7046_v33, %v14096_v43  ;;  %v6997_v38 = vsub.f32 1.5, %v14717_v9  ;;  %v9554_v33 = vld [vmem:[%s16539_s1 + $0xcd8] sm:$0xf]  ;;  %v7058_v48 = vmul.f32 %v14673_v53, %v7057_v52 }
 0x508   : > { %v5419_v46 = vadd.f32 %v5418_v58, %v5380_v49  ;;  %v7040_v19 = vsel %vm7038_vm9, %v7039_v13, %v7037_v56  ;;  %v14777_v50 = vmul.f32 0.5, %v7067_v35  ;;  %v10412_v49 = vld [vmem:[%s16539_s1 + $0xcf4] sm:$0xf0]  ;;  %v6980_v58 = vsel %vm6978_vm8, %v6979_v22, %v6977_v25 }
 0x509   : > { %v5342_v55 = vpop.f32.mrf.mxu1  ;;  %v7079_v61 = vsub.f32 %v6968_v44, %v7040_v19  ;;  %v7049_v14 = vsel %vm7048_vm11, %v14096_v43, %v7047_v17  ;;  %v9555_v4 = vor.u32 %v10412_v49, %v9554_v33  ;;  %v10284_v13 = vld [vmem:[%s16539_s1 + $0x8f4] sm:$0xf0]  ;;  %v6989_v35 = vsel %vm6988_vm10, %v14212_v26, %v6987_v24 }
 0x50a   : > { %v5343_v51 = vadd.f32 %v5342_v55, %v5304_v41  ;;  %v6106_v62 = vmul.f32 %v5419_v46, %v5419_v46  ;;  %v9810_v46 = vld [vmem:[%s16539_s1 + $0xed8] sm:$0xf]  ;;  %v7051_v19 = vand.u32 2147483648, %v14096_v43  ;;  %v7059_v49 = vmul.f32 %v7058_v48, %v14129_v7 }
 0x50b   : > { %v7322_v56 = vmul.f32 %v7079_v61, %v7079_v61  ;;  %v10476_v52 = vld [vmem:[%s16539_s1 + $0xef4] sm:$0xf0]  ;;  %5686 = vmatpush.bf16.msrb.mxu2 %v9555_v4  ;;  %v7069_v61 = vsub.f32 1.5, %v14777_v50  ;;  %v16893_v50 = vld [vmem:[#allocation15_spill] sm:$0xff] }
 0x50c   : > { %v14774_v27 = vadd.f32 %v6106_v62, %v14687_v59  ;;  %v9042_v59 = vld [vmem:[%s16539_s1 + $0x8d8] sm:$0xf]  ;;  %v7052_v25 = vsel %vm7050_vm13, %v7051_v19, %v7049_v14 }
 0x50d   : > { %v5381_v44 = vpop.f32.mrf.mxu2  ;;  %v9043_v17 = vor.u32 %v10284_v13, %v9042_v59  ;;  %v7330_v62 = vsel %vm7326_vm5, %v7322_v56, 0.0  ;;  %v9298_v33 = vld [vmem:[%s16539_s1 + $0xad8] sm:$0xf]  ;;  %v16894_v59 = vld [vmem:[#allocation16_spill] sm:$0xff]  ;;  %v7080_v4 = vsub.f32 %v6980_v58, %v7052_v25 }
 0x50e   : > { %v5382_v32 = vadd.f32 %v5381_v44, %v5343_v51  ;;  %v9811_v44 = vor.u32 %v10476_v52, %v9810_v46  ;;  %v10348_v43 = vld [vmem:[%s16539_s1 + $0xaf4] sm:$0xf0]  ;;  %v7331_v48 = vadd.f32 %v7330_v62, %v14758_v60 }
 0x50f   : > { %v5420_v41 = vpop.f32.mrf.mxu3  ;;  %v5306_v55 = vpop.f32.mrf.mxu0  ;;  %v9522_v56 = vld [vmem:[%s16539_s1 + $0xc98] sm:$0xf]  ;;  %5510 = vmatmul.bf16.gmra.mxu1 %v16893_v50  ;;  %5549 = vmatmul.bf16.gmra.mxu2 %v16894_v59  ;;  %v9299_v14 = vor.u32 %v10348_v43, %v9298_v33 }
 0x510   : > { %v5307_v53 = vadd.f32 %v5306_v55, %v14361_v12  ;;  %v5421_v22 = vadd.f32 %v5420_v41, %v5382_v32  ;;  %v10404_v32 = vld [vmem:[%s16539_s1 + $0xcb4] sm:$0xf0]  ;;  %5608 = vmatpush.bf16.msrb.mxu0 %v9043_v17  ;;  %5725 = vmatpush.bf16.msrb.mxu3 %v9811_v44 }
 0x511   : > { %v5345_v51 = vpop.f32.mrf.mxu1  ;;  %v9010_v41 = vld [vmem:[%s16539_s1 + $0x898] sm:$0xf]  ;;  %v9523_v19 = vor.u32 %v10404_v32, %v9522_v56  ;;  %5647 = vmatpush.bf16.msrb.mxu1 %v9299_v14 }
 0x512   : > { %v5346_v12 = vadd.f32 %v5345_v51, %v5307_v53  ;;  %5471 = vmatmul.bf16.gmra.mxu0 %v16892_v29  ;;  %v10276_v55 = vld [vmem:[%s16539_s1 + $0x8b4] sm:$0xf0]  ;;  %v6110_v13 = vmul.f32 %v5421_v22, %v5421_v22  ;;  %v7323_v22 = vmul.f32 %v7080_v4, %v7080_v4 }
 0x513   : > { %v16895_v46 = vld [vmem:[#allocation17_spill] sm:$0xff]  ;;  %v9011_v53 = vor.u32 %v10276_v55, %v9010_v41  ;;  %5687 = vmatpush.bf16.msrb.mxu2 %v9523_v19 }
 0x514   : > { %5588 = vmatmul.bf16.gmra.mxu3 %v16895_v46  ;;  %v9778_v51 = vld [vmem:[%s16539_s1 + $0xe98] sm:$0xf]  ;;  %v14856_v33 = vadd.f32 %v6110_v13, %v6086_v18  ;;  %v7332_v9 = vsel %vm7326_vm5, %v7323_v22, 0.0 }
 0x515   : > { %v10468_v52 = vld [vmem:[%s16539_s1 + $0xeb4] sm:$0xf0]  ;;  %v5384_v43 = vpop.f32.mrf.mxu2  ;;  %5609 = vmatpush.bf16.msrb.mxu0 %v9011_v53 }
 0x516   : > { %v9266_v58 = vld [vmem:[%s16539_s1 + $0xa98] sm:$0xf]  ;;  %v9779_v60 = vor.u32 %v10468_v52, %v9778_v51  ;;  %v5385_v55 = vadd.f32 %v5384_v43, %v5346_v12  ;;  %v6992_v52 = vsel %vm6990_vm12, %v6991_v31, %v6989_v35  ;;  %v6998_v12 = vmul.f32 %v14667_v42, %v6997_v38 }
 0x517   : > { %v10340_v17 = vld [vmem:[%s16539_s1 + $0xab4] sm:$0xf0]  ;;  %v5423_v4 = vpop.f32.mrf.mxu3  ;;  %v5308_v18 = vpop.f32.mrf.mxu0  ;;  %v7070_v43 = vmul.f32 %v14707_v10, %v7069_v61 }
 0x518   : > { %v9490_v62 = vld [vmem:[%s16539_s1 + $0xc58] sm:$0xf]  ;;  %v9267_v44 = vor.u32 %v10340_v17, %v9266_v58  ;;  %v5309_v58 = vadd.f32 %v5308_v18, %v14408_v3  ;;  %v5424_v24 = vadd.f32 %v5423_v4, %v5385_v55  ;;  %5726 = vmatpush.bf16.msrb.mxu3 %v9779_v60  ;;  %v6999_v53 = vmul.f32 %v6998_v12, %v14274_v63 }
 0x519   : > { %v10396_v25 = vld [vmem:[%s16539_s1 + $0xc74] sm:$0xf0]  ;;  %v5347_v17 = vpop.f32.mrf.mxu1  ;;  %v7333_v60 = vadd.f32 %v7332_v9, %v7331_v48  ;;  %v7071_v22 = vmul.f32 %v7070_v43, %v14203_v5  ;;  %v7075_v9 = vand.u32 2147483648, %v14203_v5 }
 0x51a   : > { %v9491_v56 = vor.u32 %v10396_v25, %v9490_v62  ;;  %v8978_v14 = vld [vmem:[%s16539_s1 + $0x858] sm:$0xf]  ;;  %v7061_v25 = vsel %vm7060_vm14, %v14129_v7, %v7059_v49  ;;  %5648 = vmatpush.bf16.msrb.mxu1 %v9267_v44  ;;  %v6114_v3 = vmul.f32 %v5424_v24, %v5424_v24  ;;  %v5348_v38 = vadd.f32 %v5347_v17, %v5309_v58 }
 0x51b   : > { %v10268_v32 = vld [vmem:[%s16539_s1 + $0x874] sm:$0xf0]  ;;  %v16897_v49 = vand.u32 2147483648, %v14129_v7  ;;  %v7073_v12 = vsel %vm7072_vm1, %v14203_v5, %v7071_v22 }
 0x51c   : > { %v9746_v41 = vld [vmem:[%s16539_s1 + $0xe58] sm:$0xf]  ;;  %v8979_v62 = vor.u32 %v10268_v32, %v8978_v14  ;;  %5688 = vmatpush.bf16.msrb.mxu2 %v9491_v56 }
 0x51d   : > { %v10460_v13 = vld [vmem:[%s16539_s1 + $0xe74] sm:$0xf0]  ;;  %v7064_v10 = vsel %vm7062_vm15, %v16897_v49, %v7061_v25  ;;  %v5386_v14 = vpop.f32.mrf.mxu2  ;;  %v16898_v25 = vld [vmem:[#allocation18_spill] sm:$0xff] }
 0x51e   : > { %v9234_v19 = vld [vmem:[%s16539_s1 + $0xa58] sm:$0xf]  ;;  %v9747_v26 = vor.u32 %v10460_v13, %v9746_v41  ;;  %5610 = vmatpush.bf16.msrb.mxu0 %v8979_v62  ;;  %v7081_v61 = vsub.f32 %v6992_v52, %v7064_v10  ;;  %v5387_v56 = vadd.f32 %v5386_v14, %v5348_v38  ;;  %v7001_v41 = vsel %vm7000_vm0, %v14274_v63, %v6999_v53  ;;  %v16901_v53 = vld [vmem:[#allocation62_spill] sm:$0xff] }
 0x51f   : > { %v10332_v51 = vld [vmem:[%s16539_s1 + $0xa74] sm:$0xf0]  ;;  %v5425_v24 = vpop.f32.mrf.mxu3  ;;  %v5311_v32 = vpop.f32.mrf.mxu0  ;;  %v6094_v49 = vmul.f32 %v16901_v53, %v16901_v53  ;;  %v7076_v14 = vsel %vm7074_vm3, %v7075_v9, %v7073_v12 }
 0x520   : > { %v9235_v31 = vor.u32 %v10332_v51, %v9234_v19  ;;  %v16896_v35 = vld [vmem:[#allocation61_spill] sm:$0xff]  ;;  %5727 = vmatpush.bf16.msrb.mxu3 %v9747_v26  ;;  %v7003_v26 = vand.u32 2147483648, %v14274_v63  ;;  %v5312_v55 = vadd.f32 %v5311_v32, %v14460_v37  ;;  %v7324_v58 = vmul.f32 %v7081_v61, %v7081_v61 }
 0x521   : > { %v6090_v42 = vmul.f32 %v16896_v35, %v16896_v35  ;;  %v9458_v7 = vld [vmem:[%s16539_s1 + $0xc18] sm:$0xf]  ;;  %v5350_v4 = vpop.f32.mrf.mxu1  ;;  %v5426_v17 = vadd.f32 %v5425_v24, %v5387_v56  ;;  %v16899_v35 = vld [vmem:[#allocation19_spill] sm:$0xff] }
 0x522   : > { %5649 = vmatpush.bf16.msrb.mxu1 %v9235_v31  ;;  %v10388_v48 = vld [vmem:[%s16539_s1 + $0xc34] sm:$0xf0]  ;;  %v5351_v62 = vadd.f32 %v5350_v4, %v5312_v55  ;;  %5476 = vmatmul.bf16.gmra.mxu0 %v16898_v25  ;;  %v7004_v31 = vsel %vm7002_vm2, %v7003_v26, %v7001_v41  ;;  %v7334_v24 = vsel %vm7326_vm5, %v7324_v58, 0.0  ;;  %v14941_v4 = vmax.f32 %v14774_v27, 1e-16 }
 0x523   : > { %v14895_v44 = vadd.f32 %v6114_v3, %v6090_v42  ;;  %v9459_v18 = vor.u32 %v10388_v48, %v9458_v7  ;;  %v8946_v13 = vld [vmem:[%s16539_s1 + $0x818] sm:$0xf]  ;;  %5515 = vmatmul.bf16.gmra.mxu1 %v16899_v35  ;;  %v16900_v42 = vld [vmem:[#allocation20_spill] sm:$0xff]  ;;  %v6118_v10 = vmul.f32 %v5426_v17, %v5426_v17  ;;  %v7082_v56 = vsub.f32 %v7004_v31, %v7076_v14 }
 0x524   : > { %v10260_v19 = vld [vmem:[%s16539_s1 + $0x834] sm:$0xf0]  ;;  %5554 = vmatmul.bf16.gmra.mxu2 %v16900_v42  ;;  %v7335_v48 = vadd.f32 %v7334_v24, %v7333_v60  ;;  %10629 = vrsqrt.f32 %v14941_v4  ;;  %v16908_v24 = vld [vmem:[#allocation24_spill] sm:$0xff]  ;;  %vm6640_vm4 = vcmp.eq.f32.partialorder %v14941_v4, inf  ;;  %vm6642_vm6 = vcmp.eq.f32.partialorder %v14941_v4, 0.0 }
 0x525   : > { %v9714_v51 = vld [vmem:[%s16539_s1 + $0xe18] sm:$0xf]  ;;  %5689 = vmatpush.bf16.msrb.mxu2 %v9459_v18  ;;  %v8947_v3 = vor.u32 %v10260_v19, %v8946_v13  ;;  %v14938_v32 = vadd.f32 %v6118_v10, %v6094_v49  ;;  %v5389_v7 = vpop.f32.mrf.mxu2  ;;  %v7325_v55 = vmul.f32 %v7082_v56, %v7082_v56  ;;  %v16905_v49 = vld [vmem:[#allocation22_spill] sm:$0xff]  ;;  %v16906_v10 = vld [vmem:[#allocation64_spill] sm:$0xff]  ;;  %10631 = vlog2.f32 %v14941_v4 }
 0x526   : > { %v10452_v52 = vld [vmem:[%s16539_s1 + $0xe34] sm:$0xf0]  ;;  %v5390_v41 = vadd.f32 %v5389_v7, %v5351_v62  ;;  %v16907_v56 = vld [vmem:[#allocation23_spill] sm:$0xff] }
 0x527   : > { %v9202_v37 = vld [vmem:[%s16539_s1 + $0xa18] sm:$0xf]  ;;  %v9715_v38 = vor.u32 %v10452_v52, %v9714_v51  ;;  %5611 = vmatpush.bf16.msrb.mxu0 %v8947_v3  ;;  %v5428_v5 = vpop.f32.mrf.mxu3  ;;  %v5313_v26 = vpop.f32.mrf.mxu0  ;;  %v7336_v51 = vsel %vm7326_vm5, %v7325_v55, 0.0 }
 0x528   : > { %v10324_v43 = vld [vmem:[%s16539_s1 + $0xa34] sm:$0xf0]  ;;  %v5314_v18 = vadd.f32 %v5313_v26, %v14488_v11  ;;  %v5429_v19 = vadd.f32 %v5428_v5, %v5390_v41  ;;  %v14948_v60 = vadd.f32 %v7336_v51, %v7335_v48 }
 0x529   : > { %v16902_v61 = vld [vmem:[#allocation21_spill] sm:$0xff]  ;;  %v9203_v22 = vor.u32 %v10324_v43, %v9202_v37  ;;  %5728 = vmatpush.bf16.msrb.mxu3 %v9715_v38  ;;  %v5352_v13 = vpop.f32.mrf.mxu1  ;;  %v16903_v37 = vld [vmem:[#allocation63_spill] sm:$0xff] }
 0x52a   : > { %5593 = vmatmul.bf16.gmra.mxu3 %v16902_v61  ;;  %v5353_v52 = vadd.f32 %v5352_v13, %v5314_v18  ;;  %v6098_v12 = vmul.f32 %v16903_v37, %v16903_v37  ;;  %v6122_v58 = vmul.f32 %v5429_v19, %v5429_v19  ;;  %16904 = vst [vmem:[#allocation50_spill] sm:$0xff] %v14948_v60  ;;  %v14953_v38 = vpop.eup %10629  ;;  %v16909_v7 = vld [vmem:[#allocation25_spill] sm:$0xff] }
 0x52b   : > { %5650 = vmatpush.bf16.msrb.mxu1 %v9203_v22  ;;  %v6102_v22 = vmul.f32 %v16906_v10, %v16906_v10  ;;  %v16910_v37 = vld [vmem:[#allocation65_spill] sm:$0xff] }
 0x52c   : > { %v14950_v17 = vadd.f32 %v6122_v58, %v6098_v12  ;;  %v6202_v12 = vmul.f32 %v16910_v37, %v16910_v37 }
 0x52d   : > { %v5391_v62 = vpop.f32.mrf.mxu2 }
 0x52e   : > { %v5392_v27 = vadd.f32 %v5391_v62, %v5353_v52 }
 0x52f   : > { %v5430_v43 = vpop.f32.mrf.mxu3  ;;  %v5316_v31 = vpop.f32.mrf.mxu0 }
 0x530   : > { %v5317_v11 = vadd.f32 %v5316_v31, %v14539_v57  ;;  %v5431_v3 = vadd.f32 %v5430_v43, %v5392_v27  ;;  %v6634_v57 = vmul.f32 %v14953_v38, %v14941_v4  ;;  %v10632_v43 = vpop.eup %10631 }
 0x531   : > { %v5355_v9 = vpop.f32.mrf.mxu1 }
 0x532   : > { %v5356_v53 = vadd.f32 %v5355_v9, %v5317_v11  ;;  %5481 = vmatmul.bf16.gmra.mxu0 %v16905_v49  ;;  %v6126_v14 = vmul.f32 %v5431_v3, %v5431_v3  ;;  %v6635_v19 = vmul.f32 %v14953_v38, %v6634_v57  ;;  %v10184_v11 = vld [vmem:[%s16539_s1 + $0x5dc] sm:$0xf] }
 0x533   : > { %5520 = vmatmul.bf16.gmra.mxu1 %v16907_v56  ;;  %v10056_v9 = vld [vmem:[%s16539_s1 + $0x1dc] sm:$0xf] }
 0x534   : > { %5559 = vmatmul.bf16.gmra.mxu2 %v16908_v24  ;;  %v14963_v48 = vadd.f32 %v6126_v14, %v6102_v22  ;;  %v14970_v62 = vmul.f32 0.5, %v6635_v19  ;;  %v8148_v57 = vld [vmem:[%s16539_s1 + $0x1f8] sm:$0xf0] }
 0x535   : > { %v5394_v41 = vpop.f32.mrf.mxu2 }
 0x536   : > { %v5395_v5 = vadd.f32 %v5394_v41, %v5356_v53  ;;  %v10248_v41 = vld [vmem:[%s16539_s1 + $0x7dc] sm:$0xf]  ;;  %v6637_v37 = vsub.f32 1.5, %v14970_v62 }
 0x537   : > { %v5433_v26 = vpop.f32.mrf.mxu3  ;;  %v5318_v55 = vpop.f32.mrf.mxu0  ;;  %v8404_v62 = vld [vmem:[%s16539_s1 + $0x3f8] sm:$0xf0] }
 0x538   : > { %v5319_v18 = vadd.f32 %v5318_v55, %v14584_v6  ;;  %v5434_v51 = vadd.f32 %v5433_v26, %v5395_v5  ;;  %v8660_v6 = vld [vmem:[%s16539_s1 + $0x5f8] sm:$0xf0]  ;;  %v16912_v5 = vld [vmem:[#allocation54_spill] sm:$0xff] }
 0x539   : > { %v5357_v13 = vpop.f32.mrf.mxu1  ;;  %v8663_v14 = vor.u32 %v10184_v11, %v8660_v6  ;;  %v16913_v26 = vld [vmem:[#allocation49_spill] sm:$0xff] }
 0x53a   : > { %5598 = vmatmul.bf16.gmra.mxu3 %v16909_v7  ;;  %v5358_v52 = vadd.f32 %v5357_v13, %v5319_v18  ;;  %v6226_v58 = vmul.f32 %v5434_v51, %v5434_v51  ;;  %v16914_v55 = vsub.f32 %v16912_v5, %v16913_v26  ;;  %v8151_v51 = vor.u32 %v10056_v9, %v8148_v57  ;;  %v10120_v6 = vld [vmem:[%s16539_s1 + $0x3dc] sm:$0xf]  ;;  %v16921_v7 = vld [vmem:[#allocation67_spill] sm:$0xff] }
 0x53b   : > { %5838 = vmatpush.bf16.msra.mxu2 %v8663_v14  ;;  %v8628_v14 = vld [vmem:[%s16539_s1 + $0x5b8] sm:$0xf0] }
 0x53c   : > { %v6274_v27 = vadd.f32 %v6226_v58, %v6202_v12  ;;  %v14992_v18 = vmul.f32 0.5, %v16914_v55  ;;  %v14999_v12 = vmul.f32 0.6931472, %v10632_v43  ;;  %v15002_v58 = vmax.f32 %v14856_v33, 1e-16  ;;  %v16916_v43 = vld [vmem:[#allocation66_spill] sm:$0xff]  ;;  %5760 = vmatpush.bf16.msra.mxu0 %v8151_v51 }
 0x53d   : > { %v5396_v31 = vpop.f32.mrf.mxu2  ;;  %v10176_v33 = vld [vmem:[%s16539_s1 + $0x59c] sm:$0xf]  ;;  %v6206_v9 = vmul.f32 %v16916_v43, %v16916_v43 }
 0x53e   : > { %v14981_v3 = vmax.f32 %v6274_v27, 1e-16  ;;  %v5397_v53 = vadd.f32 %v5396_v31, %v5358_v52  ;;  %v8916_v52 = vld [vmem:[%s16539_s1 + $0x7f8] sm:$0xf0]  ;;  %v16915_v31 = vld [vmem:[#allocation26_spill] sm:$0xff]  ;;  %v8631_v55 = vor.u32 %v10176_v33, %v8628_v14  ;;  %vm6688_vm9 = vcmp.eq.f32.partialorder %v15002_v58, inf }
 0x53f   : > { %v5435_v10 = vpop.f32.mrf.mxu3  ;;  %v5321_v22 = vpop.f32.mrf.mxu0  ;;  %v8919_v11 = vor.u32 %v10248_v41, %v8916_v52  ;;  %v10048_v57 = vld [vmem:[%s16539_s1 + $0x19c] sm:$0xf]  ;;  %vm6690_vm10 = vcmp.eq.f32.partialorder %v15002_v58, 0.0 }
 0x540   : > { %16911 = vst [vmem:[#allocation59_spill] sm:$0xff] %v14981_v3  ;;  %v5322_v13 = vadd.f32 %v5321_v22, %v14621_v47  ;;  %10633 = vrsqrt.f32 %v14981_v3  ;;  %v5436_v27 = vadd.f32 %v5435_v10, %v5397_v53  ;;  %v16917_v53 = vld [vmem:[#allocation27_spill] sm:$0xff]  ;;  %v16918_v10 = vld [vmem:[#allocation28_spill] sm:$0xff]  ;;  %v8407_v22 = vor.u32 %v10120_v6, %v8404_v62  ;;  %v8116_v41 = vld [vmem:[%s16539_s1 + $0x1b8] sm:$0xf0]  ;;  %5839 = vmatpush.bf16.msra.mxu2 %v8631_v55 }
 0x541   : > { %v5360_v19 = vpop.f32.mrf.mxu1  ;;  %10635 = vlog2.f32 %v14981_v3  ;;  %v16919_v26 = vld [vmem:[#allocation29_spill] sm:$0xff]  ;;  %5877 = vmatpush.bf16.msra.mxu3 %v8919_v11  ;;  %vm6352_vm7 = vcmp.eq.f32.partialorder %v14981_v3, inf  ;;  %vm6354_vm8 = vcmp.eq.f32.partialorder %v14981_v3, 0.0 }
 0x542   : > { %v5361_v47 = vadd.f32 %v5360_v19, %v5322_v13  ;;  %5612 = vmatmul.bf16.vlgmr.msrb.gmra.mxu0 %v16915_v31  ;;  %v6230_v5 = vmul.f32 %v5436_v27, %v5436_v27  ;;  %v8119_v13 = vor.u32 %v10048_v57, %v8116_v41  ;;  %v10240_v19 = vld [vmem:[%s16539_s1 + $0x79c] sm:$0xf]  ;;  %5799 = vmatpush.bf16.msra.mxu1 %v8407_v22  ;;  %10637 = vlog2.f32 %v15002_v58 }
 0x543   : > { %5651 = vmatmul.bf16.vlgmr.msrb.gmra.mxu1 %v16917_v53  ;;  %v8884_v52 = vld [vmem:[%s16539_s1 + $0x7b8] sm:$0xf0] }
 0x544   : > { %5690 = vmatmul.bf16.vlgmr.msrb.gmra.mxu2 %v16918_v10  ;;  %v10112_v6 = vld [vmem:[%s16539_s1 + $0x39c] sm:$0xf]  ;;  %v8887_v27 = vor.u32 %v10240_v19, %v8884_v52  ;;  %v6278_v43 = vadd.f32 %v6230_v5, %v6206_v9  ;;  %v6638_v9 = vmul.f32 %v14953_v38, %v6637_v37  ;;  %5761 = vmatpush.bf16.msra.mxu0 %v8119_v13  ;;  %v15084_v13 = vmax.f32 %v14895_v44, 1e-16 }
 0x545   : > { %v8372_v51 = vld [vmem:[%s16539_s1 + $0x3b8] sm:$0xf0]  ;;  %v5399_v14 = vpop.f32.mrf.mxu2 }
 0x546   : > { %v10168_v62 = vld [vmem:[%s16539_s1 + $0x55c] sm:$0xf]  ;;  %v8375_v57 = vor.u32 %v10112_v6, %v8372_v51  ;;  %v15057_v52 = vpop.eup %10633  ;;  %v5400_v5 = vadd.f32 %v5399_v14, %v5361_v47  ;;  %v15072_v37 = vmax.f32 %v6278_v43, 1e-16  ;;  %5878 = vmatpush.bf16.msra.mxu3 %v8887_v27  ;;  %vm6736_vm14 = vcmp.eq.f32.partialorder %v15084_v13, inf }
 0x547   : > { %v8596_v33 = vld [vmem:[%s16539_s1 + $0x578] sm:$0xf0]  ;;  %v5438_v55 = vpop.f32.mrf.mxu3  ;;  %v5323_v6 = vpop.f32.mrf.mxu0  ;;  %v6346_v38 = vmul.f32 %v15057_v52, %v14981_v3  ;;  %vm6738_vm0 = vcmp.eq.f32.partialorder %v15084_v13, 0.0 }
 0x548   : > { %v8599_v41 = vor.u32 %v10168_v62, %v8596_v33  ;;  %v10040_v11 = vld [vmem:[%s16539_s1 + $0x15c] sm:$0xf]  ;;  %v10636_v63 = vpop.eup %10635  ;;  %16920 = vst [vmem:[#allocation10_spill] sm:$0xff] %v15072_v37  ;;  %v5324_v47 = vadd.f32 %v5323_v6, %v14637_v21  ;;  %5800 = vmatpush.bf16.msra.mxu1 %v8375_v57  ;;  %v6210_v21 = vmul.f32 %v16921_v7, %v16921_v7  ;;  %10639 = vlog2.f32 %v15072_v37 }
 0x549   : > { %v8084_v22 = vld [vmem:[%s16539_s1 + $0x178] sm:$0xf0]  ;;  %v5362_v14 = vpop.f32.mrf.mxu1  ;;  %v7086_v60 = vmul.f32 0.6931472, %v10636_v63  ;;  %v6347_v63 = vmul.f32 %v15057_v52, %v6346_v38  ;;  %v7351_v38 = vand.u32 2147483647, %v14992_v18  ;;  %10641 = vlog2.f32 %v15084_v13 }
 0x54a   : > { %5729 = vmatmul.bf16.vlgmr.msrb.gmra.mxu3 %v16919_v26  ;;  %v10232_v19 = vld [vmem:[%s16539_s1 + $0x75c] sm:$0xf]  ;;  %v8087_v40 = vor.u32 %v10040_v11, %v8084_v22  ;;  %v5439_v26 = vadd.f32 %v5438_v55, %v5400_v5  ;;  %5840 = vmatpush.bf16.msra.mxu2 %v8599_v41  ;;  %v6639_v11 = vmul.f32 %v6638_v9, %v14941_v4  ;;  %vm6400_vm11 = vcmp.eq.f32.partialorder %v15072_v37, inf }
 0x54b   : > { %v8852_v51 = vld [vmem:[%s16539_s1 + $0x778] sm:$0xf0]  ;;  %v7180_v22 = vsub.f32 %v7086_v60, %v14999_v12  ;;  %v5363_v5 = vadd.f32 %v5362_v14, %v5324_v47  ;;  %vm6402_vm12 = vcmp.eq.f32.partialorder %v15072_v37, 0.0 }
 0x54c   : > { %v10104_v62 = vld [vmem:[%s16539_s1 + $0x35c] sm:$0xf]  ;;  %v8855_v10 = vor.u32 %v10232_v19, %v8852_v51  ;;  %v6234_v7 = vmul.f32 %v5439_v26, %v5439_v26  ;;  %v6348_v19 = vmul.f32 0.5, %v6347_v63  ;;  %5762 = vmatpush.bf16.msra.mxu0 %v8087_v40  ;;  %v10638_v26 = vpop.eup %10637 }
 0x54d   : > { %v8340_v33 = vld [vmem:[%s16539_s1 + $0x378] sm:$0xf0]  ;;  %v7204_v9 = vmul.f32 0.5, %v7180_v22 }
 0x54e   : > { %v8343_v53 = vor.u32 %v10104_v62, %v8340_v33  ;;  %v10160_v31 = vld [vmem:[%s16539_s1 + $0x51c] sm:$0xf]  ;;  %v6282_v51 = vadd.f32 %v6234_v7, %v6210_v21  ;;  %5879 = vmatpush.bf16.msra.mxu3 %v8855_v10  ;;  %v6349_v40 = vsub.f32 1.5, %v6348_v19  ;;  %v6643_v10 = vand.u32 2147483648, %v14941_v4  ;;  %v10640_v22 = vpop.eup %10639 }
 0x54f   : > { %v8564_v43 = vld [vmem:[%s16539_s1 + $0x538] sm:$0xf0]  ;;  %v7352_v47 = vand.u32 2147483647, %v7204_v9  ;;  %v5440_v63 = vpop.f32.mrf.mxu3  ;;  %v6641_v7 = vsel %vm6640_vm4, %v14941_v4, %v6639_v11  ;;  %v10642_v4 = vpop.eup %10641 }
 0x550   : > { %v10032_v27 = vld [vmem:[%s16539_s1 + $0x11c] sm:$0xf]  ;;  %v8567_v55 = vor.u32 %v10160_v31, %v8564_v43  ;;  %5801 = vmatpush.bf16.msra.mxu1 %v8343_v53  ;;  %v5401_v31 = vpop.f32.mrf.mxu2  ;;  %v15111_v14 = vmax.f32 %v6282_v51, 1e-16  ;;  %v15114_v53 = vmul.f32 0.6931472, %v10638_v26  ;;  %v6350_v21 = vmul.f32 %v15057_v52, %v6349_v40 }
 0x551   : > { %v8052_v57 = vld [vmem:[%s16539_s1 + $0x138] sm:$0xf0]  ;;  %v5402_v43 = vadd.f32 %v5401_v31, %v5363_v5  ;;  %v16925_v5 = vld [vmem:[#allocation68_spill] sm:$0xff] }
 0x552   : > { %v10224_v44 = vld [vmem:[%s16539_s1 + $0x71c] sm:$0xf]  ;;  %v8055_v6 = vor.u32 %v10032_v27, %v8052_v57  ;;  %5841 = vmatpush.bf16.msra.mxu2 %v8567_v55  ;;  %16922 = vst [vmem:[#allocation11_spill] sm:$0xff] %v15111_v14  ;;  %v5326_v27 = vpop.f32.mrf.mxu0  ;;  %v5365_v57 = vpop.f32.mrf.mxu1  ;;  %v6351_v52 = vmul.f32 %v6350_v21, %v14981_v3  ;;  %5617 = vmatmul.bf16.gmra.mxu0 %v11450_v0  ;;  %10643 = vlog2.f32 %v15111_v14  ;;  %vm6448_vm13 = vcmp.eq.f32.partialorder %v15111_v14, inf }
 0x553   : > { %v8820_v41 = vld [vmem:[%s16539_s1 + $0x738] sm:$0xf0]  ;;  %16923 = vst [vmem:[#allocation60_spill] sm:$0xff] %v15114_v53  ;;  %v5327_v18 = vadd.f32 %v5326_v27, %v14675_v36  ;;  %v15129_v36 = vmul.f32 0.6931472, %v10640_v22  ;;  %v5441_v19 = vadd.f32 %v5440_v63, %v5402_v43  ;;  %5656 = vmatmul.bf16.gmra.mxu1 %v11452_v1  ;;  %v6214_v55 = vmul.f32 %v16925_v5, %v16925_v5 }
 0x554   : > { %v10096_v60 = vld [vmem:[%s16539_s1 + $0x31c] sm:$0xf]  ;;  %v8823_v62 = vor.u32 %v10224_v44, %v8820_v41  ;;  %5763 = vmatpush.bf16.msra.mxu0 %v8055_v6  ;;  %v15122_v44 = vmax.f32 %v14938_v32, 1e-16  ;;  %v15124_v41 = vadd.f32 %v7352_v47, %v7351_v38  ;;  %v6355_v32 = vand.u32 2147483648, %v14981_v3  ;;  %5695 = vmatmul.bf16.gmra.mxu2 %v11454_v2 }
 0x555   : > { %v8308_v12 = vld [vmem:[%s16539_s1 + $0x338] sm:$0xf0]  ;;  %16924 = vst [vmem:[#allocation14_spill] sm:$0xff] %v15129_v36  ;;  %v5366_v11 = vadd.f32 %v5365_v57, %v5327_v18  ;;  %v6353_v6 = vsel %vm6352_vm7, %v14981_v3, %v6351_v52  ;;  %v16927_v52 = vld [vmem:[#allocation98_spill] sm:$0xff]  ;;  %vm6450_vm15 = vcmp.eq.f32.partialorder %v15111_v14, 0.0 }
 0x556   : > { %v8311_v33 = vor.u32 %v10096_v60, %v8308_v12  ;;  %5880 = vmatpush.bf16.msra.mxu3 %v8823_v62  ;;  %v6238_v60 = vmul.f32 %v5441_v19, %v5441_v19  ;;  %v16926_v12 = vld [vmem:[#allocation30_spill] sm:$0xff]  ;;  %v10152_v26 = vld [vmem:[%s16539_s1 + $0x4dc] sm:$0xf]  ;;  %v6356_v38 = vsel %vm6354_vm8, %v6355_v32, %v6353_v6  ;;  %10645 = vlog2.f32 %v15122_v44 }
 0x557   : > { %v8532_v9 = vld [vmem:[%s16539_s1 + $0x4f8] sm:$0xf0]  ;;  %v5443_v57 = vpop.f32.mrf.mxu3  ;;  %v7263_v19 = vmul.f32 %v16927_v52, %v16927_v52  ;;  %v15193_v52 = vmax.f32 %v14963_v48, 1e-16  ;;  %vm6784_vm1 = vcmp.eq.f32.partialorder %v15122_v44, inf  ;;  %vm6786_vm4 = vcmp.eq.f32.partialorder %v15122_v44, 0.0 }
 0x558   : > { %5802 = vmatpush.bf16.msra.mxu1 %v8311_v33  ;;  %v10024_v51 = vld [vmem:[%s16539_s1 + $0xdc] sm:$0xf]  ;;  %v6644_v33 = vsel %vm6642_vm6, %v6643_v10, %v6641_v7  ;;  %v8535_v40 = vor.u32 %v10152_v26, %v8532_v9  ;;  %v6286_v63 = vadd.f32 %v6238_v60, %v6214_v55  ;;  %v5404_v27 = vpop.f32.mrf.mxu2  ;;  %v10644_v60 = vpop.eup %10643 }
 0x559   : > { %v8020_v31 = vld [vmem:[%s16539_s1 + $0xf8] sm:$0xf0]  ;;  %v6910_v43 = vsub.f32 %v6356_v38, %v6644_v33  ;;  %v5405_v10 = vadd.f32 %v5404_v27, %v5366_v11  ;;  %v15186_v27 = vmax.f32 %v14950_v17, 1e-16 }
 0x55a   : > { %5734 = vmatmul.bf16.gmra.mxu3 %v16926_v12  ;;  %v10216_v47 = vld [vmem:[%s16539_s1 + $0x6dc] sm:$0xf]  ;;  %v8023_v21 = vor.u32 %v10024_v51, %v8020_v31  ;;  %v5328_v22 = vpop.f32.mrf.mxu0  ;;  %5842 = vmatpush.bf16.msra.mxu2 %v8535_v40  ;;  %v15166_v5 = vmax.f32 %v6286_v63, 1e-16  ;;  %v5367_v6 = vpop.f32.mrf.mxu1 }
 0x55b   : > { %v8788_v18 = vld [vmem:[%s16539_s1 + $0x6f8] sm:$0xf0]  ;;  %v7264_v32 = vmul.f32 %v6910_v43, %v6910_v43  ;;  %v5329_v55 = vadd.f32 %v5328_v22, %v14703_v20  ;;  %v5444_v26 = vadd.f32 %v5443_v57, %v5405_v10  ;;  %v15181_v43 = vmul.f32 0.6931472, %v10642_v4 }
 0x55c   : > { %v8791_v7 = vor.u32 %v10216_v47, %v8788_v18  ;;  %16928 = vst [vmem:[#allocation15_spill] sm:$0xff] %v15166_v5  ;;  %5764 = vmatpush.bf16.msra.mxu0 %v8023_v21  ;;  %v10088_v11 = vld [vmem:[%s16539_s1 + $0x2dc] sm:$0xf]  ;;  %v15179_v47 = vmul.f32 0.6931472, %v10644_v60  ;;  %10647 = vlog2.f32 %v15166_v5  ;;  %v10646_v63 = vpop.eup %10645  ;;  %vm6496_vm2 = vcmp.eq.f32.partialorder %v15166_v5, inf }
 0x55d   : > { %v8276_v9 = vld [vmem:[%s16539_s1 + $0x2f8] sm:$0xf0]  ;;  %v15177_v38 = vadd.f32 %v7264_v32, %v7263_v19  ;;  %v5368_v40 = vadd.f32 %v5367_v6, %v5329_v55  ;;  %v6242_v20 = vmul.f32 %v5444_v26, %v5444_v26  ;;  %16932 = vst [vmem:[#allocation61_spill] sm:$0xff] %v15181_v43  ;;  %10649 = vrsqrt.f32 %v15002_v58 }
 0x55e   : > { %5881 = vmatpush.bf16.msra.mxu3 %v8791_v7  ;;  %v16929_v51 = vld [vmem:[#allocation69_spill] sm:$0xff]  ;;  %v8279_v31 = vor.u32 %v10088_v11, %v8276_v9  ;;  %16931 = vst [vmem:[#allocation17_spill] sm:$0xff] %v15179_v47  ;;  %10651 = vrsqrt.f32 %v15072_v37  ;;  %v15196_v32 = vmul.f32 0.6931472, %v10646_v63  ;;  %v16935_v11 = vld [vmem:[#allocation70_spill] sm:$0xff]  ;;  %vm6498_vm3 = vcmp.eq.f32.partialorder %v15166_v5, 0.0 }
 0x55f   : > { %v6218_v33 = vmul.f32 %v16929_v51, %v16929_v51  ;;  %16930 = vst [vmem:[#allocation16_spill] sm:$0xff] %v15177_v38  ;;  %v5445_v7 = vpop.f32.mrf.mxu3  ;;  %v10144_v6 = vld [vmem:[%s16539_s1 + $0x49c] sm:$0xf]  ;;  %10653 = vlog2.f32 %v15186_v27  ;;  %v6222_v9 = vmul.f32 %v16935_v11, %v16935_v11  ;;  %v16936_v51 = vld [vmem:[#allocation31_spill] sm:$0xff]  ;;  %vm6832_vm8 = vcmp.eq.f32.partialorder %v15186_v27, inf }
 0x560   : > { %5803 = vmatpush.bf16.msra.mxu1 %v8279_v31  ;;  %v5406_v10 = vpop.f32.mrf.mxu2  ;;  %16934 = vst [vmem:[#allocation19_spill] sm:$0xff] %v15196_v32  ;;  %v8500_v60 = vld [vmem:[%s16539_s1 + $0x4b8] sm:$0xf0] }
 0x561   : > { %v6290_v21 = vadd.f32 %v6242_v20, %v6218_v33  ;;  %v5407_v22 = vadd.f32 %v5406_v10, %v5368_v40  ;;  %v10016_v48 = vld [vmem:[%s16539_s1 + $0x9c] sm:$0xf]  ;;  %v8503_v33 = vor.u32 %v10144_v6, %v8500_v60  ;;  %v16937_v10 = vld [vmem:[#allocation32_spill] sm:$0xff]  ;;  %v16940_v6 = vld [vmem:[#allocation34_spill] sm:$0xff] }
 0x562   : > { %v5457_v4 = vpop.f32.mrf.mxu0  ;;  %v5496_v19 = vpop.f32.mrf.mxu1  ;;  %5622 = vmatmul.bf16.gmra.mxu0 %v16936_v51  ;;  %v7988_v40 = vld [vmem:[%s16539_s1 + $0xb8] sm:$0xf0] }
 0x563   : > { %v15190_v57 = vmax.f32 %v6290_v21, 1e-16  ;;  %v5446_v17 = vadd.f32 %v5445_v7, %v5407_v22  ;;  %v5497_v55 = vadd.f32 %v5496_v19, %v5457_v4  ;;  %v10648_v26 = vpop.eup %10647  ;;  %v10208_v20 = vld [vmem:[%s16539_s1 + $0x69c] sm:$0xf]  ;;  %5661 = vmatmul.bf16.gmra.mxu1 %v16937_v10  ;;  %v7991_v7 = vor.u32 %v10016_v48, %v7988_v40  ;;  %5843 = vmatpush.bf16.msra.mxu2 %v8503_v33 }
 0x564   : > { %v8756_v31 = vld [vmem:[%s16539_s1 + $0x6b8] sm:$0xf0]  ;;  %v15221_v63 = vpop.eup %10649  ;;  %v15225_v19 = vmul.f32 0.6931472, %v10648_v26 }
 0x565   : > { %16933 = vst [vmem:[#allocation18_spill] sm:$0xff] %v15190_v57  ;;  %10655 = vlog2.f32 %v15190_v57  ;;  %v6246_v21 = vmul.f32 %v5446_v17, %v5446_v17  ;;  %v16938_v22 = vld [vmem:[#allocation33_spill] sm:$0xff]  ;;  %v8759_v4 = vor.u32 %v10208_v20, %v8756_v31  ;;  %5765 = vmatpush.bf16.msra.mxu0 %v7991_v7  ;;  %v15237_v40 = vpop.eup %10651  ;;  %v6682_v33 = vmul.f32 %v15221_v63, %v15002_v58 }
 0x566   : > { %5700 = vmatmul.bf16.gmra.mxu2 %v16938_v22  ;;  %16939 = vst [vmem:[#allocation20_spill] sm:$0xff] %v15225_v19  ;;  %v10080_v60 = vld [vmem:[%s16539_s1 + $0x29c] sm:$0xf]  ;;  %10657 = vrsqrt.f32 %v15084_v13  ;;  %v10654_v31 = vpop.eup %10653  ;;  %vm6544_vm6 = vcmp.eq.f32.partialorder %v15190_v57, inf  ;;  %vm6546_vm7 = vcmp.eq.f32.partialorder %v15190_v57, 0.0 }
 0x567   : > { %v8244_v11 = vld [vmem:[%s16539_s1 + $0x2b8] sm:$0xf0]  ;;  %v6294_v17 = vadd.f32 %v6246_v21, %v6222_v9  ;;  %5882 = vmatpush.bf16.msra.mxu3 %v8759_v4  ;;  %10659 = vlog2.f32 %v15193_v52  ;;  %v5574_v21 = vpop.f32.mrf.mxu3 }
 0x568   : > { %v8247_v48 = vor.u32 %v10080_v60, %v8244_v11  ;;  %v5535_v20 = vpop.f32.mrf.mxu2  ;;  %10661 = vrsqrt.f32 %v15111_v14  ;;  %v6394_v11 = vmul.f32 %v15237_v40, %v15072_v37  ;;  %v10136_v3 = vld [vmem:[%s16539_s1 + $0x45c] sm:$0xf] }
 0x569   : > { %v15243_v18 = vmax.f32 %v6294_v17, 1e-16  ;;  %v5536_v9 = vadd.f32 %v5535_v20, %v5497_v55  ;;  %v8468_v17 = vld [vmem:[%s16539_s1 + $0x478] sm:$0xf0] }
 0x56a   : > { %5739 = vmatmul.bf16.gmra.mxu3 %v16940_v6  ;;  %v5459_v7 = vpop.f32.mrf.mxu0  ;;  %5804 = vmatpush.bf16.msra.mxu1 %v8247_v48  ;;  %v5498_v60 = vpop.f32.mrf.mxu1  ;;  %v10008_v55 = vld [vmem:[%s16539_s1 + $0x5c] sm:$0xf]  ;;  %v6683_v48 = vmul.f32 %v15221_v63, %v6682_v33  ;;  %v8471_v20 = vor.u32 %v10136_v3, %v8468_v17  ;;  %v15273_v33 = vmul.f32 0.6931472, %v10654_v31  ;;  %v6395_v47 = vmul.f32 %v15237_v40, %v6394_v11 }
 0x56b   : > { %16941 = vst [vmem:[#allocation62_spill] sm:$0xff] %v15243_v18  ;;  %v10656_v4 = vpop.eup %10655  ;;  %v15247_v26 = vadd.f32 %v5574_v21, %v5536_v9  ;;  %v5499_v62 = vadd.f32 %v5498_v60, %v5459_v7  ;;  %10663 = vlog2.f32 %v15243_v18  ;;  %v7956_v9 = vld [vmem:[%s16539_s1 + $0x78] sm:$0xf0] }
 0x56c   : > { %v10200_v21 = vld [vmem:[%s16539_s1 + $0x65c] sm:$0xf]  ;;  %v15269_v60 = vpop.eup %10657  ;;  %v7959_v32 = vor.u32 %v10008_v55, %v7956_v9  ;;  %v15271_v43 = vmul.f32 0.6931472, %v10656_v4  ;;  %16943 = vst [vmem:[#allocation63_spill] sm:$0xff] %v15273_v33  ;;  %5844 = vmatpush.bf16.msra.mxu2 %v8471_v20  ;;  %10665 = vrsqrt.f32 %v15166_v5  ;;  %v6684_v9 = vmul.f32 0.5, %v6683_v48 }
 0x56d   : > { %v8724_v7 = vld [vmem:[%s16539_s1 + $0x678] sm:$0xf0]  ;;  %v10660_v3 = vpop.eup %10659  ;;  %v6730_v20 = vmul.f32 %v15269_v60, %v15084_v13  ;;  %10667 = vrsqrt.f32 %v15122_v44  ;;  %v6396_v53 = vmul.f32 0.5, %v6395_v47 }
 0x56e   : > { %v8727_v19 = vor.u32 %v10200_v21, %v8724_v7  ;;  %16942 = vst [vmem:[#allocation21_spill] sm:$0xff] %v15271_v43  ;;  %v15275_v17 = vpop.eup %10661  ;;  %5766 = vmatpush.bf16.msra.mxu0 %v7959_v32  ;;  %10669 = vrsqrt.f32 %v15190_v57 }
 0x56f   : > { %v5576_v21 = vpop.f32.mrf.mxu3  ;;  %v6442_v7 = vmul.f32 %v15275_v17, %v15111_v14  ;;  %10671 = vrsqrt.f32 %v15186_v27 }
 0x570   : > { %5883 = vmatpush.bf16.msra.mxu3 %v8727_v19  ;;  %v5537_v36 = vpop.f32.mrf.mxu2  ;;  %v15287_v19 = vmul.f32 0.6931472, %v10660_v3  ;;  %10673 = vrsqrt.f32 %v15243_v18 }
 0x571   : > { %v10664_v55 = vpop.eup %10663  ;;  %v5538_v4 = vadd.f32 %v5537_v36, %v5499_v62  ;;  %v10072_v36 = vld [vmem:[%s16539_s1 + $0x25c] sm:$0xf]  ;;  %10675 = vrsqrt.f32 %v15193_v52 }
 0x572   : > { %v5462_v31 = vpop.f32.mrf.mxu0  ;;  %v5501_v11 = vpop.f32.mrf.mxu1  ;;  %v15285_v32 = vmul.f32 0.6931472, %v10664_v55  ;;  %16945 = vst [vmem:[#allocation64_spill] sm:$0xff] %v15287_v19  ;;  %v8212_v62 = vld [vmem:[%s16539_s1 + $0x278] sm:$0xf0]  ;;  %5627 = vmatmul.bf16.gmra.mxu0 %v11558_v16 }
 0x573   : > { %v15290_v33 = vadd.f32 %v5576_v21, %v5538_v4  ;;  %v5502_v48 = vadd.f32 %v5501_v11, %v5462_v31  ;;  %v8215_v55 = vor.u32 %v10072_v36, %v8212_v62  ;;  %5666 = vmatmul.bf16.gmra.mxu1 %v16745_v45  ;;  %v15303_v47 = vpop.eup %10665  ;;  %v6685_v4 = vsub.f32 1.5, %v6684_v9 }
 0x574   : > { %16944 = vst [vmem:[#allocation22_spill] sm:$0xff] %v15285_v32  ;;  %v6731_v21 = vmul.f32 %v15269_v60, %v6730_v20  ;;  %v6443_v31 = vmul.f32 %v15275_v17, %v6442_v7  ;;  %v6397_v11 = vsub.f32 1.5, %v6396_v53  ;;  %v15308_v36 = vpop.eup %10667  ;;  %v6490_v62 = vmul.f32 %v15303_v47, %v15166_v5 }
 0x575   : > { %5805 = vmatpush.bf16.msra.mxu1 %v8215_v55 }
 0x576   : > { %5705 = vmatmul.bf16.gmra.mxu2 %v16746_v28  ;;  %v6686_v28 = vmul.f32 %v15221_v63, %v6685_v4  ;;  %v6732_v9 = vmul.f32 0.5, %v6731_v21  ;;  %v6444_v45 = vmul.f32 0.5, %v6443_v31  ;;  %v6398_v7 = vmul.f32 %v15237_v40, %v6397_v11  ;;  %v10000_v63 = vld [vmem:[%s16539_s1 + $0x1c] sm:$0xf] }
 0x577   : > { %v5579_v19 = vpop.f32.mrf.mxu3  ;;  %v10064_v31 = vld [vmem:[%s16539_s1 + $0x21c] sm:$0xf]  ;;  %v6491_v11 = vmul.f32 %v15303_v47, %v6490_v62 }
 0x578   : > { %v5540_v43 = vpop.f32.mrf.mxu2  ;;  %v6399_v6 = vmul.f32 %v6398_v7, %v15072_v37 }
 0x579   : > { %v5541_v3 = vadd.f32 %v5540_v43, %v5502_v48  ;;  %v8436_v43 = vld [vmem:[%s16539_s1 + $0x438] sm:$0xf0]  ;;  %v6778_v48 = vmul.f32 %v15308_v36, %v15122_v44 }
 0x57a   : > { %5744 = vmatmul.bf16.gmra.mxu3 %v16747_v30  ;;  %v5464_v32 = vpop.f32.mrf.mxu0  ;;  %v5503_v20 = vpop.f32.mrf.mxu1  ;;  %v10128_v30 = vld [vmem:[%s16539_s1 + $0x41c] sm:$0xf] }
 0x57b   : > { %v15315_v55 = vadd.f32 %v5579_v19, %v5541_v3  ;;  %v5504_v53 = vadd.f32 %v5503_v20, %v5464_v32  ;;  %v8439_v40 = vor.u32 %v10128_v30, %v8436_v43  ;;  %v7924_v32 = vld [vmem:[%s16539_s1 + $0x38] sm:$0xf0]  ;;  %v6687_v20 = vmul.f32 %v6686_v28, %v15002_v58 }
 0x57c   : > { %v10192_v19 = vld [vmem:[%s16539_s1 + $0x61c] sm:$0xf]  ;;  %v7927_v4 = vor.u32 %v10000_v63, %v7924_v32  ;;  %v6445_v43 = vsub.f32 1.5, %v6444_v45  ;;  %v15347_v63 = vpop.eup %10669  ;;  %v6733_v32 = vsub.f32 1.5, %v6732_v9  ;;  %v6492_v28 = vmul.f32 0.5, %v6491_v11 }
 0x57d   : > { %v8692_v3 = vld [vmem:[%s16539_s1 + $0x638] sm:$0xf0]  ;;  %5845 = vmatpush.bf16.msra.mxu2 %v8439_v40  ;;  %v15352_v45 = vpop.eup %10671  ;;  %v6689_v7 = vsel %vm6688_vm9, %v15002_v58, %v6687_v20  ;;  %v16947_v20 = vld [vmem:[#allocation42_spill] sm:$0xff]  ;;  %vm6834_vm9 = vcmp.eq.f32.partialorder %v15186_v27, 0.0 }
 0x57e   : > { %v8695_v21 = vor.u32 %v10192_v19, %v8692_v3  ;;  %v8180_v30 = vld [vmem:[%s16539_s1 + $0x238] sm:$0xf0]  ;;  %5767 = vmatpush.bf16.msra.mxu0 %v7927_v4  ;;  %v6779_v3 = vmul.f32 %v15308_v36, %v6778_v48  ;;  %v6401_v48 = vsel %vm6400_vm11, %v15072_v37, %v6399_v6  ;;  %v6538_v4 = vmul.f32 %v15347_v63, %v15190_v57 }
 0x57f   : > { %v8183_v16 = vor.u32 %v10064_v31, %v8180_v30  ;;  %v5581_v62 = vpop.f32.mrf.mxu3  ;;  %v6403_v31 = vand.u32 2147483648, %v15072_v37  ;;  %v6826_v6 = vmul.f32 %v15352_v45, %v15186_v27  ;;  %vm6880_vm11 = vcmp.eq.f32.partialorder %v15193_v52, inf }
 0x580   : > { %5884 = vmatpush.bf16.msra.mxu3 %v8695_v21  ;;  %v5542_v19 = vpop.f32.mrf.mxu2  ;;  %v6734_v21 = vmul.f32 %v15269_v60, %v6733_v32  ;;  %v6780_v30 = vmul.f32 0.5, %v6779_v3  ;;  %v9684_v32 = vld [vmem:[%s16539_s1 + $0xdf8] sm:$0xf0]  ;;  %v15384_v3 = vpop.eup %10673 }
 0x581   : > { %5806 = vmatpush.bf16.msra.mxu1 %v8183_v16  ;;  %v5543_v22 = vadd.f32 %v5542_v19, %v5504_v53  ;;  %v6446_v16 = vmul.f32 %v15275_v17, %v6445_v43  ;;  %v6691_v17 = vand.u32 2147483648, %v15002_v58  ;;  %v6404_v60 = vsel %vm6402_vm12, %v6403_v31, %v6401_v48  ;;  %v10440_v43 = vld [vmem:[%s16539_s1 + $0xddc] sm:$0xf]  ;;  %v15403_v51 = vpop.eup %10675 }
 0x582   : > { %v5467_v10 = vpop.f32.mrf.mxu0  ;;  %v5506_v9 = vpop.f32.mrf.mxu1  ;;  %5632 = vmatmul.bf16.gmra.mxu0 %v11612_v8  ;;  %v10312_v19 = vld [vmem:[%s16539_s1 + $0x9dc] sm:$0xf]  ;;  %v6539_v31 = vmul.f32 %v15347_v63, %v6538_v4  ;;  %v6735_v37 = vmul.f32 %v6734_v21, %v15084_v13  ;;  %v6586_v21 = vmul.f32 %v15384_v3, %v15243_v18  ;;  %vm6594_vm12 = vcmp.eq.f32.partialorder %v15243_v18, 0.0 }
 0x583   : > { %v15359_v40 = vadd.f32 %v5581_v62, %v5543_v22  ;;  %v5507_v53 = vadd.f32 %v5506_v9, %v5467_v10  ;;  %5671 = vmatmul.bf16.gmra.mxu1 %v16748_v15  ;;  %v16946_v22 = vld [vmem:[#allocation41_spill] sm:$0xff]  ;;  %v6493_v10 = vsub.f32 1.5, %v6492_v28  ;;  %v6447_v11 = vmul.f32 %v6446_v16, %v15111_v14 }
 0x584   : > { %v6692_v62 = vsel %vm6690_vm10, %v6691_v17, %v6689_v7  ;;  %v9687_v28 = vor.u32 %v10440_v43, %v9684_v32  ;;  %v9172_v16 = vld [vmem:[%s16539_s1 + $0x9f8] sm:$0xf0]  ;;  %v6781_v17 = vsub.f32 1.5, %v6780_v30  ;;  %v6827_v15 = vmul.f32 %v15352_v45, %v6826_v6 }
 0x585   : > { %v10504_v9 = vld [vmem:[%s16539_s1 + $0xfdc] sm:$0xf]  ;;  %v9175_v58 = vor.u32 %v10312_v19, %v9172_v16  ;;  %v15401_v8 = vsub.f32 %v6404_v60, %v6692_v62  ;;  %v6449_v4 = vsel %vm6448_vm13, %v15111_v14, %v6447_v11  ;;  %v6494_v60 = vmul.f32 %v15303_v47, %v6493_v10 }
 0x586   : > { %5710 = vmatmul.bf16.gmra.mxu2 %v16946_v22  ;;  %v9940_v48 = vld [vmem:[%s16539_s1 + $0xff8] sm:$0xf0]  ;;  %v6540_v19 = vmul.f32 0.5, %v6539_v31  ;;  %v6451_v11 = vand.u32 2147483648, %v15111_v14  ;;  %v6874_v16 = vmul.f32 %v15403_v51, %v15193_v52  ;;  %v6587_v10 = vmul.f32 %v15384_v3, %v6586_v21 }
 0x587   : > { %v9943_v7 = vor.u32 %v10504_v9, %v9940_v48  ;;  %v5584_v32 = vpop.f32.mrf.mxu3  ;;  %5994 = vmatpush.bf16.msrb.mxu2 %v9687_v28  ;;  %5916 = vmatpush.bf16.msrb.mxu0 %v9175_v58  ;;  %v9428_v6 = vld [vmem:[%s16539_s1 + $0xbf8] sm:$0xf0]  ;;  %v6782_v28 = vmul.f32 %v15308_v36, %v6781_v17  ;;  %v6739_v9 = vand.u32 2147483648, %v15084_v13  ;;  %v6495_v48 = vmul.f32 %v6494_v60, %v15166_v5 }
 0x588   : > { %v6452_v47 = vsel %vm6450_vm15, %v6451_v11, %v6449_v4  ;;  %v6541_v31 = vsub.f32 1.5, %v6540_v19  ;;  %v9652_v19 = vld [vmem:[%s16539_s1 + $0xdb8] sm:$0xf0]  ;;  %vm6592_vm10 = vcmp.eq.f32.partialorder %v15243_v18, inf  ;;  %vm6882_vm13 = vcmp.eq.f32.partialorder %v15193_v52, 0.0 }
 0x589   : > { %6033 = vmatpush.bf16.msrb.mxu3 %v9943_v7  ;;  %v6783_v7 = vmul.f32 %v6782_v28, %v15122_v44  ;;  %v10304_v11 = vld [vmem:[%s16539_s1 + $0x99c] sm:$0xf] }
 0x58a   : > { %5749 = vmatmul.bf16.gmra.mxu3 %v16947_v20  ;;  %v5545_v20 = vpop.f32.mrf.mxu2  ;;  %v5469_v22 = vpop.f32.mrf.mxu0  ;;  %v6542_v28 = vmul.f32 %v15347_v63, %v6541_v31  ;;  %v16948_v63 = vld [vmem:[#allocation45_spill] sm:$0xff] }
 0x58b   : > { %v5546_v43 = vadd.f32 %v5545_v20, %v5507_v53  ;;  %v5508_v38 = vpop.f32.mrf.mxu1  ;;  %v10376_v20 = vld [vmem:[%s16539_s1 + $0xbdc] sm:$0xf] }
 0x58c   : > { %v5509_v53 = vadd.f32 %v5508_v38, %v5469_v22  ;;  %v9431_v62 = vor.u32 %v10376_v20, %v9428_v6  ;;  %v6737_v38 = vsel %vm6736_vm14, %v15084_v13, %v6735_v37  ;;  %v6828_v22 = vmul.f32 0.5, %v6827_v15 }
 0x58d   : > { %v15408_v30 = vadd.f32 %v5584_v32, %v5546_v43  ;;  %v6740_v58 = vsel %vm6738_vm0, %v6739_v9, %v6737_v38  ;;  %v6875_v32 = vmul.f32 %v15403_v51, %v6874_v16  ;;  %v6499_v13 = vand.u32 2147483648, %v15166_v5  ;;  %v10496_v16 = vld [vmem:[%s16539_s1 + $0xf9c] sm:$0xf] }
 0x58e   : > { %5955 = vmatpush.bf16.msrb.mxu1 %v9431_v62  ;;  %v6829_v43 = vsub.f32 1.5, %v6828_v22  ;;  %v15431_v4 = vsub.f32 %v6452_v47, %v6740_v58  ;;  %v6588_v20 = vmul.f32 0.5, %v6587_v10  ;;  %v6497_v62 = vsel %vm6496_vm2, %v15166_v5, %v6495_v48  ;;  %v9140_v22 = vld [vmem:[%s16539_s1 + $0x9b8] sm:$0xf0]  ;;  %v16949_v58 = vld [vmem:[#allocation46_spill] sm:$0xff] }
 0x58f   : > { %v5586_v37 = vpop.f32.mrf.mxu3  ;;  %v9908_v9 = vld [vmem:[%s16539_s1 + $0xfb8] sm:$0xf0]  ;;  %v6785_v47 = vsel %vm6784_vm1, %v15122_v44, %v6783_v7  ;;  %v9143_v10 = vor.u32 %v10304_v11, %v9140_v22 }
 0x590   : > { %v9911_v48 = vor.u32 %v10496_v16, %v9908_v9  ;;  %v6830_v31 = vmul.f32 %v15352_v45, %v6829_v43  ;;  %v9396_v7 = vld [vmem:[%s16539_s1 + $0xbb8] sm:$0xf0]  ;;  %v6543_v43 = vmul.f32 %v6542_v28, %v15190_v57 }
 0x591   : > { %5917 = vmatpush.bf16.msrb.mxu0 %v9143_v10  ;;  %v10424_v28 = vld [vmem:[%s16539_s1 + $0xd5c] sm:$0xf] }
 0x592   : > { %v5547_v36 = vpop.f32.mrf.mxu2  ;;  %v5472_v17 = vpop.f32.mrf.mxu0  ;;  %5637 = vmatmul.bf16.gmra.mxu0 %v16869_v34  ;;  %6034 = vmatpush.bf16.msrb.mxu3 %v9911_v48  ;;  %v6831_v22 = vmul.f32 %v6830_v31, %v15186_v27  ;;  %v9620_v9 = vld [vmem:[%s16539_s1 + $0xd78] sm:$0xf0]  ;;  %v6545_v10 = vsel %vm6544_vm6, %v15190_v57, %v6543_v43 }
 0x593   : > { %v5548_v15 = vadd.f32 %v5547_v36, %v5509_v53  ;;  %v5511_v21 = vpop.f32.mrf.mxu1  ;;  %v10432_v53 = vld [vmem:[%s16539_s1 + $0xd9c] sm:$0xf]  ;;  %5676 = vmatmul.bf16.gmra.mxu1 %v16870_v23  ;;  %v6876_v36 = vmul.f32 0.5, %v6875_v32  ;;  %v6589_v32 = vsub.f32 1.5, %v6588_v20  ;;  %v6547_v20 = vand.u32 2147483648, %v15190_v57 }
 0x594   : > { %v5512_v60 = vadd.f32 %v5511_v21, %v5472_v17  ;;  %v9655_v38 = vor.u32 %v10432_v53, %v9652_v19  ;;  %v6787_v17 = vand.u32 2147483648, %v15122_v44  ;;  %v9623_v31 = vor.u32 %v10424_v28, %v9620_v9  ;;  %v10360_v9 = vld [vmem:[%s16539_s1 + $0xb5c] sm:$0xf] }
 0x595   : > { %v15436_v6 = vadd.f32 %v5586_v37, %v5548_v15  ;;  %v10368_v15 = vld [vmem:[%s16539_s1 + $0xb9c] sm:$0xf]  ;;  %v6500_v37 = vsel %vm6498_vm3, %v6499_v13, %v6497_v62  ;;  %v6877_v16 = vsub.f32 1.5, %v6876_v36  ;;  %v6590_v48 = vmul.f32 %v15384_v3, %v6589_v32 }
 0x596   : > { %5715 = vmatmul.bf16.gmra.mxu2 %v16948_v63  ;;  %v9399_v45 = vor.u32 %v10368_v15, %v9396_v7  ;;  %v6788_v53 = vsel %vm6786_vm4, %v6787_v17, %v6785_v47  ;;  %v10296_v47 = vld [vmem:[%s16539_s1 + $0x95c] sm:$0xf]  ;;  %v6548_v3 = vsel %vm6546_vm7, %v6547_v20, %v6545_v10  ;;  %v6835_v32 = vand.u32 2147483648, %v15186_v27 }
 0x597   : > { %5995 = vmatpush.bf16.msrb.mxu2 %v9655_v38  ;;  %v5589_v11 = vpop.f32.mrf.mxu3  ;;  %v15478_v13 = vsub.f32 %v6500_v37, %v6788_v53  ;;  %v9108_v36 = vld [vmem:[%s16539_s1 + $0x978] sm:$0xf0]  ;;  %v6878_v43 = vmul.f32 %v15403_v51, %v6877_v16 }
 0x598   : > { %5956 = vmatpush.bf16.msrb.mxu1 %v9399_v45  ;;  %v10488_v15 = vld [vmem:[%s16539_s1 + $0xf5c] sm:$0xf]  ;;  %v9111_v37 = vor.u32 %v10296_v47, %v9108_v36  ;;  %v6833_v45 = vsel %vm6832_vm8, %v15186_v27, %v6831_v22  ;;  %v16952_v47 = vld [vmem:[#allocation2_spill] sm:$0xff]  ;;  %v16954_v36 = vld [vmem:[#allocation4_spill] sm:$0xff] }
 0x599   : > { %16950 = vst [vmem:[#allocation23_spill] sm:$0xff] %v15478_v13  ;;  %v9876_v7 = vld [vmem:[%s16539_s1 + $0xf78] sm:$0xf0]  ;;  %v6879_v22 = vmul.f32 %v6878_v43, %v15193_v52 }
 0x59a   : > { %5754 = vmatmul.bf16.gmra.mxu3 %v16949_v58  ;;  %v5550_v21 = vpop.f32.mrf.mxu2  ;;  %v5474_v38 = vpop.f32.mrf.mxu0  ;;  %v9879_v17 = vor.u32 %v10488_v15, %v9876_v7  ;;  %5918 = vmatpush.bf16.msrb.mxu0 %v9111_v37  ;;  %v9364_v27 = vld [vmem:[%s16539_s1 + $0xb78] sm:$0xf0] }
 0x59b   : > { %v5551_v19 = vadd.f32 %v5550_v21, %v5512_v60  ;;  %v5513_v62 = vpop.f32.mrf.mxu1  ;;  %5996 = vmatpush.bf16.msrb.mxu2 %v9623_v31  ;;  %v6591_v21 = vmul.f32 %v6590_v48, %v15243_v18  ;;  %v9367_v10 = vor.u32 %v10360_v9, %v9364_v27  ;;  %v6595_v48 = vand.u32 2147483648, %v15243_v18  ;;  %v16953_v31 = vld [vmem:[#allocation3_spill] sm:$0xff]  ;;  %v16955_v7 = vld [vmem:[#allocation5_spill] sm:$0xff] }
 0x59c   : > { %v5514_v60 = vadd.f32 %v5513_v62, %v5474_v38  ;;  %6035 = vmatpush.bf16.msrb.mxu3 %v9879_v17  ;;  %v6881_v15 = vsel %vm6880_vm11, %v15193_v52, %v6879_v22  ;;  %v6883_v17 = vand.u32 2147483648, %v15193_v52  ;;  %v16957_v52 = vld [vmem:[#allocation6_spill] sm:$0xff] }
 0x59d   : > { %v15484_v44 = vadd.f32 %v5589_v11, %v5551_v19  ;;  %v6836_v19 = vsel %vm6834_vm9, %v6835_v32, %v6833_v45  ;;  %5957 = vmatpush.bf16.msrb.mxu1 %v9367_v10  ;;  %v16958_v10 = vld [vmem:[#allocation7_spill] sm:$0xff] }
 0x59e   : > { %v15514_v51 = vsub.f32 %v6548_v3, %v6836_v19  ;;  %v6884_v43 = vsel %vm6882_vm13, %v6883_v17, %v6881_v15 }
 0x59f   : > { %v5591_v38 = vpop.f32.mrf.mxu3 }
 0x5a0   : > { %16951 = vst [vmem:[#allocation24_spill] sm:$0xff] %v15514_v51  ;;  %v17039_v51 = vld [vmem:[#allocation21_spill] sm:$0xff] }
 0x5a2   : > { %v5552_v53 = vpop.f32.mrf.mxu2  ;;  %v5477_v62 = vpop.f32.mrf.mxu0  ;;  %5768 = vmatmul.bf16.vlgmr.msra.gmra.mxu0 %v16952_v47 }
 0x5a3   : > { %v5553_v11 = vadd.f32 %v5552_v53, %v5514_v60  ;;  %v5516_v16 = vpop.f32.mrf.mxu1  ;;  %v6593_v60 = vsel %vm6592_vm10, %v15243_v18, %v6591_v21  ;;  %5807 = vmatmul.bf16.vlgmr.msra.gmra.mxu1 %v16953_v31 }
 0x5a4   : > { %v5517_v28 = vadd.f32 %v5516_v16, %v5477_v62  ;;  %v6596_v37 = vsel %vm6594_vm12, %v6595_v48, %v6593_v60  ;;  %v16960_v48 = vld [vmem:[#allocation9_spill] sm:$0xff] }
 0x5a5   : > { %v15517_v20 = vadd.f32 %v5591_v38, %v5553_v11  ;;  %v15536_v53 = vsub.f32 %v6596_v37, %v6884_v43 }
 0x5a6   : > { %5846 = vmatmul.bf16.vlgmr.msra.gmra.mxu2 %v16954_v36 }
 0x5a7   : > { %16956 = vst [vmem:[#allocation65_spill] sm:$0xff] %v15536_v53 }
 0x5aa   : > { %5885 = vmatmul.bf16.vlgmr.msra.gmra.mxu3 %v16955_v7  ;;  %v5555_v45 = vpop.f32.mrf.mxu2  ;;  %v5479_v21 = vpop.f32.mrf.mxu0 }
 0x5ab   : > { %v5556_v3 = vadd.f32 %v5555_v45, %v5517_v28  ;;  %v5518_v19 = vpop.f32.mrf.mxu1  ;;  %v16959_v28 = vld [vmem:[#allocation8_spill] sm:$0xff] }
 0x5ac   : > { %v5519_v38 = vadd.f32 %v5518_v19, %v5479_v21 }
 0x5ad   : > { %v5594_v32 = vpop.f32.mrf.mxu3 }
 0x5ae   : > { %v15538_v11 = vadd.f32 %v5594_v32, %v5556_v3 }
 0x5b2   : > { %v5557_v62 = vpop.f32.mrf.mxu2  ;;  %v5482_v9 = vpop.f32.mrf.mxu0  ;;  %5773 = vmatmul.bf16.gmra.mxu0 %v16957_v52 }
 0x5b3   : > { %v5558_v22 = vadd.f32 %v5557_v62, %v5519_v38  ;;  %v5521_v27 = vpop.f32.mrf.mxu1  ;;  %5812 = vmatmul.bf16.gmra.mxu1 %v16958_v10  ;;  %v10480_v10 = vld [vmem:[%s16539_s1 + $0xf1c] sm:$0xf] }
 0x5b4   : > { %v5522_v47 = vadd.f32 %v5521_v27, %v5482_v9  ;;  %v16962_v9 = vld [vmem:[#allocation13_spill] sm:$0xff] }
 0x5b5   : > { %v5596_v16 = vpop.f32.mrf.mxu3  ;;  %v10416_v27 = vld [vmem:[%s16539_s1 + $0xd1c] sm:$0xf] }
 0x5b6   : > { %v15540_v60 = vadd.f32 %v5596_v16, %v5558_v22  ;;  %5851 = vmatmul.bf16.gmra.mxu2 %v16959_v28  ;;  %v16961_v16 = vld [vmem:[#allocation12_spill] sm:$0xff]  ;;  %v9844_v28 = vld [vmem:[%s16539_s1 + $0xf38] sm:$0xf0] }
 0x5ba   : > { %5890 = vmatmul.bf16.gmra.mxu3 %v16960_v48  ;;  %v5560_v31 = vpop.f32.mrf.mxu2  ;;  %v5484_v7 = vpop.f32.mrf.mxu0 }
 0x5bb   : > { %v5561_v36 = vadd.f32 %v5560_v31, %v5522_v47  ;;  %v5523_v37 = vpop.f32.mrf.mxu1  ;;  %v10288_v47 = vld [vmem:[%s16539_s1 + $0x91c] sm:$0xf] }
 0x5bc   : > { %v5524_v45 = vadd.f32 %v5523_v37, %v5484_v7  ;;  %v9847_v7 = vor.u32 %v10480_v10, %v9844_v28  ;;  %v10352_v37 = vld [vmem:[%s16539_s1 + $0xb1c] sm:$0xf] }
 0x5bd   : > { %v5599_v15 = vpop.f32.mrf.mxu3  ;;  %v9812_v10 = vld [vmem:[%s16539_s1 + $0xef8] sm:$0xf0] }
 0x5be   : > { %v15546_v17 = vadd.f32 %v5599_v15, %v5561_v36  ;;  %6036 = vmatpush.bf16.msrb.mxu3 %v9847_v7 }
 0x5c2   : > { %v5562_v43 = vpop.f32.mrf.mxu2  ;;  %v5613_v21 = vpop.f32.mrf.mxu0  ;;  %5778 = vmatmul.bf16.gmra.mxu0 %v16887_v54 }
 0x5c3   : > { %v5563_v3 = vadd.f32 %v5562_v43, %v5524_v45  ;;  %v5614_v19 = vadd.f32 %v5613_v21, %v15247_v26  ;;  %v5652_v38 = vpop.f32.mrf.mxu1  ;;  %5817 = vmatmul.bf16.gmra.mxu1 %v16888_v39  ;;  %v9588_v26 = vld [vmem:[%s16539_s1 + $0xd38] sm:$0xf0] }
 0x5c4   : > { %v9591_v54 = vor.u32 %v10416_v27, %v9588_v26  ;;  %v9076_v39 = vld [vmem:[%s16539_s1 + $0x938] sm:$0xf0] }
 0x5c5   : > { %v5601_v32 = vpop.f32.mrf.mxu3  ;;  %v5653_v22 = vadd.f32 %v5652_v38, %v5614_v19  ;;  %v9079_v15 = vor.u32 %v10288_v47, %v9076_v39  ;;  %v9332_v45 = vld [vmem:[%s16539_s1 + $0xb38] sm:$0xf0]  ;;  %v16963_v38 = vld [vmem:[#allocation71_spill] sm:$0xff] }
 0x5c6   : > { %v15549_v62 = vadd.f32 %v5601_v32, %v5563_v3  ;;  %5856 = vmatmul.bf16.gmra.mxu2 %v16961_v16  ;;  %v9335_v32 = vor.u32 %v10352_v37, %v9332_v45  ;;  %v10408_v27 = vld [vmem:[%s16539_s1 + $0xcdc] sm:$0xf] }
 0x5c7   : > { %5997 = vmatpush.bf16.msrb.mxu2 %v9591_v54  ;;  %5919 = vmatpush.bf16.msrb.mxu0 %v9079_v15  ;;  %v10280_v26 = vld [vmem:[%s16539_s1 + $0x8dc] sm:$0xf] }
 0x5c8   : > { %5958 = vmatpush.bf16.msrb.mxu1 %v9335_v32  ;;  %v9044_v54 = vld [vmem:[%s16539_s1 + $0x8f8] sm:$0xf0] }
 0x5c9   : > { %v10472_v39 = vld [vmem:[%s16539_s1 + $0xedc] sm:$0xf] }
 0x5ca   : > { %5895 = vmatmul.bf16.gmra.mxu3 %v16962_v9  ;;  %v5691_v52 = vpop.f32.mrf.mxu2  ;;  %v5615_v36 = vpop.f32.mrf.mxu0  ;;  %v9815_v15 = vor.u32 %v10472_v39, %v9812_v10  ;;  %v9300_v32 = vld [vmem:[%s16539_s1 + $0xaf8] sm:$0xf0] }
 0x5cb   : > { %v5692_v48 = vadd.f32 %v5691_v52, %v5653_v22  ;;  %v5616_v43 = vadd.f32 %v5615_v36, %v15290_v33  ;;  %v5654_v3 = vpop.f32.mrf.mxu1  ;;  %v6083_v22 = vmul.f32 %v16963_v38, %v16963_v38  ;;  %v9556_v33 = vld [vmem:[%s16539_s1 + $0xcf8] sm:$0xf0]  ;;  %v9047_v36 = vor.u32 %v10280_v26, %v9044_v54 }
 0x5cc   : > { %v9559_v52 = vor.u32 %v10408_v27, %v9556_v33  ;;  %6037 = vmatpush.bf16.msrb.mxu3 %v9815_v15  ;;  %v9012_v38 = vld [vmem:[%s16539_s1 + $0x8b8] sm:$0xf0] }
 0x5cd   : > { %v5730_v31 = vpop.f32.mrf.mxu3  ;;  %v5655_v19 = vadd.f32 %v5654_v3, %v5616_v43  ;;  %5920 = vmatpush.bf16.msrb.mxu0 %v9047_v36  ;;  %v10344_v3 = vld [vmem:[%s16539_s1 + $0xadc] sm:$0xf] }
 0x5ce   : > { %v5731_v21 = vadd.f32 %v5730_v31, %v5692_v48  ;;  %5998 = vmatpush.bf16.msrb.mxu2 %v9559_v52  ;;  %v10464_v33 = vld [vmem:[%s16539_s1 + $0xe9c] sm:$0xf] }
 0x5cf   : > { %v9780_v26 = vld [vmem:[%s16539_s1 + $0xeb8] sm:$0xf0] }
 0x5d0   : > { %v6107_v16 = vmul.f32 %v5731_v21, %v5731_v21  ;;  %v9303_v21 = vor.u32 %v10344_v3, %v9300_v32  ;;  %v9783_v52 = vor.u32 %v10464_v33, %v9780_v26  ;;  %v10392_v54 = vld [vmem:[%s16539_s1 + $0xc5c] sm:$0xf] }
 0x5d1   : > { %v9492_v39 = vld [vmem:[%s16539_s1 + $0xc78] sm:$0xf0] }
 0x5d2   : > { %v15582_v9 = vadd.f32 %v6107_v16, %v6083_v22  ;;  %v5693_v47 = vpop.f32.mrf.mxu2  ;;  %v5618_v31 = vpop.f32.mrf.mxu0  ;;  %5783 = vmatmul.bf16.gmra.mxu0 %v16892_v29  ;;  %v9524_v29 = vld [vmem:[%s16539_s1 + $0xcb8] sm:$0xf0]  ;;  %v16964_v22 = vld [vmem:[#allocation72_spill] sm:$0xff]  ;;  %5959 = vmatpush.bf16.msrb.mxu1 %v9303_v21 }
 0x5d3   : > { %v5694_v28 = vadd.f32 %v5693_v47, %v5655_v19  ;;  %v5619_v7 = vadd.f32 %v5618_v31, %v15315_v55  ;;  %v5657_v37 = vpop.f32.mrf.mxu1  ;;  %v10400_v55 = vld [vmem:[%s16539_s1 + $0xc9c] sm:$0xf]  ;;  %5822 = vmatmul.bf16.gmra.mxu1 %v16893_v50  ;;  %v6087_v16 = vmul.f32 %v16964_v22, %v16964_v22  ;;  %v9495_v31 = vor.u32 %v10392_v54, %v9492_v39 }
 0x5d4   : > { %v10272_v19 = vld [vmem:[%s16539_s1 + $0x89c] sm:$0xf]  ;;  %v9527_v50 = vor.u32 %v10400_v55, %v9524_v29  ;;  %6038 = vmatpush.bf16.msrb.mxu3 %v9783_v52 }
 0x5d5   : > { %v5732_v48 = vpop.f32.mrf.mxu3  ;;  %v5658_v43 = vadd.f32 %v5657_v37, %v5619_v7  ;;  %v10336_v47 = vld [vmem:[%s16539_s1 + $0xa9c] sm:$0xf] }
 0x5d6   : > { %v5733_v45 = vadd.f32 %v5732_v48, %v5694_v28  ;;  %5861 = vmatmul.bf16.gmra.mxu2 %v16894_v59  ;;  %v9015_v59 = vor.u32 %v10272_v19, %v9012_v38  ;;  %v10264_v36 = vld [vmem:[%s16539_s1 + $0x85c] sm:$0xf] }
 0x5d7   : > { %5999 = vmatpush.bf16.msrb.mxu2 %v9527_v50  ;;  %v8980_v15 = vld [vmem:[%s16539_s1 + $0x878] sm:$0xf0] }
 0x5d8   : > { %v6111_v27 = vmul.f32 %v5733_v45, %v5733_v45  ;;  %5921 = vmatpush.bf16.msrb.mxu0 %v9015_v59  ;;  %v10456_v7 = vld [vmem:[%s16539_s1 + $0xe5c] sm:$0xf]  ;;  %v8983_v32 = vor.u32 %v10264_v36, %v8980_v15 }
 0x5d9   : > { %v9748_v55 = vld [vmem:[%s16539_s1 + $0xe78] sm:$0xf0] }
 0x5da   : > { %5900 = vmatmul.bf16.gmra.mxu3 %v16895_v46  ;;  %v9268_v46 = vld [vmem:[%s16539_s1 + $0xab8] sm:$0xf0]  ;;  %v15645_v10 = vadd.f32 %v6111_v27, %v6087_v16  ;;  %v5696_v28 = vpop.f32.mrf.mxu2  ;;  %v5620_v3 = vpop.f32.mrf.mxu0 }
 0x5db   : > { %v9271_v48 = vor.u32 %v10336_v47, %v9268_v46  ;;  %v5697_v37 = vadd.f32 %v5696_v28, %v5658_v43  ;;  %v10328_v21 = vld [vmem:[%s16539_s1 + $0xa5c] sm:$0xf]  ;;  %v5621_v19 = vadd.f32 %v5620_v3, %v15359_v40  ;;  %v5659_v38 = vpop.f32.mrf.mxu1  ;;  %v9751_v43 = vor.u32 %v10456_v7, %v9748_v55  ;;  %6000 = vmatpush.bf16.msrb.mxu2 %v9495_v31 }
 0x5dc   : > { %v9236_v29 = vld [vmem:[%s16539_s1 + $0xa78] sm:$0xf0]  ;;  %5922 = vmatpush.bf16.msrb.mxu0 %v8983_v32 }
 0x5dd   : > { %v5735_v45 = vpop.f32.mrf.mxu3  ;;  %5960 = vmatpush.bf16.msrb.mxu1 %v9271_v48  ;;  %v9239_v16 = vor.u32 %v10328_v21, %v9236_v29  ;;  %v16965_v27 = vld [vmem:[#allocation73_spill] sm:$0xff]  ;;  %v5660_v33 = vadd.f32 %v5659_v38, %v5621_v19  ;;  %6039 = vmatpush.bf16.msrb.mxu3 %v9751_v43  ;;  %v16966_v29 = vld [vmem:[#allocation74_spill] sm:$0xff] }
 0x5de   : > { %v5736_v22 = vadd.f32 %v5735_v45, %v5697_v37  ;;  %v6091_v50 = vmul.f32 %v16965_v27, %v16965_v27  ;;  %v10384_v54 = vld [vmem:[%s16539_s1 + $0xc1c] sm:$0xf]  ;;  %v6095_v19 = vmul.f32 %v16966_v29, %v16966_v29 }
 0x5df   : > { %v9460_v39 = vld [vmem:[%s16539_s1 + $0xc38] sm:$0xf0] }
 0x5e0   : > { %v6115_v59 = vmul.f32 %v5736_v22, %v5736_v22  ;;  %v9463_v31 = vor.u32 %v10384_v54, %v9460_v39  ;;  %v10256_v36 = vld [vmem:[%s16539_s1 + $0x81c] sm:$0xf] }
 0x5e1   : > { %5961 = vmatpush.bf16.msrb.mxu1 %v9239_v16  ;;  %v8948_v15 = vld [vmem:[%s16539_s1 + $0x838] sm:$0xf0] }
 0x5e2   : > { %v15668_v26 = vadd.f32 %v6115_v59, %v6091_v50  ;;  %v5698_v47 = vpop.f32.mrf.mxu2  ;;  %v5623_v40 = vpop.f32.mrf.mxu0  ;;  %v10448_v7 = vld [vmem:[%s16539_s1 + $0xe1c] sm:$0xf]  ;;  %v8951_v45 = vor.u32 %v10256_v36, %v8948_v15  ;;  %5788 = vmatmul.bf16.gmra.mxu0 %v16898_v25  ;;  %6001 = vmatpush.bf16.msrb.mxu2 %v9463_v31 }
 0x5e3   : > { %v5699_v52 = vadd.f32 %v5698_v47, %v5660_v33  ;;  %v5624_v28 = vadd.f32 %v5623_v40, %v15408_v30  ;;  %v5662_v48 = vpop.f32.mrf.mxu1  ;;  %v9716_v30 = vld [vmem:[%s16539_s1 + $0xe38] sm:$0xf0]  ;;  %5827 = vmatmul.bf16.gmra.mxu1 %v16899_v35  ;;  %v16967_v35 = vld [vmem:[#allocation75_spill] sm:$0xff] }
 0x5e4   : > { %v10320_v3 = vld [vmem:[%s16539_s1 + $0xa1c] sm:$0xf]  ;;  %v9719_v21 = vor.u32 %v10448_v7, %v9716_v30  ;;  %5923 = vmatpush.bf16.msrb.mxu0 %v8951_v45  ;;  %v16968_v7 = vld [vmem:[#allocation76_spill] sm:$0xff] }
 0x5e5   : > { %v5737_v46 = vpop.f32.mrf.mxu3  ;;  %v9204_v32 = vld [vmem:[%s16539_s1 + $0xa38] sm:$0xf0]  ;;  %v5663_v55 = vadd.f32 %v5662_v48, %v5624_v28 }
 0x5e6   : > { %v5738_v37 = vadd.f32 %v5737_v46, %v5699_v52  ;;  %5866 = vmatmul.bf16.gmra.mxu2 %v16900_v42  ;;  %v9207_v43 = vor.u32 %v10320_v3, %v9204_v32  ;;  %6040 = vmatpush.bf16.msrb.mxu3 %v9719_v21  ;;  %v6099_v42 = vmul.f32 %v16967_v35, %v16967_v35  ;;  %v16969_v45 = vld [vmem:[#allocation25_spill] sm:$0xff] }
 0x5e8   : > { %v6119_v38 = vmul.f32 %v5738_v37, %v5738_v37  ;;  %5962 = vmatpush.bf16.msrb.mxu1 %v9207_v43  ;;  %v6103_v37 = vmul.f32 %v16968_v7, %v16968_v7 }
 0x5ea   : > { %5905 = vmatmul.bf16.gmra.mxu3 %v16902_v61  ;;  %v15701_v22 = vadd.f32 %v6119_v38, %v6095_v19  ;;  %v5701_v16 = vpop.f32.mrf.mxu2  ;;  %v5625_v50 = vpop.f32.mrf.mxu0  ;;  %v15707_v61 = vmax.f32 %v15582_v9, 1e-16 }
 0x5eb   : > { %v5702_v25 = vadd.f32 %v5701_v16, %v5663_v55  ;;  %v5626_v59 = vadd.f32 %v5625_v50, %v15436_v6  ;;  %v5664_v33 = vpop.f32.mrf.mxu1  ;;  %v16970_v16 = vld [vmem:[#allocation77_spill] sm:$0xff] }
 0x5ec   : > { %10677 = vrsqrt.f32 %v15707_v61  ;;  %vm6652_vm14 = vcmp.eq.f32.partialorder %v15707_v61, inf  ;;  %vm6654_vm15 = vcmp.eq.f32.partialorder %v15707_v61, 0.0 }
 0x5ed   : > { %v5740_v27 = vpop.f32.mrf.mxu3  ;;  %v5665_v52 = vadd.f32 %v5664_v33, %v5626_v59  ;;  %10679 = vlog2.f32 %v15707_v61 }
 0x5ee   : > { %v5741_v47 = vadd.f32 %v5740_v27, %v5702_v25 }
 0x5f0   : > { %v6123_v46 = vmul.f32 %v5741_v47, %v5741_v47 }
 0x5f2   : > { %v15709_v40 = vadd.f32 %v6123_v46, %v6099_v42  ;;  %v5703_v54 = vpop.f32.mrf.mxu2  ;;  %v5628_v48 = vpop.f32.mrf.mxu0  ;;  %5793 = vmatmul.bf16.gmra.mxu0 %v16905_v49 }
 0x5f3   : > { %v5704_v39 = vadd.f32 %v5703_v54, %v5665_v52  ;;  %v5629_v6 = vadd.f32 %v5628_v48, %v15484_v44  ;;  %v5667_v31 = vpop.f32.mrf.mxu1  ;;  %5832 = vmatmul.bf16.gmra.mxu1 %v16907_v56  ;;  %v10678_v3 = vpop.eup %10677  ;;  %v6203_v56 = vmul.f32 %v16970_v16, %v16970_v16  ;;  %v16974_v48 = vld [vmem:[#allocation28_spill] sm:$0xff] }
 0x5f4   : > { %v6646_v19 = vmul.f32 %v10678_v3, %v15707_v61 }
 0x5f5   : > { %v5742_v28 = vpop.f32.mrf.mxu3  ;;  %v5668_v15 = vadd.f32 %v5667_v31, %v5629_v6  ;;  %v16975_v6 = vld [vmem:[#allocation78_spill] sm:$0xff] }
 0x5f6   : > { %v5743_v36 = vadd.f32 %v5742_v28, %v5704_v39  ;;  %5871 = vmatmul.bf16.gmra.mxu2 %v16908_v24  ;;  %v6647_v25 = vmul.f32 %v10678_v3, %v6646_v19  ;;  %v16972_v39 = vld [vmem:[#allocation26_spill] sm:$0xff]  ;;  %v16973_v28 = vld [vmem:[#allocation27_spill] sm:$0xff]  ;;  %v6207_v31 = vmul.f32 %v16975_v6, %v16975_v6 }
 0x5f8   : > { %v6127_v9 = vmul.f32 %v5743_v36, %v5743_v36  ;;  %v6648_v42 = vmul.f32 0.5, %v6647_v25  ;;  %v15737_v36 = vmax.f32 %v15645_v10, 1e-16 }
 0x5fa   : > { %5910 = vmatmul.bf16.gmra.mxu3 %v16969_v45  ;;  %v15719_v30 = vadd.f32 %v6127_v9, %v6103_v37  ;;  %v5706_v32 = vpop.f32.mrf.mxu2  ;;  %v5630_v21 = vpop.f32.mrf.mxu0  ;;  %v6649_v7 = vsub.f32 1.5, %v6648_v42  ;;  %vm6700_vm2 = vcmp.eq.f32.partialorder %v15737_v36, inf  ;;  %vm6702_vm6 = vcmp.eq.f32.partialorder %v15737_v36, 0.0 }
 0x5fb   : > { %v5707_v44 = vadd.f32 %v5706_v32, %v5668_v15  ;;  %v5631_v29 = vadd.f32 %v5630_v21, %v15517_v20  ;;  %v5669_v49 = vpop.f32.mrf.mxu1  ;;  %v16976_v15 = vld [vmem:[#allocation29_spill] sm:$0xff]  ;;  %v10680_v37 = vpop.eup %10679 }
 0x5fc   : > { %v7136_v16 = vmul.f32 0.6931472, %v10680_v37 }
 0x5fd   : > { %v5745_v55 = vpop.f32.mrf.mxu3  ;;  %v5670_v43 = vadd.f32 %v5669_v49, %v5631_v29 }
 0x5fe   : > { %v5746_v38 = vadd.f32 %v5745_v55, %v5707_v44 }
 0x600   : > { %v6227_v24 = vmul.f32 %v5746_v38, %v5746_v38 }
 0x602   : > { %v6275_v27 = vadd.f32 %v6227_v24, %v6203_v56  ;;  %v5708_v50 = vpop.f32.mrf.mxu2  ;;  %v5633_v52 = vpop.f32.mrf.mxu0  ;;  %5924 = vmatmul.bf16.vlgmr.msrb.gmra.mxu0 %v16972_v39 }
 0x603   : > { %v5709_v33 = vadd.f32 %v5708_v50, %v5670_v43  ;;  %v5634_v20 = vadd.f32 %v5633_v52, %v15538_v11  ;;  %v5672_v35 = vpop.f32.mrf.mxu1  ;;  %5963 = vmatmul.bf16.vlgmr.msrb.gmra.mxu1 %v16973_v28  ;;  %v6650_v43 = vmul.f32 %v10678_v3, %v6649_v7  ;;  %v15749_v52 = vmax.f32 %v15668_v26, 1e-16 }
 0x604   : > { %v15725_v59 = vmax.f32 %v6275_v27, 1e-16  ;;  %v16978_v27 = vld [vmem:[#allocation79_spill] sm:$0xff] }
 0x605   : > { %v5747_v47 = vpop.f32.mrf.mxu3  ;;  %v5673_v54 = vadd.f32 %v5672_v35, %v5634_v20  ;;  %v6211_v50 = vmul.f32 %v16978_v27, %v16978_v27  ;;  %vm6748_vm8 = vcmp.eq.f32.partialorder %v15749_v52, inf  ;;  %vm6750_vm10 = vcmp.eq.f32.partialorder %v15749_v52, 0.0 }
 0x606   : > { %16971 = vst [vmem:[#allocation54_spill] sm:$0xff] %v15725_v59  ;;  %10681 = vrsqrt.f32 %v15725_v59  ;;  %v5748_v46 = vadd.f32 %v5747_v47, %v5709_v33  ;;  %6002 = vmatmul.bf16.vlgmr.msrb.gmra.mxu2 %v16974_v48  ;;  %vm6364_vm0 = vcmp.eq.f32.partialorder %v15725_v59, inf  ;;  %vm6366_vm1 = vcmp.eq.f32.partialorder %v15725_v59, 0.0 }
 0x607   : > { %10683 = vlog2.f32 %v15725_v59 }
 0x608   : > { %v6231_v11 = vmul.f32 %v5748_v46, %v5748_v46  ;;  %10685 = vlog2.f32 %v15737_v36 }
 0x60a   : > { %6041 = vmatmul.bf16.vlgmr.msrb.gmra.mxu3 %v16976_v15  ;;  %v6279_v9 = vadd.f32 %v6231_v11, %v6207_v31  ;;  %v5711_v45 = vpop.f32.mrf.mxu2  ;;  %v5635_v21 = vpop.f32.mrf.mxu0 }
 0x60b   : > { %v5712_v44 = vadd.f32 %v5711_v45, %v5673_v54  ;;  %v5636_v10 = vadd.f32 %v5635_v21, %v15540_v60  ;;  %v5674_v38 = vpop.f32.mrf.mxu1  ;;  %v6651_v60 = vmul.f32 %v6650_v43, %v15707_v61  ;;  %v16979_v54 = vld [vmem:[#allocation80_spill] sm:$0xff] }
 0x60c   : > { %v10682_v32 = vpop.eup %10681  ;;  %v15742_v19 = vmax.f32 %v6279_v9, 1e-16  ;;  %v6215_v39 = vmul.f32 %v16979_v54, %v16979_v54  ;;  %v16982_v54 = vld [vmem:[#allocation16_spill] sm:$0xff] }
 0x60d   : > { %v5750_v55 = vpop.f32.mrf.mxu3  ;;  %v10684_v29 = vpop.eup %10683  ;;  %v6358_v49 = vmul.f32 %v10682_v32, %v15725_v59  ;;  %v5675_v35 = vadd.f32 %v5674_v38, %v5636_v10 }
 0x60e   : > { %16977 = vst [vmem:[#allocation49_spill] sm:$0xff] %v15742_v19  ;;  %v7088_v56 = vmul.f32 0.6931472, %v10684_v29  ;;  %v5751_v24 = vadd.f32 %v5750_v55, %v5712_v44  ;;  %10687 = vlog2.f32 %v15742_v19  ;;  %v10686_v46 = vpop.eup %10685  ;;  %v6653_v44 = vsel %vm6652_vm14, %v15707_v61, %v6651_v60 }
 0x60f   : > { %v6359_v25 = vmul.f32 %v10682_v32, %v6358_v49  ;;  %10689 = vlog2.f32 %v15749_v52  ;;  %v15761_v55 = vmul.f32 0.6931472, %v10686_v46  ;;  %v15795_v46 = vmax.f32 %v15709_v40, 1e-16 }
 0x610   : > { %v7181_v33 = vsub.f32 %v7088_v56, %v7136_v16  ;;  %v6235_v47 = vmul.f32 %v5751_v24, %v5751_v24  ;;  %vm6412_vm3 = vcmp.eq.f32.partialorder %v15742_v19, inf  ;;  %vm6414_vm4 = vcmp.eq.f32.partialorder %v15742_v19, 0.0 }
 0x611   : > { %v6360_v20 = vmul.f32 0.5, %v6359_v25 }
 0x612   : > { %v7205_v42 = vmul.f32 0.5, %v7181_v33  ;;  %v6283_v3 = vadd.f32 %v6235_v47, %v6211_v50  ;;  %v5713_v48 = vpop.f32.mrf.mxu2  ;;  %v5638_v15 = vpop.f32.mrf.mxu0  ;;  %5929 = vmatmul.bf16.gmra.mxu0 %v11450_v0 }
 0x613   : > { %v6361_v28 = vsub.f32 1.5, %v6360_v20  ;;  %v5714_v11 = vadd.f32 %v5713_v48, %v5675_v35  ;;  %v5639_v37 = vadd.f32 %v5638_v15, %v15546_v17  ;;  %v5677_v9 = vpop.f32.mrf.mxu1  ;;  %v6655_v17 = vand.u32 2147483648, %v15707_v61  ;;  %5968 = vmatmul.bf16.gmra.mxu1 %v11452_v1  ;;  %v16983_v48 = vld [vmem:[#allocation81_spill] sm:$0xff] }
 0x614   : > { %v7353_v6 = vand.u32 2147483647, %v7205_v42  ;;  %v15755_v31 = vmax.f32 %v6283_v3, 1e-16  ;;  %v10688_v45 = vpop.eup %10687 }
 0x615   : > { %v5752_v26 = vpop.f32.mrf.mxu3  ;;  %v6362_v7 = vmul.f32 %v10682_v32, %v6361_v28  ;;  %v15767_v10 = vmul.f32 0.6931472, %v10688_v45  ;;  %v5678_v38 = vadd.f32 %v5677_v9, %v5639_v37  ;;  %v6367_v32 = vand.u32 2147483648, %v15725_v59  ;;  %v10690_v1 = vpop.eup %10689 }
 0x616   : > { %16980 = vst [vmem:[#allocation66_spill] sm:$0xff] %v15755_v31  ;;  %v5753_v21 = vadd.f32 %v5752_v26, %v5714_v11  ;;  %v15764_v29 = vadd.f32 %v15124_v41, %v7353_v6  ;;  %10691 = vlog2.f32 %v15755_v31  ;;  %6007 = vmatmul.bf16.gmra.mxu2 %v11454_v2  ;;  %v15777_v41 = vmax.f32 %v15701_v22, 1e-16 }
 0x617   : > { %v6363_v49 = vmul.f32 %v6362_v7, %v15725_v59  ;;  %v6656_v56 = vsel %vm6654_vm15, %v6655_v17, %v6653_v44  ;;  %v15792_v3 = vmul.f32 0.6931472, %v10690_v1  ;;  %v16987_v1 = vld [vmem:[#allocation32_spill] sm:$0xff]  ;;  %vm6460_vm7 = vcmp.eq.f32.partialorder %v15755_v31, inf }
 0x618   : > { %v6239_v43 = vmul.f32 %v5753_v21, %v5753_v21  ;;  %10693 = vlog2.f32 %v15777_v41  ;;  %vm6462_vm9 = vcmp.eq.f32.partialorder %v15755_v31, 0.0  ;;  %vm6796_vm12 = vcmp.eq.f32.partialorder %v15777_v41, inf }
 0x619   : > { %v6365_v16 = vsel %vm6364_vm0, %v15725_v59, %v6363_v49  ;;  %vm6798_vm14 = vcmp.eq.f32.partialorder %v15777_v41, 0.0  ;;  %vm6844_vm0 = vcmp.eq.f32.partialorder %v15795_v46, inf }
 0x61a   : > { %6046 = vmatmul.bf16.gmra.mxu3 %v16926_v12  ;;  %v6368_v24 = vsel %vm6366_vm1, %v6367_v32, %v6365_v16  ;;  %v6287_v25 = vadd.f32 %v6239_v43, %v6215_v39  ;;  %v5716_v2 = vpop.f32.mrf.mxu2  ;;  %v5640_v47 = vpop.f32.mrf.mxu0  ;;  %v15815_v43 = vmax.f32 %v15719_v30, 1e-16  ;;  %v16985_v16 = vld [vmem:[#allocation31_spill] sm:$0xff] }
 0x61b   : > { %v6911_v27 = vsub.f32 %v6368_v24, %v6656_v56  ;;  %v5717_v22 = vadd.f32 %v5716_v2, %v5678_v38  ;;  %v5641_v12 = vadd.f32 %v5640_v47, %v15549_v62  ;;  %v5679_v60 = vpop.f32.mrf.mxu1  ;;  %v6219_v62 = vmul.f32 %v16983_v48, %v16983_v48  ;;  %v16986_v56 = vld [vmem:[#allocation82_spill] sm:$0xff] }
 0x61c   : > { %v15786_v50 = vmax.f32 %v6287_v25, 1e-16  ;;  %v10692_v20 = vpop.eup %10691  ;;  %v6223_v24 = vmul.f32 %v16986_v56, %v16986_v56 }
 0x61d   : > { %v5755_v33 = vpop.f32.mrf.mxu3  ;;  %v7265_v35 = vmul.f32 %v6911_v27, %v6911_v27  ;;  %v15790_v61 = vmul.f32 0.6931472, %v10692_v20  ;;  %v5680_v28 = vadd.f32 %v5679_v60, %v5641_v12  ;;  %v16988_v27 = vld [vmem:[#allocation33_spill] sm:$0xff] }
 0x61e   : > { %16981 = vst [vmem:[#allocation67_spill] sm:$0xff] %v15786_v50  ;;  %v5756_v42 = vadd.f32 %v5755_v33, %v5717_v22  ;;  %10695 = vlog2.f32 %v15786_v50  ;;  %v10694_v15 = vpop.eup %10693  ;;  %v16989_v33 = vld [vmem:[#allocation34_spill] sm:$0xff]  ;;  %vm6508_vm11 = vcmp.eq.f32.partialorder %v15786_v50, inf  ;;  %vm6510_vm13 = vcmp.eq.f32.partialorder %v15786_v50, 0.0 }
 0x61f   : > { %v15798_v39 = vadd.f32 %v16982_v54, %v7265_v35  ;;  %10697 = vlog2.f32 %v15795_v46  ;;  %v15812_v32 = vmul.f32 0.6931472, %v10694_v15 }
 0x620   : > { %v6243_v6 = vmul.f32 %v5756_v42, %v5756_v42  ;;  %10699 = vrsqrt.f32 %v15742_v19 }
 0x621   : > { %10701 = vrsqrt.f32 %v15737_v36 }
 0x622   : > { %v6291_v26 = vadd.f32 %v6243_v6, %v6219_v62  ;;  %v5718_v7 = vpop.f32.mrf.mxu2  ;;  %v5769_v45 = vpop.f32.mrf.mxu0  ;;  %5934 = vmatmul.bf16.gmra.mxu0 %v16985_v16 }
 0x623   : > { %v5719_v37 = vadd.f32 %v5718_v7, %v5680_v28  ;;  %v5808_v21 = vpop.f32.mrf.mxu1  ;;  %5973 = vmatmul.bf16.gmra.mxu1 %v16987_v1 }
 0x624   : > { %v15807_v40 = vmax.f32 %v6291_v26, 1e-16  ;;  %v10696_v44 = vpop.eup %10695  ;;  %v5809_v38 = vadd.f32 %v5808_v21, %v5769_v45 }
 0x625   : > { %v5757_v9 = vpop.f32.mrf.mxu3  ;;  %v15810_v17 = vmul.f32 0.6931472, %v10696_v44  ;;  %v10698_v22 = vpop.eup %10697 }
 0x626   : > { %16984 = vst [vmem:[#allocation68_spill] sm:$0xff] %v15807_v40  ;;  %v5758_v49 = vadd.f32 %v5757_v9, %v5719_v37  ;;  %10703 = vlog2.f32 %v15807_v40  ;;  %6012 = vmatmul.bf16.gmra.mxu2 %v16988_v27  ;;  %v10700_v30 = vpop.eup %10699  ;;  %v15834_v6 = vmul.f32 0.6931472, %v10698_v22  ;;  %vm6556_vm15 = vcmp.eq.f32.partialorder %v15807_v40, inf }
 0x627   : > { %v15826_v20 = vpop.eup %10701  ;;  %10705 = vlog2.f32 %v15815_v43  ;;  %v6406_v48 = vmul.f32 %v10700_v30, %v15742_v19  ;;  %vm6558_vm1 = vcmp.eq.f32.partialorder %v15807_v40, 0.0 }
 0x628   : > { %v6247_v25 = vmul.f32 %v5758_v49, %v5758_v49  ;;  %10707 = vrsqrt.f32 %v15755_v31  ;;  %v6694_v37 = vmul.f32 %v15826_v20, %v15737_v36 }
 0x629   : > { %10709 = vrsqrt.f32 %v15749_v52  ;;  %v6407_v21 = vmul.f32 %v10700_v30, %v6406_v48 }
 0x62a   : > { %6051 = vmatmul.bf16.gmra.mxu3 %v16989_v33  ;;  %v6295_v47 = vadd.f32 %v6247_v25, %v6223_v24  ;;  %v5847_v35 = vpop.f32.mrf.mxu2  ;;  %v5771_v54 = vpop.f32.mrf.mxu0  ;;  %v6695_v56 = vmul.f32 %v15826_v20, %v6694_v37  ;;  %v16993_v37 = vld [vmem:[#allocation37_spill] sm:$0xff] }
 0x62b   : > { %v5848_v60 = vadd.f32 %v5847_v35, %v5809_v38  ;;  %v5810_v62 = vpop.f32.mrf.mxu1  ;;  %v6408_v35 = vmul.f32 0.5, %v6407_v21 }
 0x62c   : > { %v15830_v12 = vmax.f32 %v6295_v47, 1e-16  ;;  %v10704_v28 = vpop.eup %10703  ;;  %v5811_v15 = vadd.f32 %v5810_v62, %v5771_v54  ;;  %v6696_v62 = vmul.f32 0.5, %v6695_v56 }
 0x62d   : > { %v5886_v42 = vpop.f32.mrf.mxu3  ;;  %v15838_v7 = vmul.f32 0.6931472, %v10704_v28  ;;  %v10706_v45 = vpop.eup %10705  ;;  %v16991_v28 = vld [vmem:[#allocation35_spill] sm:$0xff] }
 0x62e   : > { %16990 = vst [vmem:[#allocation30_spill] sm:$0xff] %v15830_v12  ;;  %v15836_v26 = vadd.f32 %v5886_v42, %v5848_v60  ;;  %10711 = vlog2.f32 %v15830_v12  ;;  %v10708_v44 = vpop.eup %10707  ;;  %v15852_v47 = vmul.f32 0.6931472, %v10706_v45 }
 0x62f   : > { %v15845_v49 = vpop.eup %10709  ;;  %10713 = vrsqrt.f32 %v15786_v50  ;;  %v6454_v27 = vmul.f32 %v10708_v44, %v15755_v31 }
 0x630   : > { %10715 = vrsqrt.f32 %v15777_v41  ;;  %v6742_v54 = vmul.f32 %v15845_v49, %v15749_v52 }
 0x631   : > { %v6455_v45 = vmul.f32 %v10708_v44, %v6454_v27  ;;  %10717 = vrsqrt.f32 %v15807_v40 }
 0x632   : > { %v5849_v38 = vpop.f32.mrf.mxu2  ;;  %v5774_v1 = vpop.f32.mrf.mxu0  ;;  %5939 = vmatmul.bf16.gmra.mxu0 %v16991_v28  ;;  %10719 = vrsqrt.f32 %v15795_v46 }
 0x633   : > { %v5850_v24 = vadd.f32 %v5849_v38, %v5811_v15  ;;  %v5813_v22 = vpop.f32.mrf.mxu1  ;;  %v16992_v15 = vld [vmem:[#allocation36_spill] sm:$0xff]  ;;  %v16994_v38 = vld [vmem:[#allocation38_spill] sm:$0xff]  ;;  %v6456_v56 = vmul.f32 0.5, %v6455_v45  ;;  %10721 = vrsqrt.f32 %v15830_v12 }
 0x634   : > { %v10712_v16 = vpop.eup %10711  ;;  %v5814_v42 = vadd.f32 %v5813_v22, %v5774_v1  ;;  %5978 = vmatmul.bf16.gmra.mxu1 %v16992_v15  ;;  %v6697_v22 = vsub.f32 1.5, %v6696_v62  ;;  %10723 = vrsqrt.f32 %v15815_v43 }
 0x635   : > { %v5888_v25 = vpop.f32.mrf.mxu3  ;;  %v15850_v33 = vmul.f32 0.6931472, %v10712_v16  ;;  %v15865_v21 = vpop.eup %10713  ;;  %v6409_v16 = vsub.f32 1.5, %v6408_v35  ;;  %v6457_v62 = vsub.f32 1.5, %v6456_v56 }
 0x636   : > { %v15855_v60 = vadd.f32 %v5888_v25, %v5850_v24  ;;  %6017 = vmatmul.bf16.gmra.mxu2 %v16993_v37  ;;  %v6743_v24 = vmul.f32 %v15845_v49, %v6742_v54  ;;  %v15868_v1 = vpop.eup %10715  ;;  %v6502_v27 = vmul.f32 %v15865_v21, %v15786_v50 }
 0x637   : > { %v6410_v37 = vmul.f32 %v10700_v30, %v6409_v16  ;;  %v6790_v54 = vmul.f32 %v15868_v1, %v15777_v41  ;;  %v15881_v11 = vpop.eup %10717 }
 0x638   : > { %v6744_v2 = vmul.f32 0.5, %v6743_v24  ;;  %v6503_v45 = vmul.f32 %v15865_v21, %v6502_v27 }
 0x63a   : > { %6056 = vmatmul.bf16.gmra.mxu3 %v16994_v38  ;;  %v5852_v25 = vpop.f32.mrf.mxu2  ;;  %v5776_v48 = vpop.f32.mrf.mxu0  ;;  %v6745_v0 = vsub.f32 1.5, %v6744_v2  ;;  %v6504_v56 = vmul.f32 0.5, %v6503_v45  ;;  %v16997_v45 = vld [vmem:[#allocation41_spill] sm:$0xff] }
 0x63b   : > { %v5853_v28 = vadd.f32 %v5852_v25, %v5814_v42  ;;  %v5815_v15 = vpop.f32.mrf.mxu1  ;;  %v6698_v42 = vmul.f32 %v15826_v20, %v6697_v22  ;;  %v6411_v25 = vmul.f32 %v6410_v37, %v15742_v19  ;;  %v6458_v20 = vmul.f32 %v10708_v44, %v6457_v62  ;;  %v16996_v62 = vld [vmem:[#allocation40_spill] sm:$0xff] }
 0x63c   : > { %v5816_v35 = vadd.f32 %v5815_v15, %v5776_v48  ;;  %v15886_v15 = vpop.eup %10719 }
 0x63d   : > { %v5891_v9 = vpop.f32.mrf.mxu3  ;;  %v6699_v48 = vmul.f32 %v6698_v42, %v15737_v36  ;;  %v6413_v2 = vsel %vm6412_vm3, %v15742_v19, %v6411_v25  ;;  %v6415_v42 = vand.u32 2147483648, %v15742_v19  ;;  %v6459_v25 = vmul.f32 %v6458_v20, %v15755_v31  ;;  %v17032_v19 = vld [vmem:[#allocation61_spill] sm:$0xff] }
 0x63e   : > { %v15873_v38 = vadd.f32 %v5891_v9, %v5853_v28  ;;  %v6791_v9 = vmul.f32 %v15868_v1, %v6790_v54  ;;  %v6550_v54 = vmul.f32 %v15881_v11, %v15807_v40  ;;  %vm6604_vm3 = vcmp.eq.f32.partialorder %v15830_v12, inf }
 0x63f   : > { %v6701_v44 = vsel %vm6700_vm2, %v15737_v36, %v6699_v48  ;;  %vm6846_vm2 = vcmp.eq.f32.partialorder %v15795_v46, 0.0 }
 0x640   : > { %v6792_v18 = vmul.f32 0.5, %v6791_v9  ;;  %v16998_v9 = vld [vmem:[#allocation42_spill] sm:$0xff]  ;;  %v6551_v48 = vmul.f32 %v15881_v11, %v6550_v54  ;;  %v6461_v54 = vsel %vm6460_vm7, %v15755_v31, %v6459_v25  ;;  %vm6894_vm7 = vcmp.eq.f32.partialorder %v15815_v43, 0.0 }
 0x642   : > { %v5854_v30 = vpop.f32.mrf.mxu2  ;;  %v5779_v28 = vpop.f32.mrf.mxu0 }
 0x643   : > { %v5855_v16 = vadd.f32 %v5854_v30, %v5816_v35  ;;  %v5818_v22 = vpop.f32.mrf.mxu1  ;;  %v6746_v35 = vmul.f32 %v15845_v49, %v6745_v0  ;;  %v16995_v30 = vld [vmem:[#allocation39_spill] sm:$0xff]  ;;  %v6838_v0 = vmul.f32 %v15886_v15, %v15795_v46  ;;  %v6703_v49 = vand.u32 2147483648, %v15737_v36 }
 0x644   : > { %v5819_v37 = vadd.f32 %v5818_v22, %v5779_v28  ;;  %5944 = vmatmul.bf16.gmra.mxu0 %v16995_v30  ;;  %5983 = vmatmul.bf16.gmra.mxu1 %v16996_v62  ;;  %v15912_v28 = vpop.eup %10721 }
 0x645   : > { %v5893_v24 = vpop.f32.mrf.mxu3  ;;  %v6747_v22 = vmul.f32 %v6746_v35, %v15749_v52  ;;  %v6704_v62 = vsel %vm6702_vm6, %v6703_v49, %v6701_v44  ;;  %v6839_v20 = vmul.f32 %v15886_v15, %v6838_v0  ;;  %v6463_v49 = vand.u32 2147483648, %v15755_v31 }
 0x646   : > { %v15891_v27 = vadd.f32 %v5893_v24, %v5855_v16  ;;  %6022 = vmatmul.bf16.gmra.mxu2 %v16997_v45  ;;  %v6416_v16 = vsel %vm6414_vm4, %v6415_v42, %v6413_v2  ;;  %v6505_v24 = vsub.f32 1.5, %v6504_v56  ;;  %v6793_v45 = vsub.f32 1.5, %v6792_v18  ;;  %v15919_v56 = vpop.eup %10723 }
 0x647   : > { %v15917_v2 = vsub.f32 %v6416_v16, %v6704_v62  ;;  %v6552_v18 = vmul.f32 0.5, %v6551_v48  ;;  %v6840_v25 = vmul.f32 0.5, %v6839_v20  ;;  %vm6892_vm4 = vcmp.eq.f32.partialorder %v15815_v43, inf }
 0x648   : > { %v6506_v42 = vmul.f32 %v15865_v21, %v6505_v24  ;;  %v6794_v0 = vmul.f32 %v15868_v1, %v6793_v45  ;;  %v6751_v21 = vand.u32 2147483648, %v15749_v52  ;;  %vm6606_vm6 = vcmp.eq.f32.partialorder %v15830_v12, 0.0 }
 0x649   : > { %v6553_v16 = vsub.f32 1.5, %v6552_v18  ;;  %v6841_v20 = vsub.f32 1.5, %v6840_v25 }
 0x64a   : > { %6061 = vmatmul.bf16.gmra.mxu3 %v16998_v9  ;;  %v5857_v30 = vpop.f32.mrf.mxu2  ;;  %v5781_v14 = vpop.f32.mrf.mxu0  ;;  %v6749_v9 = vsel %vm6748_vm8, %v15749_v52, %v6747_v22  ;;  %v6795_v22 = vmul.f32 %v6794_v0, %v15777_v41 }
 0x64b   : > { %v5858_v57 = vadd.f32 %v5857_v30, %v5819_v37  ;;  %v5820_v36 = vpop.f32.mrf.mxu1  ;;  %v6598_v37 = vmul.f32 %v15912_v28, %v15830_v12  ;;  %v6752_v1 = vsel %vm6750_vm10, %v6751_v21, %v6749_v9  ;;  %v6842_v9 = vmul.f32 %v15886_v15, %v6841_v20 }
 0x64c   : > { %v5821_v44 = vadd.f32 %v5820_v36, %v5781_v14  ;;  %v6507_v14 = vmul.f32 %v6506_v42, %v15786_v50  ;;  %v6797_v0 = vsel %vm6796_vm12, %v15777_v41, %v6795_v22 }
 0x64d   : > { %v5896_v5 = vpop.f32.mrf.mxu3  ;;  %v6599_v24 = vmul.f32 %v15912_v28, %v6598_v37 }
 0x64e   : > { %v15923_v35 = vadd.f32 %v5896_v5, %v5858_v57  ;;  %v6886_v5 = vmul.f32 %v15919_v56, %v15815_v43  ;;  %v6464_v57 = vsel %vm6462_vm9, %v6463_v49, %v6461_v54  ;;  %v6509_v18 = vsel %vm6508_vm11, %v15786_v50, %v6507_v14 }
 0x64f   : > { %v15941_v54 = vsub.f32 %v6464_v57, %v6752_v1  ;;  %v6554_v49 = vmul.f32 %v15881_v11, %v6553_v16  ;;  %v6600_v31 = vmul.f32 0.5, %v6599_v24  ;;  %v6843_v24 = vmul.f32 %v6842_v9, %v15795_v46 }
 0x650   : > { %v6887_v36 = vmul.f32 %v15919_v56, %v6886_v5 }
 0x651   : > { %v6555_v5 = vmul.f32 %v6554_v49, %v15807_v40  ;;  %v6601_v57 = vsub.f32 1.5, %v6600_v31 }
 0x652   : > { %v5859_v48 = vpop.f32.mrf.mxu2  ;;  %v5784_v45 = vpop.f32.mrf.mxu0  ;;  %v6888_v25 = vmul.f32 0.5, %v6887_v36  ;;  %v6847_v36 = vand.u32 2147483648, %v15795_v46 }
 0x653   : > { %v5860_v30 = vadd.f32 %v5859_v48, %v5821_v44  ;;  %v5823_v42 = vpop.f32.mrf.mxu1  ;;  %v6511_v44 = vand.u32 2147483648, %v15786_v50  ;;  %v6557_v31 = vsel %vm6556_vm15, %v15807_v40, %v6555_v5  ;;  %v6607_v5 = vand.u32 2147483648, %v15830_v12 }
 0x654   : > { %v5824_v52 = vadd.f32 %v5823_v42, %v5784_v45  ;;  %5949 = vmatmul.bf16.gmra.mxu0 %v16869_v34  ;;  %5988 = vmatmul.bf16.gmra.mxu1 %v16870_v23  ;;  %v6799_v34 = vand.u32 2147483648, %v15777_v41  ;;  %v6889_v48 = vsub.f32 1.5, %v6888_v25  ;;  %v6602_v41 = vmul.f32 %v15912_v28, %v6601_v57 }
 0x655   : > { %v5898_v62 = vpop.f32.mrf.mxu3  ;;  %v6512_v11 = vsel %vm6510_vm13, %v6511_v44, %v6509_v18 }
 0x656   : > { %v15944_v37 = vadd.f32 %v5898_v62, %v5860_v30  ;;  %6027 = vmatmul.bf16.gmra.mxu2 %v16948_v63  ;;  %v6800_v14 = vsel %vm6798_vm14, %v6799_v34, %v6797_v0  ;;  %v6559_v30 = vand.u32 2147483648, %v15807_v40  ;;  %v6845_v62 = vsel %vm6844_vm0, %v15795_v46, %v6843_v24 }
 0x657   : > { %v15960_v15 = vsub.f32 %v6512_v11, %v6800_v14  ;;  %v6890_v45 = vmul.f32 %v15919_v56, %v6889_v48  ;;  %v6603_v42 = vmul.f32 %v6602_v41, %v15830_v12 }
 0x658   : > { %v6560_v20 = vsel %vm6558_vm1, %v6559_v30, %v6557_v31 }
 0x659   : > { %16999 = vst [vmem:[#allocation98_spill] sm:$0xff] %v15960_v15  ;;  %v6891_v0 = vmul.f32 %v6890_v45, %v15815_v43  ;;  %v6605_v34 = vsel %vm6604_vm3, %v15830_v12, %v6603_v42  ;;  %v17040_v15 = vld [vmem:[#allocation63_spill] sm:$0xff] }
 0x65a   : > { %6066 = vmatmul.bf16.gmra.mxu3 %v16949_v58  ;;  %v5862_v23 = vpop.f32.mrf.mxu2  ;;  %v5786_v16 = vpop.f32.mrf.mxu0  ;;  %v6608_v57 = vsel %vm6606_vm6, %v6607_v5, %v6605_v34 }
 0x65b   : > { %v5863_v63 = vadd.f32 %v5862_v23, %v5824_v52  ;;  %v5825_v1 = vpop.f32.mrf.mxu1  ;;  %v6848_v52 = vsel %vm6846_vm2, %v6847_v36, %v6845_v62  ;;  %v6893_v46 = vsel %vm6892_vm4, %v15815_v43, %v6891_v0  ;;  %v6895_v23 = vand.u32 2147483648, %v15815_v43 }
 0x65c   : > { %v5826_v22 = vadd.f32 %v5825_v1, %v5786_v16  ;;  %v15976_v9 = vsub.f32 %v6560_v20, %v6848_v52 }
 0x65d   : > { %v5901_v21 = vpop.f32.mrf.mxu3 }
 0x65e   : > { %v15963_v58 = vadd.f32 %v5901_v21, %v5863_v63  ;;  %17000 = vst [vmem:[#allocation69_spill] sm:$0xff] %v15976_v9  ;;  %v6896_v63 = vsel %vm6894_vm7, %v6895_v23, %v6893_v46 }
 0x65f   : > { %v15988_v48 = vsub.f32 %v6608_v57, %v6896_v63 }
 0x661   : > { %17001 = vst [vmem:[#allocation70_spill] sm:$0xff] %v15988_v48 }
 0x662   : > { %v5864_v18 = vpop.f32.mrf.mxu2  ;;  %v5789_v44 = vpop.f32.mrf.mxu0 }
 0x663   : > { %v5865_v28 = vadd.f32 %v5864_v18, %v5826_v22  ;;  %v5828_v25 = vpop.f32.mrf.mxu1 }
 0x664   : > { %v5829_v11 = vadd.f32 %v5828_v25, %v5789_v44 }
 0x665   : > { %v5903_v49 = vpop.f32.mrf.mxu3 }
 0x666   : > { %v15979_v56 = vadd.f32 %v5903_v49, %v5865_v28 }
 0x66a   : > { %v5867_v14 = vpop.f32.mrf.mxu2  ;;  %v5791_v24 = vpop.f32.mrf.mxu0 }
 0x66b   : > { %v5868_v21 = vadd.f32 %v5867_v14, %v5829_v11  ;;  %v5830_v1 = vpop.f32.mrf.mxu1 }
 0x66c   : > { %v5831_v31 = vadd.f32 %v5830_v1, %v5791_v24 }
 0x66d   : > { %v5906_v16 = vpop.f32.mrf.mxu3 }
 0x66e   : > { %v15990_v22 = vadd.f32 %v5906_v16, %v5868_v21 }
 0x672   : > { %v5869_v41 = vpop.f32.mrf.mxu2  ;;  %v5794_v45 = vpop.f32.mrf.mxu0 }
 0x673   : > { %v5870_v30 = vadd.f32 %v5869_v41, %v5831_v31  ;;  %v5833_v20 = vpop.f32.mrf.mxu1 }
 0x674   : > { %v5834_v42 = vadd.f32 %v5833_v20, %v5794_v45 }
 0x675   : > { %v5908_v62 = vpop.f32.mrf.mxu3 }
 0x676   : > { %v15992_v36 = vadd.f32 %v5908_v62, %v5870_v30  ;;  %v17002_v30 = vld [vmem:[#allocation83_spill] sm:$0xff] }
 0x677   : > { %v6084_v62 = vmul.f32 %v17002_v30, %v17002_v30 }
 0x67a   : > { %v5872_v43 = vpop.f32.mrf.mxu2  ;;  %v5796_v28 = vpop.f32.mrf.mxu0 }
 0x67b   : > { %v5873_v18 = vadd.f32 %v5872_v43, %v5834_v42  ;;  %v5835_v49 = vpop.f32.mrf.mxu1 }
 0x67c   : > { %v5836_v0 = vadd.f32 %v5835_v49, %v5796_v28 }
 0x67d   : > { %v5911_v52 = vpop.f32.mrf.mxu3 }
 0x67e   : > { %v15994_v44 = vadd.f32 %v5911_v52, %v5873_v18 }
 0x682   : > { %v5874_v25 = vpop.f32.mrf.mxu2  ;;  %v5925_v5 = vpop.f32.mrf.mxu0 }
 0x683   : > { %v5875_v11 = vadd.f32 %v5874_v25, %v5836_v0  ;;  %v5964_v46 = vpop.f32.mrf.mxu1  ;;  %v5926_v23 = vadd.f32 %v5925_v5, %v15836_v26  ;;  %v17003_v25 = vld [vmem:[#allocation84_spill] sm:$0xff] }
 0x685   : > { %v5913_v34 = vpop.f32.mrf.mxu3  ;;  %v5965_v14 = vadd.f32 %v5964_v46, %v5926_v23 }
 0x686   : > { %v15996_v57 = vadd.f32 %v5913_v34, %v5875_v11  ;;  %v6088_v11 = vmul.f32 %v17003_v25, %v17003_v25 }
 0x68a   : > { %v6003_v63 = vpop.f32.mrf.mxu2  ;;  %v5927_v24 = vpop.f32.mrf.mxu0 }
 0x68b   : > { %v6004_v21 = vadd.f32 %v6003_v63, %v5965_v14  ;;  %v5966_v1 = vpop.f32.mrf.mxu1  ;;  %v5928_v41 = vadd.f32 %v5927_v24, %v15855_v60 }
 0x68d   : > { %v6042_v16 = vpop.f32.mrf.mxu3  ;;  %v5967_v42 = vadd.f32 %v5966_v1, %v5928_v41  ;;  %v17004_v1 = vld [vmem:[#allocation85_spill] sm:$0xff] }
 0x68e   : > { %v6043_v31 = vadd.f32 %v6042_v16, %v6004_v21 }
 0x690   : > { %v6108_v45 = vmul.f32 %v6043_v31, %v6043_v31  ;;  %v6092_v31 = vmul.f32 %v17004_v1, %v17004_v1 }
 0x692   : > { %v6156_v20 = vadd.f32 %v6108_v45, %v6084_v62  ;;  %v6005_v43 = vpop.f32.mrf.mxu2  ;;  %v5930_v28 = vpop.f32.mrf.mxu0 }
 0x693   : > { %v6006_v18 = vadd.f32 %v6005_v43, %v5967_v42  ;;  %v5969_v26 = vpop.f32.mrf.mxu1  ;;  %v5931_v49 = vadd.f32 %v5930_v28, %v15873_v38 }
 0x695   : > { %v6044_v52 = vpop.f32.mrf.mxu3  ;;  %v5970_v5 = vadd.f32 %v5969_v26, %v5931_v49  ;;  %v17005_v49 = vld [vmem:[#allocation86_spill] sm:$0xff] }
 0x696   : > { %v6045_v0 = vadd.f32 %v6044_v52, %v6006_v18  ;;  %v16008_v52 = vmax.f32 %v6156_v20, 1e-16 }
 0x698   : > { %v6112_v34 = vmul.f32 %v6045_v0, %v6045_v0  ;;  %v6096_v0 = vmul.f32 %v17005_v49, %v17005_v49  ;;  %10725 = vrsqrt.f32 %v16008_v52  ;;  %vm6664_vm8 = vcmp.eq.f32.partialorder %v16008_v52, inf }
 0x699   : > { %vm6666_vm9 = vcmp.eq.f32.partialorder %v16008_v52, 0.0 }
 0x69a   : > { %v6160_v60 = vadd.f32 %v6112_v34, %v6088_v11  ;;  %v6008_v46 = vpop.f32.mrf.mxu2  ;;  %v5932_v63 = vpop.f32.mrf.mxu0 }
 0x69b   : > { %v6009_v23 = vadd.f32 %v6008_v46, %v5970_v5  ;;  %v5971_v21 = vpop.f32.mrf.mxu1  ;;  %v5933_v24 = vadd.f32 %v5932_v63, %v15891_v27 }
 0x69c   : > { %v16014_v25 = vmax.f32 %v6160_v60, 1e-16 }
 0x69d   : > { %v6047_v14 = vpop.f32.mrf.mxu3  ;;  %v5972_v30 = vadd.f32 %v5971_v21, %v5933_v24 }
 0x69e   : > { %v6048_v16 = vadd.f32 %v6047_v14, %v6009_v23  ;;  %10727 = vrsqrt.f32 %v16014_v25  ;;  %v16018_v21 = vpop.eup %10725  ;;  %vm6712_vm10 = vcmp.eq.f32.partialorder %v16014_v25, inf  ;;  %vm6714_vm11 = vcmp.eq.f32.partialorder %v16014_v25, 0.0 }
 0x6a0   : > { %v6116_v41 = vmul.f32 %v6048_v16, %v6048_v16  ;;  %v17006_v16 = vld [vmem:[#allocation87_spill] sm:$0xff] }
 0x6a1   : > { %v6100_v24 = vmul.f32 %v17006_v16, %v17006_v16 }
 0x6a2   : > { %v6164_v38 = vadd.f32 %v6116_v41, %v6092_v31  ;;  %v6010_v62 = vpop.f32.mrf.mxu2  ;;  %v5935_v43 = vpop.f32.mrf.mxu0  ;;  %v6658_v41 = vmul.f32 %v16018_v21, %v16008_v52 }
 0x6a3   : > { %v6011_v45 = vadd.f32 %v6010_v62, %v5972_v30  ;;  %v5974_v18 = vpop.f32.mrf.mxu1  ;;  %v5936_v26 = vadd.f32 %v5935_v43, %v15923_v35 }
 0x6a4   : > { %v16026_v30 = vmax.f32 %v6164_v38, 1e-16  ;;  %v17009_v38 = vld [vmem:[#allocation90_spill] sm:$0xff] }
 0x6a5   : > { %v6049_v42 = vpop.f32.mrf.mxu3  ;;  %v5975_v34 = vadd.f32 %v5974_v18, %v5936_v26  ;;  %v17007_v26 = vld [vmem:[#allocation88_spill] sm:$0xff] }
 0x6a6   : > { %v6050_v28 = vadd.f32 %v6049_v42, %v6011_v45  ;;  %v16028_v45 = vpop.eup %10727  ;;  %v6104_v49 = vmul.f32 %v17007_v26, %v17007_v26  ;;  %10729 = vrsqrt.f32 %v16026_v30  ;;  %vm6760_vm12 = vcmp.eq.f32.partialorder %v16026_v30, inf }
 0x6a7   : > { %vm6762_vm14 = vcmp.eq.f32.partialorder %v16026_v30, 0.0 }
 0x6a8   : > { %v6120_v27 = vmul.f32 %v6050_v28, %v6050_v28 }
 0x6aa   : > { %v6168_v11 = vadd.f32 %v6120_v27, %v6096_v0  ;;  %v6013_v5 = vpop.f32.mrf.mxu2  ;;  %v5937_v14 = vpop.f32.mrf.mxu0  ;;  %v17008_v0 = vld [vmem:[#allocation89_spill] sm:$0xff] }
 0x6ab   : > { %v6014_v46 = vadd.f32 %v6013_v5, %v5975_v34  ;;  %v5976_v63 = vpop.f32.mrf.mxu1  ;;  %v5938_v35 = vadd.f32 %v5937_v14, %v15944_v37  ;;  %v6204_v27 = vmul.f32 %v17008_v0, %v17008_v0  ;;  %v17020_v0 = vld [vmem:[#allocation106_spill] sm:$0xff] }
 0x6ac   : > { %v16030_v42 = vmax.f32 %v6168_v11, 1e-16  ;;  %v6659_v11 = vmul.f32 %v16018_v21, %v6658_v41  ;;  %v16103_v48 = vpop.eup %10729 }
 0x6ad   : > { %v6052_v23 = vpop.f32.mrf.mxu3  ;;  %v5977_v31 = vadd.f32 %v5976_v63, %v5938_v35  ;;  %v17010_v63 = vld [vmem:[#allocation96_spill] sm:$0xff] }
 0x6ae   : > { %v6053_v20 = vadd.f32 %v6052_v23, %v6014_v46  ;;  %v16039_v46 = vmul.f32 %v17009_v38, %v17009_v38  ;;  %v6706_v23 = vmul.f32 %v16028_v45, %v16014_v25  ;;  %10731 = vrsqrt.f32 %v16030_v42 }
 0x6af   : > { %10733 = vlog2.f32 %v16008_v52  ;;  %vm6808_vm13 = vcmp.eq.f32.partialorder %v16030_v42, inf  ;;  %vm6810_vm0 = vcmp.eq.f32.partialorder %v16030_v42, 0.0 }
 0x6b0   : > { %v6124_v1 = vmul.f32 %v6053_v20, %v6053_v20  ;;  %v17011_v20 = vld [vmem:[#allocation52_spill] sm:$0xff]  ;;  %10735 = vlog2.f32 %v16014_v25 }
 0x6b1   : > { %v17012_v35 = vsub.f32 %v17010_v63, %v17011_v20  ;;  %v17023_v20 = vld [vmem:[#allocation109_spill] sm:$0xff] }
 0x6b2   : > { %v16022_v60 = vadd.f32 %v6124_v1, %v6100_v24  ;;  %v6015_v62 = vpop.f32.mrf.mxu2  ;;  %v5940_v18 = vpop.f32.mrf.mxu0  ;;  %v17014_v24 = vld [vmem:[#allocation100_spill] sm:$0xff] }
 0x6b3   : > { %v6016_v37 = vadd.f32 %v6015_v62, %v5977_v31  ;;  %v5979_v28 = vpop.f32.mrf.mxu1  ;;  %v5941_v5 = vadd.f32 %v5940_v18, %v15963_v58  ;;  %v16049_v16 = vmul.f32 0.5, %v17012_v35  ;;  %v17013_v58 = vld [vmem:[#allocation101_spill] sm:$0xff]  ;;  %v17016_v62 = vld [vmem:[#allocation91_spill] sm:$0xff]  ;;  %v17024_v35 = vld [vmem:[#allocation108_spill] sm:$0xff] }
 0x6b4   : > { %v17015_v1 = vsub.f32 %v17013_v58, %v17014_v24  ;;  %v16058_v41 = vmul.f32 %v17016_v62, %v17016_v62  ;;  %v17025_v12 = vsub.f32 %v17023_v20, %v17024_v35  ;;  %v17026_v24 = vld [vmem:[#allocation92_spill] sm:$0xff]  ;;  %v17031_v35 = vld [vmem:[#allocation17_spill] sm:$0xff] }
 0x6b5   : > { %v6054_v43 = vpop.f32.mrf.mxu3  ;;  %v5980_v40 = vadd.f32 %v5979_v28, %v5941_v5 }
 0x6b6   : > { %v6055_v34 = vadd.f32 %v6054_v43, %v6016_v37  ;;  %v16054_v31 = vmul.f32 0.5, %v17015_v1  ;;  %v17017_v37 = vld [vmem:[#allocation58_spill] sm:$0xff]  ;;  %v16073_v58 = vmul.f32 0.5, %v17025_v12  ;;  %v16077_v1 = vmul.f32 %v17026_v24, %v17026_v24 }
 0x6b7   : > { %v17018_v43 = vld [vmem:[#allocation102_spill] sm:$0xff]  ;;  %v6707_v12 = vmul.f32 %v16028_v45, %v6706_v23  ;;  %v17033_v24 = vsub.f32 %v17031_v35, %v17032_v19 }
 0x6b8   : > { %v6128_v14 = vmul.f32 %v6055_v34, %v6055_v34  ;;  %v17019_v18 = vsub.f32 %v17017_v37, %v17018_v43  ;;  %v17021_v34 = vld [vmem:[#allocation107_spill] sm:$0xff]  ;;  %v17027_v37 = vld [vmem:[#allocation14_spill] sm:$0xff]  ;;  %v17028_v43 = vld [vmem:[#allocation60_spill] sm:$0xff] }
 0x6b9   : > { %v17022_v38 = vsub.f32 %v17020_v0, %v17021_v34  ;;  %v17030_v0 = vld [vmem:[#allocation93_spill] sm:$0xff]  ;;  %v16094_v59 = vmul.f32 0.5, %v17033_v24  ;;  %v17037_v23 = vld [vmem:[#allocation94_spill] sm:$0xff]  ;;  %v16112_v24 = vpop.eup %10731  ;;  %v6708_v9 = vmul.f32 0.5, %v6707_v12 }
 0x6ba   : > { %v16063_v26 = vmul.f32 0.5, %v17019_v18  ;;  %v16079_v62 = vadd.f32 %v6128_v14, %v6104_v49  ;;  %v17029_v18 = vsub.f32 %v17027_v37, %v17028_v43  ;;  %v16088_v34 = vmul.f32 %v17030_v0, %v17030_v0  ;;  %v6018_v20 = vpop.f32.mrf.mxu2  ;;  %v5942_v5 = vpop.f32.mrf.mxu0  ;;  %v17034_v14 = vld [vmem:[#allocation20_spill] sm:$0xff]  ;;  %v17035_v37 = vld [vmem:[#allocation19_spill] sm:$0xff] }
 0x6bb   : > { %v16068_v63 = vmul.f32 0.5, %v17022_v38  ;;  %v6660_v38 = vmul.f32 0.5, %v6659_v11  ;;  %v6019_v49 = vadd.f32 %v6018_v20, %v5980_v40  ;;  %v17036_v43 = vsub.f32 %v17034_v14, %v17035_v37  ;;  %v5981_v19 = vpop.f32.mrf.mxu1  ;;  %v17038_v11 = vld [vmem:[#allocation111_spill] sm:$0xff] }
 0x6bc   : > { %v16084_v50 = vmul.f32 0.5, %v17029_v18  ;;  %v16107_v53 = vmul.f32 %v17037_v23, %v17037_v23  ;;  %v5943_v37 = vadd.f32 %v5942_v5, %v15979_v56  ;;  %v16118_v0 = vmul.f32 %v17038_v11, %v17038_v11  ;;  %v17042_v56 = vld [vmem:[#allocation22_spill] sm:$0xff]  ;;  %v17043_v5 = vld [vmem:[#allocation64_spill] sm:$0xff] }
 0x6bd   : > { %v6057_v28 = vpop.f32.mrf.mxu3  ;;  %v16099_v18 = vmul.f32 0.5, %v17036_v43  ;;  %v6661_v23 = vsub.f32 1.5, %v6660_v38  ;;  %v17041_v40 = vsub.f32 %v17039_v51, %v17040_v15  ;;  %v17044_v20 = vsub.f32 %v17042_v56, %v17043_v5 }
 0x6be   : > { %v6058_v14 = vadd.f32 %v6057_v28, %v6019_v49  ;;  %v6754_v49 = vmul.f32 %v16103_v48, %v16026_v30  ;;  %v17045_v51 = vsub.f32 %v15767_v10, %v15761_v55  ;;  %v17046_v38 = vsub.f32 %v15790_v61, %v15792_v3 }
 0x6bf   : > { %v16123_v13 = vmul.f32 0.5, %v17041_v40  ;;  %v16131_v43 = vmul.f32 0.5, %v17044_v20  ;;  %v6802_v40 = vmul.f32 %v16112_v24, %v16030_v42  ;;  %v5982_v20 = vadd.f32 %v5981_v19, %v5943_v37 }
 0x6c0   : > { %v6228_v28 = vmul.f32 %v6058_v14, %v6058_v14  ;;  %v16138_v15 = vmul.f32 0.5, %v17045_v51  ;;  %v16143_v12 = vmul.f32 0.5, %v17046_v38  ;;  %v17047_v56 = vsub.f32 %v15810_v17, %v15812_v32 }
 0x6c1   : > { %v17048_v55 = vsub.f32 %v15838_v7, %v15834_v6  ;;  %v6662_v51 = vmul.f32 %v16018_v21, %v6661_v23  ;;  %v6709_v61 = vsub.f32 1.5, %v6708_v9  ;;  %v6803_v9 = vmul.f32 %v16112_v24, %v6802_v40 }
 0x6c2   : > { %v6276_v14 = vadd.f32 %v6228_v28, %v6204_v27  ;;  %v16150_v5 = vmul.f32 0.5, %v17047_v56  ;;  %v6020_v3 = vpop.f32.mrf.mxu2  ;;  %v6755_v27 = vmul.f32 %v16103_v48, %v6754_v49  ;;  %v5945_v37 = vpop.f32.mrf.mxu0  ;;  %v16169_v23 = vmul.f32 %v15401_v8, %v15401_v8 }
 0x6c3   : > { %v16155_v10 = vmul.f32 0.5, %v17048_v55  ;;  %v6021_v17 = vadd.f32 %v6020_v3, %v5982_v20  ;;  %v5984_v6 = vpop.f32.mrf.mxu1  ;;  %v5946_v49 = vadd.f32 %v5945_v37, %v15990_v22  ;;  %v10734_v56 = vpop.eup %10733  ;;  %v6663_v55 = vmul.f32 %v6662_v51, %v16008_v52 }
 0x6c4   : > { %v16161_v19 = vmax.f32 %v6276_v14, 1e-16  ;;  %v6710_v3 = vmul.f32 %v16028_v45, %v6709_v61  ;;  %v6756_v28 = vmul.f32 0.5, %v6755_v27  ;;  %v17049_v8 = vsub.f32 %v15850_v33, %v15852_v47  ;;  %v10736_v37 = vpop.eup %10735 }
 0x6c5   : > { %v6059_v32 = vpop.f32.mrf.mxu3  ;;  %v16186_v22 = vmul.f32 %v15917_v2, %v15917_v2  ;;  %v6804_v51 = vmul.f32 0.5, %v6803_v9  ;;  %v6667_v61 = vand.u32 2147483648, %v16008_v52  ;;  %v7138_v27 = vmul.f32 0.6931472, %v10734_v56 }
 0x6c6   : > { %10737 = vrsqrt.f32 %v16161_v19  ;;  %v6060_v40 = vadd.f32 %v6059_v32, %v6021_v17  ;;  %v16182_v38 = vmul.f32 0.5, %v17049_v8  ;;  %v5985_v17 = vadd.f32 %v5984_v6, %v5946_v49 }
 0x6c7   : > { %10739 = vlog2.f32 %v16161_v19  ;;  %v6665_v33 = vsel %vm6664_vm8, %v16008_v52, %v6663_v55  ;;  %v6711_v47 = vmul.f32 %v6710_v3, %v16014_v25  ;;  %v6715_v20 = vand.u32 2147483648, %v16014_v25 }
 0x6c8   : > { %10741 = vlog2.f32 %v16026_v30  ;;  %v6232_v45 = vmul.f32 %v6060_v40, %v6060_v40  ;;  %v16197_v11 = vmul.f32 0.6931472, %v10736_v37  ;;  %v6757_v56 = vsub.f32 1.5, %v6756_v28 }
 0x6c9   : > { %v6763_v3 = vand.u32 2147483648, %v16026_v30  ;;  %v6805_v35 = vsub.f32 1.5, %v6804_v51  ;;  %v6713_v28 = vsel %vm6712_vm10, %v16014_v25, %v6711_v47  ;;  %vm6376_vm15 = vcmp.eq.f32.partialorder %v16161_v19, inf }
 0x6ca   : > { %v6280_v2 = vadd.f32 %v6232_v45, %v16039_v46  ;;  %v6023_v32 = vpop.f32.mrf.mxu2  ;;  %v5947_v14 = vpop.f32.mrf.mxu0  ;;  %v16205_v45 = vsel %vm6666_vm9, %v6667_v61, %v6665_v33  ;;  %v6758_v61 = vmul.f32 %v16103_v48, %v6757_v56  ;;  %v16228_v48 = vsel %vm6714_vm11, %v6715_v20, %v6713_v28 }
 0x6cb   : > { %v6024_v40 = vadd.f32 %v6023_v32, %v5985_v17  ;;  %v5986_v55 = vpop.f32.mrf.mxu1  ;;  %v5948_v37 = vadd.f32 %v5947_v14, %v15992_v36  ;;  %v6806_v33 = vmul.f32 %v16112_v24, %v6805_v35  ;;  %vm6378_vm1 = vcmp.eq.f32.partialorder %v16161_v19, 0.0 }
 0x6cc   : > { %v10738_v8 = vpop.eup %10737  ;;  %v16200_v49 = vmax.f32 %v6280_v2, 1e-16  ;;  %v16212_v2 = vmax.f32 %v16022_v60, 1e-16 }
 0x6cd   : > { %v6062_v9 = vpop.f32.mrf.mxu3  ;;  %v10740_v21 = vpop.eup %10739  ;;  %v6370_v6 = vmul.f32 %v10738_v8, %v16161_v19  ;;  %v6807_v20 = vmul.f32 %v6806_v33, %v16030_v42 }
 0x6ce   : > { %v10742_v46 = vpop.eup %10741  ;;  %v7090_v17 = vmul.f32 0.6931472, %v10740_v21  ;;  %v6063_v32 = vadd.f32 %v6062_v9, %v6024_v40  ;;  %10743 = vrsqrt.f32 %v16200_v49  ;;  %v16218_v21 = vmax.f32 %v16079_v62, 1e-16 }
 0x6cf   : > { %v6371_v7 = vmul.f32 %v10738_v8, %v6370_v6  ;;  %10745 = vlog2.f32 %v16200_v49  ;;  %v16220_v14 = vmul.f32 0.6931472, %v10742_v46  ;;  %v5987_v40 = vadd.f32 %v5986_v55, %v5948_v37 }
 0x6d0   : > { %v7182_v51 = vsub.f32 %v7090_v17, %v7138_v27  ;;  %v6236_v52 = vmul.f32 %v6063_v32, %v6063_v32  ;;  %10747 = vlog2.f32 %v16030_v42  ;;  %v6811_v62 = vand.u32 2147483648, %v16030_v42 }
 0x6d1   : > { %v6372_v36 = vmul.f32 0.5, %v6371_v7  ;;  %10749 = vlog2.f32 %v16212_v2  ;;  %v6759_v6 = vmul.f32 %v6758_v61, %v16026_v30  ;;  %v6379_v61 = vand.u32 2147483648, %v16161_v19 }
 0x6d2   : > { %v7206_v47 = vmul.f32 0.5, %v7182_v51  ;;  %v6284_v60 = vadd.f32 %v6236_v52, %v16058_v41  ;;  %v6025_v9 = vpop.f32.mrf.mxu2  ;;  %v5950_v56 = vpop.f32.mrf.mxu0  ;;  %10751 = vlog2.f32 %v16218_v21  ;;  %vm6424_vm2 = vcmp.eq.f32.partialorder %v16200_v49, inf }
 0x6d3   : > { %v6373_v27 = vsub.f32 1.5, %v6372_v36  ;;  %v6026_v24 = vadd.f32 %v6025_v9, %v5987_v40  ;;  %v5951_v25 = vadd.f32 %v5950_v56, %v15994_v44  ;;  %v17051_v56 = vand.u32 2147483647, %v16084_v50 }
 0x6d4   : > { %v7354_v7 = vand.u32 2147483647, %v7206_v47  ;;  %v16232_v35 = vmax.f32 %v6284_v60, 1e-16  ;;  %v10744_v55 = vpop.eup %10743  ;;  %v17050_v47 = vand.u32 2147483647, %v16049_v16 }
 0x6d5   : > { %v6064_v41 = vpop.f32.mrf.mxu3  ;;  %v6374_v46 = vmul.f32 %v10738_v8, %v6373_v27  ;;  %v10746_v17 = vpop.eup %10745  ;;  %v6418_v32 = vmul.f32 %v10744_v55, %v16200_v49  ;;  %vm6426_vm3 = vcmp.eq.f32.partialorder %v16200_v49, 0.0  ;;  %vm6856_vm9 = vcmp.eq.f32.partialorder %v16212_v2, inf }
 0x6d6   : > { %10753 = vrsqrt.f32 %v16232_v35  ;;  %v6065_v37 = vadd.f32 %v6064_v41, %v6026_v24  ;;  %v7377_v28 = vadd.f32 %v15764_v29, %v7354_v7  ;;  %v5989_v8 = vpop.f32.mrf.mxu1  ;;  %v7098_v44 = vmul.f32 0.6931472, %v10746_v17  ;;  %v10748_v52 = vpop.eup %10747 }
 0x6d7   : > { %v6375_v51 = vmul.f32 %v6374_v46, %v16161_v19  ;;  %10755 = vlog2.f32 %v16232_v35  ;;  %v6419_v36 = vmul.f32 %v10744_v55, %v6418_v32  ;;  %v10750_v60 = vpop.eup %10749  ;;  %v5990_v27 = vadd.f32 %v5989_v8, %v5951_v25 }
 0x6d8   : > { %v6240_v33 = vmul.f32 %v6065_v37, %v6065_v37  ;;  %v7378_v29 = vadd.f32 %v7377_v28, %v17050_v47  ;;  %v7186_v9 = vsub.f32 %v7098_v44, %v16197_v11  ;;  %v10752_v17 = vpop.eup %10751  ;;  %10757 = vrsqrt.f32 %v16212_v2 }
 0x6d9   : > { %v6377_v40 = vsel %vm6376_vm15, %v16161_v19, %v6375_v51  ;;  %v6420_v24 = vmul.f32 0.5, %v6419_v36  ;;  %v16260_v37 = vmul.f32 0.6931472, %v10748_v52  ;;  %v6809_v47 = vsel %vm6808_vm13, %v16030_v42, %v6807_v20 }
 0x6da   : > { %v6380_v7 = vsel %vm6378_vm1, %v6379_v61, %v6377_v40  ;;  %v6288_v41 = vadd.f32 %v6240_v33, %v16077_v1  ;;  %v7379_v46 = vadd.f32 %v7378_v29, %v17051_v56  ;;  %v6028_v32 = vpop.f32.mrf.mxu2  ;;  %v7210_v28 = vmul.f32 0.5, %v7186_v9  ;;  %v5952_v44 = vpop.f32.mrf.mxu0 }
 0x6db   : > { %v16258_v16 = vsub.f32 %v6380_v7, %v16205_v45  ;;  %v6029_v11 = vadd.f32 %v6028_v32, %v5990_v27  ;;  %v17052_v1 = vand.u32 2147483647, %v16138_v15  ;;  %v6761_v61 = vsel %vm6760_vm12, %v16026_v30, %v6759_v6 }
 0x6dc   : > { %v10754_v25 = vpop.eup %10753  ;;  %v16262_v51 = vmax.f32 %v6288_v41, 1e-16  ;;  %v6421_v45 = vsub.f32 1.5, %v6420_v24  ;;  %v7358_v52 = vand.u32 2147483647, %v7210_v28  ;;  %v5953_v40 = vadd.f32 %v5952_v44, %v15996_v57 }
 0x6dd   : > { %v6067_v8 = vpop.f32.mrf.mxu3  ;;  %v7380_v50 = vadd.f32 %v7379_v46, %v17052_v1  ;;  %v10756_v36 = vpop.eup %10755  ;;  %v6466_v33 = vmul.f32 %v10754_v25, %v16232_v35  ;;  %v16280_v6 = vsel %vm6762_vm14, %v6763_v3, %v6761_v61  ;;  %v16282_v24 = vmul.f32 0.6931472, %v10750_v60 }
 0x6de   : > { %10759 = vrsqrt.f32 %v16262_v51  ;;  %v6068_v29 = vadd.f32 %v6067_v8, %v6029_v11  ;;  %v7106_v15 = vmul.f32 0.6931472, %v10756_v36  ;;  %v16289_v57 = vsel %vm6810_vm0, %v6811_v62, %v6809_v47  ;;  %v16291_v41 = vpop.eup %10757  ;;  %v5991_v32 = vpop.f32.mrf.mxu1 }
 0x6df   : > { %v6467_v27 = vmul.f32 %v10754_v25, %v6466_v33  ;;  %10761 = vlog2.f32 %v16262_v51  ;;  %v7381_v9 = vadd.f32 %v7380_v50, %v7358_v52  ;;  %v6422_v56 = vmul.f32 %v10744_v55, %v6421_v45 }
 0x6e0   : > { %v6244_v7 = vmul.f32 %v6068_v29, %v6068_v29  ;;  %v7190_v20 = vsub.f32 %v7106_v15, %v16220_v14  ;;  %v16293_v28 = vmul.f32 0.6931472, %v10752_v17  ;;  %v17053_v30 = vand.u32 2147483647, %v16054_v31 }
 0x6e1   : > { %v6468_v46 = vmul.f32 0.5, %v6467_v27  ;;  %v5992_v60 = vadd.f32 %v5991_v32, %v5953_v40  ;;  %v6427_v42 = vand.u32 2147483648, %v16200_v49  ;;  %v17054_v55 = vand.u32 2147483647, %v16094_v59 }
 0x6e2   : > { %v7382_v3 = vadd.f32 %v7381_v9, %v17053_v30  ;;  %v6292_v14 = vadd.f32 %v6244_v7, %v16088_v34  ;;  %v7214_v11 = vmul.f32 0.5, %v7190_v20  ;;  %v6030_v62 = vpop.f32.mrf.mxu2  ;;  %vm6472_vm4 = vcmp.eq.f32.partialorder %v16232_v35, inf }
 0x6e3   : > { %v6469_v44 = vsub.f32 1.5, %v6468_v46  ;;  %v6031_v31 = vadd.f32 %v6030_v62, %v5992_v60  ;;  %v6423_v34 = vmul.f32 %v6422_v56, %v16200_v49  ;;  %v17055_v45 = vand.u32 2147483647, %v16143_v12 }
 0x6e4   : > { %v7383_v8 = vadd.f32 %v7382_v3, %v17054_v55  ;;  %v10760_v17 = vpop.eup %10759  ;;  %v16303_v1 = vmax.f32 %v6292_v14, 1e-16  ;;  %v7362_v50 = vand.u32 2147483647, %v7214_v11  ;;  %vm6474_vm6 = vcmp.eq.f32.partialorder %v16232_v35, 0.0 }
 0x6e5   : > { %v10762_v61 = vpop.eup %10761  ;;  %v6069_v36 = vpop.f32.mrf.mxu3  ;;  %v6470_v52 = vmul.f32 %v10754_v25, %v6469_v44  ;;  %v6514_v59 = vmul.f32 %v10760_v17, %v16262_v51  ;;  %v6475_v40 = vand.u32 2147483648, %v16232_v35  ;;  %v16317_v12 = vmul.f32 %v16258_v16, %v16258_v16 }
 0x6e6   : > { %v7384_v33 = vadd.f32 %v7383_v8, %v17055_v45  ;;  %10763 = vrsqrt.f32 %v16303_v1  ;;  %v6070_v47 = vadd.f32 %v6069_v36, %v6031_v31  ;;  %v7114_v29 = vmul.f32 0.6931472, %v10762_v61 }
 0x6e7   : > { %10765 = vlog2.f32 %v16303_v1  ;;  %v6471_v27 = vmul.f32 %v6470_v52, %v16232_v35  ;;  %v6515_v9 = vmul.f32 %v10760_v17, %v6514_v59  ;;  %vm6520_vm7 = vcmp.eq.f32.partialorder %v16262_v51, inf }
 0x6e8   : > { %v7385_v15 = vadd.f32 %v7384_v33, %v7362_v50  ;;  %v6248_v25 = vmul.f32 %v6070_v47, %v6070_v47  ;;  %v7194_v7 = vsub.f32 %v7114_v29, %v16260_v37  ;;  %v6425_v20 = vsel %vm6424_vm2, %v16200_v49, %v6423_v34 }
 0x6e9   : > { %v17056_v56 = vand.u32 2147483647, %v16063_v26  ;;  %v6516_v32 = vmul.f32 0.5, %v6515_v9  ;;  %v6850_v30 = vmul.f32 %v16291_v41, %v16212_v2  ;;  %vm6522_vm8 = vcmp.eq.f32.partialorder %v16262_v51, 0.0 }
 0x6ea   : > { %v6296_v3 = vadd.f32 %v6248_v25, %v16107_v53  ;;  %v7218_v16 = vmul.f32 0.5, %v7194_v7  ;;  %10767 = vrsqrt.f32 %v16218_v21  ;;  %v17057_v37 = vand.u32 2147483647, %v16099_v18 }
 0x6eb   : > { %v7386_v46 = vadd.f32 %v7385_v15, %v17056_v56  ;;  %v6473_v60 = vsel %vm6472_vm4, %v16232_v35, %v6471_v27  ;;  %v6517_v26 = vsub.f32 1.5, %v6516_v32  ;;  %v6851_v11 = vmul.f32 %v16291_v41, %v6850_v30 }
 0x6ec   : > { %v10764_v62 = vpop.eup %10763  ;;  %v16337_v55 = vmax.f32 %v6296_v3, 1e-16  ;;  %v7366_v8 = vand.u32 2147483647, %v7218_v16  ;;  %v6428_v53 = vsel %vm6426_vm3, %v6427_v42, %v6425_v20  ;;  %v6523_v44 = vand.u32 2147483648, %v16262_v51 }
 0x6ed   : > { %v7387_v14 = vadd.f32 %v7386_v46, %v17057_v37  ;;  %v10766_v31 = vpop.eup %10765  ;;  %v17058_v18 = vand.u32 2147483647, %v16150_v5  ;;  %v6518_v61 = vmul.f32 %v10760_v17, %v6517_v26  ;;  %v6562_v34 = vmul.f32 %v10764_v62, %v16303_v1 }
 0x6ee   : > { %v6852_v36 = vmul.f32 0.5, %v6851_v11  ;;  %v7122_v45 = vmul.f32 0.6931472, %v10766_v31  ;;  %10769 = vlog2.f32 %v16337_v55  ;;  %v6476_v33 = vsel %vm6474_vm6, %v6475_v40, %v6473_v60 }
 0x6ef   : > { %v7388_v50 = vadd.f32 %v7387_v14, %v17058_v18  ;;  %v6519_v42 = vmul.f32 %v6518_v61, %v16262_v51  ;;  %v6563_v59 = vmul.f32 %v10764_v62, %v6562_v34  ;;  %10771 = vrsqrt.f32 %v16337_v55 }
 0x6f0   : > { %v10768_v5 = vpop.eup %10767  ;;  %v7198_v17 = vsub.f32 %v7122_v45, %v16282_v24  ;;  %v6853_v47 = vsub.f32 1.5, %v6852_v36  ;;  %vm6858_vm10 = vcmp.eq.f32.partialorder %v16212_v2, 0.0  ;;  %v6916_v29 = vsub.f32 %v6428_v53, %v16228_v48 }
 0x6f1   : > { %v7389_v52 = vadd.f32 %v7388_v50, %v7366_v8  ;;  %v17059_v15 = vand.u32 2147483647, %v16068_v63  ;;  %v6521_v40 = vsel %vm6520_vm7, %v16262_v51, %v6519_v42  ;;  %v6564_v9 = vmul.f32 0.5, %v6563_v59 }
 0x6f2   : > { %v6898_v25 = vmul.f32 %v10768_v5, %v16218_v21  ;;  %v7222_v7 = vmul.f32 0.5, %v7198_v17  ;;  %v6524_v20 = vsel %vm6522_vm8, %v6523_v44, %v6521_v40  ;;  %v6854_v24 = vmul.f32 %v16291_v41, %v6853_v47 }
 0x6f3   : > { %v7390_v27 = vadd.f32 %v7389_v52, %v17059_v15  ;;  %v6920_v56 = vsub.f32 %v6476_v33, %v16280_v6  ;;  %v17060_v48 = vand.u32 2147483647, %v16123_v13  ;;  %v6565_v63 = vsub.f32 1.5, %v6564_v9 }
 0x6f4   : > { %v6899_v32 = vmul.f32 %v10768_v5, %v6898_v25  ;;  %v16367_v30 = vsub.f32 %v6524_v20, %v16289_v57  ;;  %v10770_v3 = vpop.eup %10769  ;;  %v7370_v16 = vand.u32 2147483647, %v7222_v7  ;;  %vm6568_vm11 = vcmp.eq.f32.partialorder %v16303_v1, inf  ;;  %v17064_v25 = vld [vmem:[#allocation112_spill] sm:$0xff] }
 0x6f5   : > { %v7391_v46 = vadd.f32 %v7390_v27, %v17060_v48  ;;  %v6855_v37 = vmul.f32 %v6854_v24, %v16212_v2  ;;  %v6859_v14 = vand.u32 2147483648, %v16212_v2  ;;  %v10772_v60 = vpop.eup %10771  ;;  %v7130_v41 = vmul.f32 0.6931472, %v10770_v3 }
 0x6f6   : > { %v17061_v6 = vand.u32 2147483647, %v16155_v10  ;;  %v6566_v13 = vmul.f32 %v10764_v62, %v6565_v63  ;;  %v6900_v11 = vmul.f32 0.5, %v6899_v32  ;;  %vm6570_vm12 = vcmp.eq.f32.partialorder %v16303_v1, 0.0 }
 0x6f7   : > { %v6610_v57 = vmul.f32 %v10772_v60, %v16337_v55  ;;  %v6857_v8 = vsel %vm6856_vm9, %v16212_v2, %v6855_v37  ;;  %v7289_v53 = vadd.f32 %v15798_v39, %v16317_v12  ;;  %v7202_v44 = vsub.f32 %v7130_v41, %v16293_v28 }
 0x6f8   : > { %v7392_v26 = vadd.f32 %v7391_v46, %v17061_v6  ;;  %v6567_v18 = vmul.f32 %v6566_v13, %v16303_v1  ;;  %v6571_v10 = vand.u32 2147483648, %v16303_v1  ;;  %v6901_v50 = vsub.f32 1.5, %v6900_v11  ;;  %v17066_v6 = vld [vmem:[#allocation23_spill] sm:$0xff]  ;;  %v17067_v11 = vld [vmem:[#allocation110_spill] sm:$0xff] }
 0x6f9   : > { %v6611_v62 = vmul.f32 %v10772_v60, %v6610_v57  ;;  %v7270_v61 = vmul.f32 %v6916_v29, %v6916_v29  ;;  %v7290_v34 = vadd.f32 %v7289_v53, %v16118_v0  ;;  %v7226_v36 = vmul.f32 0.5, %v7202_v44  ;;  %v17069_v44 = vld [vmem:[#allocation44_spill] sm:$0xff] }
 0x6fa   : > { %v7393_v31 = vadd.f32 %v7392_v26, %v7370_v16  ;;  %v17062_v45 = vand.u32 2147483647, %v16073_v58  ;;  %v6569_v39 = vsel %vm6568_vm11, %v16303_v1, %v6567_v18  ;;  %v6860_v28 = vsel %vm6858_vm10, %v6859_v14, %v6857_v8  ;;  %v17065_v14 = vld [vmem:[#allocation43_spill] sm:$0xff] }
 0x6fb   : > { %v6572_v12 = vsel %vm6570_vm12, %v6571_v10, %v6569_v39  ;;  %v6612_v52 = vmul.f32 0.5, %v6611_v62  ;;  %v6902_v42 = vmul.f32 %v10768_v5, %v6901_v50  ;;  %v7291_v59 = vadd.f32 %v7290_v34, %v16169_v23  ;;  %v17070_v10 = vld [vmem:[#allocation24_spill] sm:$0xff]  ;;  %v17072_v39 = vld [vmem:[#allocation47_spill] sm:$0xff] }
 0x6fc   : > { %v7394_v33 = vadd.f32 %v7393_v31, %v17062_v45  ;;  %v7373_v0 = vand.u32 2147483647, %v16182_v38  ;;  %v7374_v17 = vand.u32 2147483647, %v7226_v36  ;;  %v17063_v58 = vand.u32 2147483647, %v16131_v43 }
 0x6fd   : > { %v6928_v29 = vsub.f32 %v6572_v12, %v6860_v28  ;;  %v6613_v15 = vsub.f32 1.5, %v6612_v52  ;;  %v6903_v27 = vmul.f32 %v6902_v42, %v16218_v21  ;;  %v7292_v2 = vadd.f32 %v7291_v59, %v16186_v22  ;;  %v17073_v12 = vld [vmem:[#allocation65_spill] sm:$0xff]  ;;  %v17074_v59 = vld [vmem:[#allocation70_spill] sm:$0xff] }
 0x6fe   : > { %v7395_v47 = vadd.f32 %v7394_v33, %v17063_v58  ;;  %v7271_v7 = vmul.f32 %v17064_v25, %v17064_v25  ;;  %vm6904_vm13 = vcmp.eq.f32.partialorder %v16218_v21, inf  ;;  %v7272_v38 = vmul.f32 %v15431_v4, %v15431_v4 }
 0x6ff   : > { %v6614_v9 = vmul.f32 %v10772_v60, %v6613_v15  ;;  %v7293_v5 = vadd.f32 %v7292_v2, %v7270_v61  ;;  %v6905_v23 = vsel %vm6904_vm13, %v16218_v21, %v6903_v27  ;;  %v7273_v24 = vmul.f32 %v15941_v54, %v15941_v54  ;;  %v17071_v61 = vld [vmem:[#allocation69_spill] sm:$0xff]  ;;  %v17075_v27 = vld [vmem:[#allocation50_spill] sm:$0xff] }
 0x700   : > { %v7396_v40 = vadd.f32 %v7395_v47, %v7373_v0  ;;  %vm6616_vm14 = vcmp.eq.f32.partialorder %v16337_v55, inf  ;;  %v6619_v48 = vand.u32 2147483648, %v16337_v55  ;;  %vm6906_vm15 = vcmp.eq.f32.partialorder %v16218_v21, 0.0 }
 0x701   : > { %v6615_v43 = vmul.f32 %v6614_v9, %v16337_v55  ;;  %v7294_v22 = vadd.f32 %v7293_v5, %v7271_v7  ;;  %v6907_v46 = vand.u32 2147483648, %v16218_v21  ;;  %vm6618_vm0 = vcmp.eq.f32.partialorder %v16337_v55, 0.0  ;;  %v17068_v21 = vld [vmem:[#allocation98_spill] sm:$0xff] }
 0x702   : > { %v7397_v20 = vadd.f32 %v7396_v40, %v7374_v17  ;;  %v7274_v4 = vmul.f32 %v6920_v56, %v6920_v56  ;;  %v7275_v60 = vmul.f32 %v17065_v14, %v17065_v14  ;;  %v7276_v26 = vmul.f32 %v17066_v6, %v17066_v6 }
 0x703   : > { %v6617_v63 = vsel %vm6616_vm14, %v16337_v55, %v6615_v43  ;;  %v7295_v32 = vadd.f32 %v7294_v22, %v7272_v38  ;;  %v6908_v16 = vsel %vm6906_vm15, %v6907_v46, %v6905_v23  ;;  %v7277_v57 = vmul.f32 %v17068_v21, %v17068_v21 }
 0x704   : > { %7398 = vadd.xlane.f32.xlu1 %v7397_v20  ;;  %v6620_v3 = vsel %vm6618_vm0, %v6619_v48, %v6617_v63  ;;  %v7278_v56 = vmul.f32 %v16367_v30, %v16367_v30  ;;  %v7279_v31 = vmul.f32 %v17069_v44, %v17069_v44  ;;  %v7280_v62 = vmul.f32 %v17070_v10, %v17070_v10 }
 0x705   : > { %v6932_v37 = vsub.f32 %v6620_v3, %v6908_v16  ;;  %v7296_v54 = vadd.f32 %v7295_v32, %v7273_v24  ;;  %v7281_v34 = vmul.f32 %v17071_v61, %v17071_v61  ;;  %v7282_v36 = vmul.f32 %v6928_v29, %v6928_v29 }
 0x706   : > { %v7283_v30 = vmul.f32 %v17072_v39, %v17072_v39  ;;  %v7284_v52 = vmul.f32 %v17073_v12, %v17073_v12  ;;  %v7285_v0 = vmul.f32 %v17074_v59, %v17074_v59  ;;  %vm7349_vm1 = vcmask 0  }
 0x707   : > { %v7297_v41 = vadd.f32 %v7296_v54, %v7274_v4  ;;  %v7286_v17 = vmul.f32 %v6932_v37, %v6932_v37 }
 0x709   : > { %v7298_v13 = vadd.f32 %v7297_v41, %v7275_v60 }
 0x70b   : > { %v7299_v8 = vadd.f32 %v7298_v13, %v7276_v26 }
 0x70c   : > { %7425 = vadd.xlane.f32.xlu1 %v17067_v11 }
 0x70d   : > { %v7300_v53 = vadd.f32 %v7299_v8, %v7277_v57 }
 0x70f   : > { %v7301_v18 = vadd.f32 %v7300_v53, %v7278_v56 }
 0x711   : > { %v7302_v50 = vadd.f32 %v7301_v18, %v7279_v31 }
 0x713   : > { %v7303_v45 = vadd.f32 %v7302_v50, %v7280_v62 }
 0x715   : > { %v7304_v33 = vadd.f32 %v7303_v45, %v7281_v34 }
 0x717   : > { %v7305_v28 = vadd.f32 %v7304_v33, %v7282_v36 }
 0x719   : > { %v7306_v42 = vadd.f32 %v7305_v28, %v7283_v30 }
 0x71b   : > { %v7307_v58 = vadd.f32 %v7306_v42, %v7284_v52 }
 0x71d   : > { %v7308_v47 = vadd.f32 %v7307_v58, %v7285_v0 }
 0x71f   : > { %v7309_v15 = vadd.f32 %v7308_v47, %v7286_v17 }
 0x721   : > { %7310 = vadd.xlane.f32.xlu0 %v7309_v15 }
 0x729   : > { %7338 = vadd.xlane.f32.xlu0 %v17075_v27 }
 0x777   : > { %v7399_v29 = vpop.xlane.xlu1 %7398 }
 0x778   : > { %v7400_v40 = vrot.slane %v7399_v29, 4 }
 0x77a   : > { %v7401_v20 = vadd.f32 %v7400_v40, %v7399_v29 }
 0x77c   : > { %v7402_v24 = vrot.slane %v7401_v20, 2 }
 0x77e   : > { %v7403_v3 = vadd.f32 %v7402_v24, %v7401_v20 }
 0x77f   : > { %v7426_v2 = vpop.xlane.xlu1 %7425 }
 0x780   : > { %v7427_v25 = vrot.slane %v7426_v2, 4  ;;  %v7404_v14 = vrot.slane %v7403_v3, 1 }
 0x782   : > { %v7428_v38 = vadd.f32 %v7427_v25, %v7426_v2  ;;  %v7405_v26 = vadd.f32 %v7404_v14, %v7403_v3 }
 0x784   : > { %v7429_v48 = vrot.slane %v7428_v38, 2 }
 0x786   : > { %v7430_v16 = vadd.f32 %v7429_v48, %v7428_v38 }
 0x788   : > { %v7431_v41 = vrot.slane %v7430_v16, 1 }
 0x78a   : > { %v7432_v13 = vadd.f32 %v7431_v41, %v7430_v16 }
 0x794   : > { %v7311_v9 = vpop.xlane.xlu0 %7310 }
 0x795   : > { %v7312_v7 = vrot.slane %v7311_v9, 4 }
 0x797   : > { %v7313_v5 = vadd.f32 %v7312_v7, %v7311_v9 }
 0x799   : > { %v7314_v43 = vrot.slane %v7313_v5, 2 }
 0x79b   : > { %v7315_v23 = vadd.f32 %v7314_v43, %v7313_v5 }
 0x79c   : > { %v7339_v22 = vpop.xlane.xlu0 %7338 }
 0x79d   : > { %v7340_v46 = vrot.slane %v7339_v22, 4  ;;  %v7316_v63 = vrot.slane %v7315_v23, 1 }
 0x79f   : > { %v7341_v4 = vadd.f32 %v7340_v46, %v7339_v22  ;;  %v7317_v32 = vadd.f32 %v7316_v63, %v7315_v23 }
 0x7a1   : > { %v7342_v37 = vrot.slane %v7341_v4, 2  ;;  %10509 = vpush %v7317_v32 }
 0x7a3   : > { %v7343_v54 = vadd.f32 %v7342_v37, %v7341_v4 }
 0x7a5   : > { %v7344_v60 = vrot.slane %v7343_v54, 1 }
 0x7a7   : > { %v7345_v6 = vadd.f32 %v7344_v60, %v7343_v54 }
 0x7a9   : > { %10511 = vpush %v7345_v6 }
 0x7aa   : > { %10513 = vpush %v7405_v26 }
 0x7ab   : > { %10515 = vpush %v7432_v13 }
 0x7d2   : > { %s10510_s21 = spop %10509 }
 0x7d3   : > { %v7319_v11 = vstv %s10510_s21 }
 0x7da   : > { %s10512_s22 = spop %10511 }
 0x7db   : > { %v7347_v21 = vstv %s10512_s22  ;;  %s10514_s26 = spop %10513 }
 0x7dc   : > { %v7348_v57 = vadd.f32 %v7347_v21, %v7319_v11  ;;  %v7407_v56 = vstv %s10514_s26  ;;  %s10516_s17 = spop %10515  ;;  %7440 = sbr.rel (%p9944_p5) target bundleno = 2254 (0x8ce), region = 32 }
 0x7dd   : > { %v7434_v8 = vstv %s10516_s17 }
 0x7de   : > { %7350 = vst.msk [vmem:[%s209_s25] sm:$0x1] %vm7349_vm1, %v7348_v57  ;;  %v7435_v53 = vadd.f32 %v7434_v8, %v7407_v56 }
 0x7e0   : > { %7436 = vst.msk [vmem:[%s215_s30] sm:$0x1] %vm7349_vm1, %v7435_v53 }
 0x7e1   : > { %v17076_v44 = vld [vmem:[#allocation48_spill] sm:$0xff]  ;;  %v17077_v31 = vld [vmem:[#allocation59_spill] sm:$0xff]  ;;  %v17078_v10 = vld [vmem:[#allocation54_spill] sm:$0xff] }
 0x7e2   : > { %v7441_v18 = vadd.f32 %v17077_v31, %v17076_v44  ;;  %v17079_v61 = vld [vmem:[#allocation53_spill] sm:$0xff]  ;;  %v17080_v36 = vld [vmem:[#allocation10_spill] sm:$0xff]  ;;  %v17082_v28 = vld [vmem:[#allocation95_spill] sm:$0xff] }
 0x7e3   : > { %v17081_v33 = vld [vmem:[#allocation49_spill] sm:$0xff]  ;;  %v17083_v52 = vld [vmem:[#allocation11_spill] sm:$0xff]  ;;  %v17084_v59 = vld [vmem:[#allocation66_spill] sm:$0xff] }
 0x7e4   : > { %v7442_v62 = vadd.f32 %v7441_v18, %v17078_v10  ;;  %v17085_v58 = vld [vmem:[#allocation99_spill] sm:$0xff]  ;;  %v17091_v43 = vld [vmem:[#allocation18_spill] sm:$0xff]  ;;  %v17092_v24 = vld [vmem:[#allocation68_spill] sm:$0xff] }
 0x7e5   : > { %v17086_v15 = vld [vmem:[#allocation15_spill] sm:$0xff]  ;;  %v17093_v46 = vld [vmem:[#allocation56_spill] sm:$0xff]  ;;  %v17094_v32 = vld [vmem:[#allocation105_spill] sm:$0xff] }
 0x7e6   : > { %v7443_v50 = vadd.f32 %v7442_v62, %v16161_v19  ;;  %v17087_v29 = vld [vmem:[#allocation67_spill] sm:$0xff]  ;;  %v7477_v63 = vsel %vm7326_vm5, %v17093_v46, 0.0  ;;  %v17095_v37 = vld [vmem:[#allocation97_spill] sm:$0xff]  ;;  %v17096_v14 = vld [vmem:[#allocation62_spill] sm:$0xff] }
 0x7e7   : > { %v17088_v9 = vld [vmem:[#allocation103_spill] sm:$0xff]  ;;  %v7479_v54 = vsel %vm7326_vm5, %v17095_v37, 0.0  ;;  %v17097_v41 = vld [vmem:[#allocation30_spill] sm:$0xff]  ;;  %v17098_v13 = vld [vmem:[#allocation57_spill] sm:$0xff] }
 0x7e8   : > { %v7444_v34 = vadd.f32 %v7443_v50, %v17079_v61  ;;  %v17089_v7 = vld [vmem:[#allocation51_spill] sm:$0xff]  ;;  %v7481_v11 = vsel %vm7326_vm5, %v17098_v13, 0.0  ;;  %v17099_v56 = vld [vmem:[#allocation104_spill] sm:$0xff] }
 0x7e9   : > { %v7474_v5 = vsel %vm7326_vm5, %v17089_v7, 0.0  ;;  %v17090_v20 = vld [vmem:[#allocation55_spill] sm:$0xff]  ;;  %v7483_v8 = vsel %vm7326_vm5, %v17099_v56, 0.0 }
 0x7ea   : > { %v7445_v45 = vadd.f32 %v7444_v34, %v17080_v36  ;;  %v7475_v38 = vsel %vm7326_vm5, %v17090_v20, 0.0 }
 0x7eb   : > { %v7476_v48 = vadd.f32 %v7475_v38, %v7474_v5 }
 0x7ec   : > { %v7446_v39 = vadd.f32 %v7445_v45, %v17081_v33 }
 0x7ed   : > { %v7478_v16 = vadd.f32 %v7477_v63, %v7476_v48 }
 0x7ee   : > { %v7447_v30 = vadd.f32 %v7446_v39, %v16200_v49 }
 0x7ef   : > { %v7480_v26 = vadd.f32 %v7479_v54, %v7478_v16 }
 0x7f0   : > { %v7448_v12 = vadd.f32 %v7447_v30, %v17082_v28 }
 0x7f1   : > { %v7482_v57 = vadd.f32 %v7481_v11, %v7480_v26 }
 0x7f2   : > { %v7449_v42 = vadd.f32 %v7448_v12, %v17083_v52 }
 0x7f3   : > { %v7484_v53 = vadd.f32 %v7483_v8, %v7482_v57 }
 0x7f4   : > { %v7450_v0 = vadd.f32 %v7449_v42, %v17084_v59 }
 0x7f6   : > { %v7451_v17 = vadd.f32 %v7450_v0, %v16232_v35 }
 0x7f8   : > { %v7452_v47 = vadd.f32 %v7451_v17, %v17085_v58 }
 0x7fa   : > { %v7453_v27 = vadd.f32 %v7452_v47, %v17086_v15 }
 0x7fc   : > { %v7454_v2 = vadd.f32 %v7453_v27, %v17087_v29 }
 0x7fe   : > { %v7455_v40 = vadd.f32 %v7454_v2, %v16262_v51 }
 0x800   : > { %v7456_v25 = vadd.f32 %v7455_v40, %v17088_v9 }
 0x802   : > { %v7457_v23 = vadd.f32 %v7456_v25, %v17091_v43 }
 0x804   : > { %v7458_v22 = vadd.f32 %v7457_v23, %v17092_v24 }
 0x806   : > { %v7459_v4 = vadd.f32 %v7458_v22, %v16303_v1 }
 0x808   : > { %v7460_v3 = vadd.f32 %v7459_v4, %v17094_v32 }
 0x80a   : > { %v7461_v60 = vadd.f32 %v7460_v3, %v17096_v14 }
 0x80c   : > { %v7462_v6 = vadd.f32 %v7461_v60, %v17097_v41 }
 0x80e   : > { %v7463_v21 = vadd.f32 %v7462_v6, %v16337_v55 }
 0x810   : > { %7464 = vadd.xlane.f32.xlu0 %v7463_v21 }
 0x818   : > { %7485 = vadd.xlane.f32.xlu0 %v7484_v53 }
 0x883   : > { %v7465_v44 = vpop.xlane.xlu0 %7464 }
 0x884   : > { %v7466_v31 = vrot.slane %v7465_v44, 4 }
 0x886   : > { %v7467_v18 = vadd.f32 %v7466_v31, %v7465_v44 }
 0x888   : > { %v7468_v10 = vrot.slane %v7467_v18, 2 }
 0x88a   : > { %v7469_v62 = vadd.f32 %v7468_v10, %v7467_v18 }
 0x88b   : > { %v7486_v50 = vpop.xlane.xlu0 %7485 }
 0x88c   : > { %v7487_v61 = vrot.slane %v7486_v50, 4  ;;  %v7470_v34 = vrot.slane %v7469_v62, 1 }
 0x88e   : > { %v7488_v36 = vadd.f32 %v7487_v61, %v7486_v50  ;;  %v7471_v45 = vadd.f32 %v7470_v34, %v7469_v62 }
 0x890   : > { %v7489_v33 = vrot.slane %v7488_v36, 2  ;;  %10517 = vpush %v7471_v45 }
 0x892   : > { %v7490_v55 = vadd.f32 %v7489_v33, %v7488_v36 }
 0x894   : > { %v7491_v39 = vrot.slane %v7490_v55, 1 }
 0x896   : > { %v7492_v30 = vadd.f32 %v7491_v39, %v7490_v55 }
 0x898   : > { %10519 = vpush %v7492_v30 }
 0x8c1   : > { %s10518_s5 = spop %10517 }
 0x8c2   : > { %v7473_v28 = vstv %s10518_s5 }
 0x8c9   : > { %s10520_s6 = spop %10519 }
 0x8ca   : > { %v7494_v12 = vstv %s10520_s6 }
 0x8cb   : > { %v7495_v52 = vadd.f32 %v7494_v12, %v7473_v28 }
 0x8cd   : > { %7496 = vst.msk [vmem:[%s16445_s20] sm:$0x1] %vm7349_vm1, %v7495_v52 }
 0x8ce PF: > { %p9945_p6 = scmp.ne.s32.totalorder %s10812_s16, 1 }
 0x8d0   : > { %7500 = sbr.rel (%p9945_p6) target bundleno = 2490 (0x9ba), region = 36 }
 0x8d5   : > { %v17100_v42 = vld [vmem:[#allocation48_spill] sm:$0xff]  ;;  %v17101_v59 = vld [vmem:[#allocation59_spill] sm:$0xff]  ;;  %v17102_v17 = vld [vmem:[#allocation54_spill] sm:$0xff]  ;;  %v17107_v20 = vlaneseq }
 0x8d6   : > { %v7538_v0 = vadd.f32 %v17101_v59, %v17100_v42  ;;  %v17103_v15 = vld [vmem:[#allocation53_spill] sm:$0xff]  ;;  %v17104_v29 = vld [vmem:[#allocation10_spill] sm:$0xff]  ;;  %v17106_v7 = vld [vmem:[#allocation95_spill] sm:$0xff] }
 0x8d7   : > { %v17105_v40 = vld [vmem:[#allocation49_spill] sm:$0xff]  ;;  %v7502_v38 = vshrl.u32 %v17107_v20, 7  ;;  %v17108_v43 = vld [vmem:[#allocation11_spill] sm:$0xff]  ;;  %v17109_v24 = vld [vmem:[#allocation66_spill] sm:$0xff] }
 0x8d8   : > { %v7539_v58 = vadd.f32 %v7538_v0, %v17102_v17  ;;  %v17111_v4 = vld [vmem:[#allocation15_spill] sm:$0xff]  ;;  %v17116_v26 = vld [vmem:[#allocation18_spill] sm:$0xff]  ;;  %v17117_v21 = vld [vmem:[#allocation68_spill] sm:$0xff] }
 0x8d9   : > { %v7506_v48 = vadd.s32 32, %v7502_v38  ;;  %v17112_v3 = vld [vmem:[#allocation67_spill] sm:$0xff]  ;;  %v17118_v56 = vld [vmem:[#allocation56_spill] sm:$0xff]  ;;  %v17119_v10 = vld [vmem:[#allocation97_spill] sm:$0xff] }
 0x8da   : > { %v7540_v47 = vadd.f32 %v7539_v58, %v16161_v19  ;;  %v17110_v19 = vld [vmem:[#allocation99_spill] sm:$0xff]  ;;  %v7580_v8 = vsel %vm7326_vm5, %v17118_v56, 0.0  ;;  %v17120_v50 = vld [vmem:[#allocation57_spill] sm:$0xff] }
 0x8db   : > { %vm7512_vm2 = vcmp.lt.s32.totalorder %v7506_v48, 34  ;;  %v17113_v37 = vld [vmem:[#allocation103_spill] sm:$0xff] }
 0x8dc   : > { %v7541_v27 = vadd.f32 %v7540_v47, %v17103_v15  ;;  %v17114_v54 = vld [vmem:[#allocation51_spill] sm:$0xff]  ;;  %v7532_v57 = vsel %vm7512_vm2, %v17117_v21, 0.0  ;;  %v7533_v44 = vsel %vm7512_vm2, %v16303_v1, 0.0  ;;  %v7575_v61 = vsel %vm7512_vm2, %v17120_v50, 0.0 }
 0x8dd   : > { %v7577_v14 = vsel %vm7326_vm5, %v17114_v54, 0.0  ;;  %v17115_v60 = vld [vmem:[#allocation55_spill] sm:$0xff]  ;;  %v7584_v36 = vsel %vm7326_vm5, %v7575_v61, 0.0 }
 0x8de   : > { %v7542_v2 = vadd.f32 %v7541_v27, %v17104_v29  ;;  %v7578_v41 = vsel %vm7326_vm5, %v17115_v60, 0.0 }
 0x8df   : > { %v7579_v11 = vadd.f32 %v7578_v41, %v7577_v14 }
 0x8e0   : > { %v7543_v9 = vadd.f32 %v7542_v2, %v17105_v40 }
 0x8e1   : > { %v7581_v18 = vadd.f32 %v7580_v8, %v7579_v11 }
 0x8e2   : > { %v7544_v25 = vadd.f32 %v7543_v9, %v16200_v49  ;;  %v7530_v49 = vsel %vm7512_vm2, %v17113_v37, 0.0 }
 0x8e4   : > { %v7545_v5 = vadd.f32 %v7544_v25, %v17106_v7 }
 0x8e6   : > { %v7546_v23 = vadd.f32 %v7545_v5, %v17108_v43 }
 0x8e8   : > { %v7547_v22 = vadd.f32 %v7546_v23, %v17109_v24 }
 0x8ea   : > { %v7548_v46 = vadd.f32 %v7547_v22, %v16232_v35  ;;  %v7531_v35 = vsel %vm7512_vm2, %v17116_v26, 0.0 }
 0x8ec   : > { %v7549_v63 = vadd.f32 %v7548_v46, %v17110_v19 }
 0x8ee   : > { %v7550_v32 = vadd.f32 %v7549_v63, %v17111_v4 }
 0x8f0   : > { %v7551_v16 = vadd.f32 %v7550_v32, %v17112_v3 }
 0x8f2   : > { %v7552_v6 = vadd.f32 %v7551_v16, %v16262_v51  ;;  %v7582_v51 = vsel %vm7326_vm5, %v17119_v10, 0.0 }
 0x8f3   : > { %v7583_v34 = vadd.f32 %v7582_v51, %v7581_v18 }
 0x8f4   : > { %v7553_v13 = vadd.f32 %v7552_v6, %v7530_v49 }
 0x8f5   : > { %v7585_v45 = vadd.f32 %v7584_v36, %v7583_v34 }
 0x8f6   : > { %v7554_v53 = vadd.f32 %v7553_v13, %v7531_v35 }
 0x8f8   : > { %v7555_v31 = vadd.f32 %v7554_v53, %v7532_v57 }
 0x8fa   : > { %v7556_v62 = vadd.f32 %v7555_v31, %v7533_v44 }
 0x8fc   : > { %7561 = vadd.xlane.f32.xlu0 %v7556_v62 }
 0x904   : > { %7588 = vadd.xlane.f32.xlu0 %v7585_v45 }
 0x96f   : > { %v7562_v33 = vpop.xlane.xlu0 %7561 }
 0x970   : > { %v7563_v55 = vrot.slane %v7562_v33, 4 }
 0x972   : > { %v7564_v39 = vadd.f32 %v7563_v55, %v7562_v33 }
 0x974   : > { %v7565_v30 = vrot.slane %v7564_v39, 2 }
 0x976   : > { %v7566_v1 = vadd.f32 %v7565_v30, %v7564_v39 }
 0x977   : > { %v7589_v28 = vpop.xlane.xlu0 %7588 }
 0x978   : > { %v7590_v12 = vrot.slane %v7589_v28, 4  ;;  %v7567_v52 = vrot.slane %v7566_v1, 1 }
 0x97a   : > { %v7591_v42 = vadd.f32 %v7590_v12, %v7589_v28  ;;  %v7568_v59 = vadd.f32 %v7567_v52, %v7566_v1 }
 0x97c   : > { %v7592_v0 = vrot.slane %v7591_v42, 2  ;;  %10521 = vpush %v7568_v59 }
 0x97e   : > { %v7593_v17 = vadd.f32 %v7592_v0, %v7591_v42 }
 0x980   : > { %v7594_v58 = vrot.slane %v7593_v17, 1 }
 0x982   : > { %v7595_v47 = vadd.f32 %v7594_v58, %v7593_v17 }
 0x984   : > { %10523 = vpush %v7595_v47 }
 0x9ad   : > { %s10522_s16 = spop %10521 }
 0x9ae   : > { %v7570_v15 = vstv %s10522_s16 }
 0x9b5   : > { %s10524_s7 = spop %10523 }
 0x9b6   : > { %v7597_v27 = vstv %s10524_s7 }
 0x9b7   : > { %v7598_v29 = vadd.f32 %v7597_v27, %v7570_v15 }
 0x9b9   : > { %7599 = vst.msk [vmem:[%s16445_s20] sm:$0x1] %vm7349_vm1, %v7598_v29 }
 0x9ba PF: > { %s15_s15 = sadd.s32 1, %s10779_s15  }
 0x9bb   : > { %p12_p7 = scmp.ge.s32.totalorder %s15_s15, 4  }
 0x9bd   :  { %14 = sbr.rel (!%p12_p7) target bundleno = 1 (0x1), region = 90 }

</bundles_post_ra>
